<compile_context>
chip_gen: v6e
topology: v6e:2x2x1
jax: 0.10.0
libtpu: 0.0.40
codegen_flags: <defaults>
</compile_context>

<pallas_src>
import functools
import math

import jax
import jax.numpy as jnp
from jax.experimental import pallas as pl
from jax.experimental.pallas import tpu as pltpu

EPS = 1e-5


def _rup(x, m):
    return (x + m - 1) // m * m


# ------------------------------ Pallas kernel ------------------------------

def _basic_block_kernel(*refs, stride, has_down, Ho, Wo):
    """Fused BasicBlock forward for one image (one grid step)."""
    if has_down:
        x_ref, w1_ref, w2_ref, wd_ref, bn_ref, o_ref, h_ref = refs
    else:
        x_ref, w1_ref, w2_ref, bn_ref, o_ref, h_ref = refs
        wd_ref = None

    Cp = x_ref.shape[-1]          # padded input channels (multiple of 128)
    Pp = o_ref.shape[-1]          # padded output channels (multiple of 128)
    HWo = Ho * Wo
    bn = bn_ref[...]              # (8, Pp) fp32: [s1, t1, s2, t2, sd, td, 0, 0]

    def in_tap(di, dj):
        # (Ho, Wo, Cp) bf16 window of the block input for conv tap (di, dj).
        if stride == 1:
            v = x_ref[0, pl.ds(di, Ho), pl.ds(dj, Wo), :]
        else:
            # stride-2 via phase decomposition: padded coord (di+2io, dj+2jo)
            # lives in phase (di%2, dj%2) at index (io+di//2, jo+dj//2).
            p = (di % 2) * 2 + (dj % 2)
            v = x_ref[0, p, pl.ds(di // 2, Ho), pl.ds(dj // 2, Wo), :]
        return v.reshape(HWo, Cp)

    # ---- conv1 (3x3, stride) as 9-tap MXU accumulation, + bn1 + relu (fp32) ----
    acc = jnp.zeros((HWo, Pp), jnp.float32)
    for di in range(3):
        for dj in range(3):
            acc += jnp.dot(in_tap(di, dj), w1_ref[di * 3 + dj],
                           preferred_element_type=jnp.float32)
    h = jnp.maximum(acc * bn[0:1, :] + bn[1:2, :], 0.0)

    # ---- stage conv1 output in VMEM (bf16) with a zero halo for conv2 padding ----
    h_ref[...] = jnp.zeros(h_ref.shape, h_ref.dtype)
    h_ref[1:1 + Ho, 1:1 + Wo, :] = h.astype(h_ref.dtype).reshape(Ho, Wo, Pp)

    # ---- conv2 (3x3, stride 1) + bn2 ----
    acc = jnp.zeros((HWo, Pp), jnp.float32)
    for di in range(3):
        for dj in range(3):
            tap = h_ref[pl.ds(di, Ho), pl.ds(dj, Wo), :].reshape(HWo, Pp)
            acc += jnp.dot(tap, w2_ref[di * 3 + dj],
                           preferred_element_type=jnp.float32)
    out = acc * bn[2:3, :] + bn[3:4, :]

    # ---- identity / downsample (1x1 conv, stride) + bn ----
    if stride == 1:
        ident_in = x_ref[0, pl.ds(1, Ho), pl.ds(1, Wo), :].reshape(HWo, Cp)
    else:
        ident_in = x_ref[0, 3, pl.ds(0, Ho), pl.ds(0, Wo), :].reshape(HWo, Cp)
    if has_down:
        ident = jnp.dot(ident_in, wd_ref[...], preferred_element_type=jnp.float32)
        ident = ident * bn[4:5, :] + bn[5:6, :]
    else:
        ident = ident_in.astype(jnp.float32)

    # ---- residual add + final relu ----
    out = jnp.maximum(out + ident, 0.0)
    o_ref[...] = out.reshape(1, Ho, Wo, Pp)


# ------------------------------ wrapper ------------------------------

@functools.partial(jax.jit, static_argnames=("stride",))
def basic_block_pallas(x_nchw, params, stride=1):
    """BasicBlock.forward in NCHW (PyTorch layout), inference-mode BN."""
    assert stride in (1, 2)
    w1 = params["conv1_w"]                       # (planes, inplanes, 3, 3)
    w2 = params["conv2_w"]                       # (planes, planes, 3, 3)
    planes, inplanes = int(w1.shape[0]), int(w1.shape[1])
    has_down = "down_w" in params
    assert has_down or (stride == 1 and inplanes == planes)

    N, C, H, W = x_nchw.shape
    assert C == inplanes
    Ho = (H + 2 - 3) // stride + 1
    Wo = (W + 2 - 3) // stride + 1
    Cp = _rup(inplanes, 128)
    Pp = _rup(planes, 128)
    if not has_down:
        assert Cp == Pp

    # Input: NCHW -> NHWC, 1-pixel spatial halo, lane-pad channels, bf16 operand.
    x = jnp.transpose(x_nchw, (0, 2, 3, 1)).astype(jnp.float32)
    x = jnp.pad(x, ((0, 0), (1, 1), (1, 1), (0, Cp - inplanes))).astype(jnp.bfloat16)
    if stride == 1:
        xin = x
        x_spec = pl.BlockSpec((1, H + 2, W + 2, Cp), lambda n: (n, 0, 0, 0))
    else:
        Hp, Wp = x.shape[1], x.shape[2]
        x = jnp.pad(x, ((0, 0), (0, Hp % 2), (0, Wp % 2), (0, 0)))
        xin = jnp.stack([x[:, 0::2, 0::2], x[:, 0::2, 1::2],
                         x[:, 1::2, 0::2], x[:, 1::2, 1::2]], axis=1)  # (N,4,Hh,Wh,Cp)
        Hh, Wh = xin.shape[2], xin.shape[3]
        x_spec = pl.BlockSpec((1, 4, Hh, Wh, Cp), lambda n: (n, 0, 0, 0, 0))

    # Weights: per-tap (cin, cout) matmul matrices, lane-padded, bf16.
    def conv_w_to_taps(w, cin_p, cout_p):
        cout, cin, kh, kw = w.shape
        wt = jnp.transpose(w, (2, 3, 1, 0)).reshape(kh * kw, cin, cout)
        wt = jnp.pad(wt, ((0, 0), (0, cin_p - cin), (0, cout_p - cout)))
        return wt.astype(jnp.bfloat16)

    w1m = conv_w_to_taps(w1, Cp, Pp)             # (9, Cp, Pp)
    w2m = conv_w_to_taps(w2, Pp, Pp)             # (9, Pp, Pp)

    # Fold BN (inference mode) into per-channel scale/shift.
    def fold(pre):
        s = params[pre + "_gamma"] * jax.lax.rsqrt(params[pre + "_var"] + EPS)
        return s, params[pre + "_beta"] - params[pre + "_mean"] * s

    s1, t1 = fold("bn1")
    s2, t2 = fold("bn2")
    rows = [s1, t1, s2, t2]
    if has_down:
        sd, td = fold("bnd")
        rows += [sd, td]
    rows += [jnp.zeros((planes,), jnp.float32)] * (8 - len(rows))
    bn = jnp.pad(jnp.stack(rows), ((0, 0), (0, Pp - planes)))          # (8, Pp)

    args = [xin, w1m, w2m]
    in_specs = [x_spec,
                pl.BlockSpec((9, Cp, Pp), lambda n: (0, 0, 0)),
                pl.BlockSpec((9, Pp, Pp), lambda n: (0, 0, 0))]
    if has_down:
        wd = jnp.pad(params["down_w"][:, :, 0, 0].T,
                     ((0, Cp - inplanes), (0, Pp - planes))).astype(jnp.bfloat16)
        args.append(wd)
        in_specs.append(pl.BlockSpec((Cp, Pp), lambda n: (0, 0)))
    args.append(bn)
    in_specs.append(pl.BlockSpec((8, Pp), lambda n: (0, 0)))

    flops = 2 * N * Ho * Wo * (9 * Cp * Pp + 9 * Pp * Pp
                               + (Cp * Pp if has_down else 0))
    bytes_accessed = (int(xin.size) * 2 + int(w1m.size) * 2 + int(w2m.size) * 2
                      + (Cp * Pp * 2 if has_down else 0) + int(bn.size) * 4
                      + N * Ho * Wo * Pp * 4)

    out = pl.pallas_call(
        functools.partial(_basic_block_kernel, stride=stride, has_down=has_down,
                          Ho=Ho, Wo=Wo),
        out_shape=jax.ShapeDtypeStruct((N, Ho, Wo, Pp), jnp.float32),
        grid_spec=pltpu.PrefetchScalarGridSpec(
            num_scalar_prefetch=0,
            grid=(N,),
            in_specs=in_specs,
            out_specs=pl.BlockSpec((1, Ho, Wo, Pp), lambda n: (n, 0, 0, 0)),
            scratch_shapes=[pltpu.VMEM((Ho + 2, Wo + 2, Pp), jnp.bfloat16)]),
        compiler_params=pltpu.CompilerParams(
            dimension_semantics=("parallel",),
            vmem_limit_bytes=32 * 1024 * 1024),
        cost_estimate=pl.CostEstimate(flops=flops, transcendentals=0,
                                      bytes_accessed=bytes_accessed),
    )(*args)

    # Back to the module contract: un-padded channels, NCHW.
    return jnp.transpose(out[:, :, :, :planes], (0, 3, 1, 2))


# ------------------------------ reference & params ------------------------------

def _conv2d_nhwc(x, w, stride, padding):
    return jax.lax.conv_general_dilated(
        x, jnp.transpose(w, (2, 3, 1, 0)),
        window_strides=(stride, stride),
        padding=[(padding, padding), (padding, padding)],
        dimension_numbers=("NHWC", "HWIO", "NHWC"))


def basic_block_reference(x_nchw, p, stride):
    x = jnp.transpose(x_nchw, (0, 2, 3, 1)).astype(jnp.float32)

    def bn(y, pre):
        s = p[pre + "_gamma"] / jnp.sqrt(p[pre + "_var"] + EPS)
        return (y - p[pre + "_mean"]) * s + p[pre + "_beta"]

    out = jax.nn.relu(bn(_conv2d_nhwc(x, p["conv1_w"], stride, 1), "bn1"))
    out = bn(_conv2d_nhwc(out, p["conv2_w"], 1, 1), "bn2")
    idn = bn(_conv2d_nhwc(x, p["down_w"], stride, 0), "bnd") if "down_w" in p else x
    return jnp.transpose(jax.nn.relu(out + idn), (0, 3, 1, 2))


def init_basic_block_params(key, inplanes, planes, stride):
    ks = jax.random.split(key, 16)

    def kaiming(k, shape):
        fan_out = shape[0] * shape[2] * shape[3]
        return math.sqrt(2.0 / fan_out) * jax.random.normal(k, shape, jnp.float32)

    p = {"conv1_w": kaiming(ks[0], (planes, inplanes, 3, 3)),
         "conv2_w": kaiming(ks[1], (planes, planes, 3, 3))}
    names = ["bn1", "bn2"]
    if stride != 1 or inplanes != planes:
        p["down_w"] = kaiming(ks[2], (planes, inplanes, 1, 1))
        names.append("bnd")
    for i, name in enumerate(names):
        kg, kb, km, kv = jax.random.split(ks[3 + i], 4)
        p[name + "_gamma"] = 1.0 + 0.1 * jax.random.normal(kg, (planes,), jnp.float32)
        p[name + "_beta"] = 0.1 * jax.random.normal(kb, (planes,), jnp.float32)
        p[name + "_mean"] = 0.1 * jax.random.normal(km, (planes,), jnp.float32)
        p[name + "_var"] = jax.random.uniform(kv, (planes,), jnp.float32, 0.5, 1.5)
    return p


if __name__ == "__main__":
    key = jax.random.PRNGKey(0)
    kx, k1, k2 = jax.random.split(key, 3)
    x = jax.random.normal(kx, (2, 8, 16, 16), jnp.float32)   # NCHW, like PyTorch

    # Block 1: identity residual (inplanes == planes, stride 1, no downsample).
    p1 = init_basic_block_params(k1, 8, 8, 1)
    y1 = basic_block_pallas(x, p1, stride=1)

    # Block 2: stride-2 + channel expansion + 1x1 downsample, fed by block 1.
    p2 = init_basic_block_params(k2, 8, 16, 2)
    y2 = basic_block_pallas(y1, p2, stride=2)

    y1, y2 = jax.block_until_ready((y1, y2))
    assert y1.shape == (2, 8, 16, 16), y1.shape
    assert y2.shape == (2, 16, 8, 8), y2.shape
    assert bool(jnp.all(jnp.isfinite(y1))) and bool(jnp.all(jnp.isfinite(y2)))

    # Per-block correctness vs. a pure-JAX reference (bf16 MXU operands => loose tol).
    r1 = basic_block_reference(x, p1, 1)
    r2 = basic_block_reference(y1, p2, 2)
    e1 = float(jnp.max(jnp.abs(y1 - r1)))
    e2 = float(jnp.max(jnp.abs(y2 - r2)))
    assert e1 < 0.15 and e2 < 0.15, (e1, e2)

    print("KERNEL_OK")
</pallas_src>

<mosaic_0001>
module attributes {stable_mosaic.version = 11 : i64} {
  func.func @_basic_block_kernel(%arg0: i32, %arg1: memref<1x18x18x128xbf16, #tpu.memory_space<vmem>>, %arg2: memref<9x128x128xbf16, #tpu.memory_space<vmem>>, %arg3: memref<9x128x128xbf16, #tpu.memory_space<vmem>>, %arg4: memref<8x128xf32, #tpu.memory_space<vmem>>, %arg5: memref<1x16x16x128xf32, #tpu.memory_space<vmem>>, %arg6: memref<18x18x128xbf16, #tpu.memory_space<vmem>>) attributes {dimension_semantics = [#tpu.dimension_semantics<parallel>], iteration_bounds = array<i64: 2>, scalar_prefetch = 0 : i64, scratch_operands = 1 : i64, tpu.core_type = #tpu.core_type<tc>, window_params = [{transform_indices = @transform_0, window_bounds = array<i64: 1, 18, 18, 128>}, {pipeline_mode = #tpu.pipeline_mode<synchronous>, transform_indices = @transform_1, window_bounds = array<i64: 9, 128, 128>}, {pipeline_mode = #tpu.pipeline_mode<synchronous>, transform_indices = @transform_2, window_bounds = array<i64: 9, 128, 128>}, {pipeline_mode = #tpu.pipeline_mode<synchronous>, transform_indices = @transform_3, window_bounds = array<i64: 8, 128>}, {transform_indices = @transform_4, window_bounds = array<i64: 1, 16, 16, 128>}]} {
    %c0 = arith.constant 0 : index
    %c0_0 = arith.constant 0 : index
    %0 = vector.load %arg4[%c0, %c0_0] : memref<8x128xf32, #tpu.memory_space<vmem>>, vector<8x128xf32>
    %cst = arith.constant 0.000000e+00 : f32
    %1 = vector.broadcast %cst : f32 to vector<256x128xf32>
    %c0_1 = arith.constant 0 : index
    %c0_2 = arith.constant 0 : index
    %c0_3 = arith.constant 0 : index
    %c0_4 = arith.constant 0 : index
    %2 = vector.load %arg1[%c0_1, %c0_2, %c0_3, %c0_4] : memref<1x18x18x128xbf16, #tpu.memory_space<vmem>>, vector<1x16x16x128xbf16>
    %3 = vector.shape_cast %2 : vector<1x16x16x128xbf16> to vector<16x16x128xbf16>
    %4 = vector.shape_cast %3 : vector<16x16x128xbf16> to vector<256x128xbf16>
    %c0_5 = arith.constant 0 : index
    %c0_6 = arith.constant 0 : index
    %c0_7 = arith.constant 0 : index
    %5 = vector.load %arg2[%c0_5, %c0_6, %c0_7] : memref<9x128x128xbf16, #tpu.memory_space<vmem>>, vector<1x128x128xbf16>
    %6 = vector.shape_cast %5 : vector<1x128x128xbf16> to vector<128x128xbf16>
    %cst_8 = arith.constant dense<0.000000e+00> : vector<256x128xf32>
    %7 = tpu.matmul %4, %6, %cst_8 {dimension_numbers = #tpu.dot_dimension_numbers<[1], [0], [0], [1], [0, 0, 1, 1], [], []>} : vector<256x128xbf16>, vector<128x128xbf16>, vector<256x128xf32> -> vector<256x128xf32>
    %8 = arith.addf %1, %7 : vector<256x128xf32>
    %c0_9 = arith.constant 0 : index
    %c0_10 = arith.constant 0 : index
    %c1 = arith.constant 1 : index
    %c0_11 = arith.constant 0 : index
    %9 = vector.load %arg1[%c0_9, %c0_10, %c1, %c0_11] : memref<1x18x18x128xbf16, #tpu.memory_space<vmem>>, vector<1x16x16x128xbf16>
    %10 = vector.shape_cast %9 : vector<1x16x16x128xbf16> to vector<16x16x128xbf16>
    %11 = vector.shape_cast %10 : vector<16x16x128xbf16> to vector<256x128xbf16>
    %c1_12 = arith.constant 1 : index
    %c0_13 = arith.constant 0 : index
    %c0_14 = arith.constant 0 : index
    %12 = vector.load %arg2[%c1_12, %c0_13, %c0_14] : memref<9x128x128xbf16, #tpu.memory_space<vmem>>, vector<1x128x128xbf16>
    %13 = vector.shape_cast %12 : vector<1x128x128xbf16> to vector<128x128xbf16>
    %cst_15 = arith.constant dense<0.000000e+00> : vector<256x128xf32>
    %14 = tpu.matmul %11, %13, %cst_15 {dimension_numbers = #tpu.dot_dimension_numbers<[1], [0], [0], [1], [0, 0, 1, 1], [], []>} : vector<256x128xbf16>, vector<128x128xbf16>, vector<256x128xf32> -> vector<256x128xf32>
    %15 = arith.addf %8, %14 : vector<256x128xf32>
    %c0_16 = arith.constant 0 : index
    %c0_17 = arith.constant 0 : index
    %c2 = arith.constant 2 : index
    %c0_18 = arith.constant 0 : index
    %16 = vector.load %arg1[%c0_16, %c0_17, %c2, %c0_18] : memref<1x18x18x128xbf16, #tpu.memory_space<vmem>>, vector<1x16x16x128xbf16>
    %17 = vector.shape_cast %16 : vector<1x16x16x128xbf16> to vector<16x16x128xbf16>
    %18 = vector.shape_cast %17 : vector<16x16x128xbf16> to vector<256x128xbf16>
    %c2_19 = arith.constant 2 : index
    %c0_20 = arith.constant 0 : index
    %c0_21 = arith.constant 0 : index
    %19 = vector.load %arg2[%c2_19, %c0_20, %c0_21] : memref<9x128x128xbf16, #tpu.memory_space<vmem>>, vector<1x128x128xbf16>
    %20 = vector.shape_cast %19 : vector<1x128x128xbf16> to vector<128x128xbf16>
    %cst_22 = arith.constant dense<0.000000e+00> : vector<256x128xf32>
    %21 = tpu.matmul %18, %20, %cst_22 {dimension_numbers = #tpu.dot_dimension_numbers<[1], [0], [0], [1], [0, 0, 1, 1], [], []>} : vector<256x128xbf16>, vector<128x128xbf16>, vector<256x128xf32> -> vector<256x128xf32>
    %22 = arith.addf %15, %21 : vector<256x128xf32>
    %c0_23 = arith.constant 0 : index
    %c1_24 = arith.constant 1 : index
    %c0_25 = arith.constant 0 : index
    %c0_26 = arith.constant 0 : index
    %23 = vector.load %arg1[%c0_23, %c1_24, %c0_25, %c0_26] : memref<1x18x18x128xbf16, #tpu.memory_space<vmem>>, vector<1x16x16x128xbf16>
    %24 = vector.shape_cast %23 : vector<1x16x16x128xbf16> to vector<16x16x128xbf16>
    %25 = vector.shape_cast %24 : vector<16x16x128xbf16> to vector<256x128xbf16>
    %c3 = arith.constant 3 : index
    %c0_27 = arith.constant 0 : index
    %c0_28 = arith.constant 0 : index
    %26 = vector.load %arg2[%c3, %c0_27, %c0_28] : memref<9x128x128xbf16, #tpu.memory_space<vmem>>, vector<1x128x128xbf16>
    %27 = vector.shape_cast %26 : vector<1x128x128xbf16> to vector<128x128xbf16>
    %cst_29 = arith.constant dense<0.000000e+00> : vector<256x128xf32>
    %28 = tpu.matmul %25, %27, %cst_29 {dimension_numbers = #tpu.dot_dimension_numbers<[1], [0], [0], [1], [0, 0, 1, 1], [], []>} : vector<256x128xbf16>, vector<128x128xbf16>, vector<256x128xf32> -> vector<256x128xf32>
    %29 = arith.addf %22, %28 : vector<256x128xf32>
    %c0_30 = arith.constant 0 : index
    %c1_31 = arith.constant 1 : index
    %c1_32 = arith.constant 1 : index
    %c0_33 = arith.constant 0 : index
    %30 = vector.load %arg1[%c0_30, %c1_31, %c1_32, %c0_33] : memref<1x18x18x128xbf16, #tpu.memory_space<vmem>>, vector<1x16x16x128xbf16>
    %31 = vector.shape_cast %30 : vector<1x16x16x128xbf16> to vector<16x16x128xbf16>
    %32 = vector.shape_cast %31 : vector<16x16x128xbf16> to vector<256x128xbf16>
    %c4 = arith.constant 4 : index
    %c0_34 = arith.constant 0 : index
    %c0_35 = arith.constant 0 : index
    %33 = vector.load %arg2[%c4, %c0_34, %c0_35] : memref<9x128x128xbf16, #tpu.memory_space<vmem>>, vector<1x128x128xbf16>
    %34 = vector.shape_cast %33 : vector<1x128x128xbf16> to vector<128x128xbf16>
    %cst_36 = arith.constant dense<0.000000e+00> : vector<256x128xf32>
    %35 = tpu.matmul %32, %34, %cst_36 {dimension_numbers = #tpu.dot_dimension_numbers<[1], [0], [0], [1], [0, 0, 1, 1], [], []>} : vector<256x128xbf16>, vector<128x128xbf16>, vector<256x128xf32> -> vector<256x128xf32>
    %36 = arith.addf %29, %35 : vector<256x128xf32>
    %c0_37 = arith.constant 0 : index
    %c1_38 = arith.constant 1 : index
    %c2_39 = arith.constant 2 : index
    %c0_40 = arith.constant 0 : index
    %37 = vector.load %arg1[%c0_37, %c1_38, %c2_39, %c0_40] : memref<1x18x18x128xbf16, #tpu.memory_space<vmem>>, vector<1x16x16x128xbf16>
    %38 = vector.shape_cast %37 : vector<1x16x16x128xbf16> to vector<16x16x128xbf16>
    %39 = vector.shape_cast %38 : vector<16x16x128xbf16> to vector<256x128xbf16>
    %c5 = arith.constant 5 : index
    %c0_41 = arith.constant 0 : index
    %c0_42 = arith.constant 0 : index
    %40 = vector.load %arg2[%c5, %c0_41, %c0_42] : memref<9x128x128xbf16, #tpu.memory_space<vmem>>, vector<1x128x128xbf16>
    %41 = vector.shape_cast %40 : vector<1x128x128xbf16> to vector<128x128xbf16>
    %cst_43 = arith.constant dense<0.000000e+00> : vector<256x128xf32>
    %42 = tpu.matmul %39, %41, %cst_43 {dimension_numbers = #tpu.dot_dimension_numbers<[1], [0], [0], [1], [0, 0, 1, 1], [], []>} : vector<256x128xbf16>, vector<128x128xbf16>, vector<256x128xf32> -> vector<256x128xf32>
    %43 = arith.addf %36, %42 : vector<256x128xf32>
    %c0_44 = arith.constant 0 : index
    %c2_45 = arith.constant 2 : index
    %c0_46 = arith.constant 0 : index
    %c0_47 = arith.constant 0 : index
    %44 = vector.load %arg1[%c0_44, %c2_45, %c0_46, %c0_47] : memref<1x18x18x128xbf16, #tpu.memory_space<vmem>>, vector<1x16x16x128xbf16>
    %45 = vector.shape_cast %44 : vector<1x16x16x128xbf16> to vector<16x16x128xbf16>
    %46 = vector.shape_cast %45 : vector<16x16x128xbf16> to vector<256x128xbf16>
    %c6 = arith.constant 6 : index
    %c0_48 = arith.constant 0 : index
    %c0_49 = arith.constant 0 : index
    %47 = vector.load %arg2[%c6, %c0_48, %c0_49] : memref<9x128x128xbf16, #tpu.memory_space<vmem>>, vector<1x128x128xbf16>
    %48 = vector.shape_cast %47 : vector<1x128x128xbf16> to vector<128x128xbf16>
    %cst_50 = arith.constant dense<0.000000e+00> : vector<256x128xf32>
    %49 = tpu.matmul %46, %48, %cst_50 {dimension_numbers = #tpu.dot_dimension_numbers<[1], [0], [0], [1], [0, 0, 1, 1], [], []>} : vector<256x128xbf16>, vector<128x128xbf16>, vector<256x128xf32> -> vector<256x128xf32>
    %50 = arith.addf %43, %49 : vector<256x128xf32>
    %c0_51 = arith.constant 0 : index
    %c2_52 = arith.constant 2 : index
    %c1_53 = arith.constant 1 : index
    %c0_54 = arith.constant 0 : index
    %51 = vector.load %arg1[%c0_51, %c2_52, %c1_53, %c0_54] : memref<1x18x18x128xbf16, #tpu.memory_space<vmem>>, vector<1x16x16x128xbf16>
    %52 = vector.shape_cast %51 : vector<1x16x16x128xbf16> to vector<16x16x128xbf16>
    %53 = vector.shape_cast %52 : vector<16x16x128xbf16> to vector<256x128xbf16>
    %c7 = arith.constant 7 : index
    %c0_55 = arith.constant 0 : index
    %c0_56 = arith.constant 0 : index
    %54 = vector.load %arg2[%c7, %c0_55, %c0_56] : memref<9x128x128xbf16, #tpu.memory_space<vmem>>, vector<1x128x128xbf16>
    %55 = vector.shape_cast %54 : vector<1x128x128xbf16> to vector<128x128xbf16>
    %cst_57 = arith.constant dense<0.000000e+00> : vector<256x128xf32>
    %56 = tpu.matmul %53, %55, %cst_57 {dimension_numbers = #tpu.dot_dimension_numbers<[1], [0], [0], [1], [0, 0, 1, 1], [], []>} : vector<256x128xbf16>, vector<128x128xbf16>, vector<256x128xf32> -> vector<256x128xf32>
    %57 = arith.addf %50, %56 : vector<256x128xf32>
    %c0_58 = arith.constant 0 : index
    %c2_59 = arith.constant 2 : index
    %c2_60 = arith.constant 2 : index
    %c0_61 = arith.constant 0 : index
    %58 = vector.load %arg1[%c0_58, %c2_59, %c2_60, %c0_61] : memref<1x18x18x128xbf16, #tpu.memory_space<vmem>>, vector<1x16x16x128xbf16>
    %59 = vector.shape_cast %58 : vector<1x16x16x128xbf16> to vector<16x16x128xbf16>
    %60 = vector.shape_cast %59 : vector<16x16x128xbf16> to vector<256x128xbf16>
    %c8 = arith.constant 8 : index
    %c0_62 = arith.constant 0 : index
    %c0_63 = arith.constant 0 : index
    %61 = vector.load %arg2[%c8, %c0_62, %c0_63] : memref<9x128x128xbf16, #tpu.memory_space<vmem>>, vector<1x128x128xbf16>
    %62 = vector.shape_cast %61 : vector<1x128x128xbf16> to vector<128x128xbf16>
    %cst_64 = arith.constant dense<0.000000e+00> : vector<256x128xf32>
    %63 = tpu.matmul %60, %62, %cst_64 {dimension_numbers = #tpu.dot_dimension_numbers<[1], [0], [0], [1], [0, 0, 1, 1], [], []>} : vector<256x128xbf16>, vector<128x128xbf16>, vector<256x128xf32> -> vector<256x128xf32>
    %64 = arith.addf %57, %63 : vector<256x128xf32>
    %65 = vector.extract_strided_slice %0 {offsets = [0, 0], sizes = [1, 128], strides = [1, 1]} : vector<8x128xf32> to vector<1x128xf32>
    %66 = vector.broadcast %65 : vector<1x128xf32> to vector<256x128xf32>
    %67 = arith.mulf %64, %66 : vector<256x128xf32>
    %68 = vector.extract_strided_slice %0 {offsets = [1, 0], sizes = [1, 128], strides = [1, 1]} : vector<8x128xf32> to vector<1x128xf32>
    %69 = vector.broadcast %68 : vector<1x128xf32> to vector<256x128xf32>
    %70 = arith.addf %67, %69 : vector<256x128xf32>
    %cst_65 = arith.constant 0.000000e+00 : f32
    %71 = vector.broadcast %cst_65 : f32 to vector<256x128xf32>
    %72 = arith.maximumf %70, %71 : vector<256x128xf32>
    %cst_66 = arith.constant 0.000000e+00 : bf16
    %73 = vector.broadcast %cst_66 : bf16 to vector<18x18x128xbf16>
    %c0_67 = arith.constant 0 : index
    %c0_68 = arith.constant 0 : index
    %c0_69 = arith.constant 0 : index
    %74 = vector.load %arg6[%c0_67, %c0_68, %c0_69] : memref<18x18x128xbf16, #tpu.memory_space<vmem>>, vector<18x18x128xbf16>
    tpu.vector_store %arg6[%c0_67, %c0_68, %c0_69], %73 {strides = array<i32>} : memref<18x18x128xbf16, #tpu.memory_space<vmem>>, vector<18x18x128xbf16>,
    %75 = arith.truncf %72 : vector<256x128xf32> to vector<256x128xbf16>
    %76 = vector.shape_cast %75 : vector<256x128xbf16> to vector<16x16x128xbf16>
    %c1_70 = arith.constant 1 : index
    %c1_71 = arith.constant 1 : index
    %c0_72 = arith.constant 0 : index
    %77 = vector.load %arg6[%c1_70, %c1_71, %c0_72] : memref<18x18x128xbf16, #tpu.memory_space<vmem>>, vector<16x16x128xbf16>
    tpu.vector_store %arg6[%c1_70, %c1_71, %c0_72], %76 {strides = array<i32>} : memref<18x18x128xbf16, #tpu.memory_space<vmem>>, vector<16x16x128xbf16>,
    %cst_73 = arith.constant 0.000000e+00 : f32
    %78 = vector.broadcast %cst_73 : f32 to vector<256x128xf32>
    %c0_74 = arith.constant 0 : index
    %c0_75 = arith.constant 0 : index
    %c0_76 = arith.constant 0 : index
    %79 = vector.load %arg6[%c0_74, %c0_75, %c0_76] : memref<18x18x128xbf16, #tpu.memory_space<vmem>>, vector<16x16x128xbf16>
    %80 = vector.shape_cast %79 : vector<16x16x128xbf16> to vector<256x128xbf16>
    %c0_77 = arith.constant 0 : index
    %c0_78 = arith.constant 0 : index
    %c0_79 = arith.constant 0 : index
    %81 = vector.load %arg3[%c0_77, %c0_78, %c0_79] : memref<9x128x128xbf16, #tpu.memory_space<vmem>>, vector<1x128x128xbf16>
    %82 = vector.shape_cast %81 : vector<1x128x128xbf16> to vector<128x128xbf16>
    %cst_80 = arith.constant dense<0.000000e+00> : vector<256x128xf32>
    %83 = tpu.matmul %80, %82, %cst_80 {dimension_numbers = #tpu.dot_dimension_numbers<[1], [0], [0], [1], [0, 0, 1, 1], [], []>} : vector<256x128xbf16>, vector<128x128xbf16>, vector<256x128xf32> -> vector<256x128xf32>
    %84 = arith.addf %78, %83 : vector<256x128xf32>
    %c0_81 = arith.constant 0 : index
    %c1_82 = arith.constant 1 : index
    %c0_83 = arith.constant 0 : index
    %85 = vector.load %arg6[%c0_81, %c1_82, %c0_83] : memref<18x18x128xbf16, #tpu.memory_space<vmem>>, vector<16x16x128xbf16>
    %86 = vector.shape_cast %85 : vector<16x16x128xbf16> to vector<256x128xbf16>
    %c1_84 = arith.constant 1 : index
    %c0_85 = arith.constant 0 : index
    %c0_86 = arith.constant 0 : index
    %87 = vector.load %arg3[%c1_84, %c0_85, %c0_86] : memref<9x128x128xbf16, #tpu.memory_space<vmem>>, vector<1x128x128xbf16>
    %88 = vector.shape_cast %87 : vector<1x128x128xbf16> to vector<128x128xbf16>
    %cst_87 = arith.constant dense<0.000000e+00> : vector<256x128xf32>
    %89 = tpu.matmul %86, %88, %cst_87 {dimension_numbers = #tpu.dot_dimension_numbers<[1], [0], [0], [1], [0, 0, 1, 1], [], []>} : vector<256x128xbf16>, vector<128x128xbf16>, vector<256x128xf32> -> vector<256x128xf32>
    %90 = arith.addf %84, %89 : vector<256x128xf32>
    %c0_88 = arith.constant 0 : index
    %c2_89 = arith.constant 2 : index
    %c0_90 = arith.constant 0 : index
    %91 = vector.load %arg6[%c0_88, %c2_89, %c0_90] : memref<18x18x128xbf16, #tpu.memory_space<vmem>>, vector<16x16x128xbf16>
    %92 = vector.shape_cast %91 : vector<16x16x128xbf16> to vector<256x128xbf16>
    %c2_91 = arith.constant 2 : index
    %c0_92 = arith.constant 0 : index
    %c0_93 = arith.constant 0 : index
    %93 = vector.load %arg3[%c2_91, %c0_92, %c0_93] : memref<9x128x128xbf16, #tpu.memory_space<vmem>>, vector<1x128x128xbf16>
    %94 = vector.shape_cast %93 : vector<1x128x128xbf16> to vector<128x128xbf16>
    %cst_94 = arith.constant dense<0.000000e+00> : vector<256x128xf32>
    %95 = tpu.matmul %92, %94, %cst_94 {dimension_numbers = #tpu.dot_dimension_numbers<[1], [0], [0], [1], [0, 0, 1, 1], [], []>} : vector<256x128xbf16>, vector<128x128xbf16>, vector<256x128xf32> -> vector<256x128xf32>
    %96 = arith.addf %90, %95 : vector<256x128xf32>
    %c1_95 = arith.constant 1 : index
    %c0_96 = arith.constant 0 : index
    %c0_97 = arith.constant 0 : index
    %97 = vector.load %arg6[%c1_95, %c0_96, %c0_97] : memref<18x18x128xbf16, #tpu.memory_space<vmem>>, vector<16x16x128xbf16>
    %98 = vector.shape_cast %97 : vector<16x16x128xbf16> to vector<256x128xbf16>
    %c3_98 = arith.constant 3 : index
    %c0_99 = arith.constant 0 : index
    %c0_100 = arith.constant 0 : index
    %99 = vector.load %arg3[%c3_98, %c0_99, %c0_100] : memref<9x128x128xbf16, #tpu.memory_space<vmem>>, vector<1x128x128xbf16>
    %100 = vector.shape_cast %99 : vector<1x128x128xbf16> to vector<128x128xbf16>
    %cst_101 = arith.constant dense<0.000000e+00> : vector<256x128xf32>
    %101 = tpu.matmul %98, %100, %cst_101 {dimension_numbers = #tpu.dot_dimension_numbers<[1], [0], [0], [1], [0, 0, 1, 1], [], []>} : vector<256x128xbf16>, vector<128x128xbf16>, vector<256x128xf32> -> vector<256x128xf32>
    %102 = arith.addf %96, %101 : vector<256x128xf32>
    %c1_102 = arith.constant 1 : index
    %c1_103 = arith.constant 1 : index
    %c0_104 = arith.constant 0 : index
    %103 = vector.load %arg6[%c1_102, %c1_103, %c0_104] : memref<18x18x128xbf16, #tpu.memory_space<vmem>>, vector<16x16x128xbf16>
    %104 = vector.shape_cast %103 : vector<16x16x128xbf16> to vector<256x128xbf16>
    %c4_105 = arith.constant 4 : index
    %c0_106 = arith.constant 0 : index
    %c0_107 = arith.constant 0 : index
    %105 = vector.load %arg3[%c4_105, %c0_106, %c0_107] : memref<9x128x128xbf16, #tpu.memory_space<vmem>>, vector<1x128x128xbf16>
    %106 = vector.shape_cast %105 : vector<1x128x128xbf16> to vector<128x128xbf16>
    %cst_108 = arith.constant dense<0.000000e+00> : vector<256x128xf32>
    %107 = tpu.matmul %104, %106, %cst_108 {dimension_numbers = #tpu.dot_dimension_numbers<[1], [0], [0], [1], [0, 0, 1, 1], [], []>} : vector<256x128xbf16>, vector<128x128xbf16>, vector<256x128xf32> -> vector<256x128xf32>
    %108 = arith.addf %102, %107 : vector<256x128xf32>
    %c1_109 = arith.constant 1 : index
    %c2_110 = arith.constant 2 : index
    %c0_111 = arith.constant 0 : index
    %109 = vector.load %arg6[%c1_109, %c2_110, %c0_111] : memref<18x18x128xbf16, #tpu.memory_space<vmem>>, vector<16x16x128xbf16>
    %110 = vector.shape_cast %109 : vector<16x16x128xbf16> to vector<256x128xbf16>
    %c5_112 = arith.constant 5 : index
    %c0_113 = arith.constant 0 : index
    %c0_114 = arith.constant 0 : index
    %111 = vector.load %arg3[%c5_112, %c0_113, %c0_114] : memref<9x128x128xbf16, #tpu.memory_space<vmem>>, vector<1x128x128xbf16>
    %112 = vector.shape_cast %111 : vector<1x128x128xbf16> to vector<128x128xbf16>
    %cst_115 = arith.constant dense<0.000000e+00> : vector<256x128xf32>
    %113 = tpu.matmul %110, %112, %cst_115 {dimension_numbers = #tpu.dot_dimension_numbers<[1], [0], [0], [1], [0, 0, 1, 1], [], []>} : vector<256x128xbf16>, vector<128x128xbf16>, vector<256x128xf32> -> vector<256x128xf32>
    %114 = arith.addf %108, %113 : vector<256x128xf32>
    %c2_116 = arith.constant 2 : index
    %c0_117 = arith.constant 0 : index
    %c0_118 = arith.constant 0 : index
    %115 = vector.load %arg6[%c2_116, %c0_117, %c0_118] : memref<18x18x128xbf16, #tpu.memory_space<vmem>>, vector<16x16x128xbf16>
    %116 = vector.shape_cast %115 : vector<16x16x128xbf16> to vector<256x128xbf16>
    %c6_119 = arith.constant 6 : index
    %c0_120 = arith.constant 0 : index
    %c0_121 = arith.constant 0 : index
    %117 = vector.load %arg3[%c6_119, %c0_120, %c0_121] : memref<9x128x128xbf16, #tpu.memory_space<vmem>>, vector<1x128x128xbf16>
    %118 = vector.shape_cast %117 : vector<1x128x128xbf16> to vector<128x128xbf16>
    %cst_122 = arith.constant dense<0.000000e+00> : vector<256x128xf32>
    %119 = tpu.matmul %116, %118, %cst_122 {dimension_numbers = #tpu.dot_dimension_numbers<[1], [0], [0], [1], [0, 0, 1, 1], [], []>} : vector<256x128xbf16>, vector<128x128xbf16>, vector<256x128xf32> -> vector<256x128xf32>
    %120 = arith.addf %114, %119 : vector<256x128xf32>
    %c2_123 = arith.constant 2 : index
    %c1_124 = arith.constant 1 : index
    %c0_125 = arith.constant 0 : index
    %121 = vector.load %arg6[%c2_123, %c1_124, %c0_125] : memref<18x18x128xbf16, #tpu.memory_space<vmem>>, vector<16x16x128xbf16>
    %122 = vector.shape_cast %121 : vector<16x16x128xbf16> to vector<256x128xbf16>
    %c7_126 = arith.constant 7 : index
    %c0_127 = arith.constant 0 : index
    %c0_128 = arith.constant 0 : index
    %123 = vector.load %arg3[%c7_126, %c0_127, %c0_128] : memref<9x128x128xbf16, #tpu.memory_space<vmem>>, vector<1x128x128xbf16>
    %124 = vector.shape_cast %123 : vector<1x128x128xbf16> to vector<128x128xbf16>
    %cst_129 = arith.constant dense<0.000000e+00> : vector<256x128xf32>
    %125 = tpu.matmul %122, %124, %cst_129 {dimension_numbers = #tpu.dot_dimension_numbers<[1], [0], [0], [1], [0, 0, 1, 1], [], []>} : vector<256x128xbf16>, vector<128x128xbf16>, vector<256x128xf32> -> vector<256x128xf32>
    %126 = arith.addf %120, %125 : vector<256x128xf32>
    %c2_130 = arith.constant 2 : index
    %c2_131 = arith.constant 2 : index
    %c0_132 = arith.constant 0 : index
    %127 = vector.load %arg6[%c2_130, %c2_131, %c0_132] : memref<18x18x128xbf16, #tpu.memory_space<vmem>>, vector<16x16x128xbf16>
    %128 = vector.shape_cast %127 : vector<16x16x128xbf16> to vector<256x128xbf16>
    %c8_133 = arith.constant 8 : index
    %c0_134 = arith.constant 0 : index
    %c0_135 = arith.constant 0 : index
    %129 = vector.load %arg3[%c8_133, %c0_134, %c0_135] : memref<9x128x128xbf16, #tpu.memory_space<vmem>>, vector<1x128x128xbf16>
    %130 = vector.shape_cast %129 : vector<1x128x128xbf16> to vector<128x128xbf16>
    %cst_136 = arith.constant dense<0.000000e+00> : vector<256x128xf32>
    %131 = tpu.matmul %128, %130, %cst_136 {dimension_numbers = #tpu.dot_dimension_numbers<[1], [0], [0], [1], [0, 0, 1, 1], [], []>} : vector<256x128xbf16>, vector<128x128xbf16>, vector<256x128xf32> -> vector<256x128xf32>
    %132 = arith.addf %126, %131 : vector<256x128xf32>
    %133 = vector.extract_strided_slice %0 {offsets = [2, 0], sizes = [1, 128], strides = [1, 1]} : vector<8x128xf32> to vector<1x128xf32>
    %134 = vector.broadcast %133 : vector<1x128xf32> to vector<256x128xf32>
    %135 = arith.mulf %132, %134 : vector<256x128xf32>
    %136 = vector.extract_strided_slice %0 {offsets = [3, 0], sizes = [1, 128], strides = [1, 1]} : vector<8x128xf32> to vector<1x128xf32>
    %137 = vector.broadcast %136 : vector<1x128xf32> to vector<256x128xf32>
    %138 = arith.addf %135, %137 : vector<256x128xf32>
    %c0_137 = arith.constant 0 : index
    %c1_138 = arith.constant 1 : index
    %c1_139 = arith.constant 1 : index
    %c0_140 = arith.constant 0 : index
    %139 = vector.load %arg1[%c0_137, %c1_138, %c1_139, %c0_140] : memref<1x18x18x128xbf16, #tpu.memory_space<vmem>>, vector<1x16x16x128xbf16>
    %140 = vector.shape_cast %139 : vector<1x16x16x128xbf16> to vector<16x16x128xbf16>
    %141 = vector.shape_cast %140 : vector<16x16x128xbf16> to vector<256x128xbf16>
    %142 = arith.extf %141 : vector<256x128xbf16> to vector<256x128xf32>
    %143 = arith.addf %138, %142 : vector<256x128xf32>
    %cst_141 = arith.constant 0.000000e+00 : f32
    %144 = vector.broadcast %cst_141 : f32 to vector<256x128xf32>
    %145 = arith.maximumf %143, %144 : vector<256x128xf32>
    %146 = vector.shape_cast %145 : vector<256x128xf32> to vector<1x16x16x128xf32>
    %c0_142 = arith.constant 0 : index
    %c0_143 = arith.constant 0 : index
    %c0_144 = arith.constant 0 : index
    %c0_145 = arith.constant 0 : index
    %147 = vector.load %arg5[%c0_142, %c0_143, %c0_144, %c0_145] : memref<1x16x16x128xf32, #tpu.memory_space<vmem>>, vector<1x16x16x128xf32>
    tpu.vector_store %arg5[%c0_142, %c0_143, %c0_144, %c0_145], %146 {strides = array<i32>} : memref<1x16x16x128xf32, #tpu.memory_space<vmem>>, vector<1x16x16x128xf32>,
    return
  }
  func.func @transform_0(%arg0: i32) -> (i32, i32, i32, i32) {
    %c0_i32 = arith.constant 0 : i32
    %c0_i32_0 = arith.constant 0 : i32
    %c0_i32_1 = arith.constant 0 : i32
    %c0_i32_2 = arith.constant 0 : i32
    return %arg0, %c0_i32, %c0_i32_0, %c0_i32_1 : i32, i32, i32, i32
  }
  func.func @transform_1(%arg0: i32) -> (i32, i32, i32) {
    %c0_i32 = arith.constant 0 : i32
    %c0_i32_0 = arith.constant 0 : i32
    %c0_i32_1 = arith.constant 0 : i32
    %c0_i32_2 = arith.constant 0 : i32
    return %c0_i32, %c0_i32_0, %c0_i32_1 : i32, i32, i32
  }
  func.func @transform_2(%arg0: i32) -> (i32, i32, i32) {
    %c0_i32 = arith.constant 0 : i32
    %c0_i32_0 = arith.constant 0 : i32
    %c0_i32_1 = arith.constant 0 : i32
    %c0_i32_2 = arith.constant 0 : i32
    return %c0_i32, %c0_i32_0, %c0_i32_1 : i32, i32, i32
  }
  func.func @transform_3(%arg0: i32) -> (i32, i32) {
    %c0_i32 = arith.constant 0 : i32
    %c0_i32_0 = arith.constant 0 : i32
    %c0_i32_1 = arith.constant 0 : i32
    return %c0_i32, %c0_i32_0 : i32, i32
  }
  func.func @transform_4(%arg0: i32) -> (i32, i32, i32, i32) {
    %c0_i32 = arith.constant 0 : i32
    %c0_i32_0 = arith.constant 0 : i32
    %c0_i32_1 = arith.constant 0 : i32
    %c0_i32_2 = arith.constant 0 : i32
    return %arg0, %c0_i32, %c0_i32_0, %c0_i32_1 : i32, i32, i32, i32
  }
}

</mosaic_0001>

<bundles_post_ra>
// kernel: basic_block_pallas.1
= control target key start
LH: loop header
LB: loop body
LE: loop exit
PB: predicated region body
PF: predicated region fallthrough
CT: control target
= control target key end

     0   :  { %s13922_s15 = smov 0   ;;  %s19256_s0 = inlined_call_operand.vmem [shape: bf16[2,18,18,128], index: 0, kind: input, shape index: {}]   ;;  %s19257_s1 = inlined_call_operand.vmem [shape: bf16[9,128,128], index: 1, kind: input, shape index: {}]   ;;  %s19258_s2 = inlined_call_operand.vmem [shape: bf16[9,128,128], index: 2, kind: input, shape index: {}]   ;;  %s19259_s3 = inlined_call_operand.vmem [shape: f32[8,128], index: 3, kind: input, shape index: {}]   ;;  %s19260_s4 = inlined_call_operand.vmem [shape: f32[2,16,16,128], index: 4, kind: output, shape index: {}]  }
   0x1 LB: > { %s11225_s16 = sadd.s32 4294967295, %s13894_s15   ;;  %p11229_p0 = scmp.ge.s32.totalorder %s13894_s15, 1  ;;  %s13894_s15 = sphi %s13922_s15, %s14_s15  }
   0x2   : > { %p162_p1 = scmp.lt.s32.totalorder %s13894_s15, 3 }
   0x4   : > { %p163_p2 = pnand %p11229_p0, %p162_p1 }
   0x6   : > { %166 = sbr.rel (%p163_p2) target bundleno = 1147 (0x47b), region = 36 }
   0xb   : > { %v13630_v0 = vld [vmem:[%s19257_s1 + $0x78] sm:$0xff]   ;;  %p188_p3 = scmp.lt.s32.totalorder %s11225_s16, 1  ;;  %v13632_v2 = vld [vmem:[%s19257_s1 + $0x70] sm:$0xff]   ;;  %v13634_v4 = vld [vmem:[%s19257_s1 + $0x68] sm:$0xff]   ;;  %vm264_vm0 = vsmask.f32 3328 }
   0xc   : > { %v13631_v1 = vld [vmem:[%s19257_s1 + $0x38] sm:$0xff]   ;;  %12756 = vmatprep.subr.bf16.mxu0 %v13630_v0  ;;  %v13633_v3 = vld [vmem:[%s19257_s1 + $0x30] sm:$0xff]   ;;  %v13635_v5 = vld [vmem:[%s19257_s1 + $0x28] sm:$0xff]   ;;  %vm265_vm1 = vsmask.f32 7440  ;;  %v19285_v37 = vmov 0 }
   0xd   : > { %12804 = vmatprep.subr.bf16.mxu1 %v13631_v1  ;;  %12757 = vmatpush3.bf16.msra.mxu0 %v13630_v0  ;;  %s19693_s16 = smov (!%p188_p3, %s11225_s16), 1  ;;  %v13636_v6 = vld [vmem:[%s19257_s1 + $0x60] sm:$0xff]   ;;  %v13638_v8 = vld [vmem:[%s19257_s1 + $0x58] sm:$0xff]   ;;  %v13640_v10 = vld [vmem:[%s19257_s1 + $0x50] sm:$0xff]   ;;  %vm1294_vm3 = vcmask 1042432   ;;  %vm1295_vm4 = vcmask 1046532  }
   0xe   : > { %12805 = vmatpush3.bf16.msra.mxu1 %v13631_v1  ;;  %12758 = vmatprep.subr.bf16.mxu0 %v13632_v2  ;;  %v13637_v7 = vld [vmem:[%s19257_s1 + $0x20] sm:$0xff]   ;;  %s13620_s7 = smul.u32 216, %s19693_s16  ;;  %v13639_v9 = vld [vmem:[%s19257_s1 + $0x18] sm:$0xff]   ;;  %v13641_v11 = vld [vmem:[%s19257_s1 + $0x10] sm:$0xff]   ;;  %vm5587_vm6 = vcmask 1043456   ;;  %vm5594_vm10 = vcmask 1040384  }
   0xf   : > { %12806 = vmatprep.subr.bf16.mxu1 %v13633_v3  ;;  %v13642_v17 = vld [vmem:[%s19257_s1 + $0x48] sm:$0xff]   ;;  %vm14007_vm2 = vmor %vm264_vm0, %vm265_vm1  ;;  %v13644_v48 = vld [vmem:[%s19257_s1 + $0x40] sm:$0xff]   ;;  %vm5588_vm7 = vsmask.f32 7938  ;;  %vm5263_vm8 = vsmask.f32 256 }
  0x10   : > { %s13966_s14 = scalar_lea.vmem %s19256_s0, %s13620_s7  ;;  %v13643_v32 = vld [vmem:[%s19257_s1 + $0x8] sm:$0xff]   ;;  %v19286_v37 = vsel %vm14007_vm2, 4294967295, %v19285_v37  ;;  %v13645_v53 = vld [vmem:[%s19257_s1] sm:$0xff]   ;;  %vm14359_vm5 = vmor %vm1294_vm3, %vm1295_vm4  ;;  %vm5264_vm9 = vsmask.f32 4368  ;;  %s12291_s12 = sshll.u32 %s19693_s16, 8 }
  0x11   : > { %12759 = vmatpush3.bf16.msra.mxu0 %v13632_v2  ;;  %v200_v12 = vld [vmem:[%s13966_s14] sm:$0xf]  ;;  %v13976_v13 = vld [vmem:[%s13966_s14 + $0x4] sm:$0xf]  ;;  %v13979_v14 = vld [vmem:[%s13966_s14 + $0x8] sm:$0x1]  ;;  %s18971_s17 = scalar_lea.vmem %s19260_s4, %s12291_s12 }
  0x12   : > { %12807 = vmatpush3.bf16.msra.mxu1 %v13633_v3  ;;  %12760 = vmatprep.subr.bf16.mxu0 %v13634_v4  ;;  %v268_v15 = vshrl.u32 %v200_v12, 16  ;;  %v271_v16 = vshll.u32 %v200_v12, 16  ;;  %v277_v18 = vshll.u32 %v13976_v13, 16  ;;  %v281_v19 = vshrl.u32 %v13976_v13, 16  ;;  %v13989_v22 = vld [vmem:[%s13966_s14 + $0xc] sm:$0xf]  ;;  %vm16220_vm11 = vmand %vm5587_vm6, %vm5588_vm7 }
  0x13   : > { %12808 = vmatprep.subr.bf16.mxu1 %v13635_v5  ;;  %v287_v20 = vshll.u32 %v13979_v14, 16  ;;  %v1302_v21 = vrot.slane %v13979_v14, 5  ;;  %v11273_v25 = vcombine.low %v200_v12, %v13976_v13  ;;  %v13993_v26 = vld [vmem:[%s13966_s14 + $0x10] sm:$0xf]  ;;  %v13996_v27 = vld [vmem:[%s13966_s14 + $0x14] sm:$0x1]  ;;  %vm16232_vm12 = vmor %vm5263_vm8, %vm5264_vm9 }
  0x14   : > { %v270_v23 = vrot.slane %v268_v15, 4  ;;  %v273_v24 = vrot.slane %v271_v16, 5  ;;  %v279_v28 = vrot.slane %v277_v18, 5  ;;  %v283_v29 = vrot.slane %v281_v19, 4  ;;  %19287 = vst [vmem:[#allocation3_spill] sm:$0xff] %v19286_v37  ;;  %vm16238_vm13 = vmand %vm5594_vm10, %vm5263_vm8 }
  0x15   : > { %12761 = vmatpush3.bf16.msra.mxu0 %v13634_v4  ;;  %v289_v30 = vrot.slane %v287_v20, 5  ;;  %v292_v31 = vshrl.u32 %v13989_v22, 16  ;;  %12820 = vmatprep.mubr.bf16.mxu1 %v11273_v25  ;;  %v295_v34 = vshll.u32 %v13989_v22, 16  ;;  %v301_v35 = vshll.u32 %v13993_v26, 16  ;;  %v14014_v42 = vld [vmem:[%s13966_s14 + $0x18] sm:$0xf] }
  0x16   : > { %12809 = vmatpush3.bf16.msra.mxu1 %v13635_v5  ;;  %12762 = vmatprep.subr.bf16.mxu0 %v13636_v6  ;;  %v274_v33 = vor.u32 %v273_v24, %v270_v23  ;;  %v305_v36 = vshrl.u32 %v13993_v26, 16  ;;  %v284_v38 = vor.u32 %v283_v29, %v279_v28  ;;  %v311_v40 = vshll.u32 %v13996_v27, 16  ;;  %v14017_v47 = vld [vmem:[%s13966_s14 + $0x1c] sm:$0xf]  ;;  %v14031_v57 = vld [vmem:[%s13966_s14 + $0x20] sm:$0x1] }
  0x17   : > { %12810 = vmatprep.subr.bf16.mxu1 %v13637_v7  ;;  %v294_v39 = vrot.slane %v292_v31, 4  ;;  %v1309_v41 = vrot.slane %v13996_v27, 5  ;;  %v297_v44 = vrot.slane %v295_v34, 5  ;;  %v303_v45 = vrot.slane %v301_v35, 5  ;;  %v14035_v59 = vld [vmem:[%s13966_s14 + $0x24] sm:$0xf] }
  0x18   : > { %v275_v43 = vrot.slane %v274_v33, 4  ;;  %v307_v46 = vrot.slane %v305_v36, 4  ;;  %v285_v49 = vrot.slane %v284_v38, 4  ;;  %v313_v50 = vrot.slane %v311_v40, 5  ;;  %v14042_v0 = vld [vmem:[%s13966_s14 + $0x28] sm:$0xf] }
  0x19   : > { %12763 = vmatpush3.bf16.msra.mxu0 %v13636_v6  ;;  %v11274_v51 = vcombine.low %v13989_v22, %v13993_v26  ;;  %v316_v52 = vshrl.u32 %v14014_v42, 16  ;;  %v298_v55 = vor.u32 %v297_v44, %v294_v39  ;;  %v319_v58 = vshll.u32 %v14014_v42, 16  ;;  %v13648_v5 = vld [vmem:[%s19257_s1 + $0xb8] sm:$0xff]   ;;  %v14055_v15 = vld [vmem:[%s13966_s14 + $0x2c] sm:$0x1]  ;;  %v13651_v36 = vld [vmem:[%s19257_s1 + $0xb0] sm:$0xff]  }
  0x1a   : > { %12811 = vmatpush3.bf16.msra.mxu1 %v13637_v7  ;;  %12764 = vmatprep.subr.bf16.mxu0 %v13638_v8  ;;  %v280_v54 = vsel %vm14007_vm2, %v275_v43, %v279_v28  ;;  %v308_v56 = vor.u32 %v307_v46, %v303_v45  ;;  %v290_v60 = vsel %vm14007_vm2, %v285_v49, %v289_v30  ;;  %v325_v62 = vshll.u32 %v14017_v47, 16  ;;  %v14063_v24 = vld [vmem:[%s13966_s14 + $0x30] sm:$0xf]  ;;  %v14068_v31 = vld [vmem:[%s13966_s14 + $0x34] sm:$0xf] }
  0x1b   : > { %12812 = vmatprep.subr.bf16.mxu1 %v13639_v9  ;;  %v318_v61 = vrot.slane %v316_v52, 4  ;;  %v329_v63 = vshrl.u32 %v14017_v47, 16  ;;  %v11249_v1 = vcombine.low %v280_v54, %v290_v60  ;;  %v299_v2 = vrot.slane %v298_v55, 4  ;;  %v14077_v38 = vld [vmem:[%s13966_s14 + $0x38] sm:$0x1]  ;;  %v13662_v44 = vld [vmem:[%s19257_s1 + $0xf0] sm:$0xff]  }
  0x1c   : > { %v309_v3 = vrot.slane %v308_v56, 4  ;;  %v321_v4 = vrot.slane %v319_v58, 5  ;;  %v327_v6 = vrot.slane %v325_v62, 5  ;;  %v340_v16 = vshrl.u32 %v14035_v59, 16  ;;  %v13654_v56 = vld [vmem:[%s19257_s1 + $0xa8] sm:$0xff]  }
  0x1d   : > { %12765 = vmatpush3.bf16.msra.mxu0 %v13638_v8  ;;  %v331_v7 = vrot.slane %v329_v63, 4  ;;  %v335_v8 = vshll.u32 %v14031_v57, 16  ;;  %12772 = vmatprep.mubr.bf16.mxu0 %v11249_v1  ;;  %v343_v23 = vshll.u32 %v14035_v59, 16  ;;  %v349_v29 = vshll.u32 %v14042_v0, 16 }
  0x1e   : > { %12813 = vmatpush3.bf16.msra.mxu1 %v13639_v9  ;;  %12766 = vmatprep.subr.bf16.mxu0 %v13640_v10  ;;  %v11275_v9 = vcombine.low %v14014_v42, %v14017_v47  ;;  %v322_v12 = vor.u32 %v321_v4, %v318_v61  ;;  %v342_v28 = vrot.slane %v340_v16, 4  ;;  %v353_v30 = vshrl.u32 %v14042_v0, 16  ;;  %v13666_v4 = vld [vmem:[%s19257_s1 + $0xe8] sm:$0xff]  }
  0x1f   : > { %12814 = vmatprep.subr.bf16.mxu1 %v13641_v11  ;;  %v332_v19 = vor.u32 %v331_v7, %v327_v6  ;;  %v337_v20 = vrot.slane %v335_v8, 5  ;;  %v345_v33 = vrot.slane %v343_v23, 5  ;;  %v359_v34 = vshll.u32 %v14055_v15, 16  ;;  %v14123_v23 = vld [vmem:[%s13966_s14 + $0x4c] sm:$0xf] }
  0x20   : > { %v323_v25 = vrot.slane %v322_v12, 4  ;;  %v11276_v35 = vcombine.low %v14035_v59, %v14042_v0  ;;  %v351_v40 = vrot.slane %v349_v29, 5  ;;  %v355_v42 = vrot.slane %v353_v30, 4 }
  0x21   : > { %12767 = vmatpush3.bf16.msra.mxu0 %v13640_v10  ;;  %v304_v10 = vsel %vm14007_vm2, %v299_v2, %v303_v45  ;;  %v364_v43 = vshrl.u32 %v14063_v24, 16  ;;  %v346_v46 = vor.u32 %v345_v33, %v342_v28  ;;  %v367_v49 = vshll.u32 %v14063_v24, 16  ;;  %v14106_v2 = vld [vmem:[%s13966_s14 + $0x44] sm:$0x1] }
  0x22   : > { %12815 = vmatpush3.bf16.msra.mxu1 %v13641_v11  ;;  %12768 = vmatprep.subr.bf16.mxu0 %v13642_v17  ;;  %v314_v11 = vsel %vm14007_vm2, %v309_v3, %v313_v50  ;;  %v328_v39 = vsel %vm14007_vm2, %v323_v25, %v327_v6  ;;  %v14089_v50 = vld [vmem:[%s13966_s14 + $0x3c] sm:$0xf]  ;;  %v373_v55 = vshll.u32 %v14068_v31, 16  ;;  %v377_v61 = vshrl.u32 %v14068_v31, 16 }
  0x23   : > { %12816 = vmatprep.subr.bf16.mxu1 %v13643_v32  ;;  %v11250_v18 = vcombine.low %v304_v10, %v314_v11  ;;  %v366_v54 = vrot.slane %v364_v43, 4  ;;  %v347_v58 = vrot.slane %v346_v46, 4  ;;  %v369_v60 = vrot.slane %v367_v49, 5  ;;  %v14146_v46 = vld [vmem:[%s13966_s14 + $0x54] sm:$0xf] }
  0x24   : > { %v383_v22 = vshll.u32 %v14077_v38, 16  ;;  %v375_v63 = vrot.slane %v373_v55, 5  ;;  %v11277_v1 = vcombine.low %v14063_v24, %v14068_v31  ;;  %v388_v3 = vshrl.u32 %v14089_v50, 16  ;;  %v13657_v24 = vld [vmem:[%s19257_s1 + $0xa0] sm:$0xff]  }
  0x25   : > { %12769 = vmatpush3.bf16.msra.mxu0 %v13642_v17  ;;  %v13661_v17 = vld [vmem:[%s19257_s1 + $0xf8] sm:$0xff]   ;;  %v370_v6 = vor.u32 %v369_v60, %v366_v54  ;;  %v379_v7 = vrot.slane %v377_v61, 4  ;;  %v391_v12 = vshll.u32 %v14089_v50, 16  ;;  %v407_v29 = vshll.u32 %v14106_v2, 16 }
  0x26   : > { %12817 = vmatpush3.bf16.msra.mxu1 %v13643_v32  ;;  %12770 = vmatprep.subr.bf16.mxu0 %v13644_v48  ;;  %v333_v32 = vrot.slane %v332_v19, 4  ;;  %v385_v8 = vrot.slane %v383_v22, 5  ;;  %v390_v11 = vrot.slane %v388_v3, 4  ;;  %v1320_v27 = vrot.slane %v14042_v0, 5  ;;  %v13682_v0 = vld [vmem:[%s13966_s14 + $0x24] sm:$0xff]  }
  0x27   : > { %12818 = vmatprep.subr.bf16.mxu1 %v13645_v53  ;;  %v380_v19 = vor.u32 %v379_v7, %v375_v63  ;;  %v393_v25 = vrot.slane %v391_v12, 5  ;;  %v409_v43 = vrot.slane %v407_v29, 5  ;;  %v13672_v29 = vld [vmem:[%s19257_s1 + $0xd0] sm:$0xff]  }
  0x28   : > { %v338_v45 = vsel %vm14007_vm2, %v333_v32, %v337_v20 }
  0x29   : > { %12771 = vmatpush3.bf16.msra.mxu0 %v13644_v48  ;;  %v361_v48 = vrot.slane %v359_v34, 5  ;;  %v11251_v52 = vcombine.low %v328_v39, %v338_v45  ;;  %v381_v33 = vrot.slane %v380_v19, 4  ;;  %v421_v45 = vshll.u32 %v14123_v23, 16  ;;  %v13665_v19 = vld [vmem:[%s19257_s1 + $0x90] sm:$0xff]  }
  0x2a   : > { %12819 = vmatpush3.bf16.msra.mxu1 %v13645_v53  ;;  %12852 = vmatprep.subr.bf16.mxu0 %v13648_v5  ;;  %v356_v53 = vor.u32 %v355_v42, %v351_v40  ;;  %v394_v42 = vor.u32 %v393_v25, %v390_v11 }
  0x2b   : > { %12900 = vmatprep.subr.bf16.mxu1 %v13661_v17  ;;  %v386_v49 = vsel %vm14007_vm2, %v381_v33, %v385_v8 }
  0x2c   : > { %12773 = vmatmul.mubr.bf16.vlgmr.msra.gmra.mxu0 %v11250_v18  ;;  %v357_v62 = vrot.slane %v356_v53, 4  ;;  %v371_v18 = vrot.slane %v370_v6, 4  ;;  %v395_v54 = vrot.slane %v394_v42, 4  ;;  %v14196_v42 = vld [vmem:[%s13966_s14 + $0x6c] sm:$0xf] }
  0x2d   : > { %12821 = vmatmul.mubr.bf16.vlgmr.msra.gmra.mxu1 %v11274_v51  ;;  %12853 = vmatpush3.bf16.msra.mxu0 %v13648_v5  ;;  %v14101_v51 = vld [vmem:[%s13966_s14 + $0x40] sm:$0xf]  ;;  %v352_v5 = vsel %vm14007_vm2, %v347_v58, %v351_v40  ;;  %v14158_v58 = vld [vmem:[%s13966_s14 + $0x5c] sm:$0x1] }
  0x2e   : > { %12824 = vmatprep.mubr.bf16.mxu1 %v11275_v9  ;;  %12854 = vmatprep.subr.bf16.mxu0 %v13651_v36  ;;  %v14115_v9 = vld [vmem:[%s13966_s14 + $0x48] sm:$0xf]  ;;  %v362_v10 = vsel %vm14007_vm2, %v357_v62, %v361_v48  ;;  %v397_v16 = vshll.u32 %v14101_v51, 16  ;;  %v401_v20 = vshrl.u32 %v14101_v51, 16  ;;  %v11278_v30 = vcombine.low %v14089_v50, %v14101_v51  ;;  %v13667_v40 = vld [vmem:[%s19257_s1 + $0xe0] sm:$0xff]   ;;  %v13660_v48 = vld [vmem:[%s19257_s1 + $0x98] sm:$0xff]  }
  0x2f   : > { %12776 = vmatprep.mubr.bf16.mxu0 %v11251_v52  ;;  %12901 = vmatpush3.bf16.msra.mxu1 %v13661_v17  ;;  %v11252_v17 = vcombine.low %v352_v5, %v362_v10  ;;  %v376_v32 = vsel %vm14007_vm2, %v371_v18, %v375_v63  ;;  %v412_v39 = vshrl.u32 %v14115_v9, 16  ;;  %v425_v50 = vshrl.u32 %v14123_v23, 16  ;;  %v14155_v52 = vld [vmem:[%s13966_s14 + $0x58] sm:$0xf]  ;;  %v14174_v10 = vld [vmem:[%s13966_s14 + $0x60] sm:$0xf] }
  0x30   : > { %12902 = vmatprep.subr.bf16.mxu1 %v13662_v44  ;;  %v399_v28 = vrot.slane %v397_v16, 5  ;;  %v403_v34 = vrot.slane %v401_v20, 4  ;;  %v11253_v53 = vcombine.low %v376_v32, %v386_v49  ;;  %v11279_v62 = vcombine.low %v14115_v9, %v14123_v23  ;;  %v13671_v63 = vld [vmem:[%s19257_s1 + $0xd8] sm:$0xff]   ;;  %v14177_v18 = vld [vmem:[%s13966_s14 + $0x64] sm:$0xf] }
  0x31   : > { %12855 = vmatpush3.bf16.msra.mxu0 %v13651_v36  ;;  %v14134_v36 = vld [vmem:[%s13966_s14 + $0x50] sm:$0x1]  ;;  %v427_v61 = vrot.slane %v425_v50, 4  ;;  %v439_v5 = vshll.u32 %v14146_v46, 16  ;;  %v449_v25 = vshrl.u32 %v14155_v52, 16  ;;  %v469_v50 = vshll.u32 %v14177_v18, 16 }
  0x32   : > { %12856 = vmatprep.subr.bf16.mxu0 %v13654_v56  ;;  %v404_v59 = vor.u32 %v403_v34, %v399_v28  ;;  %v431_v22 = vshll.u32 %v14134_v36, 16  ;;  %v11280_v34 = vcombine.low %v14146_v46, %v14155_v52  ;;  %v14202_v49 = vld [vmem:[%s13966_s14 + $0x70] sm:$0xf] }
  0x33   : > { %12903 = vmatpush3.bf16.msra.mxu1 %v13662_v44  ;;  %v415_v44 = vshll.u32 %v14115_v9, 16  ;;  %v445_v9 = vshll.u32 %v14155_v52, 16 }
  0x34   : > { %12777 = vmatmul.mubr.bf16.gmra.mxu0 %v11252_v17  ;;  %12904 = vmatprep.subr.bf16.mxu1 %v13666_v4  ;;  %v405_v60 = vrot.slane %v404_v59, 4  ;;  %v433_v8 = vrot.slane %v431_v22, 5  ;;  %v441_v17 = vrot.slane %v439_v5, 5 }
  0x35   : > { %12825 = vmatmul.mubr.bf16.gmra.mxu1 %v11276_v35  ;;  %12857 = vmatpush3.bf16.msra.mxu0 %v13654_v56  ;;  %v414_v35 = vrot.slane %v412_v39, 4  ;;  %v417_v55 = vrot.slane %v415_v44, 5  ;;  %v423_v56 = vrot.slane %v421_v45, 5  ;;  %v14192_v39 = vld [vmem:[%s13966_s14 + $0x68] sm:$0x1]  ;;  %v451_v44 = vrot.slane %v449_v25, 4 }
  0x36   : > { %12828 = vmatprep.mubr.bf16.mxu1 %v11277_v1  ;;  %12858 = vmatprep.subr.bf16.mxu0 %v13657_v24  ;;  %v400_v1 = vsel %vm14007_vm2, %v395_v54, %v399_v28  ;;  %v410_v6 = vsel %vm14007_vm2, %v405_v60, %v409_v43  ;;  %v455_v28 = vshll.u32 %v14158_v58, 16  ;;  %v463_v45 = vshll.u32 %v14174_v10, 16  ;;  %v13670_v54 = vld [vmem:[%s19257_s1 + $0x88] sm:$0xff]  }
  0x37   : > { %12905 = vmatpush3.bf16.msra.mxu1 %v13666_v4  ;;  %12780 = vmatprep.mubr.bf16.mxu0 %v11253_v53  ;;  %v418_v3 = vor.u32 %v417_v55, %v414_v35  ;;  %v436_v4 = vshrl.u32 %v14146_v46, 16  ;;  %v428_v7 = vor.u32 %v427_v61, %v423_v56  ;;  %v11254_v11 = vcombine.low %v400_v1, %v410_v6  ;;  %v14206_v53 = vld [vmem:[%s13966_s14 + $0x74] sm:$0x1] }
  0x38   : > { %12906 = vmatprep.subr.bf16.mxu1 %v13667_v40  ;;  %v473_v60 = vshrl.u32 %v14177_v18, 16  ;;  %v479_v61 = vshll.u32 %v14192_v39, 16  ;;  %v11281_v1 = vcombine.low %v14174_v10, %v14177_v18 }
  0x39   : > { %12859 = vmatpush3.bf16.msra.mxu0 %v13657_v24  ;;  %v419_v12 = vrot.slane %v418_v3, 4  ;;  %v438_v16 = vrot.slane %v436_v4, 4  ;;  %v429_v20 = vrot.slane %v428_v7, 4  ;;  %v447_v24 = vrot.slane %v445_v9, 5  ;;  %v13675_v7 = vld [vmem:[%s19257_s1 + $0x80] sm:$0xff]  }
  0x3a   : > { %12860 = vmatprep.subr.bf16.mxu0 %v13660_v48  ;;  %v475_v5 = vrot.slane %v473_v60, 4  ;;  %v481_v6 = vrot.slane %v479_v61, 5  ;;  %v487_v9 = vshll.u32 %v14196_v42, 16  ;;  %v14258_v61 = vld [vmem:[%s13966_s14 + $0x88] sm:$0xf] }
  0x3b   : > { %12907 = vmatpush3.bf16.msra.mxu1 %v13667_v40  ;;  %v424_v32 = vsel %vm14007_vm2, %v419_v12, %v423_v56  ;;  %v442_v33 = vor.u32 %v441_v17, %v438_v16  ;;  %v460_v40 = vshrl.u32 %v14174_v10, 16  ;;  %v434_v43 = vsel %vm14007_vm2, %v429_v20, %v433_v8  ;;  %v220_v20 = vld [vmem:[%s13966_s14 + $0x78] sm:$0xf] }
  0x3c   : > { %12908 = vmatprep.subr.bf16.mxu1 %v13671_v63  ;;  %12781 = vmatmul.mubr.bf16.gmra.mxu0 %v11254_v11  ;;  %v11255_v59 = vcombine.low %v424_v32, %v434_v43  ;;  %v452_v55 = vor.u32 %v451_v44, %v447_v24  ;;  %v465_v56 = vrot.slane %v463_v45, 5  ;;  %v493_v11 = vshll.u32 %v14202_v49, 16  ;;  %v14247_v45 = vld [vmem:[%s19257_s1 + $0x138] sm:$0xff]  }
  0x3d   : > { %12829 = vmatmul.mubr.bf16.gmra.mxu1 %v11278_v30  ;;  %v457_v30 = vrot.slane %v455_v28, 5  ;;  %12861 = vmatpush3.bf16.msra.mxu0 %v13660_v48  ;;  %v443_v35 = vrot.slane %v442_v33, 4  ;;  %v462_v46 = vrot.slane %v460_v40, 4  ;;  %v13676_v48 = vld [vmem:[%s19257_s1 + $0xc8] sm:$0xff]   ;;  %v497_v10 = vshrl.u32 %v14202_v49, 16 }
  0x3e   : > { %12832 = vmatprep.mubr.bf16.mxu1 %v11279_v62  ;;  %12862 = vmatprep.subr.bf16.mxu0 %v13665_v19  ;;  %v471_v62 = vrot.slane %v469_v50, 5  ;;  %v453_v3 = vrot.slane %v452_v55, 4  ;;  %v489_v28 = vrot.slane %v487_v9, 5  ;;  %v495_v32 = vrot.slane %v493_v11, 5  ;;  %v14235_v40 = vld [vmem:[%s13966_s14 + $0x80] sm:$0x1] }
  0x3f   : > { %12909 = vmatpush3.bf16.msra.mxu1 %v13671_v63  ;;  %12784 = vmatprep.mubr.bf16.mxu0 %v11255_v59  ;;  %v448_v22 = vsel %vm14007_vm2, %v443_v35, %v447_v24  ;;  %v484_v63 = vshrl.u32 %v14196_v42, 16  ;;  %v466_v4 = vor.u32 %v465_v56, %v462_v46  ;;  %v14232_v24 = vld [vmem:[%s13966_s14 + $0x7c] sm:$0xf]  ;;  %v499_v33 = vrot.slane %v497_v10, 4  ;;  %v14250_v55 = vld [vmem:[%s13966_s14 + $0x84] sm:$0xf] }
  0x40   : > { %12910 = vmatprep.subr.bf16.mxu1 %v13672_v29  ;;  %v458_v12 = vsel %vm14007_vm2, %v453_v3, %v457_v30  ;;  %v476_v17 = vor.u32 %v475_v5, %v471_v62  ;;  %v508_v46 = vshrl.u32 %v220_v20, 16  ;;  %v511_v50 = vshll.u32 %v220_v20, 16 }
  0x41   : > { %12863 = vmatpush3.bf16.msra.mxu0 %v13665_v19  ;;  %v486_v8 = vrot.slane %v484_v63, 4  ;;  %v467_v16 = vrot.slane %v466_v4, 4  ;;  %v503_v19 = vshll.u32 %v14206_v53, 16  ;;  %v11256_v25 = vcombine.low %v448_v22, %v458_v12  ;;  %v14261_v22 = vld [vmem:[%s13966_s14 + $0x8c] sm:$0x1] }
  0x42   : > { %12864 = vmatprep.subr.bf16.mxu0 %v13670_v54  ;;  %v477_v44 = vrot.slane %v476_v17, 4  ;;  %v500_v35 = vor.u32 %v499_v33, %v495_v32  ;;  %v517_v60 = vshll.u32 %v14232_v24, 16  ;;  %v510_v3 = vrot.slane %v508_v46, 4  ;;  %v14276_v33 = vld [vmem:[%s13966_s14 + $0x94] sm:$0xf] }
  0x43   : > { %12911 = vmatpush3.bf16.msra.mxu1 %v13672_v29  ;;  %v13677_v29 = vld [vmem:[%s19257_s1 + $0xc0] sm:$0xff]   ;;  %v472_v43 = vsel %vm14007_vm2, %v467_v16, %v471_v62  ;;  %v505_v30 = vrot.slane %v503_v19, 5  ;;  %v490_v59 = vor.u32 %v489_v28, %v486_v8  ;;  %v513_v4 = vrot.slane %v511_v50, 5  ;;  %v224_v19 = vld [vmem:[%s13966_s14 + $0x90] sm:$0xf] }
  0x44   : > { %12912 = vmatprep.subr.bf16.mxu1 %v13676_v48  ;;  %12785 = vmatmul.mubr.bf16.gmra.mxu0 %v11256_v25  ;;  %v482_v56 = vsel %vm14007_vm2, %v477_v44, %v481_v6  ;;  %v501_v63 = vrot.slane %v500_v35, 4  ;;  %v519_v5 = vrot.slane %v517_v60, 5  ;;  %v532_v10 = vshrl.u32 %v14250_v55, 16 }
  0x45   : > { %12833 = vmatmul.mubr.bf16.gmra.mxu1 %v11280_v34  ;;  %v11282_v34 = vcombine.low %v14196_v42, %v14202_v49  ;;  %12865 = vmatpush3.bf16.msra.mxu0 %v13670_v54  ;;  %v521_v42 = vshrl.u32 %v14232_v24, 16  ;;  %v527_v54 = vshll.u32 %v14235_v40, 16  ;;  %v11257_v62 = vcombine.low %v472_v43, %v482_v56  ;;  %v14284_v56 = vld [vmem:[%s13966_s14 + $0x9c] sm:$0xf] }
  0x46   : > { %12836 = vmatprep.mubr.bf16.mxu1 %v11281_v1  ;;  %12866 = vmatprep.subr.bf16.mxu0 %v13675_v7  ;;  %v491_v1 = vrot.slane %v490_v59, 4  ;;  %v506_v11 = vsel %vm14007_vm2, %v501_v63, %v505_v30  ;;  %v514_v16 = vor.u32 %v513_v4, %v510_v3  ;;  %v534_v25 = vrot.slane %v532_v10, 4 }
  0x47   : > { %12913 = vmatpush3.bf16.msra.mxu1 %v13676_v48  ;;  %v523_v6 = vrot.slane %v521_v42, 4  ;;  %v529_v8 = vrot.slane %v527_v54, 5  ;;  %12788 = vmatprep.mubr.bf16.mxu0 %v11257_v62  ;;  %v11283_v48 = vcombine.low %v220_v20, %v14232_v24  ;;  %v541_v28 = vshll.u32 %v14258_v61, 16 }
  0x48   : > { %12914 = vmatprep.subr.bf16.mxu1 %v13677_v29  ;;  %v496_v9 = vsel %vm14007_vm2, %v491_v1, %v495_v32  ;;  %v545_v32 = vshrl.u32 %v14258_v61, 16  ;;  %v551_v20 = vshll.u32 %v14261_v22, 16  ;;  %v515_v43 = vrot.slane %v514_v16, 4  ;;  %v14291_v1 = vld [vmem:[%s13966_s14 + $0xa0] sm:$0xf] }
  0x49   : > { %12867 = vmatpush3.bf16.msra.mxu0 %v13675_v7  ;;  %v11258_v12 = vcombine.low %v496_v9, %v506_v11  ;;  %v524_v17 = vor.u32 %v523_v6, %v519_v5  ;;  %v535_v7 = vshll.u32 %v14250_v55, 16  ;;  %v11284_v59 = vcombine.low %v14250_v55, %v14258_v61 }
  0x4a   : > { %12948 = vmatprep.subr.bf16.mxu0 %v14247_v45  ;;  %v547_v35 = vrot.slane %v545_v32, 4  ;;  %v553_v46 = vrot.slane %v551_v20, 5  ;;  %v556_v50 = vshrl.u32 %v224_v19, 16  ;;  %v520_v60 = vsel %vm14007_vm2, %v515_v43, %v519_v5  ;;  %v14297_v5 = vld [vmem:[%s13966_s14 + $0xa4] sm:$0x1] }
  0x4b   : > { %12915 = vmatpush3.bf16.msra.mxu1 %v13677_v29  ;;  %v525_v44 = vrot.slane %v524_v17, 4  ;;  %v537_v30 = vrot.slane %v535_v7, 5  ;;  %v14281_v29 = vld [vmem:[%s13966_s14 + $0x98] sm:$0x1]  ;;  %v559_v62 = vshll.u32 %v224_v19, 16  ;;  %v565_v4 = vshll.u32 %v14276_v33, 16 }
  0x4c   : > { %12789 = vmatmul.mubr.bf16.gmra.mxu0 %v11258_v12  ;;  %v558_v3 = vrot.slane %v556_v50, 4  ;;  %v569_v11 = vshrl.u32 %v14276_v33, 16  ;;  %v11285_v12 = vcombine.low %v224_v19, %v14276_v33  ;;  %v580_v16 = vshrl.u32 %v14284_v56, 16  ;;  %v228_v32 = vld [vmem:[%s13966_s14 + $0xa8] sm:$0xf] }
  0x4d   : > { %12837 = vmatmul.mubr.bf16.gmra.mxu1 %v11282_v34  ;;  %v543_v34 = vrot.slane %v541_v28, 5  ;;  %v530_v42 = vsel %vm14007_vm2, %v525_v44, %v529_v8  ;;  %v538_v54 = vor.u32 %v537_v30, %v534_v25  ;;  %v561_v9 = vrot.slane %v559_v62, 5  ;;  %v14309_v19 = vld [vmem:[%s13966_s14 + $0xac] sm:$0xf] }
  0x4e   : > { %12840 = vmatprep.mubr.bf16.mxu1 %v11283_v48  ;;  %v11259_v55 = vcombine.low %v520_v60, %v530_v42  ;;  %v575_v48 = vshll.u32 %v14281_v29, 16  ;;  %v567_v10 = vrot.slane %v565_v4, 5  ;;  %v571_v25 = vrot.slane %v569_v11, 4 }
  0x4f   : > { %v548_v63 = vor.u32 %v547_v35, %v543_v34  ;;  %v539_v6 = vrot.slane %v538_v54, 4  ;;  %v562_v7 = vor.u32 %v561_v9, %v558_v3  ;;  %v582_v43 = vrot.slane %v580_v16, 4  ;;  %v14327_v9 = vld [vmem:[%s13966_s14 + $0xb4] sm:$0xf] }
  0x50   : > { %12792 = vmatprep.mubr.bf16.mxu0 %v11259_v55  ;;  %v577_v28 = vrot.slane %v575_v48, 5  ;;  %v583_v44 = vshll.u32 %v14284_v56, 16  ;;  %v589_v30 = vshll.u32 %v14291_v1, 16  ;;  %v572_v60 = vor.u32 %v571_v25, %v567_v10  ;;  %v14321_v55 = vld [vmem:[%s13966_s14 + $0xb0] sm:$0x1] }
  0x51   : > { %v549_v8 = vrot.slane %v548_v63, 4  ;;  %v544_v17 = vsel %vm14007_vm2, %v539_v6, %v543_v34  ;;  %v14314_v34 = vld [vmem:[%s19257_s1 + $0x178] sm:$0xff]   ;;  %v563_v50 = vrot.slane %v562_v7, 4  ;;  %v599_v54 = vshll.u32 %v14297_v5, 16 }
  0x52   : > { %v591_v42 = vrot.slane %v589_v30, 5  ;;  %v11286_v62 = vcombine.low %v14284_v56, %v14291_v1  ;;  %12996 = vmatprep.subr.bf16.mxu1 %v14314_v34  ;;  %v573_v3 = vrot.slane %v572_v60, 4  ;;  %v604_v6 = vshrl.u32 %v228_v32, 16 }
  0x53   : > { %v554_v20 = vsel %vm14007_vm2, %v549_v8, %v553_v46  ;;  %v585_v46 = vrot.slane %v583_v44, 5  ;;  %v568_v63 = vsel %vm14007_vm2, %v563_v50, %v567_v10  ;;  %v601_v48 = vrot.slane %v599_v54, 5  ;;  %v14334_v10 = vld [vmem:[%s13966_s14 + $0xb8] sm:$0xf] }
  0x54   : > { %v11260_v35 = vcombine.low %v544_v17, %v554_v20  ;;  %v607_v8 = vshll.u32 %v228_v32, 16  ;;  %v613_v56 = vshll.u32 %v14309_v19, 16  ;;  %v606_v17 = vrot.slane %v604_v6, 4 }
  0x55   : > { %12841 = vmatmul.mubr.bf16.gmra.mxu1 %v11284_v59  ;;  %v593_v59 = vshrl.u32 %v14291_v1, 16  ;;  %v586_v11 = vor.u32 %v585_v46, %v582_v43  ;;  %v617_v7 = vshrl.u32 %v14309_v19, 16  ;;  %v623_v60 = vshll.u32 %v14321_v55, 16 }
  0x56   : > { %12844 = vmatprep.mubr.bf16.mxu1 %v11285_v12  ;;  %12793 = vmatmul.mubr.bf16.gmra.mxu0 %v11260_v35  ;;  %v578_v12 = vsel %vm14007_vm2, %v573_v3, %v577_v28  ;;  %v609_v44 = vrot.slane %v607_v8, 5  ;;  %v615_v30 = vrot.slane %v613_v56, 5  ;;  %v14337_v35 = vld [vmem:[%s13966_s14 + $0xbc] sm:$0x1]  ;;  %v1246_v28 = vld [vmem:[%s13966_s14] sm:$0xe] }
  0x57   : > { %v595_v4 = vrot.slane %v593_v59, 4  ;;  %v11261_v25 = vcombine.low %v568_v63, %v578_v12  ;;  %v587_v20 = vrot.slane %v586_v11, 4  ;;  %v619_v50 = vrot.slane %v617_v7, 4  ;;  %v1247_v8 = vld [vmem:[%s13966_s14 + $0xc] sm:$0xe] }
  0x58   : > { %v11287_v59 = vcombine.low %v228_v32, %v14309_v19  ;;  %v610_v54 = vor.u32 %v609_v44, %v606_v17  ;;  %v628_v63 = vshrl.u32 %v14327_v9, 16  ;;  %v631_v3 = vshll.u32 %v14327_v9, 16 }
  0x59   : > { %v596_v16 = vor.u32 %v595_v4, %v591_v42  ;;  %12796 = vmatprep.mubr.bf16.mxu0 %v11261_v25  ;;  %v592_v46 = vsel %vm14007_vm2, %v587_v20, %v591_v42  ;;  %v620_v6 = vor.u32 %v619_v50, %v615_v30  ;;  %v625_v11 = vrot.slane %v623_v60, 5  ;;  %v1248_v20 = vld [vmem:[%s13966_s14 + $0x18] sm:$0xe] }
  0x5a   : > { %v637_v32 = vshll.u32 %v14334_v10, 16  ;;  %v611_v12 = vrot.slane %v610_v54, 4  ;;  %v630_v42 = vrot.slane %v628_v63, 4  ;;  %v641_v7 = vshrl.u32 %v14334_v10, 16 }
  0x5b   : > { %v597_v43 = vrot.slane %v596_v16, 4  ;;  %v621_v16 = vrot.slane %v620_v6, 4  ;;  %v647_v25 = vshll.u32 %v14337_v35, 16  ;;  %v19288_v50 = vmov 0 }
  0x5c   : > { %v639_v17 = vrot.slane %v637_v32, 5  ;;  %v19289_v50 = vsel %vm14359_vm5, 4294967295, %v19288_v50  ;;  %v11297_v60 = vrot.slane %v1246_v28, 9  ;;  %v643_v54 = vrot.slane %v641_v7, 4 }
  0x5d   : > { %12845 = vmatmul.mubr.bf16.gmra.mxu1 %v11286_v62  ;;  %v602_v4 = vsel %vm14007_vm2, %v597_v43, %v601_v48  ;;  %v633_v62 = vrot.slane %v631_v3, 5  ;;  %v616_v48 = vsel %vm14007_vm2, %v611_v12, %v615_v30  ;;  %v11288_v43 = vcombine.low %v14327_v9, %v14334_v10  ;;  %19290 = vst [vmem:[#allocation4_spill] sm:$0xff] %v19289_v50  ;;  %v13679_v30 = vld [vmem:[%s13966_s14 + $0xc] sm:$0xff]  }
  0x5e   : > { %12848 = vmatprep.mubr.bf16.mxu1 %v11287_v59  ;;  %v11262_v56 = vcombine.low %v592_v46, %v602_v4  ;;  %v1249_v59 = vld [vmem:[%s13966_s14 + $0x24] sm:$0xe]  ;;  %v626_v46 = vsel %vm14007_vm2, %v621_v16, %v625_v11  ;;  %v649_v63 = vrot.slane %v647_v25, 5  ;;  %v1299_v3 = vrot.slane %v13976_v13, 5 }
  0x5f   : > { %v634_v44 = vor.u32 %v633_v62, %v630_v42  ;;  %v11263_v4 = vcombine.low %v616_v48, %v626_v46  ;;  %v11298_v9 = vrot.slane %v1247_v8, 9  ;;  %v1306_v32 = vrot.slane %v13993_v26, 5  ;;  %v1250_v62 = vld [vmem:[%s13966_s14 + $0x30] sm:$0xe] }
  0x60   : > { %12797 = vmatmul.mubr.bf16.gmra.mxu0 %v11262_v56  ;;  %v644_v56 = vor.u32 %v643_v54, %v639_v17  ;;  %v1300_v28 = vsel %vm14359_vm5, %v11297_v60, %v1299_v3  ;;  %v1301_v12 = vrot.slane %v1299_v3, 4  ;;  %v11299_v42 = vrot.slane %v1248_v20, 9  ;;  %v1251_v20 = vld [vmem:[%s13966_s14 + $0x3c] sm:$0xe] }
  0x61   : > { %v635_v6 = vrot.slane %v634_v44, 4  ;;  %12800 = vmatprep.mubr.bf16.mxu0 %v11263_v4  ;;  %v14375_v13 = vsel %vm14359_vm5, %v11298_v9, %v1306_v32  ;;  %v1308_v8 = vrot.slane %v1306_v32, 4  ;;  %v1313_v26 = vrot.slane %v14017_v47, 5  ;;  %v13680_v47 = vld [vmem:[%s13966_s14 + $0x18] sm:$0xff]  }
  0x62   : > { %v645_v16 = vrot.slane %v644_v56, 4  ;;  %v1303_v7 = vsel %vm14359_vm5, %v1301_v12, %v1302_v21  ;;  %v1316_v25 = vrot.slane %v14031_v57, 5  ;;  %v11301_v54 = vrot.slane %v1250_v62, 9  ;;  %v13694_v12 = vld [vmem:[%s19257_s1 + $0x170] sm:$0xff]  }
  0x63   : > { %v640_v11 = vsel %vm14007_vm2, %v635_v6, %v639_v17  ;;  %v11300_v17 = vrot.slane %v1249_v59, 9  ;;  %v11329_v48 = vcombine.low %v1300_v28, %v1303_v7  ;;  %v14389_v44 = vsel %vm14359_vm5, %v1308_v8, %v1309_v41  ;;  %v1253_v6 = vld [vmem:[%s13966_s14 + $0x54] sm:$0xe]  ;;  %v1254_v28 = vld [vmem:[%s13966_s14 + $0x60] sm:$0xe] }
  0x64   : > { %v14394_v14 = vsel %vm14359_vm5, %v11299_v42, %v1313_v26  ;;  %v1315_v21 = vrot.slane %v1313_v26, 4  ;;  %v650_v57 = vsel %vm14007_vm2, %v645_v16, %v649_v63  ;;  %v11330_v60 = vcombine.low %v14375_v13, %v14389_v44  ;;  %v1255_v16 = vld [vmem:[%s13966_s14 + $0x6c] sm:$0xe] }
  0x65   : > { %12849 = vmatmul.mubr.bf16.gmra.mxu1 %v11288_v43  ;;  %v1252_v43 = vld [vmem:[%s13966_s14 + $0x48] sm:$0xe]  ;;  %v1323_v41 = vrot.slane %v14055_v15, 5  ;;  %v11264_v59 = vcombine.low %v640_v11, %v650_v57  ;;  %v1327_v3 = vrot.slane %v14068_v31, 5  ;;  %v14412_v63 = vsel %vm14359_vm5, %v11300_v17, %v1320_v27  ;;  %v13681_v17 = vld [vmem:[%s19257_s1 + $0x130] sm:$0xff]  }
  0x66   : > { %12916 = vmatprep.mubr.bf16.mxu1 %v13679_v30  ;;  %v14405_v46 = vsel %vm14359_vm5, %v1315_v21, %v1316_v25  ;;  %v1322_v4 = vrot.slane %v1320_v27, 4  ;;  %v1330_v15 = vrot.slane %v14077_v38, 5  ;;  %v11302_v31 = vrot.slane %v1251_v20, 9  ;;  %v13683_v20 = vld [vmem:[%s13966_s14 + $0x30] sm:$0xff]  }
  0x67   : > { %v11331_v30 = vcombine.low %v14394_v14, %v14405_v46  ;;  %v14419_v9 = vsel %vm14359_vm5, %v11301_v54, %v1327_v3  ;;  %v1329_v32 = vrot.slane %v1327_v3, 4  ;;  %v1334_v56 = vrot.slane %v14101_v51, 5  ;;  %v13685_v46 = vld [vmem:[%s13966_s14 + $0x3c] sm:$0xff]  }
  0x68   : > { %12801 = vmatmul.mubr.bf16.gmra.mxu0 %v11264_v59  ;;  %v14428_v38 = vsel %vm14359_vm5, %v1322_v4, %v1323_v41  ;;  %v1337_v42 = vrot.slane %v14106_v2, 5  ;;  %v11303_v11 = vrot.slane %v1252_v43, 9  ;;  %v1341_v13 = vrot.slane %v14123_v23, 5  ;;  %v1256_v59 = vld [vmem:[%s13966_s14 + $0x78] sm:$0xe] }
  0x69   : > { %12868 = vmatprep.mubr.bf16.mxu0 %v11329_v48  ;;  %v11332_v51 = vcombine.low %v14412_v63, %v14428_v38  ;;  %v14436_v8 = vsel %vm14359_vm5, %v1329_v32, %v1330_v15  ;;  %v14440_v26 = vsel %vm14359_vm5, %v11302_v31, %v1334_v56  ;;  %v1336_v62 = vrot.slane %v1334_v56, 4  ;;  %v13699_v31 = vld [vmem:[%s19257_s1 + $0x160] sm:$0xff]  }
  0x6a   : > { %v11333_v2 = vcombine.low %v14419_v9, %v14436_v8  ;;  %v14447_v23 = vsel %vm14359_vm5, %v11303_v11, %v1341_v13  ;;  %v1343_v7 = vrot.slane %v1341_v13, 4  ;;  %v1344_v25 = vrot.slane %v14134_v36, 5  ;;  %v13698_v36 = vld [vmem:[%s19257_s1 + $0x168] sm:$0xff]  }
  0x6b   : > { %v14457_v48 = vsel %vm14359_vm5, %v1336_v62, %v1337_v42  ;;  %v11304_v44 = vrot.slane %v1253_v6, 9  ;;  %v1351_v14 = vrot.slane %v14158_v58, 5  ;;  %v11305_v43 = vrot.slane %v1254_v28, 9 }
  0x6c   : > { %v14468_v21 = vsel %vm14359_vm5, %v1343_v7, %v1344_v25  ;;  %v1355_v57 = vrot.slane %v14177_v18, 5  ;;  %v1358_v41 = vrot.slane %v14192_v39, 5  ;;  %v11306_v4 = vrot.slane %v1255_v16, 9  ;;  %v13703_v16 = vld [vmem:[%s19257_s1 + $0x158] sm:$0xff]   ;;  %v13686_v7 = vld [vmem:[%s13966_s14 + $0x48] sm:$0xff]  }
  0x6d   : > { %12917 = vmatmul.mubr.bf16.vlgmr.msra.gmra.mxu1 %v13680_v47  ;;  %v1348_v47 = vrot.slane %v14155_v52, 5  ;;  %v11335_v52 = vcombine.low %v14447_v23, %v14468_v21  ;;  %v1362_v18 = vrot.slane %v14202_v49, 5  ;;  %v1365_v6 = vrot.slane %v14206_v53, 5  ;;  %v13684_v49 = vld [vmem:[%s19257_s1 + $0x128] sm:$0xff]   ;;  %v11428_v21 = vld [vmem:[%s13966_s14 + $0x18] sm:$0xf] }
  0x6e   : > { %12920 = vmatprep.mubr.bf16.mxu1 %v13682_v0  ;;  %12997 = vmatpush3.bf16.msra.mxu1 %v14314_v34  ;;  %v11334_v34 = vcombine.low %v14440_v26, %v14457_v48  ;;  %v14482_v54 = vsel %vm14359_vm5, %v11305_v43, %v1355_v57  ;;  %v1357_v3 = vrot.slane %v1355_v57, 4  ;;  %v1257_v0 = vld [vmem:[%s13966_s14 + $0x84] sm:$0xe]  ;;  %v11307_v39 = vrot.slane %v1256_v59, 9  ;;  %v13704_v59 = vld [vmem:[%s19257_s1 + $0x150] sm:$0xff]  }
  0x6f   : > { %12998 = vmatprep.subr.bf16.mxu1 %v13694_v12  ;;  %v14475_v58 = vsel %vm14359_vm5, %v11304_v44, %v1348_v47  ;;  %v1350_v27 = vrot.slane %v1348_v47, 4  ;;  %v1369_v32 = vrot.slane %v14232_v24, 5  ;;  %v14507_v24 = vsel %vm14359_vm5, %v11306_v4, %v1362_v18  ;;  %v14635_v48 = vld [vmem:[%s13966_s14 + $0x14] sm:$0x1] }
  0x70   : > { %12869 = vmatmul.mubr.bf16.vlgmr.msra.gmra.mxu0 %v11330_v60  ;;  %v14503_v53 = vsel %vm14359_vm5, %v1357_v3, %v1358_v41  ;;  %v1364_v56 = vrot.slane %v1362_v18, 4  ;;  %v11308_v11 = vrot.slane %v1257_v0, 9  ;;  %v1376_v13 = vrot.slane %v14258_v61, 5  ;;  %v13688_v61 = vld [vmem:[%s13966_s14 + $0x54] sm:$0xff]  }
  0x71   : > { %v14488_v15 = vsel %vm14359_vm5, %v1350_v27, %v1351_v14  ;;  %12949 = vmatpush3.bf16.msra.mxu0 %v14247_v45  ;;  %12872 = vmatprep.mubr.bf16.mxu0 %v11331_v30  ;;  %v11337_v45 = vcombine.low %v14482_v54, %v14503_v53  ;;  %v14513_v30 = vsel %vm14359_vm5, %v11307_v39, %v1369_v32  ;;  %v1371_v28 = vrot.slane %v1369_v32, 4  ;;  %v1258_v14 = vld [vmem:[%s13966_s14 + $0x90] sm:$0xe]  ;;  %v1259_v27 = vld [vmem:[%s13966_s14 + $0x9c] sm:$0xe]  ;;  %v13689_v32 = vld [vmem:[%s13966_s14 + $0x60] sm:$0xff]  }
  0x72   : > { %12999 = vmatpush3.bf16.msra.mxu1 %v13694_v12  ;;  %v11336_v60 = vcombine.low %v14475_v58, %v14488_v15  ;;  %12950 = vmatprep.subr.bf16.mxu0 %v13681_v17  ;;  %v1372_v12 = vrot.slane %v14235_v40, 5  ;;  %v14518_v42 = vsel %vm14359_vm5, %v1364_v56, %v1365_v6  ;;  %v1379_v62 = vrot.slane %v14261_v22, 5  ;;  %v13687_v40 = vld [vmem:[%s19257_s1 + $0x120] sm:$0xff]   ;;  %v1261_v39 = vld [vmem:[%s13966_s14 + $0xb4] sm:$0xe]  ;;  %v14680_v53 = vld [vmem:[%s19257_s1 + $0x1b8] sm:$0xff]  }
  0x73   : > { %13000 = vmatprep.subr.bf16.mxu1 %v13698_v36  ;;  %v11338_v25 = vcombine.low %v14507_v24, %v14518_v42  ;;  %v14540_v44 = vsel %vm14359_vm5, %v11308_v11, %v1376_v13  ;;  %v1378_v47 = vrot.slane %v1376_v13, 4  ;;  %v11309_v43 = vrot.slane %v1258_v14, 9  ;;  %v13691_v11 = vld [vmem:[%s13966_s14 + $0x6c] sm:$0xff]  }
  0x74   : > { %v1386_v57 = vrot.slane %v14281_v29, 5  ;;  %v1390_v41 = vrot.slane %v14291_v1, 5  ;;  %v13690_v29 = vld [vmem:[%s19257_s1 + $0x118] sm:$0xff]   ;;  %v1397_v18 = vrot.slane %v14309_v19, 5  ;;  %v1400_v6 = vrot.slane %v14321_v55, 5 }
  0x75   : > { %12921 = vmatmul.mubr.bf16.gmra.mxu1 %v13683_v20  ;;  %v14533_v20 = vsel %vm14359_vm5, %v1371_v28, %v1372_v12  ;;  %12951 = vmatpush3.bf16.msra.mxu0 %v13681_v17  ;;  %v1393_v17 = vrot.slane %v14297_v5, 5  ;;  %v11312_v56 = vrot.slane %v1261_v39, 9  ;;  %v1404_v28 = vrot.slane %v14334_v10, 5 }
  0x76   : > { %12924 = vmatprep.mubr.bf16.mxu1 %v13685_v46  ;;  %13001 = vmatpush3.bf16.msra.mxu1 %v13698_v36  ;;  %v11339_v22 = vcombine.low %v14513_v30, %v14533_v20  ;;  %v1383_v36 = vrot.slane %v14276_v33, 5  ;;  %v14553_v46 = vsel %vm14359_vm5, %v1378_v47, %v1379_v62  ;;  %v11310_v33 = vrot.slane %v1259_v27, 9  ;;  %v13700_v47 = vld [vmem:[%s19257_s1 + $0x108] sm:$0xff]  }
  0x77   : > { %13002 = vmatprep.subr.bf16.mxu1 %v13699_v31  ;;  %12952 = vmatprep.subr.bf16.mxu0 %v13684_v49  ;;  %v11340_v1 = vcombine.low %v14540_v44, %v14553_v46  ;;  %v1392_v4 = vrot.slane %v1390_v41, 4  ;;  %v1399_v0 = vrot.slane %v1397_v18, 4  ;;  %v1407_v12 = vrot.slane %v14337_v35, 5  ;;  %v13709_v35 = vld [vmem:[%s19257_s1 + $0x140] sm:$0xff]  }
  0x78   : > { %v1385_v3 = vrot.slane %v1383_v36, 4  ;;  %12873 = vmatmul.mubr.bf16.gmra.mxu0 %v11332_v51  ;;  %v14565_v5 = vsel %vm14359_vm5, %v11309_v43, %v1383_v36  ;;  %v14577_v38 = vsel %vm14359_vm5, %v11310_v33, %v1390_v41  ;;  %v13708_v51 = vld [vmem:[%s19257_s1 + $0x148] sm:$0xff]   ;;  %v14610_v62 = vsel %vm14359_vm5, %v11312_v56, %v1404_v28 }
  0x79   : > { %12876 = vmatprep.mubr.bf16.mxu0 %v11333_v2  ;;  %12953 = vmatpush3.bf16.msra.mxu0 %v13684_v49  ;;  %v14583_v9 = vsel %vm14359_vm5, %v1392_v4, %v1393_v17  ;;  %v1260_v2 = vld [vmem:[%s13966_s14 + $0xa8] sm:$0xe]  ;;  %v14602_v55 = vsel %vm14359_vm5, %v1399_v0, %v1400_v6  ;;  %v1406_v10 = vrot.slane %v1404_v28, 4  ;;  %v2186_v23 = vshll.u32 %v14635_v48, 16  ;;  %v14643_v17 = vld [vmem:[%s13966_s14 + $0x20] sm:$0x1] }
  0x7a   : > { %13003 = vmatpush3.bf16.msra.mxu1 %v13699_v31  ;;  %v14573_v63 = vsel %vm14359_vm5, %v1385_v3, %v1386_v57  ;;  %12954 = vmatprep.subr.bf16.mxu0 %v13687_v40  ;;  %v11342_v8 = vcombine.low %v14577_v38, %v14583_v9  ;;  %v13695_v31 = vld [vmem:[%s19257_s1 + $0x110] sm:$0xff]   ;;  %v11311_v49 = vrot.slane %v1260_v2, 9  ;;  %v13692_v3 = vld [vmem:[%s13966_s14 + $0x78] sm:$0xff]   ;;  %v2194_v4 = vshll.u32 %v11428_v21, 16  ;;  %v13696_v2 = vld [vmem:[%s13966_s14 + $0x84] sm:$0xff]  }
  0x7b   : > { %13004 = vmatprep.subr.bf16.mxu1 %v13703_v16  ;;  %v11341_v19 = vcombine.low %v14565_v5, %v14573_v63  ;;  %v2210_v39 = vshll.u32 %v14643_v17, 16 }
  0x7c   : > { %v14606_v13 = vsel %vm14359_vm5, %v11311_v49, %v1397_v18  ;;  %v13705_v49 = vld [vmem:[%s19257_s1 + $0x100] sm:$0xff]   ;;  %v2196_v28 = vrot.slane %v2194_v4, 5 }
  0x7d   : > { %12925 = vmatmul.mubr.bf16.gmra.mxu1 %v13686_v7  ;;  %12955 = vmatpush3.bf16.msra.mxu0 %v13687_v40  ;;  %v14622_v7 = vsel %vm14359_vm5, %v1406_v10, %v1407_v12  ;;  %v11425_v40 = vld [vmem:[%s13966_s14 + $0xc] sm:$0xf] }
  0x7e   : > { %12928 = vmatprep.mubr.bf16.mxu1 %v13688_v61  ;;  %13005 = vmatpush3.bf16.msra.mxu1 %v13703_v16  ;;  %v11343_v16 = vcombine.low %v14606_v13, %v14602_v55  ;;  %v11426_v61 = vld [vmem:[%s13966_s14 + $0x10] sm:$0xf]  ;;  %v11344_v26 = vcombine.low %v14610_v62, %v14622_v7  ;;  %v2170_v14 = vshll.u32 %v11425_v40, 16  ;;  %v11513_v12 = vld [vmem:[%s13966_s14 + $0xc] sm:$0xe] }
  0x7f   : > { %13006 = vmatprep.subr.bf16.mxu1 %v13704_v59  ;;  %12956 = vmatprep.subr.bf16.mxu0 %v13690_v29  ;;  %v2176_v36 = vshll.u32 %v11426_v61, 16  ;;  %v2180_v43 = vshrl.u32 %v11426_v61, 16  ;;  %v11446_v13 = vld [vmem:[%s13966_s14 + $0x60] sm:$0xf] }
  0x80   : > { %12877 = vmatmul.mubr.bf16.gmra.mxu0 %v11334_v34  ;;  %v2167_v34 = vshrl.u32 %v11425_v40, 16  ;;  %v2172_v27 = vrot.slane %v2170_v14, 5  ;;  %v11529_v14 = vrot.slane %v11513_v12, 9 }
  0x81   : > { %12880 = vmatprep.mubr.bf16.mxu0 %v11335_v52  ;;  %12957 = vmatpush3.bf16.msra.mxu0 %v13690_v29  ;;  %v14640_v52 = vld [vmem:[%s13966_s14 + $0x1c] sm:$0xf]  ;;  %v2178_v41 = vrot.slane %v2176_v36, 5  ;;  %v2182_v33 = vrot.slane %v2180_v43, 4  ;;  %v2188_v29 = vrot.slane %v2186_v23, 5 }
  0x82   : > { %13007 = vmatpush3.bf16.msra.mxu1 %v13704_v59  ;;  %12958 = vmatprep.subr.bf16.mxu0 %v13695_v31  ;;  %v2169_v57 = vrot.slane %v2167_v34, 4  ;;  %v2191_v59 = vshrl.u32 %v11428_v21, 16  ;;  %v2200_v18 = vshll.u32 %v14640_v52, 16  ;;  %v2212_v34 = vrot.slane %v2210_v39, 5  ;;  %v11514_v36 = vld [vmem:[%s13966_s14 + $0x18] sm:$0xe] }
  0x83   : > { %13008 = vmatprep.subr.bf16.mxu1 %v13708_v51  ;;  %v2183_v56 = vor.u32 %v2182_v33, %v2178_v41  ;;  %v11530_v15 = vrot.slane %v11514_v36, 9  ;;  %v2948_v33 = vrot.slane %v14643_v17, 5 }
  0x84   : > { %v2173_v0 = vor.u32 %v2172_v27, %v2169_v57  ;;  %v2193_v6 = vrot.slane %v2191_v59, 4  ;;  %v2941_v57 = vrot.slane %v14635_v48, 5  ;;  %v14688_v27 = vld [vmem:[%s13966_s14 + $0x28] sm:$0xf] }
  0x85   : > { %12929 = vmatmul.mubr.bf16.gmra.mxu1 %v13689_v32  ;;  %12959 = vmatpush3.bf16.msra.mxu0 %v13695_v31  ;;  %v14653_v32 = vld [vmem:[%s19257_s1 + $0x1f8] sm:$0xff]   ;;  %v2202_v31 = vrot.slane %v2200_v18, 5  ;;  %v2184_v43 = vrot.slane %v2183_v56, 4  ;;  %v2224_v17 = vshll.u32 %v14688_v27, 16  ;;  %v2228_v39 = vshrl.u32 %v14688_v27, 16 }
  0x86   : > { %12932 = vmatprep.mubr.bf16.mxu1 %v13691_v11  ;;  %13009 = vmatpush3.bf16.msra.mxu1 %v13708_v51  ;;  %v2204_v51 = vshrl.u32 %v14640_v52, 16  ;;  %v2938_v11 = vrot.slane %v11426_v61, 5  ;;  %v2174_v10 = vrot.slane %v2173_v0, 4  ;;  %v2197_v23 = vor.u32 %v2196_v28, %v2193_v6  ;;  %v11434_v0 = vld [vmem:[%s13966_s14 + $0x30] sm:$0xf] }
  0x87   : > { %13010 = vmatprep.subr.bf16.mxu1 %v13709_v35  ;;  %12960 = vmatprep.subr.bf16.mxu0 %v13700_v47  ;;  %v2189_v48 = vsel %vm14007_vm2, %v2184_v43, %v2188_v29  ;;  %v14696_v29 = vld [vmem:[%s13966_s14 + $0x2c] sm:$0x1]  ;;  %v11435_v56 = vld [vmem:[%s13966_s14 + $0x34] sm:$0xf]  ;;  %v2226_v36 = vrot.slane %v2224_v17, 5  ;;  %v2230_v43 = vrot.slane %v2228_v39, 4 }
  0x88   : > { %v2206_v40 = vrot.slane %v2204_v51, 4  ;;  %12881 = vmatmul.mubr.bf16.gmra.mxu0 %v11336_v60  ;;  %v2940_v21 = vrot.slane %v2938_v11, 4  ;;  %v14672_v58 = vsel %vm14359_vm5, %v11529_v14, %v2938_v11  ;;  %v11431_v60 = vld [vmem:[%s13966_s14 + $0x24] sm:$0xf]  ;;  %v2198_v54 = vrot.slane %v2197_v23, 4  ;;  %v13697_v28 = vld [vmem:[%s13966_s14 + $0x90] sm:$0xff]  }
  0x89   : > { %12884 = vmatprep.mubr.bf16.mxu0 %v11337_v45  ;;  %12961 = vmatpush3.bf16.msra.mxu0 %v13700_v47  ;;  %v2945_v47 = vrot.slane %v14640_v52, 5  ;;  %v2218_v51 = vshll.u32 %v11431_v60, 16  ;;  %v2234_v11 = vshll.u32 %v14696_v29, 16  ;;  %v11515_v23 = vld [vmem:[%s13966_s14 + $0x24] sm:$0xe]  ;;  %v2952_v20 = vrot.slane %v14688_v27, 5 }
  0x8a   : > { %13011 = vmatpush3.bf16.msra.mxu1 %v13709_v35  ;;  %v2179_v35 = vsel %vm14007_vm2, %v2174_v10, %v2178_v41  ;;  %v2207_v61 = vor.u32 %v2206_v40, %v2202_v31  ;;  %12962 = vmatprep.subr.bf16.mxu0 %v13705_v49  ;;  %v14684_v45 = vsel %vm14359_vm5, %v2940_v21, %v2941_v57  ;;  %v11436_v10 = vld [vmem:[%s13966_s14 + $0x38] sm:$0x1]  ;;  %v13701_v40 = vld [vmem:[%s13966_s14 + $0x9c] sm:$0xff]   ;;  %v2239_v57 = vshrl.u32 %v11434_v0, 16 }
  0x8b   : > { %13092 = vmatprep.subr.bf16.mxu1 %v14653_v32  ;;  %v14690_v41 = vcombine.low %v2179_v35, %v2189_v48  ;;  %v2203_v4 = vsel %vm14007_vm2, %v2198_v54, %v2202_v31  ;;  %v14702_v52 = vsel %vm14359_vm5, %v11530_v15, %v2945_v47  ;;  %v2947_v18 = vrot.slane %v2945_v47, 4  ;;  %v11516_v47 = vld [vmem:[%s13966_s14 + $0x30] sm:$0xe] }
  0x8c   : > { %v2208_v59 = vrot.slane %v2207_v61, 4  ;;  %v2220_v14 = vrot.slane %v2218_v51, 5  ;;  %v2236_v21 = vrot.slane %v2234_v11, 5  ;;  %v2242_v35 = vshll.u32 %v11434_v0, 16 }
  0x8d   : > { %12933 = vmatmul.mubr.bf16.gmra.mxu1 %v13692_v3  ;;  %v11561_v3 = vcombine.low %v14672_v58, %v14684_v45  ;;  %12963 = vmatpush3.bf16.msra.mxu0 %v13705_v49  ;;  %v14716_v12 = vsel %vm14359_vm5, %v2947_v18, %v2948_v33  ;;  %v2248_v61 = vshll.u32 %v11435_v56, 16  ;;  %v2252_v48 = vshrl.u32 %v11435_v56, 16 }
  0x8e   : > { %12936 = vmatprep.mubr.bf16.mxu1 %v13696_v2  ;;  %v2215_v2 = vshrl.u32 %v11431_v60, 16  ;;  %v2213_v6 = vsel %vm14007_vm2, %v2208_v59, %v2212_v34  ;;  %13044 = vmatprep.subr.bf16.mxu0 %v14680_v53  ;;  %v11562_v34 = vcombine.low %v14702_v52, %v14716_v12  ;;  %v2231_v60 = vor.u32 %v2230_v43, %v2226_v36  ;;  %v11449_v52 = vld [vmem:[%s13966_s14 + $0x6c] sm:$0xf] }
  0x8f   : > { %v14711_v31 = vcombine.low %v2203_v4, %v2213_v6  ;;  %v2258_v54 = vshll.u32 %v11436_v10, 16  ;;  %v2241_v59 = vrot.slane %v2239_v57, 4  ;;  %v2244_v33 = vrot.slane %v2242_v35, 5  ;;  %v14752_v57 = vld [vmem:[%s13966_s14 + $0x44] sm:$0x1] }
  0x90   : > { %v2217_v49 = vrot.slane %v2215_v2, 4  ;;  %12885 = vmatmul.mubr.bf16.gmra.mxu0 %v11338_v25  ;;  %v2250_v4 = vrot.slane %v2248_v61, 5  ;;  %v11531_v24 = vrot.slane %v11515_v23, 9  ;;  %v2232_v25 = vrot.slane %v2231_v60, 4 }
  0x91   : > { %12888 = vmatprep.mubr.bf16.mxu0 %v11339_v22  ;;  %v2254_v18 = vrot.slane %v2252_v48, 4  ;;  %v2260_v2 = vrot.slane %v2258_v54, 5  ;;  %v2245_v30 = vor.u32 %v2244_v33, %v2241_v59  ;;  %v2955_v22 = vrot.slane %v14696_v29, 5  ;;  %v11440_v48 = vld [vmem:[%s13966_s14 + $0x48] sm:$0xf] }
  0x92   : > { %v2221_v15 = vor.u32 %v2220_v14, %v2217_v49  ;;  %v11532_v0 = vrot.slane %v11516_v47, 9  ;;  %v2237_v51 = vsel %vm14007_vm2, %v2232_v25, %v2236_v21  ;;  %v2959_v39 = vrot.slane %v11435_v56, 5  ;;  %v13702_v49 = vld [vmem:[%s13966_s14 + $0xa8] sm:$0xff]   ;;  %v11438_v14 = vld [vmem:[%s13966_s14 + $0x40] sm:$0xf] }
  0x93   : > { %v2255_v17 = vor.u32 %v2254_v18, %v2250_v4  ;;  %v14743_v27 = vsel %vm14359_vm5, %v11531_v24, %v2952_v20  ;;  %v2954_v29 = vrot.slane %v2952_v20, 4  ;;  %v2962_v21 = vrot.slane %v11436_v10, 5  ;;  %v14765_v54 = vld [vmem:[%s13966_s14 + $0x4c] sm:$0xf]  ;;  %v14783_v59 = vld [vmem:[%s13966_s14 + $0x50] sm:$0x1] }
  0x94   : > { %v2222_v42 = vrot.slane %v2221_v15, 4  ;;  %v14749_v23 = vsel %vm14359_vm5, %v11532_v0, %v2959_v39  ;;  %v2961_v56 = vrot.slane %v2959_v39, 4  ;;  %v2272_v10 = vshll.u32 %v11438_v14, 16  ;;  %v11517_v20 = vld [vmem:[%s13966_s14 + $0x3c] sm:$0xe] }
  0x95   : > { %12937 = vmatmul.mubr.bf16.gmra.mxu1 %v13697_v28  ;;  %v11437_v28 = vld [vmem:[%s13966_s14 + $0x3c] sm:$0xf]  ;;  %v2256_v43 = vrot.slane %v2255_v17, 4  ;;  %v14761_v61 = vsel %vm14359_vm5, %v2954_v29, %v2955_v22  ;;  %v2282_v24 = vshll.u32 %v14752_v57, 16  ;;  %v2290_v18 = vshll.u32 %v11440_v48, 16  ;;  %v13707_v22 = vld [vmem:[%s13966_s14 + $0xc0] sm:$0xff]  }
  0x96   : > { %12940 = vmatprep.mubr.bf16.mxu1 %v13701_v40  ;;  %v2227_v6 = vsel %vm14007_vm2, %v2222_v42, %v2226_v36  ;;  %v2246_v40 = vrot.slane %v2245_v30, 4  ;;  %v13706_v36 = vld [vmem:[%s13966_s14 + $0xb4] sm:$0xff]   ;;  %v2263_v15 = vshrl.u32 %v11437_v28, 16  ;;  %v2266_v60 = vshll.u32 %v11437_v28, 16  ;;  %v11518_v29 = vld [vmem:[%s13966_s14 + $0x48] sm:$0xe] }
  0x97   : > { %v14739_v11 = vcombine.low %v2227_v6, %v2237_v51  ;;  %v2261_v44 = vsel %vm14007_vm2, %v2256_v43, %v2260_v2  ;;  %v11563_v46 = vcombine.low %v14743_v27, %v14761_v61  ;;  %v2274_v33 = vrot.slane %v2272_v10, 5  ;;  %v13718_v27 = vld [vmem:[%s19257_s1 + $0x1e8] sm:$0xff]   ;;  %v13711_v61 = vld [vmem:[%s19257_s1 + $0x1b0] sm:$0xff]  }
  0x98   : > { %12889 = vmatmul.mubr.bf16.gmra.mxu0 %v11340_v1  ;;  %v2251_v35 = vsel %vm14007_vm2, %v2246_v40, %v2250_v4  ;;  %v14776_v1 = vsel %vm14359_vm5, %v2961_v56, %v2962_v21  ;;  %v2265_v63 = vrot.slane %v2263_v15, 4  ;;  %v2276_v4 = vshrl.u32 %v11438_v14, 16 }
  0x99   : > { %12892 = vmatprep.mubr.bf16.mxu0 %v11341_v19  ;;  %v14778_v47 = vcombine.low %v2251_v35, %v2261_v44  ;;  %v11564_v5 = vcombine.low %v14749_v23, %v14776_v1  ;;  %v2268_v19 = vrot.slane %v2266_v60, 5  ;;  %v2287_v42 = vshrl.u32 %v11440_v48, 16  ;;  %v11443_v44 = vld [vmem:[%s13966_s14 + $0x54] sm:$0xf] }
  0x9a   : > { %v2296_v2 = vshll.u32 %v14765_v54, 16  ;;  %v2300_v30 = vshrl.u32 %v14765_v54, 16  ;;  %v2278_v0 = vrot.slane %v2276_v4, 4  ;;  %v2284_v6 = vrot.slane %v2282_v24, 5 }
  0x9b   : > { %v2269_v25 = vor.u32 %v2268_v19, %v2265_v63  ;;  %v2289_v51 = vrot.slane %v2287_v42, 4  ;;  %v2306_v17 = vshll.u32 %v14783_v59, 16  ;;  %v2292_v28 = vrot.slane %v2290_v18, 5  ;;  %v14810_v63 = vld [vmem:[%s13966_s14 + $0x5c] sm:$0x1] }
  0x9c   : > { %v2302_v40 = vrot.slane %v2300_v30, 4  ;;  %v11533_v56 = vrot.slane %v11517_v20, 9  ;;  %v2966_v21 = vrot.slane %v11438_v14, 5  ;;  %v2969_v48 = vrot.slane %v14752_v57, 5 }
  0x9d   : > { %12941 = vmatmul.mubr.bf16.gmra.mxu1 %v13702_v49  ;;  %v2270_v39 = vrot.slane %v2269_v25, 4  ;;  %v2298_v49 = vrot.slane %v2296_v2, 5  ;;  %v2308_v43 = vrot.slane %v2306_v17, 5  ;;  %v2293_v15 = vor.u32 %v2292_v28, %v2289_v51  ;;  %v14825_v25 = vld [vmem:[%s13966_s14 + $0x64] sm:$0xf] }
  0x9e   : > { %12944 = vmatprep.mubr.bf16.mxu1 %v13706_v36  ;;  %v2279_v36 = vor.u32 %v2278_v0, %v2274_v33  ;;  %v14804_v14 = vsel %vm14359_vm5, %v11533_v56, %v2966_v21  ;;  %v2968_v38 = vrot.slane %v2966_v21, 4  ;;  %v11534_v9 = vrot.slane %v11518_v29, 9  ;;  %v14849_v17 = vld [vmem:[%s13966_s14 + $0x68] sm:$0x1]  ;;  %v11519_v21 = vld [vmem:[%s13966_s14 + $0x54] sm:$0xe] }
  0x9f   : > { %v2275_v35 = vsel %vm14007_vm2, %v2270_v39, %v2274_v33  ;;  %v2303_v60 = vor.u32 %v2302_v40, %v2298_v49  ;;  %v2294_v19 = vrot.slane %v2293_v15, 4  ;;  %v2973_v33 = vrot.slane %v14765_v54, 5  ;;  %v13716_v40 = vld [vmem:[%s19257_s1 + $0x1f0] sm:$0xff]  }
  0xa0   : > { %12893 = vmatmul.mubr.bf16.gmra.mxu0 %v11342_v8  ;;  %v2280_v10 = vrot.slane %v2279_v36, 4  ;;  %v14807_v8 = vld [vmem:[%s13966_s14 + $0x58] sm:$0xf]  ;;  %v2976_v55 = vrot.slane %v14783_v59, 5  ;;  %v14822_v4 = vsel %vm14359_vm5, %v2968_v38, %v2969_v48  ;;  %v2311_v24 = vshrl.u32 %v11443_v44, 16 }
  0xa1   : > { %12896 = vmatprep.mubr.bf16.mxu0 %v11343_v16  ;;  %v2304_v57 = vrot.slane %v2303_v60, 4  ;;  %v2314_v42 = vshll.u32 %v11443_v44, 16  ;;  %v2299_v59 = vsel %vm14007_vm2, %v2294_v19, %v2298_v49  ;;  %v11565_v45 = vcombine.low %v14804_v14, %v14822_v4  ;;  %v13721_v14 = vld [vmem:[%s19257_s1 + $0x1d8] sm:$0xff]   ;;  %v13713_v4 = vld [vmem:[%s19257_s1 + $0x1a0] sm:$0xff]  }
  0xa2   : > { %v2285_v16 = vsel %vm14007_vm2, %v2280_v10, %v2284_v6  ;;  %v14839_v18 = vsel %vm14359_vm5, %v11534_v9, %v2973_v33  ;;  %v2975_v2 = vrot.slane %v2973_v33, 4  ;;  %v2313_v30 = vrot.slane %v2311_v24, 4 }
  0xa3   : > { %v14827_v54 = vcombine.low %v2275_v35, %v2285_v16  ;;  %v2309_v58 = vsel %vm14007_vm2, %v2304_v57, %v2308_v43  ;;  %v2316_v20 = vrot.slane %v2314_v42, 5  ;;  %v2324_v0 = vshrl.u32 %v14807_v8, 16  ;;  %v11520_v35 = vld [vmem:[%s13966_s14 + $0x60] sm:$0xe] }
  0xa4   : > { %v2330_v6 = vshll.u32 %v14810_v63, 16  ;;  %v14846_v51 = vsel %vm14359_vm5, %v2975_v2, %v2976_v55  ;;  %v2335_v39 = vshrl.u32 %v11446_v13, 16  ;;  %v2338_v28 = vshll.u32 %v11446_v13, 16  ;;  %v14878_v55 = vld [vmem:[%s13966_s14 + $0x70] sm:$0xf] }
  0xa5   : > { %12945 = vmatmul.mubr.bf16.gmra.mxu1 %v13707_v22  ;;  %v2320_v22 = vshll.u32 %v14807_v8, 16  ;;  %v2344_v49 = vshll.u32 %v14825_v25, 16  ;;  %v11566_v29 = vcombine.low %v14839_v18, %v14846_v51  ;;  %v2317_v36 = vor.u32 %v2316_v20, %v2313_v30  ;;  %v14891_v13 = vld [vmem:[%s13966_s14 + $0x74] sm:$0x1] }
  0xa6   : > { %13012 = vmatprep.mubr.bf16.mxu1 %v11561_v3  ;;  %v14835_v3 = vcombine.low %v2299_v59, %v2309_v58  ;;  %v2326_v56 = vrot.slane %v2324_v0, 4  ;;  %v2332_v15 = vrot.slane %v2330_v6, 5  ;;  %v2337_v60 = vrot.slane %v2335_v39, 4 }
  0xa7   : > { %v2322_v43 = vrot.slane %v2320_v22, 5  ;;  %v2340_v48 = vrot.slane %v2338_v28, 5  ;;  %v2346_v44 = vrot.slane %v2344_v49, 5  ;;  %v2318_v62 = vrot.slane %v2317_v36, 4  ;;  %v11452_v22 = vld [vmem:[%s13966_s14 + $0x78] sm:$0xf] }
  0xa8   : > { %12897 = vmatmul.mubr.bf16.gmra.mxu0 %v11344_v26  ;;  %v2348_v26 = vshrl.u32 %v14825_v25, 16  ;;  %v2354_v10 = vshll.u32 %v14849_v17, 16  ;;  %v11535_v38 = vrot.slane %v11519_v21, 9  ;;  %v2980_v9 = vrot.slane %v14807_v8, 5  ;;  %v14937_v21 = vld [vmem:[%s13966_s14 + $0x80] sm:$0x1] }
  0xa9   : > { %12964 = vmatprep.mubr.bf16.mxu0 %v14690_v41  ;;  %v2327_v7 = vor.u32 %v2326_v56, %v2322_v43  ;;  %v2341_v41 = vor.u32 %v2340_v48, %v2337_v60  ;;  %v2983_v19 = vrot.slane %v14810_v63, 5  ;;  %v2323_v12 = vsel %vm14007_vm2, %v2318_v62, %v2322_v43  ;;  %v14924_v43 = vld [vmem:[%s13966_s14 + $0x7c] sm:$0xf] }
  0xaa   : > { %v2350_v57 = vrot.slane %v2348_v26, 4  ;;  %v2356_v33 = vrot.slane %v2354_v10, 5  ;;  %v2982_v8 = vrot.slane %v2980_v9, 4  ;;  %v11536_v63 = vrot.slane %v11520_v35, 9 }
  0xab   : > { %v2987_v42 = vrot.slane %v14825_v25, 5  ;;  %v2990_v59 = vrot.slane %v14849_v17, 5  ;;  %v2359_v20 = vshrl.u32 %v11449_v52, 16  ;;  %v13712_v25 = vld [vmem:[%s19257_s1 + $0x1a8] sm:$0xff]   ;;  %v2362_v49 = vshll.u32 %v11449_v52, 16 }
  0xac   : > { %v2351_v24 = vor.u32 %v2350_v57, %v2346_v44  ;;  %v14903_v30 = vsel %vm14359_vm5, %v2982_v8, %v2983_v19  ;;  %v2372_v36 = vshrl.u32 %v14878_v55, 16  ;;  %v2383_v35 = vshrl.u32 %v11452_v22, 16  ;;  %v13722_v57 = vld [vmem:[%s19257_s1 + $0x1d0] sm:$0xff]  }
  0xad   : > { %13013 = vmatmul.mubr.bf16.vlgmr.msra.gmra.mxu1 %v11562_v34  ;;  %v2328_v34 = vrot.slane %v2327_v7, 4  ;;  %v14914_v17 = vsel %vm14359_vm5, %v11536_v63, %v2987_v42  ;;  %v2989_v39 = vrot.slane %v2987_v42, 4  ;;  %v2361_v28 = vrot.slane %v2359_v20, 4 }
  0xae   : > { %13016 = vmatprep.mubr.bf16.mxu1 %v11563_v46  ;;  %13093 = vmatpush3.bf16.msra.mxu1 %v14653_v32  ;;  %v2342_v46 = vrot.slane %v2341_v41, 4  ;;  %v14888_v32 = vsel %vm14359_vm5, %v11535_v38, %v2980_v9  ;;  %v2352_v0 = vrot.slane %v2351_v24, 4  ;;  %v2364_v1 = vrot.slane %v2362_v49, 5  ;;  %v11522_v38 = vld [vmem:[%s13966_s14 + $0x78] sm:$0xe] }
  0xaf   : > { %13094 = vmatprep.subr.bf16.mxu1 %v13716_v40  ;;  %v2333_v16 = vsel %vm14007_vm2, %v2328_v34, %v2332_v15  ;;  %v11567_v6 = vcombine.low %v14888_v32, %v14903_v30  ;;  %v11521_v15 = vld [vmem:[%s13966_s14 + $0x6c] sm:$0xe]  ;;  %v2374_v48 = vrot.slane %v2372_v36, 4  ;;  %v2385_v62 = vrot.slane %v2383_v35, 4  ;;  %v11455_v34 = vld [vmem:[%s13966_s14 + $0x84] sm:$0xf] }
  0xb0   : > { %v14897_v58 = vcombine.low %v2323_v12, %v2333_v16  ;;  %v2347_v2 = vsel %vm14007_vm2, %v2342_v46, %v2346_v44  ;;  %12965 = vmatmul.mubr.bf16.vlgmr.msra.gmra.mxu0 %v14711_v31  ;;  %v13719_v31 = vld [vmem:[%s19257_s1 + $0x1e0] sm:$0xff]   ;;  %v2357_v56 = vsel %vm14007_vm2, %v2352_v0, %v2356_v33  ;;  %v2386_v7 = vshll.u32 %v11452_v22, 16  ;;  %v14992_v0 = vld [vmem:[%s13966_s14 + $0x8c] sm:$0x1] }
  0xb1   : > { %13045 = vmatpush3.bf16.msra.mxu0 %v14680_v53  ;;  %12968 = vmatprep.mubr.bf16.mxu0 %v14739_v11  ;;  %v14933_v53 = vsel %vm14359_vm5, %v2989_v39, %v2990_v59  ;;  %v2378_v11 = vshll.u32 %v14891_v13, 16  ;;  %v14943_v60 = vcombine.low %v2347_v2, %v2357_v56  ;;  %v2392_v26 = vshll.u32 %v14924_v43, 16 }
  0xb2   : > { %13095 = vmatpush3.bf16.msra.mxu1 %v13716_v40  ;;  %v2368_v40 = vshll.u32 %v14878_v55, 16  ;;  %13046 = vmatprep.subr.bf16.mxu0 %v13711_v61  ;;  %v11568_v23 = vcombine.low %v14914_v17, %v14933_v53  ;;  %v2396_v10 = vshrl.u32 %v14924_v43, 16  ;;  %v2402_v41 = vshll.u32 %v14937_v21, 16 }
  0xb3   : > { %13096 = vmatprep.subr.bf16.mxu1 %v13718_v27  ;;  %v2380_v44 = vrot.slane %v2378_v11, 5  ;;  %v2388_v19 = vrot.slane %v2386_v7, 5  ;;  %v11537_v52 = vrot.slane %v11521_v15, 9  ;;  %v2994_v12 = vrot.slane %v14878_v55, 5 }
  0xb4   : > { %v2404_v46 = vrot.slane %v2402_v41, 5  ;;  %v2997_v59 = vrot.slane %v14891_v13, 5  ;;  %v3001_v22 = vrot.slane %v14924_v43, 5  ;;  %v3004_v13 = vrot.slane %v14937_v21, 5  ;;  %v13717_v21 = vld [vmem:[%s19257_s1 + $0x190] sm:$0xff]  }
  0xb5   : > { %13017 = vmatmul.mubr.bf16.gmra.mxu1 %v11564_v5  ;;  %v2370_v5 = vrot.slane %v2368_v40, 5  ;;  %13047 = vmatpush3.bf16.msra.mxu0 %v13711_v61  ;;  %v2398_v61 = vrot.slane %v2396_v10, 4  ;;  %v2389_v63 = vor.u32 %v2388_v19, %v2385_v62  ;;  %v14965_v16 = vsel %vm14359_vm5, %v11537_v52, %v2994_v12  ;;  %v13724_v40 = vld [vmem:[%s19257_s1 + $0x1c8] sm:$0xff]  }
  0xb6   : > { %13020 = vmatprep.mubr.bf16.mxu1 %v11565_v45  ;;  %13097 = vmatpush3.bf16.msra.mxu1 %v13718_v27  ;;  %v2365_v45 = vor.u32 %v2364_v1, %v2361_v28  ;;  %v2394_v27 = vrot.slane %v2392_v26, 5  ;;  %v2996_v55 = vrot.slane %v2994_v12, 4  ;;  %v2407_v39 = vshrl.u32 %v11455_v34, 16  ;;  %v13725_v26 = vld [vmem:[%s19257_s1 + $0x1c0] sm:$0xff]  }
  0xb7   : > { %13098 = vmatprep.subr.bf16.mxu1 %v13719_v31  ;;  %13048 = vmatprep.subr.bf16.mxu0 %v13712_v25  ;;  %v2375_v9 = vor.u32 %v2374_v48, %v2370_v5  ;;  %v2390_v20 = vrot.slane %v2389_v63, 4  ;;  %v3003_v30 = vrot.slane %v3001_v22, 4  ;;  %v2410_v56 = vshll.u32 %v11455_v34, 16  ;;  %v15023_v48 = vld [vmem:[%s13966_s14 + $0x98] sm:$0x1] }
  0xb8   : > { %v2366_v33 = vrot.slane %v2365_v45, 4  ;;  %12969 = vmatmul.mubr.bf16.gmra.mxu0 %v14778_v47  ;;  %v2399_v42 = vor.u32 %v2398_v61, %v2394_v27  ;;  %v11538_v47 = vrot.slane %v11522_v38, 9  ;;  %v2409_v43 = vrot.slane %v2407_v39, 4  ;;  %v11524_v45 = vld [vmem:[%s13966_s14 + $0x90] sm:$0xe] }
  0xb9   : > { %v2376_v8 = vrot.slane %v2375_v9, 4  ;;  %12972 = vmatprep.mubr.bf16.mxu0 %v14827_v54  ;;  %13049 = vmatpush3.bf16.msra.mxu0 %v13712_v25  ;;  %v13714_v54 = vld [vmem:[%s19257_s1 + $0x198] sm:$0xff]   ;;  %v14982_v25 = vld [vmem:[%s13966_s14 + $0x88] sm:$0xf]  ;;  %v2395_v28 = vsel %vm14007_vm2, %v2390_v20, %v2394_v27  ;;  %v15018_v15 = vsel %vm14359_vm5, %v3003_v30, %v3004_v13  ;;  %v2412_v7 = vrot.slane %v2410_v56, 5 }
  0xba   : > { %13099 = vmatpush3.bf16.msra.mxu1 %v13719_v31  ;;  %v2371_v24 = vsel %vm14007_vm2, %v2366_v33, %v2370_v5  ;;  %13050 = vmatprep.subr.bf16.mxu0 %v13713_v4  ;;  %v2400_v51 = vrot.slane %v2399_v42, 4  ;;  %v11458_v31 = vld [vmem:[%s13966_s14 + $0x90] sm:$0xf]  ;;  %v15000_v32 = vsel %vm14359_vm5, %v11538_v47, %v3001_v22  ;;  %v2416_v11 = vshll.u32 %v14982_v25, 16  ;;  %v11461_v61 = vld [vmem:[%s13966_s14 + $0x9c] sm:$0xf] }
  0xbb   : > { %13100 = vmatprep.subr.bf16.mxu1 %v13721_v14  ;;  %v2381_v2 = vsel %vm14007_vm2, %v2376_v8, %v2380_v44  ;;  %v2420_v1 = vshrl.u32 %v14982_v25, 16  ;;  %v2426_v5 = vshll.u32 %v14992_v0, 16  ;;  %v11523_v44 = vld [vmem:[%s13966_s14 + $0x84] sm:$0xe]  ;;  %v11570_v62 = vcombine.low %v15000_v32, %v15018_v15  ;;  %v15063_v39 = vld [vmem:[%s13966_s14 + $0xa4] sm:$0x1] }
  0xbc   : > { %v14987_v18 = vcombine.low %v2371_v24, %v2381_v2  ;;  %v2405_v36 = vsel %vm14007_vm2, %v2400_v51, %v2404_v46  ;;  %v2434_v38 = vshll.u32 %v11458_v31, 16  ;;  %v2413_v19 = vor.u32 %v2412_v7, %v2409_v43  ;;  %v15047_v24 = vld [vmem:[%s13966_s14 + $0xa0] sm:$0xf]  ;;  %v11525_v7 = vld [vmem:[%s13966_s14 + $0x9c] sm:$0xe] }
  0xbd   : > { %13021 = vmatmul.mubr.bf16.gmra.mxu1 %v11566_v29  ;;  %v2998_v29 = vsel %vm14359_vm5, %v2996_v55, %v2997_v59  ;;  %13051 = vmatpush3.bf16.msra.mxu0 %v13713_v4  ;;  %v15014_v35 = vcombine.low %v2395_v28, %v2405_v36  ;;  %v2431_v4 = vshrl.u32 %v11458_v31, 16  ;;  %v2422_v10 = vrot.slane %v2420_v1, 4  ;;  %v11526_v15 = vld [vmem:[%s13966_s14 + $0xa8] sm:$0xe] }
  0xbe   : > { %13024 = vmatprep.mubr.bf16.mxu1 %v11567_v6  ;;  %13101 = vmatpush3.bf16.msra.mxu1 %v13721_v14  ;;  %v11569_v49 = vcombine.low %v14965_v16, %v2998_v29  ;;  %v15003_v6 = vld [vmem:[%s13966_s14 + $0x94] sm:$0xf]  ;;  %v2418_v14 = vrot.slane %v2416_v11, 5  ;;  %v2428_v41 = vrot.slane %v2426_v5, 5  ;;  %v2450_v34 = vshll.u32 %v15023_v48, 16 }
  0xbf   : > { %13102 = vmatprep.subr.bf16.mxu1 %v13722_v57  ;;  %13052 = vmatprep.subr.bf16.mxu0 %v13714_v54  ;;  %v2440_v9 = vshll.u32 %v15003_v6, 16  ;;  %v2433_v52 = vrot.slane %v2431_v4, 4  ;;  %v2444_v12 = vshrl.u32 %v15003_v6, 16  ;;  %v11539_v27 = vrot.slane %v11523_v44, 9  ;;  %v15076_v11 = vld [vmem:[%s13966_s14 + $0xac] sm:$0xf] }
  0xc0   : > { %12973 = vmatmul.mubr.bf16.gmra.mxu0 %v14835_v3  ;;  %v2423_v3 = vor.u32 %v2422_v10, %v2418_v14  ;;  %v2414_v46 = vrot.slane %v2413_v19, 4  ;;  %v2452_v63 = vrot.slane %v2450_v34, 5  ;;  %v3008_v16 = vrot.slane %v14982_v25, 5  ;;  %v13723_v25 = vld [vmem:[%s19257_s1 + $0x180] sm:$0xff]   ;;  %v15093_v44 = vld [vmem:[%s13966_s14 + $0xb0] sm:$0x1] }
  0xc1   : > { %12976 = vmatprep.mubr.bf16.mxu0 %v14897_v58  ;;  %13053 = vmatpush3.bf16.msra.mxu0 %v13714_v54  ;;  %v2442_v33 = vrot.slane %v2440_v9, 5  ;;  %v13720_v58 = vld [vmem:[%s19257_s1 + $0x188] sm:$0xff]   ;;  %v2446_v8 = vrot.slane %v2444_v12, 4  ;;  %v11540_v55 = vrot.slane %v11524_v45, 9  ;;  %v3015_v22 = vrot.slane %v15003_v6, 5 }
  0xc2   : > { %13103 = vmatpush3.bf16.msra.mxu1 %v13722_v57  ;;  %v2436_v57 = vrot.slane %v2434_v38, 5  ;;  %13054 = vmatprep.subr.bf16.mxu0 %v13717_v21  ;;  %v2424_v17 = vrot.slane %v2423_v3, 4  ;;  %v2419_v42 = vsel %vm14007_vm2, %v2414_v46, %v2418_v14  ;;  %v3009_v47 = vsel %vm14359_vm5, %v11539_v27, %v3008_v16 }
  0xc3   : > { %13104 = vmatprep.subr.bf16.mxu1 %v13724_v40  ;;  %v2447_v59 = vor.u32 %v2446_v8, %v2442_v33  ;;  %v3010_v2 = vrot.slane %v3008_v16, 4  ;;  %v3018_v13 = vrot.slane %v15023_v48, 5  ;;  %v2455_v31 = vshrl.u32 %v11461_v61, 16 }
  0xc4   : > { %v2437_v53 = vor.u32 %v2436_v57, %v2433_v52  ;;  %v2429_v20 = vsel %vm14007_vm2, %v2424_v17, %v2428_v41  ;;  %v3016_v30 = vsel %vm14359_vm5, %v11540_v55, %v3015_v22  ;;  %v3017_v6 = vrot.slane %v3015_v22, 4 }
  0xc5   : > { %13025 = vmatmul.mubr.bf16.gmra.mxu1 %v11568_v23  ;;  %v3011_v23 = vrot.slane %v14992_v0, 5  ;;  %13055 = vmatpush3.bf16.msra.mxu0 %v13717_v21  ;;  %v11499_v51 = vcombine.low %v2419_v42, %v2429_v20  ;;  %v2448_v29 = vrot.slane %v2447_v59, 4  ;;  %v2457_v43 = vrot.slane %v2455_v31, 4  ;;  %v15081_v21 = vld [vmem:[%s19257_s1 + $0x238] sm:$0xff]  }
  0xc6   : > { %13028 = vmatprep.mubr.bf16.mxu1 %v11569_v49  ;;  %13105 = vmatpush3.bf16.msra.mxu1 %v13724_v40  ;;  %v2438_v54 = vrot.slane %v2437_v53, 4  ;;  %v11464_v40 = vld [vmem:[%s13966_s14 + $0xa8] sm:$0xf]  ;;  %v2458_v56 = vshll.u32 %v11461_v61, 16  ;;  %v3019_v1 = vsel %vm14359_vm5, %v3017_v6, %v3018_v13  ;;  %v2468_v5 = vshrl.u32 %v15047_v24, 16 }
  0xc7   : > { %13106 = vmatprep.subr.bf16.mxu1 %v13725_v26  ;;  %13056 = vmatprep.subr.bf16.mxu0 %v13720_v58  ;;  %v3012_v0 = vsel %vm14359_vm5, %v3010_v2, %v3011_v23  ;;  %v2453_v36 = vsel %vm14007_vm2, %v2448_v29, %v2452_v63  ;;  %v2474_v48 = vshll.u32 %v15063_v39, 16  ;;  %v11572_v14 = vcombine.low %v3016_v30, %v3019_v1  ;;  %v15115_v20 = vld [vmem:[%s13966_s14 + $0xbc] sm:$0x1]  ;;  %v15121_v29 = vld [vmem:[%s13966_s14 + $0xc4] sm:$0xf] }
  0xc8   : > { %12977 = vmatmul.mubr.bf16.gmra.mxu0 %v14943_v60  ;;  %v2443_v28 = vsel %vm14007_vm2, %v2438_v54, %v2442_v33  ;;  %v11571_v49 = vcombine.low %v3009_v47, %v3012_v0  ;;  %v2464_v60 = vshll.u32 %v15047_v24, 16  ;;  %v2460_v4 = vrot.slane %v2458_v56, 5  ;;  %v11467_v33 = vld [vmem:[%s13966_s14 + $0xb4] sm:$0xf] }
  0xc9   : > { %12980 = vmatprep.mubr.bf16.mxu0 %v14987_v18  ;;  %13057 = vmatpush3.bf16.msra.mxu0 %v13720_v58  ;;  %v15086_v18 = vcombine.low %v2443_v28, %v2453_v36  ;;  %v2479_v32 = vshrl.u32 %v11464_v40, 16  ;;  %v2482_v10 = vshll.u32 %v11464_v40, 16  ;;  %v2488_v41 = vshll.u32 %v15076_v11, 16 }
  0xca   : > { %13107 = vmatpush3.bf16.msra.mxu1 %v13725_v26  ;;  %13058 = vmatprep.subr.bf16.mxu0 %v13723_v25  ;;  %v2466_v45 = vrot.slane %v2464_v60, 5  ;;  %v2476_v26 = vrot.slane %v2474_v48, 5  ;;  %v2461_v38 = vor.u32 %v2460_v4, %v2457_v43  ;;  %v2492_v19 = vshrl.u32 %v15076_v11, 16  ;;  %v11527_v43 = vld [vmem:[%s13966_s14 + $0xb4] sm:$0xe] }
  0xcb   : > { %v2481_v9 = vrot.slane %v2479_v32, 4  ;;  %v2498_v52 = vshll.u32 %v15093_v44, 16  ;;  %v2484_v34 = vrot.slane %v2482_v10, 5  ;;  %v2490_v3 = vrot.slane %v2488_v41, 5  ;;  %v11528_v41 = vld [vmem:[%s13966_s14 + $0xc0] sm:$0xe] }
  0xcc   : > { %v11541_v57 = vrot.slane %v11525_v7, 9  ;;  %v2462_v27 = vrot.slane %v2461_v38, 4  ;;  %v2494_v61 = vrot.slane %v2492_v19, 4  ;;  %v3022_v46 = vrot.slane %v15047_v24, 5  ;;  %v11468_v24 = vld [vmem:[%s13966_s14 + $0xb8] sm:$0xf] }
  0xcd   : > { %13029 = vmatmul.mubr.bf16.gmra.mxu1 %v11570_v62  ;;  %v2470_v62 = vrot.slane %v2468_v5, 4  ;;  %13059 = vmatpush3.bf16.msra.mxu0 %v13723_v25  ;;  %v2500_v58 = vrot.slane %v2498_v52, 5  ;;  %v2485_v63 = vor.u32 %v2484_v34, %v2481_v9  ;;  %v3025_v16 = vrot.slane %v15063_v39, 5 }
  0xce   : > { %13032 = vmatprep.mubr.bf16.mxu1 %v11571_v49  ;;  %13140 = vmatprep.subr.bf16.mxu0 %v15081_v21  ;;  %v11542_v17 = vrot.slane %v11526_v15, 9  ;;  %v2467_v53 = vsel %vm14007_vm2, %v2462_v27, %v2466_v45  ;;  %v2495_v23 = vor.u32 %v2494_v61, %v2490_v3  ;;  %v3023_v55 = vsel %vm14359_vm5, %v11541_v57, %v3022_v46  ;;  %v15128_v49 = vld [vmem:[%s13966_s14 + $0xc8] sm:$0x1] }
  0xcf   : > { %v2471_v12 = vor.u32 %v2470_v62, %v2466_v45  ;;  %v3024_v42 = vrot.slane %v3022_v46, 4  ;;  %v2486_v59 = vrot.slane %v2485_v63, 4  ;;  %v3029_v47 = vrot.slane %v15076_v11, 5 }
  0xd0   : > { %12981 = vmatmul.mubr.bf16.gmra.mxu0 %v15014_v35  ;;  %v3032_v2 = vrot.slane %v15093_v44, 5  ;;  %v2496_v22 = vrot.slane %v2495_v23, 4  ;;  %v2503_v25 = vshrl.u32 %v11467_v33, 16  ;;  %v2506_v40 = vshll.u32 %v11467_v33, 16 }
  0xd1   : > { %v2472_v8 = vrot.slane %v2471_v12, 4  ;;  %12984 = vmatprep.mubr.bf16.mxu0 %v11499_v51  ;;  %v3026_v13 = vsel %vm14359_vm5, %v3024_v42, %v3025_v16  ;;  %v11470_v51 = vld [vmem:[%s13966_s14 + $0xc0] sm:$0xf]  ;;  %v2491_v0 = vsel %vm14007_vm2, %v2486_v59, %v2490_v3  ;;  %v3030_v31 = vsel %vm14359_vm5, %v11542_v17, %v3029_v47  ;;  %v11658_v17 = vld [vmem:[%s13966_s14 + $0x1c] sm:$0xf] }
  0xd2   : > { %v11573_v39 = vcombine.low %v3023_v55, %v3026_v13  ;;  %v3031_v28 = vrot.slane %v3029_v47, 4  ;;  %v2501_v30 = vsel %vm14007_vm2, %v2496_v22, %v2500_v58  ;;  %v2505_v6 = vrot.slane %v2503_v25, 4  ;;  %v11657_v58 = vld [vmem:[%s13966_s14 + $0x18] sm:$0xf] }
  0xd3   : > { %v2477_v35 = vsel %vm14007_vm2, %v2472_v8, %v2476_v26  ;;  %v2512_v36 = vshll.u32 %v11468_v24, 16  ;;  %v11502_v56 = vcombine.low %v2491_v0, %v2501_v30  ;;  %v2516_v11 = vshrl.u32 %v11468_v24, 16 }
  0xd4   : > { %v11501_v54 = vcombine.low %v2467_v53, %v2477_v35  ;;  %v3033_v60 = vsel %vm14359_vm5, %v3031_v28, %v3032_v2  ;;  %v2522_v1 = vshll.u32 %v15115_v20, 16  ;;  %v2508_v48 = vrot.slane %v2506_v40, 5  ;;  %v11659_v53 = vld [vmem:[%s13966_s14 + $0x20] sm:$0x1]  ;;  %v11660_v35 = vld [vmem:[%s13966_s14 + $0x24] sm:$0xf] }
  0xd5   : > { %13033 = vmatmul.mubr.bf16.gmra.mxu1 %v11572_v14  ;;  %v11574_v5 = vcombine.low %v3030_v31, %v3033_v60  ;;  %v2514_v44 = vrot.slane %v2512_v36, 5  ;;  %v2527_v7 = vshrl.u32 %v11470_v51, 16  ;;  %v2518_v14 = vrot.slane %v2516_v11, 4 }
  0xd6   : > { %13036 = vmatprep.mubr.bf16.mxu1 %v11573_v39  ;;  %v2524_v4 = vrot.slane %v2522_v1, 5  ;;  %v2530_v45 = vshll.u32 %v11470_v51, 16  ;;  %v2536_v32 = vshll.u32 %v15121_v29, 16  ;;  %v2509_v15 = vor.u32 %v2508_v48, %v2505_v6  ;;  %v15168_v6 = vld [vmem:[%s13966_s14 + $0x2c] sm:$0x1]  ;;  %v13726_v48 = vld [vmem:[%s13966_s14 + $0x18] sm:$0xff]  }
  0xd7   : > { %v2529_v62 = vrot.slane %v2527_v7, 4  ;;  %v2540_v26 = vshrl.u32 %v15121_v29, 16  ;;  %v2546_v10 = vshll.u32 %v15128_v49, 16  ;;  %v2519_v38 = vor.u32 %v2518_v14, %v2514_v44 }
  0xd8   : > { %12985 = vmatmul.mubr.bf16.gmra.mxu0 %v15086_v18  ;;  %v2532_v9 = vrot.slane %v2530_v45, 5  ;;  %v2538_v19 = vrot.slane %v2536_v32, 5  ;;  %v11543_v18 = vrot.slane %v11527_v43, 9  ;;  %v2510_v52 = vrot.slane %v2509_v15, 4  ;;  %v11663_v45 = vld [vmem:[%s13966_s14 + $0x30] sm:$0xf] }
  0xd9   : > { %12988 = vmatprep.mubr.bf16.mxu0 %v11501_v54  ;;  %v2542_v12 = vrot.slane %v2540_v26, 4  ;;  %v2548_v34 = vrot.slane %v2546_v10, 5  ;;  %v3036_v3 = vrot.slane %v11468_v24, 5  ;;  %v2520_v57 = vrot.slane %v2519_v38, 4  ;;  %v15157_v54 = vld [vmem:[%s13966_s14 + $0x28] sm:$0xf] }
  0xda   : > { %v2533_v33 = vor.u32 %v2532_v9, %v2529_v62  ;;  %v3039_v27 = vrot.slane %v15115_v20, 5  ;;  %v11544_v61 = vrot.slane %v11528_v41, 9  ;;  %v2515_v46 = vsel %vm14007_vm2, %v2510_v52, %v2514_v44  ;;  %v11664_v10 = vld [vmem:[%s13966_s14 + $0x34] sm:$0xf] }
  0xdb   : > { %v2543_v8 = vor.u32 %v2542_v12, %v2538_v19  ;;  %v3037_v63 = vsel %vm14359_vm5, %v11543_v18, %v3036_v3  ;;  %v3038_v16 = vrot.slane %v3036_v3, 4  ;;  %v2525_v23 = vsel %vm14007_vm2, %v2520_v57, %v2524_v4  ;;  %v11666_v3 = vld [vmem:[%s13966_s14 + $0x3c] sm:$0xf] }
  0xdc   : > { %v2534_v55 = vrot.slane %v2533_v33, 4  ;;  %v3043_v42 = vrot.slane %v15121_v29, 5  ;;  %v3046_v24 = vrot.slane %v15128_v49, 5  ;;  %v11503_v59 = vcombine.low %v2515_v46, %v2525_v23 }
  0xdd   : > { %13037 = vmatmul.mubr.bf16.gmra.mxu1 %v11574_v5  ;;  %v2544_v47 = vrot.slane %v2543_v8, 4  ;;  %v3040_v2 = vsel %vm14359_vm5, %v3038_v16, %v3039_v27  ;;  %v3806_v20 = vshrl.u32 %v11657_v58, 16  ;;  %v3809_v39 = vshll.u32 %v11657_v58, 16 }
  0xde   : > { %v2539_v22 = vsel %vm14007_vm2, %v2534_v55, %v2538_v19  ;;  %v11575_v13 = vcombine.low %v3037_v63, %v3040_v2  ;;  %v3044_v25 = vsel %vm14359_vm5, %v11544_v61, %v3043_v42  ;;  %v3045_v51 = vrot.slane %v3043_v42, 4  ;;  %v11665_v19 = vld [vmem:[%s13966_s14 + $0x38] sm:$0x1] }
  0xdf   : > { %v2549_v29 = vsel %vm14007_vm2, %v2544_v47, %v2548_v34  ;;  %v3808_v0 = vrot.slane %v3806_v20, 4  ;;  %v3815_v31 = vshll.u32 %v11658_v17, 16  ;;  %v3819_v49 = vshrl.u32 %v11658_v17, 16 }
  0xe0   : > { %12989 = vmatmul.mubr.bf16.gmra.mxu0 %v11502_v56  ;;  %13040 = vmatprep.mubr.bf16.mxu1 %v11575_v13  ;;  %v3047_v28 = vsel %vm14359_vm5, %v3045_v51, %v3046_v24  ;;  %v3825_v30 = vshll.u32 %v11659_v53, 16  ;;  %v3811_v36 = vrot.slane %v3809_v39, 5  ;;  %v3830_v56 = vshrl.u32 %v11660_v35, 16  ;;  %v11667_v13 = vld [vmem:[%s13966_s14 + $0x40] sm:$0xf]  ;;  %v13731_v39 = vld [vmem:[%s19257_s1 + $0x230] sm:$0xff]  }
  0xe1   : > { %12992 = vmatprep.mubr.bf16.mxu0 %v11503_v59  ;;  %v11576_v40 = vcombine.low %v3044_v25, %v3047_v28  ;;  %v3817_v43 = vrot.slane %v3815_v31, 5  ;;  %v11504_v60 = vcombine.low %v2539_v22, %v2549_v29  ;;  %v3821_v11 = vrot.slane %v3819_v49, 4  ;;  %v15197_v31 = vld [vmem:[%s13966_s14 + $0x44] sm:$0x1] }
  0xe2   : > { %v3833_v1 = vshll.u32 %v11660_v35, 16  ;;  %v3839_v5 = vshll.u32 %v15157_v54, 16  ;;  %v3812_v44 = vor.u32 %v3811_v36, %v3808_v0  ;;  %v3832_v7 = vrot.slane %v3830_v56, 4  ;;  %v13727_v35 = vld [vmem:[%s13966_s14 + $0x24] sm:$0xff]   ;;  %v13729_v0 = vld [vmem:[%s13966_s14 + $0x30] sm:$0xff]  }
  0xe3   : > { %v3843_v14 = vshrl.u32 %v15157_v54, 16  ;;  %v3849_v4 = vshll.u32 %v15168_v6, 16  ;;  %v3822_v32 = vor.u32 %v3821_v11, %v3817_v43  ;;  %v3827_v15 = vrot.slane %v3825_v30, 5 }
  0xe4   : > { %v3835_v62 = vrot.slane %v3833_v1, 5  ;;  %v3841_v26 = vrot.slane %v3839_v5, 5  ;;  %v3813_v41 = vrot.slane %v3812_v44, 4  ;;  %v3854_v12 = vshrl.u32 %v11663_v45, 16 }
  0xe5   : > { %13041 = vmatmul.mubr.bf16.gmra.mxu1 %v11576_v40  ;;  %v3845_v38 = vrot.slane %v3843_v14, 4  ;;  %v3851_v9 = vrot.slane %v3849_v4, 5  ;;  %v3823_v18 = vrot.slane %v3822_v32, 4  ;;  %v3857_v34 = vshll.u32 %v11663_v45, 16 }
  0xe6   : > { %v3836_v52 = vor.u32 %v3835_v62, %v3832_v7  ;;  %v3818_v33 = vsel %vm14007_vm2, %v3813_v41, %v3817_v43  ;;  %v3863_v61 = vshll.u32 %v11664_v10, 16  ;;  %v3867_v58 = vshrl.u32 %v11664_v10, 16  ;;  %v11670_v7 = vld [vmem:[%s13966_s14 + $0x4c] sm:$0xf]  ;;  %v11671_v62 = vld [vmem:[%s13966_s14 + $0x50] sm:$0x1] }
  0xe7   : > { %v3846_v27 = vor.u32 %v3845_v38, %v3841_v26  ;;  %v3828_v8 = vsel %vm14007_vm2, %v3823_v18, %v3827_v15  ;;  %v3856_v16 = vrot.slane %v3854_v12, 4  ;;  %v3859_v17 = vrot.slane %v3857_v34, 5 }
  0xe8   : > { %12993 = vmatmul.mubr.bf16.gmra.mxu0 %v11504_v60  ;;  %v3837_v63 = vrot.slane %v3836_v52, 4  ;;  %v11721_v23 = vcombine.low %v3818_v33, %v3828_v8  ;;  %v3865_v24 = vrot.slane %v3863_v61, 5  ;;  %v3869_v20 = vrot.slane %v3867_v58, 4  ;;  %v11669_v60 = vld [vmem:[%s13966_s14 + $0x48] sm:$0xf] }
  0xe9   : > { %13060 = vmatprep.mubr.bf16.mxu0 %v13726_v48  ;;  %v3847_v42 = vrot.slane %v3846_v27, 4  ;;  %v3860_v2 = vor.u32 %v3859_v17, %v3856_v16  ;;  %v3873_v22 = vshll.u32 %v11665_v19, 16  ;;  %v3878_v28 = vshrl.u32 %v11666_v3, 16  ;;  %v11672_v58 = vld [vmem:[%s13966_s14 + $0x54] sm:$0xf] }
  0xea   : > { %v3842_v47 = vsel %vm14007_vm2, %v3837_v63, %v3841_v26  ;;  %13108 = vmatprep.mubr.bf16.mxu1 %v11721_v23  ;;  %v3881_v49 = vshll.u32 %v11666_v3, 16  ;;  %v3870_v43 = vor.u32 %v3869_v20, %v3865_v24  ;;  %v3887_v44 = vshll.u32 %v11667_v13, 16  ;;  %v13737_v20 = vld [vmem:[%s19257_s1 + $0x220] sm:$0xff]  }
  0xeb   : > { %v3852_v51 = vsel %vm14007_vm2, %v3847_v42, %v3851_v9  ;;  %v3861_v36 = vrot.slane %v3860_v2, 4  ;;  %v3875_v56 = vrot.slane %v3873_v22, 5  ;;  %v3880_v5 = vrot.slane %v3878_v28, 4  ;;  %v15226_v2 = vld [vmem:[%s13966_s14 + $0x58] sm:$0xf] }
  0xec   : > { %v12774_v57 = vpop.f32.mrf.mxu0  ;;  %v11722_v30 = vcombine.low %v3842_v47, %v3852_v51  ;;  %v3883_v48 = vrot.slane %v3881_v49, 5  ;;  %v3871_v45 = vrot.slane %v3870_v43, 4  ;;  %v3891_v32 = vshrl.u32 %v11667_v13, 16  ;;  %v11675_v43 = vld [vmem:[%s13966_s14 + $0x60] sm:$0xf] }
  0xed   : > { %v12822_v46 = vpop.f32.mrf.mxu1  ;;  %v3866_v4 = vsel %vm14007_vm2, %v3861_v36, %v3865_v24  ;;  %v3897_v15 = vshll.u32 %v15197_v31, 16  ;;  %v3889_v9 = vrot.slane %v3887_v44, 5  ;;  %v3902_v34 = vshrl.u32 %v11669_v60, 16 }
  0xee   : > { %v15182_v53 = vadd.f32 %v12822_v46, %v12774_v57  ;;  %v814_v55 = vpop.f32.mrf.mxu0  ;;  %13109 = vmatmul.mubr.bf16.vlgmr.msra.gmra.mxu1 %v11722_v30  ;;  %v3884_v38 = vor.u32 %v3883_v48, %v3880_v5  ;;  %v3876_v18 = vsel %vm14007_vm2, %v3871_v45, %v3875_v56  ;;  %v3893_v52 = vrot.slane %v3891_v32, 4  ;;  %v13730_v46 = vld [vmem:[%s13966_s14 + $0x3c] sm:$0xff]  }
  0xef   : > { %v1119_v59 = vpop.f32.mrf.mxu1  ;;  %v3899_v12 = vrot.slane %v3897_v15, 5  ;;  %v11723_v57 = vcombine.low %v3866_v4, %v3876_v18  ;;  %v3905_v61 = vshll.u32 %v11669_v60, 16  ;;  %v3904_v16 = vrot.slane %v3902_v34, 4  ;;  %v15254_v34 = vld [vmem:[%s13966_s14 + $0x64] sm:$0xf] }
  0xf0   : > { %v15188_v25 = vadd.f32 %v1119_v59, %v814_v55  ;;  %v12775_v29 = vpop.f32.mrf.mxu0  ;;  %13061 = vmatmul.mubr.bf16.vlgmr.msra.gmra.mxu0 %v13727_v35  ;;  %v3885_v27 = vrot.slane %v3884_v38, 4  ;;  %v3894_v63 = vor.u32 %v3893_v52, %v3889_v9  ;;  %v3911_v17 = vshll.u32 %v11670_v7, 16  ;;  %v13732_v35 = vld [vmem:[%s13966_s14 + $0x48] sm:$0xff]   ;;  %v13733_v52 = vld [vmem:[%s13966_s14 + $0x54] sm:$0xff]  }
  0xf1   : > { %v12823_v40 = vpop.f32.mrf.mxu1  ;;  %13141 = vmatpush3.bf16.msra.mxu0 %v15081_v21  ;;  %13064 = vmatprep.mubr.bf16.mxu0 %v13729_v0  ;;  %v13734_v21 = vld [vmem:[%s19257_s1 + $0x228] sm:$0xff]   ;;  %v3915_v23 = vshrl.u32 %v11670_v7, 16  ;;  %v3907_v59 = vrot.slane %v3905_v61, 5  ;;  %v3921_v47 = vshll.u32 %v11671_v62, 16  ;;  %v15232_v0 = vld [vmem:[%s13966_s14 + $0x5c] sm:$0x1] }
  0xf2   : > { %v15200_v11 = vadd.f32 %v12823_v40, %v12775_v29  ;;  %v817_v1 = vpop.f32.mrf.mxu0  ;;  %13142 = vmatprep.subr.bf16.mxu0 %v13731_v39  ;;  %13112 = vmatprep.mubr.bf16.mxu1 %v11723_v57  ;;  %v3890_v42 = vsel %vm14007_vm2, %v3885_v27, %v3889_v9  ;;  %v3895_v22 = vrot.slane %v3894_v63, 4  ;;  %v3913_v51 = vrot.slane %v3911_v17, 5  ;;  %v13740_v9 = vld [vmem:[%s19257_s1 + $0x218] sm:$0xff]  }
  0xf3   : > { %v1122_v14 = vpop.f32.mrf.mxu1  ;;  %v3917_v29 = vrot.slane %v3915_v23, 4  ;;  %v3908_v30 = vor.u32 %v3907_v59, %v3904_v16  ;;  %v3923_v40 = vrot.slane %v3921_v47, 5  ;;  %v3929_v36 = vshll.u32 %v11672_v58, 16 }
  0xf4   : > { %v15209_v10 = vadd.f32 %v1122_v14, %v817_v1  ;;  %v12778_v41 = vpop.f32.mrf.mxu0  ;;  %v3900_v56 = vsel %vm14007_vm2, %v3895_v22, %v3899_v12  ;;  %v3935_v48 = vshll.u32 %v15226_v2, 16  ;;  %v3945_v38 = vshll.u32 %v15232_v0, 16 }
  0xf5   : > { %v12826_v19 = vpop.f32.mrf.mxu1  ;;  %13143 = vmatpush3.bf16.msra.mxu0 %v13731_v39  ;;  %v3926_v39 = vshrl.u32 %v11672_v58, 16  ;;  %v3918_v1 = vor.u32 %v3917_v29, %v3913_v51  ;;  %v11724_v44 = vcombine.low %v3890_v42, %v3900_v56  ;;  %v3909_v14 = vrot.slane %v3908_v30, 4 }
  0xf6   : > { %v15216_v3 = vadd.f32 %v12826_v19, %v12778_v41  ;;  %v830_v33 = vpop.f32.mrf.mxu0  ;;  %13144 = vmatprep.subr.bf16.mxu0 %v13734_v21  ;;  %v3931_v4 = vrot.slane %v3929_v36, 5  ;;  %v3937_v62 = vrot.slane %v3935_v48, 5  ;;  %v3939_v41 = vshrl.u32 %v15226_v2, 16  ;;  %v15279_v36 = vld [vmem:[%s13966_s14 + $0x74] sm:$0x1] }
  0xf7   : > { %v1135_v8 = vpop.f32.mrf.mxu1  ;;  %v3928_v5 = vrot.slane %v3926_v39, 4  ;;  %v3919_v15 = vrot.slane %v3918_v1, 4  ;;  %13113 = vmatmul.mubr.bf16.gmra.mxu1 %v11724_v44  ;;  %v3914_v12 = vsel %vm14007_vm2, %v3909_v14, %v3913_v51  ;;  %v3947_v58 = vrot.slane %v3945_v38, 5  ;;  %v13743_v39 = vld [vmem:[%s19257_s1 + $0x210] sm:$0xff]  }
  0xf8   : > { %v15220_v55 = vadd.f32 %v1135_v8, %v830_v33  ;;  %v12779_v24 = vpop.f32.mrf.mxu0  ;;  %13065 = vmatmul.mubr.bf16.gmra.mxu0 %v13730_v46  ;;  %v3941_v61 = vrot.slane %v3939_v41, 4  ;;  %v13735_v46 = vld [vmem:[%s13966_s14 + $0x60] sm:$0xff]   ;;  %v15260_v8 = vld [vmem:[%s13966_s14 + $0x68] sm:$0x1]  ;;  %v3950_v63 = vshrl.u32 %v11675_v43, 16  ;;  %v3953_v42 = vshll.u32 %v11675_v43, 16 }
  0xf9   : > { %v12827_v13 = vpop.f32.mrf.mxu1  ;;  %13068 = vmatprep.mubr.bf16.mxu0 %v13732_v35  ;;  %13145 = vmatpush3.bf16.msra.mxu0 %v13734_v21  ;;  %v3932_v21 = vor.u32 %v3931_v4, %v3928_v5  ;;  %v3924_v57 = vsel %vm14007_vm2, %v3919_v15, %v3923_v40  ;;  %v15266_v35 = vld [vmem:[%s13966_s14 + $0x70] sm:$0xf]  ;;  %v3959_v51 = vshll.u32 %v15254_v34, 16  ;;  %v3963_v29 = vshrl.u32 %v15254_v34, 16 }
  0xfa   : > { %v15234_v28 = vadd.f32 %v12827_v13, %v12779_v24  ;;  %v833_v49 = vpop.f32.mrf.mxu0  ;;  %13146 = vmatprep.subr.bf16.mxu0 %v13737_v20  ;;  %v11725_v16 = vcombine.low %v3914_v12, %v3924_v57  ;;  %v11678_v24 = vld [vmem:[%s13966_s14 + $0x6c] sm:$0xf]  ;;  %v3942_v59 = vor.u32 %v3941_v61, %v3937_v62  ;;  %v3952_v13 = vrot.slane %v3950_v63, 4 }
  0xfb   : > { %v1138_v60 = vpop.f32.mrf.mxu1  ;;  %v3933_v23 = vrot.slane %v3932_v21, 4  ;;  %v3955_v30 = vrot.slane %v3953_v42, 5  ;;  %v3969_v40 = vshll.u32 %v15260_v8, 16  ;;  %v3961_v1 = vrot.slane %v3959_v51, 5 }
  0xfc   : > { %v15240_v7 = vadd.f32 %v1138_v60, %v833_v49  ;;  %v12782_v45 = vpop.f32.mrf.mxu0  ;;  %13116 = vmatprep.mubr.bf16.mxu1 %v11725_v16  ;;  %v3943_v43 = vrot.slane %v3942_v59, 4  ;;  %v3965_v5 = vrot.slane %v3963_v29, 4  ;;  %v3974_v48 = vshrl.u32 %v11678_v24, 16 }
  0xfd   : > { %v12830_v32 = vpop.f32.mrf.mxu1  ;;  %13147 = vmatpush3.bf16.msra.mxu0 %v13737_v20  ;;  %v3938_v20 = vsel %vm14007_vm2, %v3933_v23, %v3937_v62  ;;  %v3956_v14 = vor.u32 %v3955_v30, %v3952_v13  ;;  %v3971_v4 = vrot.slane %v3969_v40, 5  ;;  %v3983_v38 = vshll.u32 %v15266_v35, 16  ;;  %v15300_v13 = vld [vmem:[%s13966_s14 + $0x7c] sm:$0xf]  ;;  %v15305_v40 = vld [vmem:[%s13966_s14 + $0x80] sm:$0x1] }
  0xfe   : > { %v15248_v18 = vadd.f32 %v12830_v32, %v12782_v45  ;;  %v846_v33 = vpop.f32.mrf.mxu0  ;;  %13148 = vmatprep.subr.bf16.mxu0 %v13740_v9  ;;  %v3977_v45 = vshll.u32 %v11678_v24, 16  ;;  %v3948_v32 = vsel %vm14007_vm2, %v3943_v43, %v3947_v58  ;;  %v3966_v62 = vor.u32 %v3965_v5, %v3961_v1  ;;  %v13736_v58 = vld [vmem:[%s13966_s14 + $0x6c] sm:$0xff]  }
  0xff   : > { %v1151_v27 = vpop.f32.mrf.mxu1  ;;  %v3976_v41 = vrot.slane %v3974_v48, 4  ;;  %v11726_v12 = vcombine.low %v3938_v20, %v3948_v32  ;;  %v3957_v21 = vrot.slane %v3956_v14, 4  ;;  %v3985_v16 = vrot.slane %v3983_v38, 5  ;;  %v11684_v14 = vld [vmem:[%s13966_s14 + $0x84] sm:$0xf] }
 0x100   : > { %v15262_v17 = vadd.f32 %v1151_v27, %v846_v33  ;;  %v12783_v47 = vpop.f32.mrf.mxu0  ;;  %13069 = vmatmul.mubr.bf16.gmra.mxu0 %v13733_v52  ;;  %v13746_v52 = vld [vmem:[%s19257_s1 + $0x208] sm:$0xff]   ;;  %v3979_v57 = vrot.slane %v3977_v45, 5  ;;  %v11681_v33 = vld [vmem:[%s13966_s14 + $0x78] sm:$0xf]  ;;  %v3993_v23 = vshll.u32 %v15279_v36, 16 }
 0x101   : > { %v12831_v22 = vpop.f32.mrf.mxu1  ;;  %13072 = vmatprep.mubr.bf16.mxu0 %v13735_v46  ;;  %13149 = vmatpush3.bf16.msra.mxu0 %v13740_v9  ;;  %v3987_v9 = vshrl.u32 %v15266_v35, 16  ;;  %v3967_v46 = vrot.slane %v3966_v62, 4  ;;  %v3962_v24 = vsel %vm14007_vm2, %v3957_v21, %v3961_v1  ;;  %v3998_v43 = vshrl.u32 %v11681_v33, 16 }
 0x102   : > { %v15275_v49 = vadd.f32 %v12831_v22, %v12783_v47  ;;  %v849_v56 = vpop.f32.mrf.mxu0  ;;  %13150 = vmatprep.subr.bf16.mxu0 %v13743_v39  ;;  %13117 = vmatmul.mubr.bf16.gmra.mxu1 %v11726_v12  ;;  %v3980_v59 = vor.u32 %v3979_v57, %v3976_v41  ;;  %v13738_v22 = vld [vmem:[%s13966_s14 + $0x78] sm:$0xff]   ;;  %v3995_v20 = vrot.slane %v3993_v23, 5  ;;  %v4007_v62 = vshll.u32 %v15300_v13, 16 }
 0x103   : > { %v1154_v60 = vpop.f32.mrf.mxu1  ;;  %v3989_v47 = vrot.slane %v3987_v9, 4  ;;  %v3972_v51 = vsel %vm14007_vm2, %v3967_v46, %v3971_v4  ;;  %v4000_v32 = vrot.slane %v3998_v43, 4  ;;  %v4011_v41 = vshrl.u32 %v15300_v13, 16  ;;  %v13739_v43 = vld [vmem:[%s13966_s14 + $0x84] sm:$0xff]  }
 0x104   : > { %v15281_v44 = vadd.f32 %v1154_v60, %v849_v56  ;;  %v12786_v61 = vpop.f32.mrf.mxu0  ;;  %v4001_v56 = vshll.u32 %v11681_v33, 16  ;;  %v11727_v60 = vcombine.low %v3962_v24, %v3972_v51  ;;  %v3981_v5 = vrot.slane %v3980_v59, 4  ;;  %v11687_v51 = vld [vmem:[%s13966_s14 + $0x90] sm:$0xf] }
 0x105   : > { %v12834_v15 = vpop.f32.mrf.mxu1  ;;  %13151 = vmatpush3.bf16.msra.mxu0 %v13743_v39  ;;  %v3990_v48 = vor.u32 %v3989_v47, %v3985_v16  ;;  %v13749_v39 = vld [vmem:[%s19257_s1 + $0x200] sm:$0xff]   ;;  %v4017_v57 = vshll.u32 %v15305_v40, 16  ;;  %v4013_v46 = vrot.slane %v4011_v41, 4  ;;  %v4022_v23 = vshrl.u32 %v11684_v14, 16  ;;  %v15328_v47 = vld [vmem:[%s13966_s14 + $0x8c] sm:$0x1] }
 0x106   : > { %v15294_v42 = vadd.f32 %v12834_v15, %v12786_v61  ;;  %v862_v29 = vpop.f32.mrf.mxu0  ;;  %13152 = vmatprep.subr.bf16.mxu0 %v13746_v52  ;;  %v4003_v15 = vrot.slane %v4001_v56, 5  ;;  %13120 = vmatprep.mubr.bf16.mxu1 %v11727_v60  ;;  %v3986_v38 = vsel %vm14007_vm2, %v3981_v5, %v3985_v16  ;;  %v4041_v41 = vshll.u32 %v15328_v47, 16 }
 0x107   : > { %v1167_v63 = vpop.f32.mrf.mxu1  ;;  %v3991_v12 = vrot.slane %v3990_v48, 4  ;;  %v4019_v59 = vrot.slane %v4017_v57, 5  ;;  %v4046_v57 = vshrl.u32 %v11687_v51, 16 }
 0x108   : > { %v15307_v1 = vadd.f32 %v1167_v63, %v862_v29  ;;  %13073 = vmatmul.mubr.bf16.gmra.mxu0 %v13736_v58  ;;  %v12787_v4 = vpop.f32.mrf.mxu0  ;;  %v4004_v61 = vor.u32 %v4003_v15, %v4000_v32  ;;  %v4009_v58 = vrot.slane %v4007_v62, 5  ;;  %v15321_v63 = vld [vmem:[%s13966_s14 + $0x88] sm:$0xf] }
 0x109   : > { %v12835_v30 = vpop.f32.mrf.mxu1  ;;  %13076 = vmatprep.mubr.bf16.mxu0 %v13738_v22  ;;  %13153 = vmatpush3.bf16.msra.mxu0 %v13746_v52  ;;  %v3996_v16 = vsel %vm14007_vm2, %v3991_v12, %v3995_v20  ;;  %v4025_v22 = vshll.u32 %v11684_v14, 16  ;;  %v4024_v52 = vrot.slane %v4022_v23, 4  ;;  %v13741_v14 = vld [vmem:[%s13966_s14 + $0x90] sm:$0xff]   ;;  %v15346_v23 = vld [vmem:[%s13966_s14 + $0x98] sm:$0x1] }
 0x10a   : > { %19291 = vst [vmem:[#allocation5_spill] sm:$0xff] %v15307_v1  ;;  %v15317_v21 = vadd.f32 %v12835_v30, %v12787_v4  ;;  %v865_v9 = vpop.f32.mrf.mxu0  ;;  %13154 = vmatprep.subr.bf16.mxu0 %v13749_v39  ;;  %v11728_v29 = vcombine.low %v3986_v38, %v3996_v16  ;;  %v4005_v56 = vrot.slane %v4004_v61, 4  ;;  %v4014_v60 = vor.u32 %v4013_v46, %v4009_v58  ;;  %v15341_v12 = vld [vmem:[%s13966_s14 + $0x94] sm:$0xf]  ;;  %v11690_v16 = vld [vmem:[%s13966_s14 + $0x9c] sm:$0xf] }
 0x10b   : > { %v1170_v45 = vpop.f32.mrf.mxu1  ;;  %v4027_v20 = vrot.slane %v4025_v22, 5  ;;  %v4031_v4 = vshll.u32 %v15321_v63, 16  ;;  %v4043_v22 = vrot.slane %v4041_v41, 5  ;;  %v15364_v41 = vld [vmem:[%s13966_s14 + $0xa4] sm:$0x1] }
 0x10c   : > { %19292 = vst [vmem:[#allocation6_spill] sm:$0xff] %v15317_v21  ;;  %v15325_v24 = vadd.f32 %v1170_v45, %v865_v9  ;;  %v12790_v30 = vpop.f32.mrf.mxu0  ;;  %v4035_v45 = vshrl.u32 %v15321_v63, 16  ;;  %13121 = vmatmul.mubr.bf16.gmra.mxu1 %v11728_v29  ;;  %v4010_v32 = vsel %vm14007_vm2, %v4005_v56, %v4009_v58  ;;  %v4015_v15 = vrot.slane %v4014_v60, 4  ;;  %19299 = vst [vmem:[#allocation13_spill] sm:$0xff] %v15364_v41  ;;  %v15414_v21 = vld [vmem:[%s13966_s14 + $0xc4] sm:$0xf] }
 0x10d   : > { %v12838_v33 = vpop.f32.mrf.mxu1  ;;  %13155 = vmatpush3.bf16.msra.mxu0 %v13749_v39  ;;  %v4033_v61 = vrot.slane %v4031_v4, 5  ;;  %v4048_v56 = vrot.slane %v4046_v57, 4  ;;  %v4049_v60 = vshll.u32 %v11687_v51, 16  ;;  %v15354_v39 = vld [vmem:[%s13966_s14 + $0xa0] sm:$0xf]  ;;  %v4065_v51 = vshll.u32 %v15346_v23, 16 }
 0x10e   : > { %19293 = vst [vmem:[#allocation7_spill] sm:$0xff] %v15325_v24  ;;  %v15332_v48 = vadd.f32 %v12838_v33, %v12790_v30  ;;  %v878_v62 = vpop.f32.mrf.mxu0  ;;  %v4028_v33 = vor.u32 %v4027_v20, %v4024_v52  ;;  %v4037_v46 = vrot.slane %v4035_v45, 4  ;;  %v4020_v58 = vsel %vm14007_vm2, %v4015_v15, %v4019_v59  ;;  %v11693_v57 = vld [vmem:[%s13966_s14 + $0xa8] sm:$0xf]  ;;  %19307 = vst [vmem:[#allocation21_spill] sm:$0xff] %v15414_v21 }
 0x10f   : > { %v1183_v5 = vpop.f32.mrf.mxu1  ;;  %v4051_v45 = vrot.slane %v4049_v60, 5  ;;  %v4055_v15 = vshll.u32 %v15341_v12, 16  ;;  %v4067_v60 = vrot.slane %v4065_v51, 5 }
 0x110   : > { %19294 = vst [vmem:[#allocation8_spill] sm:$0xff] %v15332_v48  ;;  %v15343_v9 = vadd.f32 %v1183_v5, %v878_v62  ;;  %13077 = vmatmul.mubr.bf16.gmra.mxu0 %v13739_v43  ;;  %v12791_v29 = vpop.f32.mrf.mxu0  ;;  %v11729_v5 = vcombine.low %v4010_v32, %v4020_v58  ;;  %v4029_v52 = vrot.slane %v4028_v33, 4  ;;  %v4038_v20 = vor.u32 %v4037_v46, %v4033_v61  ;;  %v13742_v33 = vld [vmem:[%s13966_s14 + $0x9c] sm:$0xff]  }
 0x111   : > { %v12839_v38 = vpop.f32.mrf.mxu1  ;;  %13080 = vmatprep.mubr.bf16.mxu0 %v13741_v14  ;;  %v4059_v62 = vshrl.u32 %v15341_v12, 16  ;;  %v4070_v14 = vshrl.u32 %v11690_v16, 16  ;;  %v4052_v46 = vor.u32 %v4051_v45, %v4048_v56  ;;  %v4057_v58 = vrot.slane %v4055_v15, 5 }
 0x112   : > { %19295 = vst [vmem:[#allocation9_spill] sm:$0xff] %v15343_v9  ;;  %v15356_v4 = vadd.f32 %v12839_v38, %v12791_v29  ;;  %v15358_v43 = vpop.f32.mrf.mxu0  ;;  %13124 = vmatprep.mubr.bf16.mxu1 %v11729_v5  ;;  %v4034_v32 = vsel %vm14007_vm2, %v4029_v52, %v4033_v61  ;;  %v4039_v38 = vrot.slane %v4038_v20, 4  ;;  %v13744_v61 = vld [vmem:[%s13966_s14 + $0xa8] sm:$0xff]   ;;  %v4097_v48 = vshll.u32 %v11693_v57, 16 }
 0x113   : > { %v15351_v30 = vpop.f32.mrf.mxu1  ;;  %19298 = vst [vmem:[#allocation12_spill] sm:$0xff] %v15358_v43  ;;  %v4061_v29 = vrot.slane %v4059_v62, 4  ;;  %v4072_v5 = vrot.slane %v4070_v14, 4  ;;  %v4079_v43 = vshll.u32 %v15354_v39, 16  ;;  %v15375_v52 = vld [vmem:[%s13966_s14 + $0xac] sm:$0xf] }
 0x114   : > { %19296 = vst [vmem:[#allocation10_spill] sm:$0xff] %v15351_v30  ;;  %19297 = vst [vmem:[#allocation11_spill] sm:$0xff] %v15356_v4  ;;  %v4044_v19 = vsel %vm14007_vm2, %v4039_v38, %v4043_v22  ;;  %v4073_v30 = vshll.u32 %v11690_v16, 16  ;;  %v4053_v56 = vrot.slane %v4052_v46, 4  ;;  %v4083_v22 = vshrl.u32 %v15354_v39, 16 }
 0x115   : > { %v12842_v59 = vpop.f32.mrf.mxu1  ;;  %v11730_v20 = vcombine.low %v4034_v32, %v4044_v19  ;;  %v4062_v45 = vor.u32 %v4061_v29, %v4057_v58  ;;  %v4081_v9 = vrot.slane %v4079_v43, 5  ;;  %v4089_v38 = vshll.u32 %v15364_v41, 16  ;;  %v15382_v16 = vld [vmem:[%s13966_s14 + $0xb0] sm:$0x1]  ;;  %v11696_v43 = vld [vmem:[%s13966_s14 + $0xb4] sm:$0xf] }
 0x116   : > { %v12794_v26 = vpop.f32.mrf.mxu0  ;;  %v4075_v51 = vrot.slane %v4073_v30, 5  ;;  %19301 = vst [vmem:[#allocation15_spill] sm:$0xff] %v15382_v16  ;;  %v4094_v30 = vshrl.u32 %v11693_v57, 16  ;;  %v4085_v46 = vrot.slane %v4083_v22, 4  ;;  %v4099_v57 = vrot.slane %v4097_v48, 5 }
 0x117   : > { %v1199_v27 = vpop.f32.mrf.mxu1  ;;  %v15377_v4 = vadd.f32 %v12842_v59, %v12794_v26  ;;  %13125 = vmatmul.mubr.bf16.gmra.mxu1 %v11730_v20  ;;  %v4058_v26 = vsel %vm14007_vm2, %v4053_v56, %v4057_v58  ;;  %v4063_v19 = vrot.slane %v4062_v45, 4  ;;  %v4091_v29 = vrot.slane %v4089_v38, 5  ;;  %v15392_v20 = vld [vmem:[%s13966_s14 + $0xb8] sm:$0xf]  ;;  %v11699_v48 = vld [vmem:[%s13966_s14 + $0xc0] sm:$0xf] }
 0x118   : > { %v894_v62 = vpop.f32.mrf.mxu0  ;;  %13081 = vmatmul.mubr.bf16.gmra.mxu0 %v13742_v33  ;;  %v4076_v14 = vor.u32 %v4075_v51, %v4072_v5  ;;  %v13745_v56 = vld [vmem:[%s13966_s14 + $0xb4] sm:$0xff]   ;;  %v4096_v45 = vrot.slane %v4094_v30, 4  ;;  %v4086_v22 = vor.u32 %v4085_v46, %v4081_v9  ;;  %v4118_v46 = vshrl.u32 %v11696_v43, 16 }
 0x119   : > { %19300 = vst [vmem:[#allocation14_spill] sm:$0xff] %v15377_v4  ;;  %v12843_v15 = vpop.f32.mrf.mxu1  ;;  %v15386_v59 = vadd.f32 %v1199_v27, %v894_v62  ;;  %13084 = vmatprep.mubr.bf16.mxu0 %v13744_v61  ;;  %v4068_v33 = vsel %vm14007_vm2, %v4063_v19, %v4067_v60  ;;  %v4103_v62 = vshll.u32 %v15375_v52, 16  ;;  %v13747_v61 = vld [vmem:[%s13966_s14 + $0xc0] sm:$0xff]   ;;  %v4113_v60 = vshll.u32 %v15382_v16, 16  ;;  %v15407_v19 = vld [vmem:[%s13966_s14 + $0xbc] sm:$0x1] }
 0x11a   : > { %v12795_v4 = vpop.f32.mrf.mxu0  ;;  %v11731_v5 = vcombine.low %v4058_v26, %v4068_v33  ;;  %v4077_v51 = vrot.slane %v4076_v14, 4  ;;  %19306 = vst [vmem:[#allocation20_spill] sm:$0xff] %v15407_v19  ;;  %v4087_v30 = vrot.slane %v4086_v22, 4  ;;  %v4100_v14 = vor.u32 %v4099_v57, %v4096_v45 }
 0x11b   : > { %19302 = vst [vmem:[#allocation16_spill] sm:$0xff] %v15386_v59  ;;  %v15388_v32 = vpop.f32.mrf.mxu1  ;;  %v15396_v58 = vadd.f32 %v12843_v15, %v12795_v4  ;;  %v4105_v59 = vrot.slane %v4103_v62, 5  ;;  %v4107_v4 = vshrl.u32 %v15375_v52, 16  ;;  %v4121_v62 = vshll.u32 %v11696_v43, 16 }
 0x11c   : > { %19303 = vst [vmem:[#allocation17_spill] sm:$0xff] %v15388_v32  ;;  %v15400_v38 = vpop.f32.mrf.mxu0  ;;  %13128 = vmatprep.mubr.bf16.mxu1 %v11731_v5  ;;  %v4082_v26 = vsel %vm14007_vm2, %v4077_v51, %v4081_v9  ;;  %v4115_v32 = vrot.slane %v4113_v60, 5  ;;  %v4092_v16 = vsel %vm14007_vm2, %v4087_v30, %v4091_v29  ;;  %v4101_v9 = vrot.slane %v4100_v14, 4 }
 0x11d   : > { %19304 = vst [vmem:[#allocation18_spill] sm:$0xff] %v15396_v58  ;;  %v12846_v27 = vpop.f32.mrf.mxu1  ;;  %19305 = vst [vmem:[#allocation19_spill] sm:$0xff] %v15400_v38  ;;  %v4109_v38 = vrot.slane %v4107_v4, 4  ;;  %v4127_v58 = vshll.u32 %v15392_v20, 16  ;;  %v4120_v51 = vrot.slane %v4118_v46, 4  ;;  %v11732_v45 = vcombine.low %v4082_v26, %v4092_v16 }
 0x11e   : > { %v4123_v4 = vrot.slane %v4121_v62, 5  ;;  %v4106_v41 = vsel %vm14007_vm2, %v4101_v9, %v4105_v59  ;;  %v4131_v29 = vshrl.u32 %v15392_v20, 16  ;;  %v15429_v16 = vld [vmem:[%s13966_s14 + $0xc8] sm:$0x1]  ;;  %v4142_v30 = vshrl.u32 %v11699_v48, 16 }
 0x11f   : > { %v1215_v15 = vpop.f32.mrf.mxu1  ;;  %v4110_v22 = vor.u32 %v4109_v38, %v4105_v59  ;;  %v4129_v43 = vrot.slane %v4127_v58, 5  ;;  %19311 = vst [vmem:[#allocation25_spill] sm:$0xff] %v15429_v16  ;;  %13129 = vmatmul.mubr.bf16.gmra.mxu1 %v11732_v45  ;;  %v4145_v14 = vshll.u32 %v11699_v48, 16  ;;  %v11702_v46 = vld [vmem:[%s13966_s14 + $0xcc] sm:$0xf] }
 0x120   : > { %v12798_v33 = vpop.f32.mrf.mxu0  ;;  %13085 = vmatmul.mubr.bf16.gmra.mxu0 %v13745_v56  ;;  %v4124_v38 = vor.u32 %v4123_v4, %v4120_v51  ;;  %v4133_v59 = vrot.slane %v4131_v29, 4  ;;  %v15436_v62 = vld [vmem:[%s13966_s14 + $0xd0] sm:$0xf] }
 0x121   : > { %v12847_v24 = vpop.f32.mrf.mxu1  ;;  %v15418_v5 = vadd.f32 %v12846_v27, %v12798_v33  ;;  %v4137_v27 = vshll.u32 %v15407_v19, 16  ;;  %13088 = vmatprep.mubr.bf16.mxu0 %v13747_v61  ;;  %v4111_v56 = vrot.slane %v4110_v22, 4  ;;  %v4151_v33 = vshll.u32 %v15414_v21, 16  ;;  %19313 = vst [vmem:[#allocation27_spill] sm:$0xff] %v15436_v62  ;;  %v13748_v51 = vld [vmem:[%s13966_s14 + $0xcc] sm:$0xff]  }
 0x122   : > { %v910_v57 = vpop.f32.mrf.mxu0  ;;  %v4125_v9 = vrot.slane %v4124_v38, 4  ;;  %v4144_v22 = vrot.slane %v4142_v30, 4  ;;  %v4134_v29 = vor.u32 %v4133_v59, %v4129_v43 }
 0x123   : > { %19308 = vst [vmem:[#allocation22_spill] sm:$0xff] %v15418_v5  ;;  %v15420_v60 = vpop.f32.mrf.mxu1  ;;  %v15424_v1 = vadd.f32 %v1215_v15, %v910_v57  ;;  %v4116_v61 = vsel %vm14007_vm2, %v4111_v56, %v4115_v32  ;;  %v4147_v57 = vrot.slane %v4145_v14, 5  ;;  %v4161_v32 = vshll.u32 %v15429_v16, 16  ;;  %v15448_v56 = vld [vmem:[%s13966_s14 + $0xd4] sm:$0x1] }
 0x124   : > { %19309 = vst [vmem:[#allocation23_spill] sm:$0xff] %v15420_v60  ;;  %v12799_v58 = vpop.f32.mrf.mxu0  ;;  %v11733_v48 = vcombine.low %v4106_v41, %v4116_v61  ;;  %v4130_v60 = vsel %vm14007_vm2, %v4125_v9, %v4129_v43  ;;  %v4135_v30 = vrot.slane %v4134_v29, 4  ;;  %v4166_v14 = vshrl.u32 %v11702_v46, 16  ;;  %v11746_v5 = vld [vmem:[%s13966_s14 + $0x24] sm:$0xe] }
 0x125   : > { %19310 = vst [vmem:[#allocation24_spill] sm:$0xff] %v15424_v1  ;;  %v12850_v26 = vpop.f32.mrf.mxu1  ;;  %v15432_v15 = vadd.f32 %v12847_v24, %v12799_v58  ;;  %v4139_v24 = vrot.slane %v4137_v27, 5  ;;  %v4153_v58 = vrot.slane %v4151_v33, 5  ;;  %v4155_v1 = vshrl.u32 %v15414_v21, 16  ;;  %v11745_v27 = vld [vmem:[%s13966_s14 + $0x18] sm:$0xe] }
 0x126   : > { %v15440_v45 = vpop.f32.mrf.mxu0  ;;  %13132 = vmatprep.mubr.bf16.mxu1 %v11733_v48  ;;  %v4175_v41 = vshll.u32 %v15436_v62, 16  ;;  %v4163_v61 = vrot.slane %v4161_v32, 5  ;;  %v4179_v9 = vshrl.u32 %v15436_v62, 16  ;;  %v4168_v29 = vrot.slane %v4166_v14, 4  ;;  %v13870_v14 = vld [vmem:[%s13966_s14 + $0x1c] sm:$0xf] }
 0x127   : > { %19312 = vst [vmem:[#allocation26_spill] sm:$0xff] %v15432_v15  ;;  %19314 = vst [vmem:[#allocation28_spill] sm:$0xff] %v15440_v45  ;;  %v1231_v4 = vpop.f32.mrf.mxu1  ;;  %v4148_v15 = vor.u32 %v4147_v57, %v4144_v22  ;;  %v4169_v45 = vshll.u32 %v11702_v46, 16  ;;  %v4157_v43 = vrot.slane %v4155_v1, 4  ;;  %v4140_v57 = vsel %vm14007_vm2, %v4135_v30, %v4139_v24  ;;  %v11747_v24 = vld [vmem:[%s13966_s14 + $0x30] sm:$0xe] }
 0x128   : > { %v12802_v59 = vpop.f32.mrf.mxu0  ;;  %13089 = vmatmul.mubr.bf16.gmra.mxu0 %v13748_v51  ;;  %v11734_v16 = vcombine.low %v4130_v60, %v4140_v57  ;;  %v4177_v32 = vrot.slane %v4175_v41, 5  ;;  %v4181_v19 = vrot.slane %v4179_v9, 4  ;;  %v11761_v60 = vrot.slane %v11745_v27, 9  ;;  %v11748_v9 = vld [vmem:[%s13966_s14 + $0x3c] sm:$0xe] }
 0x129   : > { %v12851_v38 = vpop.f32.mrf.mxu1  ;;  %v4149_v33 = vrot.slane %v4148_v15, 4  ;;  %v15457_v48 = vadd.f32 %v12850_v26, %v12802_v59  ;;  %v4171_v46 = vrot.slane %v4169_v45, 5  ;;  %v4158_v1 = vor.u32 %v4157_v43, %v4153_v58 }
 0x12a   : > { %v926_v51 = vpop.f32.mrf.mxu0  ;;  %v4185_v26 = vshll.u32 %v15448_v56, 16  ;;  %13133 = vmatmul.mubr.bf16.gmra.mxu1 %v11734_v16  ;;  %v4577_v59 = vrot.slane %v13870_v14, 5  ;;  %v4182_v43 = vor.u32 %v4181_v19, %v4177_v32 }
 0x12b   : > { %v15453_v22 = vpop.f32.mrf.mxu1  ;;  %v4154_v15 = vsel %vm14007_vm2, %v4149_v33, %v4153_v58  ;;  %v4172_v21 = vor.u32 %v4171_v46, %v4168_v29  ;;  %v4159_v45 = vrot.slane %v4158_v1, 4  ;;  %v13871_v33 = vld [vmem:[%s13966_s14 + $0x20] sm:$0x1]  ;;  %v11762_v1 = vrot.slane %v11746_v5, 9 }
 0x12c   : > { %19315 = vst [vmem:[#allocation29_spill] sm:$0xff] %v15453_v22  ;;  %v15462_v22 = vadd.f32 %v1231_v4, %v926_v51  ;;  %v12803_v30 = vpop.f32.mrf.mxu0  ;;  %v4580_v57 = vrot.slane %v13871_v33, 5  ;;  %v4187_v4 = vrot.slane %v4185_v26, 5  ;;  %v4578_v16 = vsel %vm14359_vm5, %v11761_v60, %v4577_v59  ;;  %v11749_v26 = vld [vmem:[%s13966_s14 + $0x48] sm:$0xe] }
 0x12d   : > { %v12918_v62 = vpop.f32.mrf.mxu1  ;;  %v4173_v41 = vrot.slane %v4172_v21, 4  ;;  %v15468_v51 = vadd.f32 %v12851_v38, %v12803_v30  ;;  %v4164_v29 = vsel %vm14007_vm2, %v4159_v45, %v4163_v61  ;;  %v4579_v27 = vrot.slane %v4577_v59, 4 }
 0x12e   : > { %v15473_v46 = vpop.f32.mrf.mxu0  ;;  %v11735_v21 = vcombine.low %v4154_v15, %v4164_v29  ;;  %v4183_v38 = vrot.slane %v4182_v43, 4  ;;  %v19317_v30 = vrot.slane %v15157_v54, 5  ;;  %v11763_v33 = vrot.slane %v11747_v24, 9  ;;  %v11750_v29 = vld [vmem:[%s13966_s14 + $0x54] sm:$0xe] }
 0x12f   : > { %v1959_v58 = vpop.f32.mrf.mxu1  ;;  %19316 = vst [vmem:[#allocation30_spill] sm:$0xff] %v15473_v46  ;;  %v4178_v19 = vsel %vm14007_vm2, %v4173_v41, %v4177_v32  ;;  %v4581_v61 = vsel %vm14359_vm5, %v4579_v27, %v4580_v57  ;;  %v13872_v43 = vld [vmem:[%s13966_s14 + $0x34] sm:$0xf] }
 0x130   : > { %v12870_v45 = vpop.f32.mrf.mxu0  ;;  %v4585_v5 = vsel %vm14359_vm5, %v11762_v1, %v19317_v30  ;;  %v19318_v60 = vmov %v19317_v30  ;;  %13136 = vmatprep.mubr.bf16.mxu1 %v11735_v21  ;;  %v4188_v32 = vsel %vm14007_vm2, %v4183_v38, %v4187_v4  ;;  %v11793_v41 = vcombine.low %v4578_v16, %v4581_v61  ;;  %v13873_v30 = vld [vmem:[%s13966_s14 + $0x38] sm:$0x1]  ;;  %v13874_v61 = vld [vmem:[%s13966_s14 + $0x40] sm:$0xf] }
 0x131   : > { %v12919_v14 = vpop.f32.mrf.mxu1  ;;  %v4586_v59 = vrot.slane %v19318_v60, 4  ;;  %v1701_v57 = vadd.f32 %v12870_v45, %v15182_v53  ;;  %v4591_v27 = vrot.slane %v13872_v43, 5  ;;  %v11736_v46 = vcombine.low %v4178_v19, %v4188_v32 }
 0x132   : > { %v19320_v1 = vrot.slane %v15168_v6, 5  ;;  %v1572_v24 = vpop.f32.mrf.mxu0  ;;  %v4594_v60 = vrot.slane %v13873_v30, 5  ;;  %v11764_v21 = vrot.slane %v11748_v9, 9  ;;  %13156 = vmatprep.mubr.bf16.mxu0 %v11793_v41  ;;  %v4598_v45 = vrot.slane %v13874_v61, 5  ;;  %v13875_v9 = vld [vmem:[%s13966_s14 + $0x4c] sm:$0xf] }
 0x133   : > { %v15489_v15 = vpop.f32.mrf.mxu1  ;;  %v1699_v53 = vadd.f32 %v1572_v24, %v15188_v25  ;;  %v15502_v16 = vadd.f32 %v12918_v62, %v1701_v57  ;;  %v4592_v19 = vsel %vm14359_vm5, %v11763_v33, %v4591_v27  ;;  %13137 = vmatmul.mubr.bf16.gmra.mxu1 %v11736_v46  ;;  %v4593_v38 = vrot.slane %v4591_v27, 4  ;;  %v13876_v25 = vld [vmem:[%s13966_s14 + $0x50] sm:$0x1]  ;;  %v11752_v61 = vld [vmem:[%s13966_s14 + $0x6c] sm:$0xe] }
 0x134   : > { %19319 = vst [vmem:[#allocation31_spill] sm:$0xff] %v15489_v15  ;;  %v4588_v54 = vsel %vm14359_vm5, %v4586_v59, %v19320_v1  ;;  %v12871_v6 = vpop.f32.mrf.mxu0  ;;  %v11765_v32 = vrot.slane %v11749_v26, 9  ;;  %v4605_v43 = vrot.slane %v13875_v9, 5  ;;  %v4608_v62 = vrot.slane %v13876_v25, 5  ;;  %v11751_v1 = vld [vmem:[%s13966_s14 + $0x60] sm:$0xe] }
 0x135   : > { %v12922_v15 = vpop.f32.mrf.mxu1  ;;  %v11794_v4 = vcombine.low %v4585_v5, %v4588_v54  ;;  %v1702_v5 = vadd.f32 %v12871_v6, %v15200_v11  ;;  %v15509_v41 = vadd.f32 %v1959_v58, %v1699_v53  ;;  %v11766_v57 = vrot.slane %v11750_v29, 9 }
 0x136   : > { %v1575_v33 = vpop.f32.mrf.mxu0  ;;  %v4595_v46 = vsel %vm14359_vm5, %v4593_v38, %v4594_v60  ;;  %v4599_v27 = vsel %vm14359_vm5, %v11764_v21, %v4598_v45  ;;  %v4600_v26 = vrot.slane %v4598_v45, 4  ;;  %v4606_v24 = vsel %vm14359_vm5, %v11765_v32, %v4605_v43 }
 0x137   : > { %v1975_v59 = vpop.f32.mrf.mxu1  ;;  %13157 = vmatmul.mubr.bf16.vlgmr.msra.gmra.mxu0 %v11794_v4  ;;  %v15520_v11 = vadd.f32 %v1575_v33, %v15209_v10  ;;  %v15522_v58 = vadd.f32 %v12919_v14, %v1702_v5  ;;  %v11795_v29 = vcombine.low %v4592_v19, %v4595_v46  ;;  %v4607_v30 = vrot.slane %v4605_v43, 4 }
 0x138   : > { %v12874_v4 = vpop.f32.mrf.mxu0  ;;  %v19321_v53 = vrot.slane %v15197_v31, 5  ;;  %v4612_v21 = vrot.slane %v15226_v2, 5  ;;  %v4619_v38 = vrot.slane %v15254_v34, 5  ;;  %v11767_v5 = vrot.slane %v11751_v1, 9 }
 0x139   : > { %v12923_v54 = vpop.f32.mrf.mxu1  ;;  %13160 = vmatprep.mubr.bf16.mxu0 %v11795_v29  ;;  %v1705_v10 = vadd.f32 %v12874_v4, %v15216_v3  ;;  %v4609_v19 = vsel %vm14359_vm5, %v4607_v30, %v4608_v62  ;;  %v4622_v3 = vrot.slane %v15260_v8, 5  ;;  %v19322_v46 = vrot.slane %v15232_v0, 5 }
 0x13a   : > { %v4602_v60 = vsel %vm14359_vm5, %v4600_v26, %v19321_v53  ;;  %v1588_v45 = vpop.f32.mrf.mxu0  ;;  %v11797_v31 = vcombine.low %v4606_v24, %v4609_v19  ;;  %v4613_v32 = vsel %vm14359_vm5, %v11766_v57, %v4612_v21  ;;  %v4614_v9 = vrot.slane %v4612_v21, 4  ;;  %v11753_v24 = vld [vmem:[%s13966_s14 + $0x78] sm:$0xe] }
 0x13b   : > { %v15528_v6 = vpop.f32.mrf.mxu1  ;;  %v11796_v14 = vcombine.low %v4599_v27, %v4602_v60  ;;  %v1703_v2 = vadd.f32 %v1588_v45, %v15220_v55  ;;  %v15539_v34 = vadd.f32 %v12922_v15, %v1705_v10  ;;  %v4621_v25 = vrot.slane %v4619_v38, 4 }
 0x13c   : > { %v12875_v33 = vpop.f32.mrf.mxu0  ;;  %v4616_v62 = vsel %vm14359_vm5, %v4614_v9, %v19322_v46  ;;  %v11768_v26 = vrot.slane %v11752_v61, 9  ;;  %v4626_v57 = vrot.slane %v15266_v35, 5  ;;  %v4633_v4 = vrot.slane %v15300_v13, 5 }
 0x13d   : > { %v12926_v43 = vpop.f32.mrf.mxu1  ;;  %v1706_v1 = vadd.f32 %v12875_v33, %v15234_v28  ;;  %v15549_v55 = vadd.f32 %v1975_v59, %v1703_v2  ;;  %v11798_v15 = vcombine.low %v4613_v32, %v4616_v62  ;;  %v4620_v28 = vsel %vm14359_vm5, %v11767_v5, %v4619_v38 }
 0x13e   : > { %v1591_v29 = vpop.f32.mrf.mxu0  ;;  %v15553_v0 = vsel %vm14359_vm5, %v11768_v26, %v4626_v57  ;;  %v4628_v30 = vrot.slane %v4626_v57, 4  ;;  %v4623_v59 = vsel %vm14359_vm5, %v4621_v25, %v4622_v3  ;;  %v19323_v61 = vrot.slane %v15279_v36, 5  ;;  %v11754_v36 = vld [vmem:[%s13966_s14 + $0x84] sm:$0xe]  ;;  %v15589_v26 = vld [vmem:[%s13966_s14 + $0x9c] sm:$0xe] }
 0x13f   : > { %v1991_v27 = vpop.f32.mrf.mxu1  ;;  %13161 = vmatmul.mubr.bf16.gmra.mxu0 %v11796_v14  ;;  %v15557_v53 = vadd.f32 %v1591_v29, %v15240_v7  ;;  %v15559_v35 = vadd.f32 %v12923_v54, %v1706_v1  ;;  %v11769_v10 = vrot.slane %v11753_v24, 9  ;;  %v11799_v19 = vcombine.low %v4620_v28, %v4623_v59  ;;  %v15599_v1 = vld [vmem:[%s13966_s14 + $0xa8] sm:$0xe]  ;;  %v15605_v28 = vld [vmem:[%s13966_s14 + $0xb4] sm:$0xe] }
 0x140   : > { %13164 = vmatprep.mubr.bf16.mxu0 %v11797_v31  ;;  %v12878_v60 = vpop.f32.mrf.mxu0  ;;  %v4630_v13 = vsel %vm14359_vm5, %v4628_v30, %v19323_v61  ;;  %v4635_v45 = vrot.slane %v4633_v4, 4  ;;  %v4636_v31 = vrot.slane %v15305_v40, 5  ;;  %v4640_v25 = vrot.slane %v15321_v63, 5  ;;  %v15611_v61 = vld [vmem:[%s13966_s14 + $0xc0] sm:$0xe] }
 0x141   : > { %v12927_v8 = vpop.f32.mrf.mxu1  ;;  %v1709_v7 = vadd.f32 %v12878_v60, %v15248_v18  ;;  %v11800_v54 = vcombine.low %v15553_v0, %v4630_v13  ;;  %v11755_v18 = vld [vmem:[%s13966_s14 + $0x90] sm:$0xe]  ;;  %v11770_v62 = vrot.slane %v11754_v36, 9  ;;  %v4647_v63 = vrot.slane %v15341_v12, 5  ;;  %v19324_v13 = vld [vmem:[#allocation5_spill] sm:$0xff] }
 0x142   : > { %v1604_v14 = vpop.f32.mrf.mxu0  ;;  %v4654_v24 = vrot.slane %v15354_v39, 5  ;;  %v4642_v0 = vrot.slane %v4640_v25, 4  ;;  %v11771_v30 = vrot.slane %v11755_v18, 9  ;;  %v11772_v60 = vrot.slane %v15589_v26, 9  ;;  %v19328_v26 = vld [vmem:[#allocation7_spill] sm:$0xff] }
 0x143   : > { %v15565_v21 = vpop.f32.mrf.mxu1  ;;  %v1707_v32 = vadd.f32 %v1604_v14, %v15262_v17  ;;  %v15575_v9 = vadd.f32 %v12926_v43, %v1709_v7  ;;  %v4634_v17 = vsel %vm14359_vm5, %v11769_v10, %v4633_v4  ;;  %v4637_v43 = vsel %vm14359_vm5, %v4635_v45, %v4636_v31 }
 0x144   : > { %v12879_v5 = vpop.f32.mrf.mxu0  ;;  %v11801_v4 = vcombine.low %v4634_v17, %v4637_v43  ;;  %v4649_v59 = vrot.slane %v4647_v63, 4  ;;  %v4661_v39 = vrot.slane %v15375_v52, 5  ;;  %v4656_v14 = vrot.slane %v4654_v24, 4  ;;  %v19326_v52 = vld [vmem:[#allocation6_spill] sm:$0xff] }
 0x145   : > { %v12930_v38 = vpop.f32.mrf.mxu1  ;;  %v1710_v3 = vadd.f32 %v12879_v5, %v15275_v49  ;;  %v15581_v33 = vadd.f32 %v1991_v27, %v1707_v32  ;;  %v4643_v27 = vrot.slane %v15328_v47, 5  ;;  %v4650_v47 = vrot.slane %v15346_v23, 5 }
 0x146   : > { %v1607_v46 = vpop.f32.mrf.mxu0  ;;  %v4641_v31 = vsel %vm14359_vm5, %v11770_v62, %v4640_v25  ;;  %v11773_v23 = vrot.slane %v15599_v1, 9  ;;  %v4668_v36 = vrot.slane %v15392_v20, 5  ;;  %v4663_v43 = vrot.slane %v4661_v39, 4  ;;  %v19327_v62 = vld [vmem:[#allocation15_spill] sm:$0xff] }
 0x147   : > { %v2007_v2 = vpop.f32.mrf.mxu1  ;;  %13165 = vmatmul.mubr.bf16.gmra.mxu0 %v11798_v15  ;;  %v15592_v57 = vadd.f32 %v1607_v46, %v15281_v44  ;;  %v15594_v49 = vadd.f32 %v12927_v8, %v1710_v3  ;;  %v4648_v3 = vsel %vm14359_vm5, %v11771_v30, %v4647_v63  ;;  %v4651_v25 = vsel %vm14359_vm5, %v4649_v59, %v4650_v47  ;;  %v19331_v59 = vld [vmem:[#allocation8_spill] sm:$0xff] }
 0x148   : > { %13168 = vmatprep.mubr.bf16.mxu0 %v11799_v19  ;;  %v12882_v15 = vpop.f32.mrf.mxu0  ;;  %v4664_v20 = vrot.slane %v19327_v62, 5  ;;  %v11775_v63 = vrot.slane %v15611_v61, 9  ;;  %v19333_v61 = vld [vmem:[#allocation11_spill] sm:$0xff] }
 0x149   : > { %v12931_v40 = vpop.f32.mrf.mxu1  ;;  %v1713_v12 = vadd.f32 %v12882_v15, %v15294_v42  ;;  %v19325_v42 = vld [vmem:[#allocation13_spill] sm:$0xff] }
 0x14a   : > { %v1620_v44 = vpop.f32.mrf.mxu0  ;;  %v4657_v19 = vrot.slane %v19325_v42, 5 }
 0x14b   : > { %v15601_v29 = vpop.f32.mrf.mxu1  ;;  %v1711_v7 = vadd.f32 %v1620_v44, %v19324_v13  ;;  %v15614_v10 = vadd.f32 %v12930_v38, %v1713_v12  ;;  %v4644_v38 = vsel %vm14359_vm5, %v4642_v0, %v4643_v27  ;;  %v19329_v27 = vld [vmem:[#allocation20_spill] sm:$0xff]  ;;  %v4670_v12 = vrot.slane %v4668_v36, 4 }
 0x14c   : > { %v12883_v45 = vpop.f32.mrf.mxu0  ;;  %v4671_v15 = vrot.slane %v19329_v27, 5  ;;  %v11802_v13 = vcombine.low %v4641_v31, %v4644_v38  ;;  %v4655_v31 = vsel %vm14359_vm5, %v11772_v60, %v4654_v24  ;;  %v4658_v38 = vsel %vm14359_vm5, %v4656_v14, %v4657_v19 }
 0x14d   : > { %v12934_v8 = vpop.f32.mrf.mxu1  ;;  %v1714_v5 = vadd.f32 %v12883_v45, %v19326_v52  ;;  %v15622_v18 = vadd.f32 %v2007_v2, %v1711_v7  ;;  %v19332_v45 = vld [vmem:[#allocation9_spill] sm:$0xff] }
 0x14e   : > { %v1623_v46 = vpop.f32.mrf.mxu0 }
 0x14f   : > { %v2023_v32 = vpop.f32.mrf.mxu1  ;;  %13169 = vmatmul.mubr.bf16.gmra.mxu0 %v11800_v54  ;;  %v11774_v54 = vrot.slane %v15605_v28, 9  ;;  %v15633_v2 = vadd.f32 %v1623_v46, %v19328_v26  ;;  %v15635_v1 = vadd.f32 %v12931_v40, %v1714_v5  ;;  %v11803_v28 = vcombine.low %v4648_v3, %v4651_v25 }
 0x150   : > { %13172 = vmatprep.mubr.bf16.mxu0 %v11801_v4  ;;  %v12886_v0 = vpop.f32.mrf.mxu0  ;;  %v19330_v4 = vld [vmem:[#allocation21_spill] sm:$0xff] }
 0x151   : > { %v12935_v17 = vpop.f32.mrf.mxu1  ;;  %v4675_v44 = vrot.slane %v19330_v4, 5  ;;  %v1717_v47 = vadd.f32 %v12886_v0, %v19331_v59  ;;  %v4665_v0 = vsel %vm14359_vm5, %v4663_v43, %v4664_v20  ;;  %v19334_v59 = vld [vmem:[#allocation14_spill] sm:$0xff] }
 0x152   : > { %v1636_v7 = vpop.f32.mrf.mxu0  ;;  %v19337_v43 = vld [vmem:[#allocation18_spill] sm:$0xff] }
 0x153   : > { %v15639_v30 = vpop.f32.mrf.mxu1  ;;  %v1715_v52 = vadd.f32 %v1636_v7, %v19332_v45  ;;  %v15644_v40 = vadd.f32 %v12934_v8, %v1717_v47  ;;  %v4662_v8 = vsel %vm14359_vm5, %v11773_v23, %v4661_v39  ;;  %v19336_v45 = vld [vmem:[#allocation25_spill] sm:$0xff] }
 0x154   : > { %v12887_v5 = vpop.f32.mrf.mxu0  ;;  %v11805_v24 = vcombine.low %v4662_v8, %v4665_v0  ;;  %v4678_v39 = vrot.slane %v19336_v45, 5  ;;  %v19340_v45 = vld [vmem:[#allocation24_spill] sm:$0xff] }
 0x155   : > { %v12938_v42 = vpop.f32.mrf.mxu1  ;;  %v1718_v62 = vadd.f32 %v12887_v5, %v19333_v61  ;;  %v15647_v26 = vadd.f32 %v2023_v32, %v1715_v52 }
 0x156   : > { %v15649_v27 = vpop.f32.mrf.mxu0 }
 0x157   : > { %v2039_v46 = vpop.f32.mrf.mxu1  ;;  %13173 = vmatmul.mubr.bf16.gmra.mxu0 %v11802_v13  ;;  %v15655_v25 = vadd.f32 %v12935_v17, %v1718_v62  ;;  %v11804_v13 = vcombine.low %v4655_v31, %v4658_v38  ;;  %v4677_v17 = vrot.slane %v4675_v44, 4  ;;  %v4669_v62 = vsel %vm14359_vm5, %v11774_v54, %v4668_v36  ;;  %v19338_v38 = vld [vmem:[#allocation27_spill] sm:$0xff] }
 0x158   : > { %13176 = vmatprep.mubr.bf16.mxu0 %v11803_v28  ;;  %v12890_v32 = vpop.f32.mrf.mxu0  ;;  %v19335_v28 = vld [vmem:[#allocation16_spill] sm:$0xff]  ;;  %v4682_v8 = vrot.slane %v19338_v38, 5 }
 0x159   : > { %v12939_v3 = vpop.f32.mrf.mxu1  ;;  %v1721_v47 = vadd.f32 %v12890_v32, %v19334_v59  ;;  %v4676_v32 = vsel %vm14359_vm5, %v11775_v63, %v4675_v44  ;;  %v11760_v59 = vld [vmem:[%s13966_s14 + $0xcc] sm:$0xe]  ;;  %v13750_v44 = vld [vmem:[%s19258_s2 + $0x78] sm:$0xff]  }
 0x15a   : > { %v1652_v7 = vpop.f32.mrf.mxu0  ;;  %13188 = vmatprep.subr.bf16.mxu1 %v13750_v44 }
 0x15b   : > { %v15661_v4 = vpop.f32.mrf.mxu1  ;;  %v1719_v14 = vadd.f32 %v1652_v7, %v19335_v28  ;;  %v15665_v19 = vadd.f32 %v12938_v42, %v1721_v47  ;;  %v4672_v42 = vsel %vm14359_vm5, %v4670_v12, %v4671_v15  ;;  %v19339_v7 = vld [vmem:[#allocation22_spill] sm:$0xff]  ;;  %v11776_v12 = vrot.slane %v11760_v59, 9  ;;  %13189 = vmatpush3.bf16.msra.mxu1 %v13750_v44 }
 0x15c   : > { %v12891_v23 = vpop.f32.mrf.mxu0  ;;  %v11806_v54 = vcombine.low %v4669_v62, %v4672_v42  ;;  %v4684_v28 = vrot.slane %v4682_v8, 4 }
 0x15d   : > { %v12942_v60 = vpop.f32.mrf.mxu1  ;;  %v1722_v20 = vadd.f32 %v12891_v23, %v19337_v43  ;;  %v15669_v5 = vadd.f32 %v2039_v46, %v1719_v14  ;;  %v4679_v46 = vsel %vm14359_vm5, %v4677_v17, %v4678_v39  ;;  %v19341_v43 = vld [vmem:[#allocation26_spill] sm:$0xff] }
 0x15e   : > { %v15671_v61 = vpop.f32.mrf.mxu0  ;;  %v11807_v15 = vcombine.low %v4676_v32, %v4679_v46 }
 0x15f   : > { %v2055_v52 = vpop.f32.mrf.mxu1  ;;  %13177 = vmatmul.mubr.bf16.gmra.mxu0 %v11804_v13  ;;  %v15678_v0 = vadd.f32 %v12939_v3, %v1722_v20  ;;  %v4685_v3 = vrot.slane %v15448_v56, 5  ;;  %v4683_v56 = vsel %vm14359_vm5, %v11776_v12, %v4682_v8 }
 0x160   : > { %13180 = vmatprep.mubr.bf16.mxu0 %v11805_v24  ;;  %v12894_v47 = vpop.f32.mrf.mxu0 }
 0x161   : > { %v12943_v31 = vpop.f32.mrf.mxu1  ;;  %v1725_v36 = vadd.f32 %v12894_v47, %v19339_v7 }
 0x162   : > { %v1668_v24 = vpop.f32.mrf.mxu0 }
 0x163   : > { %v15685_v13 = vpop.f32.mrf.mxu1  ;;  %v1723_v23 = vadd.f32 %v1668_v24, %v19340_v45  ;;  %v15690_v63 = vadd.f32 %v12942_v60, %v1725_v36  ;;  %v4686_v60 = vsel %vm14359_vm5, %v4684_v28, %v4685_v3 }
 0x164   : > { %v12895_v17 = vpop.f32.mrf.mxu0  ;;  %v11808_v47 = vcombine.low %v4683_v56, %v4686_v60  ;;  %v13752_v56 = vld [vmem:[%s19258_s2 + $0x68] sm:$0xff]  }
 0x165   : > { %v12946_v14 = vpop.f32.mrf.mxu1  ;;  %v1726_v20 = vadd.f32 %v12895_v17, %v19341_v43  ;;  %v15696_v62 = vadd.f32 %v2055_v52, %v1723_v23 }
 0x166   : > { %v15698_v42 = vpop.f32.mrf.mxu0 }
 0x167   : > { %v2071_v39 = vpop.f32.mrf.mxu1  ;;  %13181 = vmatmul.mubr.bf16.gmra.mxu0 %v11806_v54  ;;  %v15704_v32 = vadd.f32 %v12943_v31, %v1726_v20 }
 0x168   : > { %13184 = vmatprep.mubr.bf16.mxu0 %v11807_v15  ;;  %v12898_v46 = vpop.f32.mrf.mxu0 }
 0x169   : > { %v12947_v38 = vpop.f32.mrf.mxu1  ;;  %v1729_v52 = vadd.f32 %v12898_v46, %v15457_v48  ;;  %v13751_v48 = vld [vmem:[%s19258_s2 + $0x70] sm:$0xff]  }
 0x16a   : > { %v1684_v7 = vpop.f32.mrf.mxu0  ;;  %13190 = vmatprep.subr.bf16.mxu1 %v13751_v48 }
 0x16b   : > { %v15706_v59 = vpop.f32.mrf.mxu1  ;;  %v1727_v54 = vadd.f32 %v1684_v7, %v15462_v22  ;;  %v15712_v24 = vadd.f32 %v12946_v14, %v1729_v52  ;;  %13191 = vmatpush3.bf16.msra.mxu1 %v13751_v48  ;;  %v13896_v48 = vmov 0  }
 0x16c   : > { %v12899_v8 = vpop.f32.mrf.mxu0  ;;  %13192 = vmatprep.subr.bf16.mxu1 %v13752_v56  ;;  %5119 = vst [vmem:[#allocation2 + $0x18] sm:$0xf] %v13896_v48  ;;  %5113 = vst [vmem:[#allocation2] sm:$0xf] %v13896_v48 }
 0x16d   : > { %v15709_v36 = vpop.f32.mrf.mxu1  ;;  %v1730_v31 = vadd.f32 %v12899_v8, %v15468_v51  ;;  %v15717_v12 = vadd.f32 %v2071_v39, %v1727_v54  ;;  %5114 = vst [vmem:[#allocation2 + $0x4] sm:$0xf] %v13896_v48  ;;  %5115 = vst [vmem:[#allocation2 + $0x8] sm:$0x1] %v13896_v48 }
 0x16e   : > { %v15722_v28 = vpop.f32.mrf.mxu0  ;;  %5116 = vst [vmem:[#allocation2 + $0xc] sm:$0xf] %v13896_v48  ;;  %5117 = vst [vmem:[#allocation2 + $0x10] sm:$0xf] %v13896_v48 }
 0x16f   : > { %v15714_v15 = vpop.f32.mrf.mxu1  ;;  %13185 = vmatmul.mubr.bf16.gmra.mxu0 %v11808_v47  ;;  %v15726_v45 = vadd.f32 %v12947_v38, %v1730_v31  ;;  %13193 = vmatpush3.bf16.msra.mxu1 %v13752_v56  ;;  %5118 = vst [vmem:[#allocation2 + $0x14] sm:$0x1] %v13896_v48  ;;  %5120 = vst [vmem:[#allocation2 + $0x1c] sm:$0xf] %v13896_v48 }
 0x170   : > { %v12966_v22 = vpop.f32.mrf.mxu0  ;;  %5121 = vst [vmem:[#allocation2 + $0x20] sm:$0x1] %v13896_v48  ;;  %5122 = vst [vmem:[#allocation2 + $0x24] sm:$0xf] %v13896_v48 }
 0x171   : > { %v15724_v3 = vpop.f32.mrf.mxu1  ;;  %v15731_v23 = vadd.f32 %v12966_v22, %v15502_v16  ;;  %5123 = vst [vmem:[#allocation2 + $0x28] sm:$0xf] %v13896_v48  ;;  %5124 = vst [vmem:[#allocation2 + $0x2c] sm:$0x1] %v13896_v48 }
 0x172   : > { %v2713_v51 = vpop.f32.mrf.mxu0  ;;  %5125 = vst [vmem:[#allocation2 + $0x30] sm:$0xf] %v13896_v48  ;;  %5126 = vst [vmem:[#allocation2 + $0x34] sm:$0xf] %v13896_v48 }
 0x173   : > { %v15728_v14 = vpop.f32.mrf.mxu1  ;;  %v15736_v17 = vadd.f32 %v2713_v51, %v15509_v41  ;;  %5127 = vst [vmem:[#allocation2 + $0x38] sm:$0x1] %v13896_v48  ;;  %5128 = vst [vmem:[#allocation2 + $0x3c] sm:$0xf] %v13896_v48 }
 0x174   : > { %v12967_v39 = vpop.f32.mrf.mxu0  ;;  %5129 = vst [vmem:[#allocation2 + $0x40] sm:$0xf] %v13896_v48  ;;  %5130 = vst [vmem:[#allocation2 + $0x44] sm:$0x1] %v13896_v48 }
 0x175   : > { %v15733_v44 = vpop.f32.mrf.mxu1  ;;  %v15741_v20 = vadd.f32 %v12967_v39, %v15522_v58  ;;  %v13753_v58 = vld [vmem:[%s19258_s2 + $0x38] sm:$0xff]   ;;  %5131 = vst [vmem:[#allocation2 + $0x48] sm:$0xf] %v13896_v48  ;;  %5132 = vst [vmem:[#allocation2 + $0x4c] sm:$0xf] %v13896_v48 }
 0x176   : > { %19342 = vst [vmem:[#allocation5_spill] sm:$0xff] %v15733_v44  ;;  %v15746_v60 = vpop.f32.mrf.mxu0  ;;  %13236 = vmatprep.subr.bf16.mxu0 %v13753_v58  ;;  %5133 = vst [vmem:[#allocation2 + $0x50] sm:$0x1] %v13896_v48 }
 0x177   : > { %v15738_v43 = vpop.f32.mrf.mxu1  ;;  %5134 = vst [vmem:[#allocation2 + $0x54] sm:$0xf] %v13896_v48  ;;  %5135 = vst [vmem:[#allocation2 + $0x58] sm:$0xf] %v13896_v48  ;;  %13237 = vmatpush3.bf16.msra.mxu0 %v13753_v58  ;;  %v13756_v58 = vld [vmem:[%s19258_s2 + $0x28] sm:$0xff]  }
 0x178   : > { %19343 = vst [vmem:[#allocation13_spill] sm:$0xff] %v15738_v43  ;;  %v12970_v38 = vpop.f32.mrf.mxu0  ;;  %5136 = vst [vmem:[#allocation2 + $0x5c] sm:$0x1] %v13896_v48 }
 0x179   : > { %v15748_v16 = vpop.f32.mrf.mxu1  ;;  %v15753_v41 = vadd.f32 %v12970_v38, %v15539_v34  ;;  %5137 = vst [vmem:[#allocation2 + $0x60] sm:$0xf] %v13896_v48  ;;  %5138 = vst [vmem:[#allocation2 + $0x64] sm:$0xf] %v13896_v48 }
 0x17a   : > { %v2729_v52 = vpop.f32.mrf.mxu0  ;;  %5139 = vst [vmem:[#allocation2 + $0x68] sm:$0x1] %v13896_v48  ;;  %5140 = vst [vmem:[#allocation2 + $0x6c] sm:$0xf] %v13896_v48 }
 0x17b   : > { %v15750_v46 = vpop.f32.mrf.mxu1  ;;  %v15761_v7 = vadd.f32 %v2729_v52, %v15549_v55  ;;  %5141 = vst [vmem:[#allocation2 + $0x70] sm:$0xf] %v13896_v48  ;;  %5142 = vst [vmem:[#allocation2 + $0x74] sm:$0x1] %v13896_v48 }
 0x17c   : > { %19344 = vst [vmem:[#allocation6_spill] sm:$0xff] %v15750_v46  ;;  %v12971_v54 = vpop.f32.mrf.mxu0  ;;  %5143 = vst [vmem:[#allocation2 + $0x78] sm:$0xf] %v13896_v48 }
 0x17d   : > { %v15755_v47 = vpop.f32.mrf.mxu1  ;;  %19345 = vst [vmem:[#allocation15_spill] sm:$0xff] %v15761_v7  ;;  %v2847_v31 = vadd.f32 %v12971_v54, %v15559_v35  ;;  %5144 = vst [vmem:[#allocation2 + $0x7c] sm:$0xf] %v13896_v48  ;;  %v13755_v35 = vld [vmem:[%s19258_s2 + $0x30] sm:$0xff]  }
 0x17e   : > { %5145 = vst [vmem:[#allocation2 + $0x80] sm:$0x1] %v13896_v48  ;;  %5146 = vst [vmem:[#allocation2 + $0x84] sm:$0xf] %v13896_v48  ;;  %v15766_v34 = vpop.f32.mrf.mxu0  ;;  %13238 = vmatprep.subr.bf16.mxu0 %v13755_v35 }
 0x17f   : > { %v15763_v8 = vpop.f32.mrf.mxu1  ;;  %5147 = vst [vmem:[#allocation2 + $0x88] sm:$0xf] %v13896_v48  ;;  %5148 = vst [vmem:[#allocation2 + $0x8c] sm:$0x1] %v13896_v48  ;;  %v15772_v22 = vadd.f32 %v15748_v16, %v2847_v31  ;;  %13239 = vmatpush3.bf16.msra.mxu0 %v13755_v35 }
 0x180   : > { %5149 = vst [vmem:[#allocation2 + $0x90] sm:$0xf] %v13896_v48  ;;  %5150 = vst [vmem:[#allocation2 + $0x94] sm:$0xf] %v13896_v48  ;;  %v12974_v51 = vpop.f32.mrf.mxu0  ;;  %13240 = vmatprep.subr.bf16.mxu0 %v13756_v58 }
 0x181   : > { %5151 = vst [vmem:[#allocation2 + $0x98] sm:$0x1] %v13896_v48  ;;  %5152 = vst [vmem:[#allocation2 + $0x9c] sm:$0xf] %v13896_v48  ;;  %v13023_v55 = vpop.f32.mrf.mxu1  ;;  %v2850_v56 = vadd.f32 %v12974_v51, %v15575_v9 }
 0x182   : > { %5153 = vst [vmem:[#allocation2 + $0xa0] sm:$0xf] %v13896_v48  ;;  %5154 = vst [vmem:[#allocation2 + $0xa4] sm:$0x1] %v13896_v48  ;;  %v2745_v38 = vpop.f32.mrf.mxu0 }
 0x183   : > { %5155 = vst [vmem:[#allocation2 + $0xa8] sm:$0xf] %v13896_v48  ;;  %5156 = vst [vmem:[#allocation2 + $0xac] sm:$0xf] %v13896_v48  ;;  %v15774_v39 = vpop.f32.mrf.mxu1  ;;  %v2848_v54 = vadd.f32 %v2745_v38, %v15581_v33  ;;  %13241 = vmatpush3.bf16.msra.mxu0 %v13756_v58  ;;  %v13758_v33 = vld [vmem:[%s19258_s2 + $0x20] sm:$0xff]  }
 0x184   : > { %5157 = vst [vmem:[#allocation2 + $0xb0] sm:$0x1] %v13896_v48  ;;  %5158 = vst [vmem:[#allocation2 + $0xb4] sm:$0xf] %v13896_v48  ;;  %v12975_v16 = vpop.f32.mrf.mxu0  ;;  %13242 = vmatprep.subr.bf16.mxu0 %v13758_v33 }
 0x185   : > { %5159 = vst [vmem:[#allocation2 + $0xb8] sm:$0xf] %v13896_v48  ;;  %5160 = vst [vmem:[#allocation2 + $0xbc] sm:$0x1] %v13896_v48  ;;  %v13026_v52 = vpop.f32.mrf.mxu1  ;;  %v2851_v50 = vadd.f32 %v12975_v16, %v15594_v49  ;;  %v13754_v49 = vld [vmem:[%s19258_s2 + $0x60] sm:$0xff]  }
 0x186   : > { %5161 = vst [vmem:[#allocation2 + $0xc0] sm:$0xf] %v13896_v48  ;;  %5162 = vst [vmem:[#allocation2 + $0xc4] sm:$0xf] %v13896_v48  ;;  %v15788_v9 = vpop.f32.mrf.mxu0  ;;  %13194 = vmatprep.subr.bf16.mxu1 %v13754_v49 }
 0x187   : > { %5163 = vst [vmem:[#allocation2 + $0xc8] sm:$0x1] %v13896_v48  ;;  %5164 = vst [vmem:[#allocation2 + $0xcc] sm:$0xf] %v13896_v48  ;;  %v3259_v31 = vpop.f32.mrf.mxu1  ;;  %v15790_v51 = vadd.f32 %v13023_v55, %v2851_v50  ;;  %13243 = vmatpush3.bf16.msra.mxu0 %v13758_v33  ;;  %13195 = vmatpush3.bf16.msra.mxu1 %v13754_v49 }
 0x188   : > { %5165 = vst [vmem:[#allocation2 + $0xd0] sm:$0xf] %v13896_v48  ;;  %5166 = vst [vmem:[#allocation2 + $0xd4] sm:$0x1] %v13896_v48  ;;  %v15782_v48 = vadd.f32 %v15755_v47, %v2850_v56  ;;  %v12978_v46 = vpop.f32.mrf.mxu0 }
 0x189   : > { %19346 = vst [vmem:[#allocation7_spill] sm:$0xff] %v15774_v39  ;;  %v15786_v39 = vadd.f32 %v15763_v8, %v2848_v54  ;;  %19347 = vst [vmem:[#allocation20_spill] sm:$0xff] %v15788_v9  ;;  %v13027_v35 = vpop.f32.mrf.mxu1  ;;  %v2854_v47 = vadd.f32 %v12978_v46, %v15614_v10  ;;  %v13759_v10 = vld [vmem:[%s19258_s2 + $0x18] sm:$0xff]  }
 0x18a   : > { %v2761_v8 = vpop.f32.mrf.mxu0  ;;  %13244 = vmatprep.subr.bf16.mxu0 %v13759_v10 }
 0x18b   : > { %v15792_v43 = vpop.f32.mrf.mxu1  ;;  %v2852_v38 = vadd.f32 %v2761_v8, %v15622_v18  ;;  %v15802_v50 = vadd.f32 %v13026_v52, %v2854_v47  ;;  %13245 = vmatpush3.bf16.msra.mxu0 %v13759_v10 }
 0x18c   : > { %19348 = vst [vmem:[#allocation21_spill] sm:$0xff] %v15792_v43  ;;  %v12979_v55 = vpop.f32.mrf.mxu0 }
 0x18d   : > { %v13030_v56 = vpop.f32.mrf.mxu1  ;;  %v2855_v54 = vadd.f32 %v12979_v55, %v15635_v1  ;;  %v15805_v16 = vadd.f32 %v3259_v31, %v2852_v38  ;;  %v13761_v1 = vld [vmem:[%s19258_s2 + $0x10] sm:$0xff]  }
 0x18e   : > { %v15810_v46 = vpop.f32.mrf.mxu0  ;;  %13246 = vmatprep.subr.bf16.mxu0 %v13761_v1 }
 0x18f   : > { %v3275_v58 = vpop.f32.mrf.mxu1  ;;  %19349 = vst [vmem:[#allocation8_spill] sm:$0xff] %v15810_v46  ;;  %v15812_v7 = vadd.f32 %v13027_v35, %v2855_v54  ;;  %v13757_v35 = vld [vmem:[%s19258_s2 + $0x58] sm:$0xff]   ;;  %13247 = vmatpush3.bf16.msra.mxu0 %v13761_v1  ;;  %v13762_v1 = vld [vmem:[%s19258_s2 + $0x8] sm:$0xff]  }
 0x190   : > { %v12982_v18 = vpop.f32.mrf.mxu0  ;;  %13196 = vmatprep.subr.bf16.mxu1 %v13757_v35  ;;  %13248 = vmatprep.subr.bf16.mxu0 %v13762_v1 }
 0x191   : > { %v13031_v43 = vpop.f32.mrf.mxu1  ;;  %v2858_v33 = vadd.f32 %v12982_v18, %v15644_v40  ;;  %13197 = vmatpush3.bf16.msra.mxu1 %v13757_v35 }
 0x192   : > { %v2777_v31 = vpop.f32.mrf.mxu0 }
 0x193   : > { %v15814_v52 = vpop.f32.mrf.mxu1  ;;  %v2856_v49 = vadd.f32 %v2777_v31, %v15647_v26  ;;  %v15821_v8 = vadd.f32 %v13030_v56, %v2858_v33  ;;  %13249 = vmatpush3.bf16.msra.mxu0 %v13762_v1 }
 0x194   : > { %19350 = vst [vmem:[#allocation9_spill] sm:$0xff] %v15814_v52  ;;  %v12983_v38 = vpop.f32.mrf.mxu0 }
 0x195   : > { %v13034_v47 = vpop.f32.mrf.mxu1  ;;  %v2859_v40 = vadd.f32 %v12983_v38, %v15655_v25  ;;  %v15827_v54 = vadd.f32 %v3275_v58, %v2856_v49  ;;  %v13760_v58 = vld [vmem:[%s19258_s2 + $0x50] sm:$0xff]  }
 0x196   : > { %v15829_v10 = vpop.f32.mrf.mxu0  ;;  %13198 = vmatprep.subr.bf16.mxu1 %v13760_v58 }
 0x197   : > { %v3291_v55 = vpop.f32.mrf.mxu1  ;;  %19351 = vst [vmem:[#allocation11_spill] sm:$0xff] %v15829_v10  ;;  %v15831_v26 = vadd.f32 %v13031_v43, %v2859_v40  ;;  %13199 = vmatpush3.bf16.msra.mxu1 %v13760_v58  ;;  %v5705_v58 = vld [vmem:[#allocation2 + $0x4] sm:$0xf] }
 0x198   : > { %v12986_v56 = vpop.f32.mrf.mxu0 }
 0x199   : > { %v13035_v18 = vpop.f32.mrf.mxu1  ;;  %v2862_v31 = vadd.f32 %v12986_v56, %v15665_v19 }
 0x19a   : > { %v2793_v52 = vpop.f32.mrf.mxu0 }
 0x19b   : > { %v15833_v33 = vpop.f32.mrf.mxu1  ;;  %v2860_v49 = vadd.f32 %v2793_v52, %v15669_v5  ;;  %v15843_v35 = vadd.f32 %v13034_v47, %v2862_v31  ;;  %v13764_v5 = vld [vmem:[%s19258_s2] sm:$0xff]  }
 0x19c   : > { %19352 = vst [vmem:[#allocation14_spill] sm:$0xff] %v15833_v33  ;;  %v12987_v43 = vpop.f32.mrf.mxu0  ;;  %13250 = vmatprep.subr.bf16.mxu0 %v13764_v5 }
 0x19d   : > { %v13038_v25 = vpop.f32.mrf.mxu1  ;;  %v2863_v19 = vadd.f32 %v12987_v43, %v15678_v0  ;;  %v15846_v40 = vadd.f32 %v3291_v55, %v2860_v49  ;;  %v13763_v0 = vld [vmem:[%s19258_s2 + $0x48] sm:$0xff]   ;;  %v5704_v55 = vld [vmem:[#allocation2] sm:$0xf]  ;;  %13251 = vmatpush3.bf16.msra.mxu0 %v13764_v5 }
 0x19e   : > { %v15848_v56 = vpop.f32.mrf.mxu0  ;;  %13200 = vmatprep.subr.bf16.mxu1 %v13763_v0  ;;  %v11889_v43 = vcombine.low %v5704_v55, %v5705_v58 }
 0x19f   : > { %v3307_v38 = vpop.f32.mrf.mxu1  ;;  %19353 = vst [vmem:[#allocation16_spill] sm:$0xff] %v15848_v56  ;;  %v15850_v10 = vadd.f32 %v13035_v18, %v2863_v19  ;;  %13201 = vmatpush3.bf16.msra.mxu1 %v13763_v0 }
 0x1a0   : > { %v12990_v46 = vpop.f32.mrf.mxu0  ;;  %13252 = vmatprep.mubr.bf16.mxu0 %v11889_v43  ;;  %v5772_v43 = vshll.u32 %v5704_v55, 16 }
 0x1a1   : > { %v13039_v33 = vpop.f32.mrf.mxu1  ;;  %v2866_v52 = vadd.f32 %v12990_v46, %v15690_v63 }
 0x1a2   : > { %v2809_v31 = vpop.f32.mrf.mxu0 }
 0x1a3   : > { %v15856_v47 = vpop.f32.mrf.mxu1  ;;  %v2864_v1 = vadd.f32 %v2809_v31, %v15696_v62  ;;  %v15862_v18 = vadd.f32 %v13038_v25, %v2866_v52 }
 0x1a4   : > { %19354 = vst [vmem:[#allocation25_spill] sm:$0xff] %v15856_v47  ;;  %v12991_v49 = vpop.f32.mrf.mxu0 }
 0x1a5   : > { %v2867_v63 = vadd.f32 %v12991_v49, %v15704_v32  ;;  %v15865_v46 = vadd.f32 %v3307_v38, %v2864_v1  ;;  %v13042_v19 = vpop.f32.mrf.mxu1 }
 0x1a6   : > { %v15867_v47 = vpop.f32.mrf.mxu0 }
 0x1a7   : > { %19355 = vst [vmem:[#allocation18_spill] sm:$0xff] %v15867_v47  ;;  %v15869_v56 = vadd.f32 %v13039_v33, %v2867_v63  ;;  %v3323_v9 = vpop.f32.mrf.mxu1  ;;  %v5769_v33 = vshrl.u32 %v5704_v55, 16  ;;  %v5778_v55 = vshll.u32 %v5705_v58, 16 }
 0x1a8   : > { %v12994_v62 = vpop.f32.mrf.mxu0 }
 0x1a9   : > { %v2870_v25 = vadd.f32 %v12994_v62, %v15712_v24  ;;  %v13043_v5 = vpop.f32.mrf.mxu1  ;;  %v13767_v24 = vld [vmem:[%s19258_s2 + $0x40] sm:$0xff]   ;;  %v5782_v62 = vshrl.u32 %v5705_v58, 16 }
 0x1aa   : > { %v2825_v52 = vpop.f32.mrf.mxu0  ;;  %13202 = vmatprep.subr.bf16.mxu1 %v13767_v24 }
 0x1ab   : > { %v2868_v31 = vadd.f32 %v2825_v52, %v15717_v12  ;;  %v15873_v44 = vadd.f32 %v13042_v19, %v2870_v25  ;;  %v15875_v38 = vpop.f32.mrf.mxu1  ;;  %13203 = vmatpush3.bf16.msra.mxu1 %v13767_v24  ;;  %v5771_v25 = vrot.slane %v5769_v33, 4  ;;  %v5774_v52 = vrot.slane %v5772_v43, 5 }
 0x1ac   : > { %v12995_v32 = vpop.f32.mrf.mxu0  ;;  %19356 = vst [vmem:[#allocation27_spill] sm:$0xff] %v15875_v38  ;;  %v5752_v38 = vld [vmem:[#allocation2 + $0x8] sm:$0x1] }
 0x1ad   : > { %v2871_v0 = vadd.f32 %v12995_v32, %v15726_v45  ;;  %v15878_v1 = vadd.f32 %v3323_v9, %v2868_v31  ;;  %v5788_v47 = vshll.u32 %v5752_v38, 16 }
 0x1ae   : > { %v15880_v49 = vpop.f32.mrf.mxu0  ;;  %v15889_v19 = vpop.f32.mrf.mxu1 }
 0x1af   : > { %19357 = vst [vmem:[#allocation22_spill] sm:$0xff] %v15880_v49  ;;  %v15885_v63 = vadd.f32 %v13043_v5, %v2871_v0  ;;  %19359 = vst [vmem:[#allocation26_spill] sm:$0xff] %v15889_v19  ;;  %v5780_v5 = vrot.slane %v5778_v55, 5  ;;  %v5784_v0 = vrot.slane %v5782_v62, 4  ;;  %v5775_v19 = vor.u32 %v5774_v52, %v5771_v25 }
 0x1b0   : > { %v15887_v12 = vpop.f32.mrf.mxu0  ;;  %v15893_v9 = vpop.f32.mrf.mxu1  ;;  %v5790_v43 = vrot.slane %v5788_v47, 5 }
 0x1b1   : > { %19358 = vst [vmem:[#allocation24_spill] sm:$0xff] %v15887_v12  ;;  %19361 = vst [vmem:[#allocation33_spill] sm:$0xff] %v15893_v9  ;;  %v5785_v49 = vor.u32 %v5784_v0, %v5780_v5  ;;  %v5776_v9 = vrot.slane %v5775_v19, 4 }
 0x1b2   : > { %v15891_v45 = vpop.f32.mrf.mxu0  ;;  %v15897_v32 = vpop.f32.mrf.mxu1 }
 0x1b3   : > { %19360 = vst [vmem:[#allocation32_spill] sm:$0xff] %v15891_v45  ;;  %19362 = vst [vmem:[#allocation34_spill] sm:$0xff] %v15897_v32  ;;  %v5786_v33 = vrot.slane %v5785_v49, 4  ;;  %v5781_v32 = vsel %vm14007_vm2, %v5776_v9, %v5780_v5 }
 0x1b4   : > { %v15895_v31 = vpop.f32.mrf.mxu0  ;;  %v15901_v24 = vpop.f32.mrf.mxu1 }
 0x1b5   : > { %v5791_v62 = vsel %vm14007_vm2, %v5786_v33, %v5790_v43 }
 0x1b6   : > { %v15899_v12 = vpop.f32.mrf.mxu0  ;;  %v11865_v25 = vcombine.low %v5781_v32, %v5791_v62 }
 0x1b7   : > { %v15911_v55 = vpop.f32.mrf.mxu1 }
 0x1b8   : > { %v15903_v45 = vpop.f32.mrf.mxu0  ;;  %13204 = vmatprep.mubr.bf16.mxu1 %v11865_v25 }
 0x1b9   : > { %v15916_v0 = vpop.f32.mrf.mxu1 }
 0x1ba   : > { %v15905_v58 = vpop.f32.mrf.mxu0 }
 0x1bb   : > { %v15920_v47 = vpop.f32.mrf.mxu1 }
 0x1bc   : > { %v13067_v52 = vpop.f32.mrf.mxu0 }
 0x1bd   : > { %v15914_v38 = vadd.f32 %v13067_v52, %v15772_v22  ;;  %v15925_v5 = vpop.f32.mrf.mxu1  ;;  %v13771_v52 = vld [vmem:[%s19258_s2 + $0xb8] sm:$0xff]  }
 0x1be   : > { %v15918_v49 = vpop.f32.mrf.mxu0  ;;  %13284 = vmatprep.subr.bf16.mxu1 %v13771_v52 }
 0x1c0   : > { %v13070_v19 = vpop.f32.mrf.mxu0 }
 0x1c1   : > { %v15923_v9 = vadd.f32 %v13070_v19, %v15782_v48 }
 0x1c2   : > { %v3630_v33 = vpop.f32.mrf.mxu0  ;;  %v15930_v22 = vpop.f32.mrf.mxu1 }
 0x1c3   : > { %v15928_v32 = vadd.f32 %v3630_v33, %v15786_v39  ;;  %19364 = vst [vmem:[#allocation36_spill] sm:$0xff] %v15930_v22 }
 0x1c4   : > { %v13071_v43 = vpop.f32.mrf.mxu0  ;;  %v15940_v48 = vpop.f32.mrf.mxu1 }
 0x1c5   : > { %19363 = vst [vmem:[#allocation35_spill] sm:$0xff] %v15928_v32  ;;  %v15933_v62 = vadd.f32 %v13071_v43, %v15790_v51  ;;  %19366 = vst [vmem:[#allocation38_spill] sm:$0xff] %v15940_v48 }
 0x1c6   : > { %v15935_v25 = vpop.f32.mrf.mxu0  ;;  %v15942_v37 = vpop.f32.mrf.mxu1 }
 0x1c7   : > { %19365 = vst [vmem:[#allocation37_spill] sm:$0xff] %v15933_v62  ;;  %19367 = vst [vmem:[#allocation39_spill] sm:$0xff] %v15942_v37 }
 0x1c8   : > { %v13074_v19 = vpop.f32.mrf.mxu0  ;;  %v15947_v32 = vpop.f32.mrf.mxu1 }
 0x1c9   : > { %v15945_v39 = vadd.f32 %v13074_v19, %v15802_v50 }
 0x1ca   : > { %v3646_v33 = vpop.f32.mrf.mxu0 }
 0x1cb   : > { %19368 = vst [vmem:[#allocation40_spill] sm:$0xff] %v15945_v39  ;;  %v15950_v51 = vadd.f32 %v3646_v33, %v15805_v16 }
 0x1cc   : > { %v13075_v43 = vpop.f32.mrf.mxu0  ;;  %v15955_v22 = vpop.f32.mrf.mxu1 }
 0x1cd   : > { %19369 = vst [vmem:[#allocation41_spill] sm:$0xff] %v15950_v51  ;;  %v15953_v62 = vadd.f32 %v13075_v43, %v15812_v7  ;;  %19371 = vst [vmem:[#allocation43_spill] sm:$0xff] %v15955_v22 }
 0x1ce   : > { %v15957_v48 = vpop.f32.mrf.mxu0  ;;  %v15959_v52 = vpop.f32.mrf.mxu1 }
 0x1cf   : > { %19370 = vst [vmem:[#allocation42_spill] sm:$0xff] %v15953_v62  ;;  %19372 = vst [vmem:[#allocation44_spill] sm:$0xff] %v15959_v52 }
 0x1d0   : > { %v13078_v37 = vpop.f32.mrf.mxu0  ;;  %v15964_v19 = vpop.f32.mrf.mxu1 }
 0x1d1   : > { %v15962_v50 = vadd.f32 %v13078_v37, %v15821_v8  ;;  %19374 = vst [vmem:[#allocation46_spill] sm:$0xff] %v15964_v19  ;;  %v19395_v19 = vld [vmem:[#allocation29_spill] sm:$0xff] }
 0x1d2   : > { %v3662_v39 = vpop.f32.mrf.mxu0  ;;  %v15969_v33 = vpop.f32.mrf.mxu1 }
 0x1d3   : > { %19373 = vst [vmem:[#allocation45_spill] sm:$0xff] %v15962_v50  ;;  %v15967_v16 = vadd.f32 %v3662_v39, %v15827_v54  ;;  %19376 = vst [vmem:[#allocation48_spill] sm:$0xff] %v15969_v33 }
 0x1d4   : > { %v13079_v7 = vpop.f32.mrf.mxu0 }
 0x1d5   : > { %19375 = vst [vmem:[#allocation47_spill] sm:$0xff] %v15967_v16  ;;  %v15972_v43 = vadd.f32 %v13079_v7, %v15831_v26 }
 0x1d6   : > { %v15974_v62 = vpop.f32.mrf.mxu0 }
 0x1d7   : > { %19377 = vst [vmem:[#allocation49_spill] sm:$0xff] %v15972_v43  ;;  %v15976_v51 = vpop.f32.mrf.mxu1 }
 0x1d8   : > { %19378 = vst [vmem:[#allocation50_spill] sm:$0xff] %v15976_v51  ;;  %v13082_v52 = vpop.f32.mrf.mxu0 }
 0x1d9   : > { %v15979_v37 = vadd.f32 %v13082_v52, %v15843_v35  ;;  %v15981_v8 = vpop.f32.mrf.mxu1 }
 0x1da   : > { %19380 = vst [vmem:[#allocation52_spill] sm:$0xff] %v15981_v8  ;;  %v3678_v50 = vpop.f32.mrf.mxu0  ;;  %v19388_v8 = vld [vmem:[#allocation12_spill] sm:$0xff] }
 0x1db   : > { %19379 = vst [vmem:[#allocation51_spill] sm:$0xff] %v15979_v37  ;;  %v15984_v54 = vadd.f32 %v3678_v50, %v15846_v40  ;;  %v15986_v39 = vpop.f32.mrf.mxu1  ;;  %v19389_v40 = vld [vmem:[#allocation10_spill] sm:$0xff] }
 0x1dc   : > { %19382 = vst [vmem:[#allocation54_spill] sm:$0xff] %v15986_v39  ;;  %v13083_v16 = vpop.f32.mrf.mxu0  ;;  %v1187_v50 = vadd.f32 %v19389_v40, %v19388_v8  ;;  %v19390_v39 = vld [vmem:[#allocation19_spill] sm:$0xff] }
 0x1dd   : > { %19381 = vst [vmem:[#allocation53_spill] sm:$0xff] %v15984_v54  ;;  %v15989_v26 = vadd.f32 %v13083_v16, %v15850_v10  ;;  %v15991_v7 = vpop.f32.mrf.mxu1  ;;  %v19391_v10 = vld [vmem:[#allocation17_spill] sm:$0xff] }
 0x1de   : > { %19384 = vst [vmem:[#allocation56_spill] sm:$0xff] %v15991_v7  ;;  %v15993_v43 = vpop.f32.mrf.mxu0  ;;  %v1203_v16 = vadd.f32 %v19391_v10, %v19390_v39  ;;  %v19393_v7 = vld [vmem:[#allocation23_spill] sm:$0xff] }
 0x1df   : > { %19383 = vst [vmem:[#allocation55_spill] sm:$0xff] %v15989_v26  ;;  %19385 = vst [vmem:[#allocation57_spill] sm:$0xff] %v15993_v43  ;;  %v15998_v52 = vpop.f32.mrf.mxu1  ;;  %v19392_v26 = vld [vmem:[#allocation28_spill] sm:$0xff]  ;;  %v19394_v43 = vld [vmem:[#allocation30_spill] sm:$0xff] }
 0x1e0   : > { %v13086_v51 = vpop.f32.mrf.mxu0  ;;  %19387 = vst [vmem:[#allocation59_spill] sm:$0xff] %v15998_v52  ;;  %v1219_v33 = vadd.f32 %v19393_v7, %v19392_v26  ;;  %v1235_v22 = vadd.f32 %v19395_v19, %v19394_v43  ;;  %v1716_v52 = vadd.f32 %v15649_v27, %v1187_v50  ;;  %v1720_v39 = vadd.f32 %v15671_v61, %v1203_v16 }
 0x1e1   : > { %v15996_v35 = vadd.f32 %v13086_v51, %v15862_v18  ;;  %v16011_v18 = vpop.f32.mrf.mxu1  ;;  %v2091_v43 = vadd.f32 %v15528_v6, %v15557_v53  ;;  %v2099_v61 = vadd.f32 %v15601_v29, %v15633_v2  ;;  %v3341_v29 = vadd.f32 %v15724_v3, %v15741_v20 }
 0x1e2   : > { %v3694_v37 = vpop.f32.mrf.mxu0  ;;  %v1724_v40 = vadd.f32 %v15698_v42, %v1219_v33  ;;  %v1728_v26 = vadd.f32 %v15722_v28, %v1235_v22  ;;  %v2103_v42 = vadd.f32 %v15639_v30, %v1716_v52  ;;  %v2107_v6 = vadd.f32 %v15661_v4, %v1720_v39  ;;  %v19398_v4 = vld [vmem:[#allocation5_spill] sm:$0xff]  ;;  %v19402_v52 = vld [vmem:[#allocation8_spill] sm:$0xff]  ;;  %v19406_v39 = vld [vmem:[#allocation18_spill] sm:$0xff] }
 0x1e3   : > { %19386 = vst [vmem:[#allocation58_spill] sm:$0xff] %v15996_v35  ;;  %v16003_v54 = vadd.f32 %v3694_v37, %v15865_v46  ;;  %v5009_v35 = vlaneseq  ;;  %v19396_v46 = vld [vmem:[#allocation31_spill] sm:$0xff]  ;;  %v16022_v7 = vpop.f32.mrf.mxu1  ;;  %v2845_v22 = vadd.f32 %v15766_v34, %v2091_v43  ;;  %v2853_v3 = vadd.f32 %v19402_v52, %v2099_v61  ;;  %v199_v43 = vld [vmem:[%s19259_s3] sm:$0xff] }
 0x1e4   : > { %v13087_v51 = vpop.f32.mrf.mxu0  ;;  %v2087_v37 = vadd.f32 %v19396_v46, %v15520_v11  ;;  %v2095_v11 = vadd.f32 %v15565_v21, %v15592_v57  ;;  %v2111_v53 = vadd.f32 %v15685_v13, %v1724_v40  ;;  %v3340_v21 = vadd.f32 %v15709_v36, %v15731_v23  ;;  %v19400_v23 = vld [vmem:[#allocation15_spill] sm:$0xff]  ;;  %v19405_v46 = vld [vmem:[#allocation16_spill] sm:$0xff] }
 0x1e5   : > { %v16015_v8 = vadd.f32 %v13087_v51, %v15869_v56  ;;  %v16029_v56 = vpop.f32.mrf.mxu1  ;;  %v16031_v10 = vshrl.u32 %v5009_v35, 7  ;;  %v3338_v57 = vadd.f32 %v15714_v15, %v15736_v17  ;;  %v3344_v13 = vadd.f32 %v19398_v4, %v15753_v41  ;;  %v19401_v15 = vld [vmem:[#allocation13_spill] sm:$0xff]  ;;  %v19404_v41 = vld [vmem:[#allocation11_spill] sm:$0xff]  ;;  %v19409_v61 = vld [vmem:[#allocation32_spill] sm:$0xff] }
 0x1e6   : > { %v16024_v19 = vpop.f32.mrf.mxu0  ;;  %v2841_v27 = vadd.f32 %v15746_v60, %v2087_v37  ;;  %v2115_v60 = vadd.f32 %v15706_v59, %v1728_v26  ;;  %v19399_v59 = vld [vmem:[#allocation20_spill] sm:$0xff]  ;;  %v3342_v17 = vadd.f32 %v19401_v15, %v19400_v23  ;;  %v2857_v51 = vadd.f32 %v19404_v41, %v2103_v42  ;;  %v19410_v4 = vld [vmem:[#allocation7_spill] sm:$0xff]  ;;  %v19411_v23 = vld [vmem:[#allocation21_spill] sm:$0xff] }
 0x1e7   : > { %19397 = vst [vmem:[#allocation12_spill] sm:$0xff] %v16031_v10  ;;  %v5011_v36 = vsub.s32 0, %v16031_v10  ;;  %v2861_v37 = vadd.f32 %v19405_v46, %v2107_v6  ;;  %v2865_v40 = vadd.f32 %v19406_v39, %v2111_v53  ;;  %v3731_v53 = vadd.f32 %v15903_v45, %v3344_v13  ;;  %v19415_v13 = vld [vmem:[#allocation27_spill] sm:$0xff]  ;;  %v19416_v41 = vld [vmem:[#allocation26_spill] sm:$0xff]  ;;  %v19417_v46 = vld [vmem:[#allocation33_spill] sm:$0xff] }
 0x1e8   : > { %v13090_v50 = vpop.f32.mrf.mxu0  ;;  %v3339_v30 = vadd.f32 %v15728_v14, %v2841_v27  ;;  %v5047_v14 = vsub.s32 1, %v16031_v10  ;;  %v19407_v27 = vld [vmem:[#allocation22_spill] sm:$0xff]  ;;  %v3351_v15 = vadd.f32 %v19411_v23, %v2853_v3 }
 0x1e9   : > { %v16039_v28 = vadd.f32 %v13090_v50, %v15873_v44  ;;  %v2849_v44 = vadd.f32 %v19399_v59, %v2095_v11  ;;  %v2869_v50 = vadd.f32 %v19407_v27, %v2115_v60  ;;  %v3729_v59 = vadd.f32 %v15905_v58, %v3342_v17  ;;  %v19419_v27 = vld [vmem:[#allocation36_spill] sm:$0xff] }
 0x1ea   : > { %v3710_v33 = vpop.f32.mrf.mxu0  ;;  %v16058_v34 = vpop.f32.mrf.mxu1  ;;  %v3726_v6 = vadd.f32 %v15899_v12, %v3339_v30  ;;  %v19414_v12 = vld [vmem:[#allocation25_spill] sm:$0xff]  ;;  %v4485_v39 = vadd.f32 %v15911_v55, %v3731_v53  ;;  %v19428_v53 = vld [vmem:[#allocation42_spill] sm:$0xff] }
 0x1eb   : > { %v16052_v2 = vadd.f32 %v3710_v33, %v15878_v1  ;;  %v19403_v1 = vld [vmem:[#allocation6_spill] sm:$0xff]  ;;  %v3725_v33 = vadd.f32 %v19409_v61, %v3338_v57  ;;  %v3347_v42 = vadd.f32 %v19410_v4, %v2849_v44  ;;  %v16091_v57 = vrot.slane %v199_v43, %v5047_v14  ;;  %v19423_v61 = vld [vmem:[#allocation39_spill] sm:$0xff] }
 0x1ec   : > { %v13091_v35 = vpop.f32.mrf.mxu0  ;;  %v3343_v16 = vadd.f32 %v19403_v1, %v2845_v22  ;;  %v16072_v26 = vpop.f32.mrf.mxu1  ;;  %v3728_v22 = vadd.f32 %v15895_v31, %v3341_v29  ;;  %v19412_v31 = vld [vmem:[#allocation9_spill] sm:$0xff]  ;;  %v19413_v44 = vld [vmem:[#allocation14_spill] sm:$0xff]  ;;  %v3363_v30 = vadd.f32 %v19414_v12, %v2865_v40  ;;  %v3367_v17 = vadd.f32 %v19415_v13, %v2869_v50  ;;  %v19425_v4 = vld [vmem:[#allocation43_spill] sm:$0xff] }
 0x1ed   : > { %v16065_v20 = vadd.f32 %v13091_v35, %v15885_v63  ;;  %v19408_v63 = vld [vmem:[#allocation24_spill] sm:$0xff]  ;;  %v3355_v29 = vadd.f32 %v19412_v31, %v2857_v51  ;;  %v3359_v1 = vadd.f32 %v19413_v44, %v2861_v37  ;;  %v3734_v45 = vadd.f32 %v15935_v25, %v3347_v42  ;;  %v19426_v42 = vld [vmem:[#allocation41_spill] sm:$0xff]  ;;  %v19433_v12 = vld [vmem:[#allocation50_spill] sm:$0xff] }
 0x1ee   : > { %v3727_v11 = vadd.f32 %v19408_v63, %v3340_v21  ;;  %v16085_v35 = vpop.f32.mrf.mxu1  ;;  %v3730_v60 = vadd.f32 %v15918_v49, %v3343_v16  ;;  %v3713_v52 = vpop.f32.mrf.mxu0  ;;  %v16089_v21 = vrot.slane %v199_v43, %v5011_v36  ;;  %v4479_v49 = vadd.f32 %v19417_v46, %v3725_v33  ;;  %v19418_v16 = vld [vmem:[#allocation34_spill] sm:$0xff]  ;;  %v19420_v63 = vld [vmem:[#allocation35_spill] sm:$0xff]  ;;  %v19432_v44 = vld [vmem:[#allocation45_spill] sm:$0xff] }
 0x1ef   : > { %v4482_v36 = vadd.f32 %v19418_v16, %v3728_v22  ;;  %v4480_v14 = vadd.f32 %v15901_v24, %v3726_v6  ;;  %v16104_v51 = vadd.f32 %v15916_v0, %v3729_v59  ;;  %v3738_v37 = vadd.f32 %v15957_v48, %v3351_v15  ;;  %v19421_v0 = vld [vmem:[#allocation38_spill] sm:$0xff]  ;;  %v19422_v48 = vld [vmem:[#allocation37_spill] sm:$0xff]  ;;  %v19424_v22 = vld [vmem:[#allocation40_spill] sm:$0xff] }
 0x1f0   : > { %v4451_v58 = vpop.f32.mrf.mxu1  ;;  %v4481_v3 = vadd.f32 %v19416_v41, %v3727_v11  ;;  %v16109_v25 = vadd.f32 %v15920_v47, %v15914_v38  ;;  %v16112_v43 = vadd.f32 %v15925_v5, %v3730_v60  ;;  %v16116_v50 = vadd.f32 %v19419_v27, %v15923_v9  ;;  %v19429_v59 = vld [vmem:[#allocation46_spill] sm:$0xff]  ;;  %v19430_v15 = vld [vmem:[#allocation57_spill] sm:$0xff]  ;;  %v19435_v46 = vld [vmem:[#allocation52_spill] sm:$0xff] }
 0x1f1   : > { %v3742_v24 = vadd.f32 %v15974_v62, %v3355_v29  ;;  %v16121_v11 = vadd.f32 %v19421_v0, %v19420_v63  ;;  %v16125_v33 = vadd.f32 %v19423_v61, %v19422_v48  ;;  %v16128_v38 = vadd.f32 %v15947_v32, %v3734_v45  ;;  %v19427_v62 = vld [vmem:[#allocation44_spill] sm:$0xff]  ;;  %v19436_v27 = vld [vmem:[#allocation49_spill] sm:$0xff] }
 0x1f2   : > { %v16132_v9 = vadd.f32 %v19425_v4, %v19424_v22  ;;  %v16136_v6 = vadd.f32 %v19427_v62, %v19426_v42  ;;  %v16140_v23 = vadd.f32 %v19429_v59, %v19428_v53  ;;  %v3746_v60 = vadd.f32 %v19430_v15, %v3359_v1  ;;  %v19431_v29 = vld [vmem:[#allocation48_spill] sm:$0xff]  ;;  %v19439_v22 = vld [vmem:[#allocation51_spill] sm:$0xff]  ;;  %v19441_v53 = vld [vmem:[#allocation53_spill] sm:$0xff] }
 0x1f3   : > { %v13138_v40 = vpop.f32.mrf.mxu1  ;;  %v16144_v32 = vadd.f32 %v19431_v29, %v3738_v37  ;;  %v16148_v45 = vadd.f32 %v19433_v12, %v19432_v44  ;;  %v19438_v63 = vld [vmem:[#allocation56_spill] sm:$0xff]  ;;  %v3750_v0 = vadd.f32 %v16024_v19, %v3363_v30  ;;  %v16171_v59 = vadd.f32 %v16011_v18, %v19441_v53  ;;  %v19442_v15 = vld [vmem:[#allocation55_spill] sm:$0xff]  ;;  %v19443_v18 = vld [vmem:[#allocation58_spill] sm:$0xff] }
 0x1f4   : > { %v16160_v37 = vadd.f32 %v19438_v63, %v3742_v24  ;;  %v16175_v24 = vadd.f32 %v16022_v7, %v19442_v15  ;;  %v16178_v19 = vadd.f32 %v16029_v56, %v3746_v60  ;;  %v3754_v30 = vadd.f32 %v3713_v52, %v3367_v17 }
 0x1f5   : > { %v4464_v47 = vpop.f32.mrf.mxu1  ;;  %v16188_v7 = vadd.f32 %v16072_v26, %v16003_v54  ;;  %v16192_v56 = vadd.f32 %v16085_v35, %v16015_v8  ;;  %v16194_v52 = vadd.f32 %v4451_v58, %v3750_v0  ;;  %v16212_v0 = vld [vmem:[%s19258_s2 + $0xf8] sm:$0xff]  }
 0x1f6   : > { %v16202_v54 = vadd.f32 %v4464_v47, %v16052_v2  ;;  %13332 = vmatprep.subr.bf16.mxu0 %v16212_v0 }
 0x1f7   : > { %v13158_v55 = vpop.f32.mrf.mxu0  ;;  %v13139_v48 = vpop.f32.mrf.mxu1 }
 0x1f8   : > { %v4979_v5 = vadd.f32 %v13158_v55, %v4481_v3  ;;  %v19434_v3 = vld [vmem:[#allocation47_spill] sm:$0xff]  ;;  %v19437_v55 = vld [vmem:[#allocation54_spill] sm:$0xff]  ;;  %v16205_v26 = vadd.f32 %v13139_v48, %v16065_v20 }
 0x1f9   : > { %v4850_v31 = vpop.f32.mrf.mxu0  ;;  %v16153_v16 = vadd.f32 %v19435_v46, %v19434_v3  ;;  %v16157_v1 = vadd.f32 %v19437_v55, %v19436_v27  ;;  %v4467_v17 = vpop.f32.mrf.mxu1 }
 0x1fa   : > { %v5015_v13 = vmul.f32 %v16089_v21, %v4979_v5  ;;  %v4977_v41 = vadd.f32 %v4850_v31, %v4479_v49  ;;  %v19440_v5 = vld [vmem:[#allocation59_spill] sm:$0xff]  ;;  %v16207_v58 = vadd.f32 %v4467_v17, %v3754_v30 }
 0x1fb   : > { %v13159_v61 = vpop.f32.mrf.mxu0  ;;  %v16165_v4 = vadd.f32 %v19440_v5, %v19439_v22 }
 0x1fc   : > { %v5051_v49 = vadd.f32 %v16091_v57, %v5015_v13  ;;  %v5013_v42 = vmul.f32 %v16089_v21, %v4977_v41  ;;  %v4980_v62 = vadd.f32 %v13159_v61, %v4482_v36  ;;  %v16184_v13 = vadd.f32 %v16058_v34, %v19443_v18 }
 0x1fd   : > { %v4853_v31 = vpop.f32.mrf.mxu0  ;;  %v16199_v34 = vadd.f32 %v13138_v40, %v16039_v28 }
 0x1fe   : > { %v5083_v29 = vmax.f32 %v5051_v49, 0.0  ;;  %v5049_v44 = vadd.f32 %v16091_v57, %v5013_v42  ;;  %v5016_v36 = vmul.f32 %v16089_v21, %v4980_v62  ;;  %v4978_v12 = vadd.f32 %v4853_v31, %v4480_v14  ;;  %v5599_v49 = vld [vmem:[#allocation2 + $0x18] sm:$0xf] }
 0x1ff   : > { %v13162_v60 = vpop.f32.mrf.mxu0 }
 0x200   : > { %v12294_v41 = vpack.c.bf16 %v5083_v29, %v5083_v29  ;;  %v5081_v3 = vmax.f32 %v5049_v44, 0.0  ;;  %v5052_v14 = vadd.f32 %v16091_v57, %v5016_v36  ;;  %v5014_v46 = vmul.f32 %v16089_v21, %v4978_v12  ;;  %v5590_v36 = vld [vmem:[#allocation2 + $0xc] sm:$0xf] }
 0x201   : > { %v4983_v8 = vadd.f32 %v13162_v60, %v4485_v39  ;;  %v4866_v35 = vpop.f32.mrf.mxu0 }
 0x202   : > { %v5284_v27 = vshrl.u32 %v12294_v41, 16  ;;  %v12292_v55 = vpack.c.bf16 %v5081_v3, %v5081_v3  ;;  %v5084_v63 = vmax.f32 %v5052_v14, 0.0  ;;  %v5287_v28 = vshll.u32 %v12294_v41, 16 }
 0x203   : > { %v5050_v40 = vadd.f32 %v16091_v57, %v5014_v46  ;;  %v5019_v2 = vmul.f32 %v16089_v21, %v4983_v8  ;;  %v4981_v20 = vadd.f32 %v4866_v35, %v16104_v51  ;;  %v13163_v47 = vpop.f32.mrf.mxu0 }
 0x204   : > { %v5286_v39 = vrot.slane %v5284_v27, 7  ;;  %v5267_v48 = vshrl.u32 %v12292_v55, 16  ;;  %v5270_v61 = vshll.u32 %v12292_v55, 16  ;;  %v12295_v22 = vpack.c.bf16 %v5084_v63, %v5084_v63  ;;  %v5603_v27 = vld [vmem:[#allocation2 + $0x20] sm:$0x1] }
 0x205   : > { %v5082_v42 = vmax.f32 %v5050_v40, 0.0  ;;  %v5055_v62 = vadd.f32 %v16091_v57, %v5019_v2  ;;  %v5017_v53 = vmul.f32 %v16089_v21, %v4981_v20  ;;  %v4984_v51 = vadd.f32 %v13163_v47, %v16109_v25  ;;  %v4869_v15 = vpop.f32.mrf.mxu0 }
 0x206   : > { %v5289_v30 = vor.u32 %v5287_v28, %v5286_v39  ;;  %v5290_v31 = vrot.slane %v5286_v39, 4  ;;  %v5269_v29 = vrot.slane %v5267_v48, 7  ;;  %v5292_v44 = vshrl.u32 %v12295_v22, 16 }
 0x207   : > { %v5295_v12 = vshll.u32 %v12295_v22, 16  ;;  %v12293_v18 = vpack.c.bf16 %v5082_v42, %v5082_v42  ;;  %v5087_v17 = vmax.f32 %v5055_v62, 0.0  ;;  %v5053_v60 = vadd.f32 %v16091_v57, %v5017_v53  ;;  %v13166_v41 = vpop.f32.mrf.mxu0 }
 0x208   : > { %v5600_v3 = vsel %vm16220_vm11, %v5289_v30, %v5599_v49  ;;  %v5272_v14 = vor.u32 %v5270_v61, %v5269_v29  ;;  %v5273_v46 = vrot.slane %v5269_v29, 4  ;;  %v5294_v8 = vrot.slane %v5292_v44, 7  ;;  %v5596_v29 = vld [vmem:[#allocation2 + $0x14] sm:$0x1] }
 0x209   : > { %5601 = vst [vmem:[#allocation2 + $0x18] sm:$0xf] %v5600_v3  ;;  %v5275_v55 = vshrl.u32 %v12293_v18, 16  ;;  %v5278_v63 = vshll.u32 %v12293_v18, 16  ;;  %v12298_v28 = vpack.c.bf16 %v5087_v17, %v5087_v17  ;;  %v5085_v40 = vmax.f32 %v5053_v60, 0.0  ;;  %v4882_v2 = vpop.f32.mrf.mxu0 }
 0x20a   : > { %v5591_v20 = vsel %vm16220_vm11, %v5272_v14, %v5590_v36  ;;  %v5297_v47 = vor.u32 %v5295_v12, %v5294_v8  ;;  %v5299_v39 = vrot.slane %v5294_v8, 4  ;;  %v5020_v48 = vmul.f32 %v16089_v21, %v4984_v51  ;;  %v5613_v3 = vld [vmem:[#allocation2 + $0x30] sm:$0xf] }
 0x20b   : > { %5592 = vst [vmem:[#allocation2 + $0xc] sm:$0xf] %v5591_v20  ;;  %v5277_v61 = vrot.slane %v5275_v55, 7  ;;  %v5318_v22 = vshrl.u32 %v12298_v28, 16  ;;  %v5321_v49 = vshll.u32 %v12298_v28, 16  ;;  %v12296_v42 = vpack.c.bf16 %v5085_v40, %v5085_v40  ;;  %v13167_v62 = vpop.f32.mrf.mxu0 }
 0x20c   : > { %v5298_v53 = vsel %vm16232_vm12, %v5290_v31, %v5297_v47  ;;  %v5604_v30 = vsel %vm16238_vm13, %v5299_v39, %v5603_v27  ;;  %v5056_v44 = vadd.f32 %v16091_v57, %v5020_v48  ;;  %v4982_v36 = vadd.f32 %v4869_v15, %v16112_v43 }
 0x20d   : > { %5602 = vst [vmem:[#allocation2 + $0x1c] sm:$0xf] %v5298_v53  ;;  %5605 = vst [vmem:[#allocation2 + $0x20] sm:$0x1] %v5604_v30  ;;  %v5280_v51 = vor.u32 %v5278_v63, %v5277_v61  ;;  %v5282_v12 = vrot.slane %v5277_v61, 4  ;;  %v5320_v18 = vrot.slane %v5318_v22, 7  ;;  %v4885_v60 = vpop.f32.mrf.mxu0  ;;  %v4987_v55 = vadd.f32 %v13166_v41, %v16116_v50 }
 0x20e   : > { %v5301_v17 = vshrl.u32 %v12296_v42, 16  ;;  %v5304_v14 = vshll.u32 %v12296_v42, 16  ;;  %v5088_v8 = vmax.f32 %v5056_v44, 0.0  ;;  %v5018_v31 = vmul.f32 %v16089_v21, %v4982_v36  ;;  %v5606_v41 = vld [vmem:[#allocation2 + $0x24] sm:$0xf] }
 0x20f   : > { %v5281_v27 = vsel %vm16232_vm12, %v5273_v46, %v5280_v51  ;;  %v5597_v43 = vsel %vm16238_vm13, %v5282_v12, %v5596_v29  ;;  %v5323_v15 = vor.u32 %v5321_v49, %v5320_v18  ;;  %v5324_v28 = vrot.slane %v5320_v18, 4  ;;  %v13170_v63 = vpop.f32.mrf.mxu0 }
 0x210   : > { %5593 = vst [vmem:[#allocation2 + $0x10] sm:$0xf] %v5281_v27  ;;  %5598 = vst [vmem:[#allocation2 + $0x14] sm:$0x1] %v5597_v43  ;;  %v16257_v40 = vrot.slane %v5301_v17, 7  ;;  %v12299_v20 = vpack.c.bf16 %v5088_v8, %v5088_v8  ;;  %v5054_v47 = vadd.f32 %v16091_v57, %v5018_v31  ;;  %v5023_v39 = vmul.f32 %v16089_v21, %v4987_v55 }
 0x211   : > { %v5614_v50 = vsel %vm16220_vm11, %v5323_v15, %v5613_v3  ;;  %v4985_v46 = vadd.f32 %v4882_v2, %v16121_v11  ;;  %v4988_v48 = vadd.f32 %v13167_v62, %v16125_v33  ;;  %v4986_v61 = vadd.f32 %v4885_v60, %v16128_v38  ;;  %v4898_v30 = vpop.f32.mrf.mxu0  ;;  %v5617_v38 = vld [vmem:[#allocation2 + $0x38] sm:$0x1] }
 0x212   : > { %5615 = vst [vmem:[#allocation2 + $0x30] sm:$0xf] %v5614_v50  ;;  %v5306_v22 = vor.u32 %v5304_v14, %v16257_v40  ;;  %v5307_v49 = vrot.slane %v16257_v40, 4  ;;  %v5326_v42 = vshrl.u32 %v12299_v20, 16  ;;  %v5329_v53 = vshll.u32 %v12299_v20, 16 }
 0x213   : > { %v5086_v29 = vmax.f32 %v5054_v47, 0.0  ;;  %v5059_v44 = vadd.f32 %v16091_v57, %v5023_v39  ;;  %v5021_v36 = vmul.f32 %v16089_v21, %v4985_v46  ;;  %v5024_v51 = vmul.f32 %v16089_v21, %v4988_v48  ;;  %v13171_v55 = vpop.f32.mrf.mxu0  ;;  %v5610_v48 = vld [vmem:[#allocation2 + $0x2c] sm:$0x1] }
 0x214   : > { %v5607_v11 = vsel %vm16220_vm11, %v5306_v22, %v5606_v41  ;;  %v5328_v33 = vrot.slane %v5326_v42, 7  ;;  %v5022_v2 = vmul.f32 %v16089_v21, %v4986_v61  ;;  %v4991_v62 = vadd.f32 %v13170_v63, %v16132_v9 }
 0x215   : > { %5608 = vst [vmem:[#allocation2 + $0x24] sm:$0xf] %v5607_v11  ;;  %v12297_v12 = vpack.c.bf16 %v5086_v29, %v5086_v29  ;;  %v5091_v18 = vmax.f32 %v5059_v44, 0.0  ;;  %v5057_v17 = vadd.f32 %v16091_v57, %v5021_v36  ;;  %v5060_v60 = vadd.f32 %v16091_v57, %v5024_v51  ;;  %v4901_v29 = vpop.f32.mrf.mxu0  ;;  %v5627_v11 = vld [vmem:[#allocation2 + $0x48] sm:$0xf] }
 0x216   : > { %v5331_v3 = vor.u32 %v5329_v53, %v5328_v33  ;;  %v5333_v14 = vrot.slane %v5328_v33, 4  ;;  %v5058_v8 = vadd.f32 %v16091_v57, %v5022_v2  ;;  %v5027_v31 = vmul.f32 %v16089_v21, %v4991_v62 }
 0x217   : > { %v5309_v27 = vshrl.u32 %v12297_v12, 16  ;;  %v5312_v43 = vshll.u32 %v12297_v12, 16  ;;  %v12302_v15 = vpack.c.bf16 %v5091_v18, %v5091_v18  ;;  %v5089_v40 = vmax.f32 %v5057_v17, 0.0 }
 0x218   : > { %v5332_v9 = vsel %vm16232_vm12, %v5324_v28, %v5331_v3  ;;  %v5618_v63 = vsel %vm16238_vm13, %v5333_v14, %v5617_v38  ;;  %v5092_v20 = vmax.f32 %v5060_v60, 0.0  ;;  %v5090_v47 = vmax.f32 %v5058_v8, 0.0  ;;  %v13174_v8 = vpop.f32.mrf.mxu0 }
 0x219   : > { %5616 = vst [vmem:[#allocation2 + $0x34] sm:$0xf] %v5332_v9  ;;  %5619 = vst [vmem:[#allocation2 + $0x38] sm:$0x1] %v5618_v63  ;;  %v5311_v39 = vrot.slane %v5309_v27, 7  ;;  %v5352_v50 = vshrl.u32 %v12302_v15, 16  ;;  %v12300_v46 = vpack.c.bf16 %v5089_v40, %v5089_v40  ;;  %v5063_v42 = vadd.f32 %v16091_v57, %v5027_v31 }
 0x21a   : > { %v5355_v41 = vshll.u32 %v12302_v15, 16  ;;  %v12303_v61 = vpack.c.bf16 %v5092_v20, %v5092_v20  ;;  %v12301_v22 = vpack.c.bf16 %v5090_v47, %v5090_v47  ;;  %v4989_v53 = vadd.f32 %v4898_v30, %v16136_v6  ;;  %v5620_v27 = vld [vmem:[#allocation2 + $0x3c] sm:$0xf] }
 0x21b   : > { %v5314_v28 = vor.u32 %v5312_v43, %v5311_v39  ;;  %v5316_v44 = vrot.slane %v5311_v39, 4  ;;  %v5354_v36 = vrot.slane %v5352_v50, 7  ;;  %v5335_v51 = vshrl.u32 %v12300_v46, 16  ;;  %v5631_v43 = vld [vmem:[#allocation2 + $0x50] sm:$0x1] }
 0x21c   : > { %v5338_v33 = vshll.u32 %v12300_v46, 16  ;;  %v5360_v38 = vshrl.u32 %v12303_v61, 16  ;;  %v5363_v2 = vshll.u32 %v12303_v61, 16  ;;  %v5343_v62 = vshrl.u32 %v12301_v22, 16  ;;  %v5624_v39 = vld [vmem:[#allocation2 + $0x44] sm:$0x1] }
 0x21d   : > { %v5315_v12 = vsel %vm16232_vm12, %v5307_v49, %v5314_v28  ;;  %v5611_v18 = vsel %vm16238_vm13, %v5316_v44, %v5610_v48  ;;  %v5357_v17 = vor.u32 %v5355_v41, %v5354_v36  ;;  %v5358_v60 = vrot.slane %v5354_v36, 4 }
 0x21e   : > { %5609 = vst [vmem:[#allocation2 + $0x28] sm:$0xf] %v5315_v12  ;;  %5612 = vst [vmem:[#allocation2 + $0x2c] sm:$0x1] %v5611_v18  ;;  %v5337_v6 = vrot.slane %v5335_v51, 7  ;;  %v5362_v30 = vrot.slane %v5360_v38, 7  ;;  %v5025_v49 = vmul.f32 %v16089_v21, %v4989_v53  ;;  %v4992_v40 = vadd.f32 %v13171_v55, %v16140_v23 }
 0x21f   : > { %v5345_v3 = vrot.slane %v5343_v62, 7  ;;  %v5346_v14 = vshll.u32 %v12301_v22, 16  ;;  %v5628_v31 = vsel %vm16220_vm11, %v5357_v17, %v5627_v11  ;;  %v5095_v15 = vmax.f32 %v5063_v42, 0.0  ;;  %v4914_v42 = vpop.f32.mrf.mxu0  ;;  %v5706_v53 = vld [vmem:[#allocation2 + $0xc] sm:$0xf] }
 0x220   : > { %5629 = vst [vmem:[#allocation2 + $0x48] sm:$0xf] %v5628_v31  ;;  %v5340_v9 = vor.u32 %v5338_v33, %v5337_v6  ;;  %v5341_v63 = vrot.slane %v5337_v6, 4  ;;  %v5365_v20 = vor.u32 %v5363_v2, %v5362_v30  ;;  %v5367_v47 = vrot.slane %v5362_v30, 4 }
 0x221   : > { %v5348_v50 = vor.u32 %v5346_v14, %v5345_v3  ;;  %v5350_v41 = vrot.slane %v5345_v3, 4  ;;  %v12306_v46 = vpack.c.bf16 %v5095_v15, %v5095_v15  ;;  %v5061_v48 = vadd.f32 %v16091_v57, %v5025_v49  ;;  %v16313_v31 = vpop.f32.mrf.mxu0  ;;  %v16321_v49 = vld [vmem:[#allocation2 + $0x10] sm:$0xf] }
 0x222   : > { %v5621_v61 = vsel %vm16220_vm11, %v5340_v9, %v5620_v27  ;;  %v5366_v22 = vsel %vm16232_vm12, %v5358_v60, %v5365_v20  ;;  %v5632_v23 = vsel %vm16238_vm13, %v5367_v47, %v5631_v43  ;;  %v5028_v55 = vmul.f32 %v16089_v21, %v4992_v40  ;;  %v5641_v60 = vld [vmem:[#allocation2 + $0x60] sm:$0xf] }
 0x223   : > { %5622 = vst [vmem:[#allocation2 + $0x3c] sm:$0xf] %v5621_v61  ;;  %5630 = vst [vmem:[#allocation2 + $0x4c] sm:$0xf] %v5366_v22  ;;  %v5349_v28 = vsel %vm16232_vm12, %v5341_v63, %v5348_v50  ;;  %v5625_v44 = vsel %vm16238_vm13, %v5350_v41, %v5624_v39  ;;  %v5386_v36 = vshrl.u32 %v12306_v46, 16  ;;  %v5389_v51 = vshll.u32 %v12306_v46, 16 }
 0x224   : > { %5633 = vst [vmem:[#allocation2 + $0x50] sm:$0x1] %v5632_v23  ;;  %5623 = vst [vmem:[#allocation2 + $0x40] sm:$0xf] %v5349_v28  ;;  %v5093_v11 = vmax.f32 %v5061_v48, 0.0  ;;  %v5064_v33 = vadd.f32 %v16091_v57, %v5028_v55  ;;  %v4990_v38 = vadd.f32 %v4901_v29, %v16144_v32  ;;  %v4995_v2 = vadd.f32 %v13174_v8, %v16148_v45  ;;  %v4917_v48 = vpop.f32.mrf.mxu0  ;;  %v13782_v28 = vld [vmem:[%s19258_s2 + $0xf0] sm:$0xff]  }
 0x225   : > { %5626 = vst [vmem:[#allocation2 + $0x44] sm:$0x1] %v5625_v44  ;;  %v16308_v62 = vrot.slane %v5386_v36, 7  ;;  %v4993_v12 = vadd.f32 %v4914_v42, %v16153_v16  ;;  %v5793_v18 = vshrl.u32 %v5706_v53, 16  ;;  %v5796_v17 = vshll.u32 %v5706_v53, 16 }
 0x226   : > { %v12304_v6 = vpack.c.bf16 %v5093_v11, %v5093_v11  ;;  %v5096_v30 = vmax.f32 %v5064_v33, 0.0  ;;  %v5026_v3 = vmul.f32 %v16089_v21, %v4990_v38  ;;  %v5031_v14 = vmul.f32 %v16089_v21, %v4995_v2  ;;  %v5708_v46 = vld [vmem:[#allocation2 + $0x18] sm:$0xf]  ;;  %v5634_v61 = vld [vmem:[#allocation2 + $0x54] sm:$0xf] }
 0x227   : > { %v5391_v27 = vor.u32 %v5389_v51, %v16308_v62  ;;  %v5392_v32 = vrot.slane %v16308_v62, 4  ;;  %v5029_v45 = vmul.f32 %v16089_v21, %v4993_v12  ;;  %v16318_v29 = vrot.slane %v5793_v18, 4  ;;  %v5645_v11 = vld [vmem:[#allocation2 + $0x68] sm:$0x1] }
 0x228   : > { %v5369_v16 = vshrl.u32 %v12304_v6, 16  ;;  %v5372_v8 = vshll.u32 %v12304_v6, 16  ;;  %v12307_v43 = vpack.c.bf16 %v5096_v30, %v5096_v30  ;;  %v5062_v15 = vadd.f32 %v16091_v57, %v5026_v3  ;;  %v13178_v30 = vpop.f32.mrf.mxu0 }
 0x229   : > { %v5642_v40 = vsel %vm16220_vm11, %v5391_v27, %v5641_v60  ;;  %v5067_v9 = vadd.f32 %v16091_v57, %v5031_v14  ;;  %v5065_v63 = vadd.f32 %v16091_v57, %v5029_v45  ;;  %v16327_v20 = vrot.slane %v5796_v17, 5  ;;  %v5638_v14 = vld [vmem:[#allocation2 + $0x5c] sm:$0x1] }
 0x22a   : > { %5643 = vst [vmem:[#allocation2 + $0x60] sm:$0xf] %v5642_v40  ;;  %v16329_v47 = vrot.slane %v5369_v16, 7  ;;  %v5394_v39 = vshrl.u32 %v12307_v43, 16  ;;  %v5397_v50 = vshll.u32 %v12307_v43, 16  ;;  %v5094_v41 = vmax.f32 %v5062_v15, 0.0 }
 0x22b   : > { %v5099_v22 = vmax.f32 %v5067_v9, 0.0  ;;  %v5097_v23 = vmax.f32 %v5065_v63, 0.0  ;;  %v5806_v55 = vshrl.u32 %v16321_v49, 16  ;;  %v11890_v42 = vcombine.low %v5706_v53, %v16321_v49  ;;  %v13784_v53 = vld [vmem:[%s19258_s2 + $0xe8] sm:$0xff]   ;;  %v5655_v9 = vld [vmem:[#allocation2 + $0x78] sm:$0xf] }
 0x22c   : > { %v5374_v44 = vor.u32 %v5372_v8, %v16329_v47  ;;  %v5375_v36 = vrot.slane %v16329_v47, 4  ;;  %v5396_v51 = vrot.slane %v5394_v39, 7  ;;  %v12305_v33 = vpack.c.bf16 %v5094_v41, %v5094_v41  ;;  %v16344_v8 = vld [vmem:[#allocation2 + $0x1c] sm:$0xf]  ;;  %v5648_v47 = vld [vmem:[#allocation2 + $0x6c] sm:$0xf] }
 0x22d   : > { %v12310_v38 = vpack.c.bf16 %v5099_v22, %v5099_v22  ;;  %v12308_v2 = vpack.c.bf16 %v5097_v23, %v5097_v23  ;;  %13253 = vmatmul.mubr.bf16.vlgmr.msra.gmra.mxu0 %v11890_v42  ;;  %v5817_v62 = vshrl.u32 %v5708_v46, 16  ;;  %v5820_v12 = vshll.u32 %v5708_v46, 16 }
 0x22e   : > { %v5635_v18 = vsel %vm16220_vm11, %v5374_v44, %v5634_v61  ;;  %v5399_v17 = vor.u32 %v5397_v50, %v5396_v51  ;;  %v5401_v60 = vrot.slane %v5396_v51, 4  ;;  %v5377_v6 = vshrl.u32 %v12305_v33, 16  ;;  %13333 = vmatpush3.bf16.msra.mxu0 %v16212_v0  ;;  %v4930_v44 = vpop.f32.mrf.mxu0  ;;  %v5710_v51 = vld [vmem:[#allocation2 + $0x24] sm:$0xf] }
 0x22f   : > { %5636 = vst [vmem:[#allocation2 + $0x54] sm:$0xf] %v5635_v18  ;;  %v5380_v3 = vshll.u32 %v12305_v33, 16  ;;  %v5420_v27 = vshrl.u32 %v12310_v38, 16  ;;  %v5423_v45 = vshll.u32 %v12310_v38, 16  ;;  %v5403_v16 = vshrl.u32 %v12308_v2, 16  ;;  %13334 = vmatprep.subr.bf16.mxu0 %v13782_v28 }
 0x230   : > { %v5400_v43 = vsel %vm16232_vm12, %v5392_v32, %v5399_v17  ;;  %v5646_v15 = vsel %vm16238_vm13, %v5401_v60, %v5645_v11  ;;  %v5379_v40 = vrot.slane %v5377_v6, 7  ;;  %v5406_v63 = vshll.u32 %v12308_v2, 16  ;;  %v13787_v32 = vld [vmem:[%s19258_s2 + $0xe0] sm:$0xff]  }
 0x231   : > { %5644 = vst [vmem:[#allocation2 + $0x64] sm:$0xf] %v5400_v43  ;;  %5647 = vst [vmem:[#allocation2 + $0x68] sm:$0x1] %v5646_v15  ;;  %v16350_v0 = vrot.slane %v5420_v27, 7  ;;  %v16352_v39 = vrot.slane %v5403_v16, 7  ;;  %v11891_v42 = vcombine.low %v5708_v46, %v16344_v8  ;;  %v4994_v18 = vadd.f32 %v4917_v48, %v16160_v37 }
 0x232   : > { %v16354_v50 = vrot.slane %v5817_v62, 4  ;;  %v16356_v41 = vrot.slane %v5820_v12, 5  ;;  %v5382_v61 = vor.u32 %v5380_v3, %v5379_v40  ;;  %v5384_v22 = vrot.slane %v5379_v40, 4  ;;  %13335 = vmatpush3.bf16.msra.mxu0 %v13782_v28  ;;  %v16367_v62 = vld [vmem:[#allocation2 + $0x28] sm:$0xf] }
 0x233   : > { %v5830_v23 = vshrl.u32 %v16344_v8, 16  ;;  %v5425_v11 = vor.u32 %v5423_v45, %v16350_v0  ;;  %v5426_v33 = vrot.slane %v16350_v0, 4  ;;  %v5408_v38 = vor.u32 %v5406_v63, %v16352_v39  ;;  %13336 = vmatprep.subr.bf16.mxu0 %v13784_v53  ;;  %13256 = vmatprep.mubr.bf16.mxu0 %v11891_v42 }
 0x234   : > { %v5409_v2 = vrot.slane %v16352_v39, 4  ;;  %v5383_v12 = vsel %vm16232_vm12, %v5375_v36, %v5382_v61  ;;  %v5639_v46 = vsel %vm16238_vm13, %v5384_v22, %v5638_v14  ;;  %v4996_v28 = vadd.f32 %v16313_v31, %v16157_v1  ;;  %v16404_v61 = vpop.f32.mrf.mxu0 }
 0x235   : > { %5637 = vst [vmem:[#allocation2 + $0x58] sm:$0xf] %v5383_v12  ;;  %5640 = vst [vmem:[#allocation2 + $0x5c] sm:$0x1] %v5639_v46  ;;  %v5656_v17 = vsel %vm16220_vm11, %v5425_v11, %v5655_v9  ;;  %v5649_v60 = vsel %vm16220_vm11, %v5408_v38, %v5648_v47  ;;  %v4999_v6 = vadd.f32 %v13178_v30, %v16165_v4  ;;  %v5841_v31 = vshrl.u32 %v5710_v51, 16 }
 0x236   : > { %v4997_v36 = vadd.f32 %v4930_v44, %v16171_v59  ;;  %5657 = vst [vmem:[#allocation2 + $0x78] sm:$0xf] %v5656_v17  ;;  %5650 = vst [vmem:[#allocation2 + $0x6c] sm:$0xf] %v5649_v60  ;;  %v5032_v3 = vmul.f32 %v16089_v21, %v4996_v28  ;;  %v5030_v1 = vmul.f32 %v16089_v21, %v4994_v18  ;;  %v5844_v37 = vshll.u32 %v5710_v51, 16  ;;  %v13789_v59 = vld [vmem:[%s19258_s2 + $0xd8] sm:$0xff]  }
 0x237   : > { %13337 = vmatpush3.bf16.msra.mxu0 %v13784_v53  ;;  %v5035_v48 = vmul.f32 %v16089_v21, %v4999_v6  ;;  %v5854_v27 = vshrl.u32 %v16367_v62, 16  ;;  %v11892_v45 = vcombine.low %v5710_v51, %v16367_v62  ;;  %v5753_v4 = vld [vmem:[#allocation2 + $0x14] sm:$0x1]  ;;  %v16393_v43 = vrot.slane %v5841_v31, 4  ;;  %v16402_v47 = vld [vmem:[#allocation2 + $0x30] sm:$0xf] }
 0x238   : > { %v5033_v14 = vmul.f32 %v16089_v21, %v4997_v36  ;;  %13338 = vmatprep.subr.bf16.mxu0 %v13787_v32  ;;  %v5068_v30 = vadd.f32 %v16091_v57, %v5032_v3  ;;  %v5066_v16 = vadd.f32 %v16091_v57, %v5030_v1  ;;  %v16395_v53 = vrot.slane %v5844_v37, 5  ;;  %v16421_v36 = vpop.f32.mrf.mxu0  ;;  %v13794_v3 = vld [vmem:[%s19258_s2 + $0xc8] sm:$0xff]  }
 0x239   : > { %v5071_v15 = vadd.f32 %v16091_v57, %v5035_v48  ;;  %13257 = vmatmul.mubr.bf16.gmra.mxu0 %v11892_v45  ;;  %v5799_v9 = vor.u32 %v16327_v20, %v16318_v29  ;;  %v5802_v63 = vshll.u32 %v16321_v49, 16  ;;  %v5808_v44 = vrot.slane %v5806_v55, 4  ;;  %v13792_v29 = vld [vmem:[%s19258_s2 + $0xd0] sm:$0xff]   ;;  %v5659_v45 = vld [vmem:[#allocation2 + $0x80] sm:$0x1] }
 0x23a   : > { %v5069_v40 = vadd.f32 %v16091_v57, %v5033_v14  ;;  %v5100_v22 = vmax.f32 %v5068_v30, 0.0  ;;  %v5098_v42 = vmax.f32 %v5066_v16, 0.0  ;;  %v5812_v51 = vshll.u32 %v5753_v4, 16  ;;  %v16426_v14 = vld [vmem:[#allocation2 + $0x34] sm:$0xf] }
 0x23b   : > { %13339 = vmatpush3.bf16.msra.mxu0 %v13787_v32  ;;  %v5103_v11 = vmax.f32 %v5071_v15, 0.0  ;;  %v16408_v12 = vrot.slane %v5799_v9, 4  ;;  %v16410_v46 = vrot.slane %v5802_v63, 5  ;;  %v5865_v17 = vshrl.u32 %v16402_v47, 16  ;;  %v5652_v63 = vld [vmem:[#allocation2 + $0x74] sm:$0x1] }
 0x23c   : > { %v5101_v38 = vmax.f32 %v5069_v40, 0.0  ;;  %13340 = vmatprep.subr.bf16.mxu0 %v13789_v59  ;;  %v12311_v20 = vpack.c.bf16 %v5100_v22, %v5100_v22  ;;  %v12309_v28 = vpack.c.bf16 %v5098_v42, %v5098_v42  ;;  %v5814_v18 = vrot.slane %v5812_v51, 5 }
 0x23d   : > { %v12314_v49 = vpack.c.bf16 %v5103_v11, %v5103_v11  ;;  %v5805_v60 = vsel %vm14007_vm2, %v16408_v12, %v16410_v46  ;;  %v5809_v6 = vor.u32 %v5808_v44, %v16410_v46  ;;  %v16428_v42 = vrot.slane %v5865_v17, 4 }
 0x23e   : > { %v12312_v55 = vpack.c.bf16 %v5101_v38, %v5101_v38  ;;  %v5428_v1 = vshrl.u32 %v12311_v20, 16  ;;  %v5431_v31 = vshll.u32 %v12311_v20, 16  ;;  %v5411_v37 = vshrl.u32 %v12309_v28, 16  ;;  %v13182_v38 = vpop.f32.mrf.mxu0 }
 0x23f   : > { %v5414_v48 = vshll.u32 %v12309_v28, 16  ;;  %13341 = vmatpush3.bf16.msra.mxu0 %v13789_v59  ;;  %v5454_v4 = vshrl.u32 %v12314_v49, 16  ;;  %v5457_v30 = vshll.u32 %v12314_v49, 16  ;;  %v5810_v22 = vrot.slane %v5809_v6, 4  ;;  %v5669_v49 = vld [vmem:[#allocation2 + $0x90] sm:$0xf] }
 0x240   : > { %v5437_v16 = vshrl.u32 %v12312_v55, 16  ;;  %v5440_v15 = vshll.u32 %v12312_v55, 16  ;;  %13342 = vmatprep.subr.bf16.mxu0 %v13792_v29  ;;  %v5430_v40 = vrot.slane %v5428_v1, 7  ;;  %v5413_v9 = vrot.slane %v5411_v37, 7  ;;  %v5662_v55 = vld [vmem:[#allocation2 + $0x84] sm:$0xf] }
 0x241   : > { %v16430_v44 = vrot.slane %v5454_v4, 7  ;;  %v5868_v11 = vshll.u32 %v16402_v47, 16  ;;  %v5878_v59 = vshrl.u32 %v16426_v14, 16  ;;  %v13797_v4 = vld [vmem:[%s19258_s2 + $0xc0] sm:$0xff]   ;;  %v5815_v39 = vsel %vm14007_vm2, %v5810_v22, %v5814_v18  ;;  %v13774_v18 = vld [vmem:[%s19258_s2 + $0xb0] sm:$0xff]  }
 0x242   : > { %v16432_v51 = vrot.slane %v5437_v16, 7  ;;  %v5433_v12 = vor.u32 %v5431_v31, %v5430_v40  ;;  %v5435_v46 = vrot.slane %v5430_v40, 4  ;;  %v5416_v20 = vor.u32 %v5414_v48, %v5413_v9  ;;  %v5754_v16 = vld [vmem:[#allocation2 + $0x20] sm:$0x1] }
 0x243   : > { %v5418_v28 = vrot.slane %v5413_v9, 4  ;;  %13343 = vmatpush3.bf16.msra.mxu0 %v13792_v29  ;;  %v5459_v6 = vor.u32 %v5457_v30, %v16430_v44  ;;  %v5460_v17 = vrot.slane %v16430_v44, 4  ;;  %v11893_v40 = vcombine.low %v16402_v47, %v16426_v14 }
 0x244   : > { %v5442_v1 = vor.u32 %v5440_v15, %v16432_v51  ;;  %v5443_v37 = vrot.slane %v16432_v51, 4  ;;  %13344 = vmatprep.subr.bf16.mxu0 %v13794_v3  ;;  %v5434_v31 = vsel %vm16232_vm12, %v5426_v33, %v5433_v12  ;;  %v5660_v29 = vsel %vm16238_vm13, %v5435_v46, %v5659_v45  ;;  %v5714_v12 = vld [vmem:[#allocation2 + $0x3c] sm:$0xf] }
 0x245   : > { %v5417_v48 = vsel %vm16232_vm12, %v5409_v2, %v5416_v20  ;;  %v5653_v30 = vsel %vm16238_vm13, %v5418_v28, %v5652_v63  ;;  %5658 = vst [vmem:[#allocation2 + $0x7c] sm:$0xf] %v5434_v31  ;;  %5661 = vst [vmem:[#allocation2 + $0x80] sm:$0x1] %v5660_v29  ;;  %v5670_v0 = vsel %vm16220_vm11, %v5459_v6, %v5669_v49  ;;  %v16461_v45 = vrot.slane %v5868_v11, 5  ;;  %v4946_v2 = vpop.f32.mrf.mxu0 }
 0x246   : > { %5651 = vst [vmem:[#allocation2 + $0x70] sm:$0xf] %v5417_v48  ;;  %5654 = vst [vmem:[#allocation2 + $0x74] sm:$0x1] %v5653_v30  ;;  %v5663_v33 = vsel %vm16220_vm11, %v5442_v1, %v5662_v55  ;;  %v11866_v15 = vcombine.low %v5805_v60, %v5815_v39  ;;  %v5000_v9 = vadd.f32 %v16404_v61, %v16175_v24  ;;  %v5826_v22 = vshll.u32 %v16344_v8, 16  ;;  %v16480_v24 = vld [vmem:[%s19258_s2 + $0x178] sm:$0xff]  }
 0x247   : > { %5671 = vst [vmem:[#allocation2 + $0x90] sm:$0xf] %v5670_v0  ;;  %5664 = vst [vmem:[#allocation2 + $0x84] sm:$0xf] %v5663_v33  ;;  %v5823_v63 = vor.u32 %v16356_v41, %v16354_v50  ;;  %13345 = vmatpush3.bf16.msra.mxu0 %v13794_v3  ;;  %v5832_v60 = vrot.slane %v5830_v23, 4  ;;  %v5836_v11 = vshll.u32 %v5754_v16, 16  ;;  %v4998_v47 = vadd.f32 %v16421_v36, %v16178_v19 }
 0x248   : > { %13346 = vmatprep.subr.bf16.mxu0 %v13797_v4  ;;  %13205 = vmatmul.mubr.bf16.vlgmr.msra.gmra.mxu1 %v11866_v15  ;;  %v5036_v50 = vmul.f32 %v16089_v21, %v5000_v9  ;;  %v5003_v61 = vadd.f32 %v13182_v38, %v16184_v13  ;;  %v5001_v8 = vadd.f32 %v4946_v2, %v16188_v7  ;;  %v5828_v23 = vrot.slane %v5826_v22, 5  ;;  %v13877_v19 = vld [vmem:[%s19258_s2 + $0xb8] sm:$0xff]   ;;  %v16492_v55 = vld [vmem:[#allocation2 + $0x40] sm:$0xf]  ;;  %v13777_v7 = vld [vmem:[%s19258_s2 + $0xa8] sm:$0xff]  }
 0x249   : > { %13260 = vmatprep.mubr.bf16.mxu0 %v11893_v40  ;;  %v5824_v41 = vrot.slane %v5823_v63, 4  ;;  %v5838_v3 = vrot.slane %v5836_v11, 5  ;;  %13285 = vmatpush3.bf16.msra.mxu1 %v13877_v19  ;;  %v5034_v36 = vmul.f32 %v16089_v21, %v4998_v47  ;;  %v5889_v46 = vshrl.u32 %v5714_v12, 16  ;;  %v16511_v63 = vpop.f32.mrf.mxu0  ;;  %v13781_v22 = vld [vmem:[%s19258_s2 + $0xa0] sm:$0xff]  }
 0x24a   : > { %v5072_v20 = vadd.f32 %v16091_v57, %v5036_v50  ;;  %v5039_v28 = vmul.f32 %v16089_v21, %v5003_v61  ;;  %v5037_v49 = vmul.f32 %v16089_v21, %v5001_v8  ;;  %v5892_v13 = vshll.u32 %v5714_v12, 16  ;;  %13286 = vmatprep.subr.bf16.mxu1 %v13774_v18 }
 0x24b   : > { %13347 = vmatpush3.bf16.msra.mxu0 %v13797_v4  ;;  %v5829_v38 = vsel %vm14007_vm2, %v5824_v41, %v5828_v23  ;;  %v5833_v6 = vor.u32 %v5832_v60, %v5828_v23  ;;  %v5070_v1 = vadd.f32 %v16091_v57, %v5034_v36  ;;  %v16500_v31 = vrot.slane %v5889_v46, 4  ;;  %v16521_v41 = vld [vmem:[#allocation2 + $0x2c] sm:$0x1] }
 0x24c   : > { %13428 = vmatprep.subr.bf16.mxu0 %v16480_v24  ;;  %v5104_v29 = vmax.f32 %v5072_v20, 0.0  ;;  %v5075_v48 = vadd.f32 %v16091_v57, %v5039_v28  ;;  %v5073_v30 = vadd.f32 %v16091_v57, %v5037_v49  ;;  %v16505_v16 = vrot.slane %v5892_v13, 5  ;;  %v16528_v20 = vpop.f32.mrf.mxu0  ;;  %v5673_v28 = vld [vmem:[#allocation2 + $0x98] sm:$0x1] }
 0x24d   : > { %v5834_v0 = vrot.slane %v5833_v6, 4  ;;  %v5102_v33 = vmax.f32 %v5070_v1, 0.0  ;;  %v5902_v4 = vshrl.u32 %v16492_v55, 16  ;;  %v11894_v39 = vcombine.low %v5714_v12, %v16492_v55  ;;  %13287 = vmatpush3.bf16.msra.mxu1 %v13774_v18 }
 0x24e   : > { %v12315_v2 = vpack.c.bf16 %v5104_v29, %v5104_v29  ;;  %v5107_v15 = vmax.f32 %v5075_v48, 0.0  ;;  %v5105_v40 = vmax.f32 %v5073_v30, 0.0  ;;  %v5847_v9 = vor.u32 %v16395_v53, %v16393_v43  ;;  %13288 = vmatprep.subr.bf16.mxu1 %v13777_v7  ;;  %v5666_v29 = vld [vmem:[#allocation2 + $0x8c] sm:$0x1] }
 0x24f   : > { %v5839_v60 = vsel %vm14007_vm2, %v5834_v0, %v5838_v3  ;;  %v12313_v11 = vpack.c.bf16 %v5102_v33, %v5102_v33  ;;  %13261 = vmatmul.mubr.bf16.gmra.mxu0 %v11894_v39  ;;  %v5850_v12 = vshll.u32 %v16367_v62, 16  ;;  %v5856_v18 = vrot.slane %v5854_v27, 4  ;;  %v13786_v3 = vld [vmem:[%s19258_s2 + $0x98] sm:$0xff]   ;;  %v5683_v39 = vld [vmem:[#allocation2 + $0xa8] sm:$0xf] }
 0x250   : > { %v5462_v47 = vshrl.u32 %v12315_v2, 16  ;;  %v5465_v50 = vshll.u32 %v12315_v2, 16  ;;  %v11867_v43 = vcombine.low %v5829_v38, %v5839_v60  ;;  %v12318_v53 = vpack.c.bf16 %v5107_v15, %v5107_v15 }
 0x251   : > { %v5445_v61 = vshrl.u32 %v12313_v11, 16  ;;  %v5448_v8 = vshll.u32 %v12313_v11, 16  ;;  %v12316_v23 = vpack.c.bf16 %v5105_v40, %v5105_v40  ;;  %v16523_v19 = vrot.slane %v5847_v9, 4  ;;  %13289 = vmatpush3.bf16.msra.mxu1 %v13777_v7  ;;  %v5716_v40 = vld [vmem:[#allocation2 + $0x48] sm:$0xf] }
 0x252   : > { %v5464_v36 = vrot.slane %v5462_v47, 7  ;;  %13208 = vmatprep.mubr.bf16.mxu1 %v11867_v43  ;;  %v5488_v62 = vshrl.u32 %v12318_v53, 16  ;;  %v5491_v27 = vshll.u32 %v12318_v53, 16  ;;  %v5852_v46 = vrot.slane %v5850_v12, 5  ;;  %13290 = vmatprep.subr.bf16.mxu1 %v13781_v22  ;;  %v5676_v47 = vld [vmem:[#allocation2 + $0x9c] sm:$0xf]  ;;  %v13186_v43 = vpop.f32.mrf.mxu0 }
 0x253   : > { %v5447_v49 = vrot.slane %v5445_v61, 7  ;;  %v5471_v13 = vshrl.u32 %v12316_v23, 16  ;;  %v5474_v38 = vshll.u32 %v12316_v23, 16  ;;  %v5860_v6 = vshll.u32 %v16521_v41, 16 }
 0x254   : > { %v5467_v1 = vor.u32 %v5465_v50, %v5464_v36  ;;  %v5469_v7 = vrot.slane %v5464_v36, 4  ;;  %v16531_v48 = vrot.slane %v5488_v62, 7  ;;  %v5853_v30 = vsel %vm14007_vm2, %v16523_v19, %v5852_v46  ;;  %v16546_v50 = vld [vmem:[#allocation2 + $0x4c] sm:$0xf] }
 0x255   : > { %v5450_v0 = vor.u32 %v5448_v8, %v5447_v49  ;;  %v5452_v33 = vrot.slane %v5447_v49, 4  ;;  %v16536_v2 = vrot.slane %v5471_v13, 7  ;;  %v5857_v15 = vor.u32 %v5856_v18, %v5852_v46  ;;  %13291 = vmatpush3.bf16.msra.mxu1 %v13781_v22  ;;  %v13791_v22 = vld [vmem:[%s19258_s2 + $0x90] sm:$0xff]  }
 0x256   : > { %v5468_v9 = vsel %vm16232_vm12, %v5460_v17, %v5467_v1  ;;  %v5674_v60 = vsel %vm16238_vm13, %v5469_v7, %v5673_v28  ;;  %v5493_v11 = vor.u32 %v5491_v27, %v16531_v48  ;;  %v5494_v12 = vrot.slane %v16531_v48, 4  ;;  %13292 = vmatprep.subr.bf16.mxu1 %v13786_v3  ;;  %v16565_v27 = vld [vmem:[#allocation2 + $0x38] sm:$0x1] }
 0x257   : > { %5672 = vst [vmem:[#allocation2 + $0x94] sm:$0xf] %v5468_v9  ;;  %5675 = vst [vmem:[#allocation2 + $0x98] sm:$0x1] %v5674_v60  ;;  %v5451_v44 = vsel %vm16232_vm12, %v5443_v37, %v5450_v0  ;;  %v5667_v17 = vsel %vm16238_vm13, %v5452_v33, %v5666_v29  ;;  %v5476_v18 = vor.u32 %v5474_v38, %v16536_v2  ;;  %v5477_v53 = vrot.slane %v16536_v2, 4  ;;  %v4962_v38 = vpop.f32.mrf.mxu0  ;;  %v13795_v0 = vld [vmem:[%s19258_s2 + $0x88] sm:$0xff]  }
 0x258   : > { %5665 = vst [vmem:[#allocation2 + $0x88] sm:$0xf] %v5451_v44  ;;  %5668 = vst [vmem:[#allocation2 + $0x8c] sm:$0x1] %v5667_v17  ;;  %v5684_v61 = vsel %vm16220_vm11, %v5493_v11, %v5683_v39  ;;  %v5858_v8 = vrot.slane %v5857_v15, 4  ;;  %v5862_v23 = vrot.slane %v5860_v6, 5  ;;  %v11895_v62 = vcombine.low %v5716_v40, %v16546_v50 }
 0x259   : > { %v5913_v19 = vshrl.u32 %v5716_v40, 16  ;;  %5685 = vst [vmem:[#allocation2 + $0xa8] sm:$0xf] %v5684_v61  ;;  %v5677_v51 = vsel %vm16220_vm11, %v5476_v18, %v5676_v47  ;;  %v5916_v37 = vshll.u32 %v5716_v40, 16  ;;  %v5926_v36 = vshrl.u32 %v16546_v50, 16  ;;  %13293 = vmatpush3.bf16.msra.mxu1 %v13786_v3 }
 0x25a   : > { %5678 = vst [vmem:[#allocation2 + $0x9c] sm:$0xf] %v5677_v51  ;;  %v5863_v46 = vsel %vm14007_vm2, %v5858_v8, %v5862_v23  ;;  %v5004_v49 = vadd.f32 %v16511_v63, %v16192_v56  ;;  %v5871_v13 = vor.u32 %v16461_v45, %v16428_v42  ;;  %v5718_v6 = vld [vmem:[#allocation2 + $0x54] sm:$0xf]  ;;  %13294 = vmatprep.subr.bf16.mxu1 %v13791_v22  ;;  %v5874_v3 = vshll.u32 %v16426_v14, 16 }
 0x25b   : > { %v16569_v28 = vrot.slane %v5913_v19, 4  ;;  %v11868_v1 = vcombine.low %v5853_v30, %v5863_v46  ;;  %v16575_v7 = vrot.slane %v5916_v37, 5  ;;  %13264 = vmatprep.mubr.bf16.mxu0 %v11895_v62  ;;  %v5880_v29 = vrot.slane %v5878_v59, 4  ;;  %v16591_v9 = vld [vmem:[#allocation2 + $0x58] sm:$0xf] }
 0x25c   : > { %v5040_v56 = vmul.f32 %v16089_v21, %v5004_v49  ;;  %v5872_v63 = vrot.slane %v5871_v13, 4  ;;  %v5884_v42 = vshll.u32 %v16565_v27, 16  ;;  %v5002_v45 = vadd.f32 %v16528_v20, %v16194_v52 }
 0x25d   : > { %13209 = vmatmul.mubr.bf16.gmra.mxu1 %v11868_v1  ;;  %v5876_v30 = vrot.slane %v5874_v3, 5  ;;  %v5007_v33 = vadd.f32 %v13186_v43, %v16199_v34  ;;  %v5005_v39 = vadd.f32 %v4962_v38, %v16202_v54  ;;  %v5937_v14 = vshrl.u32 %v5718_v6, 16  ;;  %v13799_v54 = vld [vmem:[%s19258_s2 + $0x80] sm:$0xff]   ;;  %v16617_v38 = vld [vmem:[%s19258_s2 + $0x138] sm:$0xff]  }
 0x25e   : > { %v5076_v59 = vadd.f32 %v16091_v57, %v5040_v56  ;;  %v5886_v15 = vrot.slane %v5884_v42, 5  ;;  %v5038_v40 = vmul.f32 %v16089_v21, %v5002_v45  ;;  %v5940_v60 = vshll.u32 %v5718_v6, 16  ;;  %13295 = vmatpush3.bf16.msra.mxu1 %v13791_v22 }
 0x25f   : > { %v5877_v11 = vsel %vm14007_vm2, %v5872_v63, %v5876_v30  ;;  %v5881_v52 = vor.u32 %v5880_v29, %v5876_v30  ;;  %v5043_v20 = vmul.f32 %v16089_v21, %v5007_v33  ;;  %v5041_v34 = vmul.f32 %v16089_v21, %v5005_v39  ;;  %13296 = vmatprep.subr.bf16.mxu1 %v13795_v0  ;;  %v16619_v30 = vld [vmem:[#allocation2 + $0x44] sm:$0x1]  ;;  %v5687_v39 = vld [vmem:[#allocation2 + $0xb0] sm:$0x1] }
 0x260   : > { %v5108_v47 = vmax.f32 %v5076_v59, 0.0  ;;  %v5074_v43 = vadd.f32 %v16091_v57, %v5038_v40  ;;  %v16601_v44 = vrot.slane %v5937_v14, 4  ;;  %v16603_v17 = vrot.slane %v5940_v60, 5 }
 0x261   : > { %v5882_v22 = vrot.slane %v5881_v52, 4  ;;  %v5079_v18 = vadd.f32 %v16091_v57, %v5043_v20  ;;  %v5077_v61 = vadd.f32 %v16091_v57, %v5041_v34  ;;  %v5950_v8 = vshrl.u32 %v16591_v9, 16  ;;  %v5680_v20 = vld [vmem:[#allocation2 + $0xa4] sm:$0x1] }
 0x262   : > { %v12319_v23 = vpack.c.bf16 %v5108_v47, %v5108_v47  ;;  %v5106_v19 = vmax.f32 %v5074_v43, 0.0  ;;  %v11896_v51 = vcombine.low %v5718_v6, %v16591_v9  ;;  %v5895_v37 = vor.u32 %v16505_v16, %v16500_v31  ;;  %13297 = vmatpush3.bf16.msra.mxu1 %v13795_v0  ;;  %v5697_v43 = vld [vmem:[#allocation2 + $0xc0] sm:$0xf] }
 0x263   : > { %v5887_v62 = vsel %vm14007_vm2, %v5882_v22, %v5886_v15  ;;  %v5111_v46 = vmax.f32 %v5079_v18, 0.0  ;;  %v5109_v49 = vmax.f32 %v5077_v61, 0.0  ;;  %v5898_v13 = vshll.u32 %v16492_v55, 16  ;;  %13298 = vmatprep.subr.bf16.mxu1 %v13799_v54 }
 0x264   : > { %v5496_v1 = vshrl.u32 %v12319_v23, 16  ;;  %v5499_v3 = vshll.u32 %v12319_v23, 16  ;;  %v11869_v6 = vcombine.low %v5877_v11, %v5887_v62  ;;  %v12317_v29 = vpack.c.bf16 %v5106_v19, %v5106_v19  ;;  %13265 = vmatmul.mubr.bf16.gmra.mxu0 %v11896_v51  ;;  %v5690_v19 = vld [vmem:[#allocation2 + $0xb4] sm:$0xf]  ;;  %v5720_v51 = vld [vmem:[#allocation2 + $0x60] sm:$0xf] }
 0x265   : > { %v12322_v31 = vpack.c.bf16 %v5111_v46, %v5111_v46  ;;  %v12320_v16 = vpack.c.bf16 %v5109_v49, %v5109_v49  ;;  %v5896_v0 = vrot.slane %v5895_v37, 4  ;;  %v5900_v56 = vrot.slane %v5898_v13, 5  ;;  %v13187_v37 = vpop.f32.mrf.mxu0  ;;  %v16641_v13 = vld [vmem:[#allocation2 + $0x64] sm:$0xf] }
 0x266   : > { %v5498_v63 = vrot.slane %v5496_v1, 7  ;;  %13212 = vmatprep.mubr.bf16.mxu1 %v11869_v6  ;;  %v5479_v42 = vshrl.u32 %v12317_v29, 16  ;;  %v5482_v45 = vshll.u32 %v12317_v29, 16  ;;  %v5904_v33 = vrot.slane %v5902_v4, 4  ;;  %13299 = vmatpush3.bf16.msra.mxu1 %v13799_v54  ;;  %v16649_v29 = vld [vmem:[#allocation2 + $0x50] sm:$0x1] }
 0x267   : > { %v5522_v14 = vshrl.u32 %v12322_v31, 16  ;;  %v5525_v59 = vshll.u32 %v12322_v31, 16  ;;  %v5505_v15 = vshrl.u32 %v12320_v16, 16  ;;  %v5508_v40 = vshll.u32 %v12320_v16, 16  ;;  %13380 = vmatprep.subr.bf16.mxu1 %v16617_v38 }
 0x268   : > { %v5501_v60 = vor.u32 %v5499_v3, %v5498_v63  ;;  %v5503_v11 = vrot.slane %v5498_v63, 4  ;;  %v5481_v52 = vrot.slane %v5479_v42, 7  ;;  %v5901_v34 = vsel %vm14007_vm2, %v5896_v0, %v5900_v56 }
 0x269   : > { %v16626_v47 = vrot.slane %v5522_v14, 7  ;;  %v16628_v55 = vrot.slane %v5505_v15, 7  ;;  %v5905_v4 = vor.u32 %v5904_v33, %v5900_v56  ;;  %v5908_v54 = vshll.u32 %v16619_v30, 16  ;;  %v5722_v33 = vld [vmem:[#allocation2 + $0x6c] sm:$0xf] }
 0x26a   : > { %v5502_v22 = vsel %vm16232_vm12, %v5494_v12, %v5501_v60  ;;  %v5688_v18 = vsel %vm16238_vm13, %v5503_v11, %v5687_v39  ;;  %v5484_v61 = vor.u32 %v5482_v45, %v5481_v52  ;;  %v5486_v23 = vrot.slane %v5481_v52, 4  ;;  %v4965_v45 = vpop.f32.mrf.mxu0  ;;  %v16666_v15 = vld [vmem:[#allocation2 + $0x70] sm:$0xf] }
 0x26b   : > { %5686 = vst [vmem:[#allocation2 + $0xac] sm:$0xf] %v5502_v22  ;;  %5689 = vst [vmem:[#allocation2 + $0xb0] sm:$0x1] %v5688_v18  ;;  %v5527_v62 = vor.u32 %v5525_v59, %v16626_v47  ;;  %v5528_v46 = vrot.slane %v16626_v47, 4  ;;  %v5510_v49 = vor.u32 %v5508_v40, %v16628_v55  ;;  %v5511_v48 = vrot.slane %v16628_v55, 4 }
 0x26c   : > { %v5485_v12 = vsel %vm16232_vm12, %v5477_v53, %v5484_v61  ;;  %v5681_v1 = vsel %vm16238_vm13, %v5486_v23, %v5680_v20  ;;  %v5906_v3 = vrot.slane %v5905_v4, 4  ;;  %v5910_v6 = vrot.slane %v5908_v54, 5  ;;  %v16676_v22 = vld [vmem:[#allocation2 + $0x5c] sm:$0x1] }
 0x26d   : > { %5679 = vst [vmem:[#allocation2 + $0xa0] sm:$0xf] %v5485_v12  ;;  %5682 = vst [vmem:[#allocation2 + $0xa4] sm:$0x1] %v5681_v1  ;;  %v5698_v31 = vsel %vm16220_vm11, %v5527_v62, %v5697_v43  ;;  %v5691_v16 = vsel %vm16220_vm11, %v5510_v49, %v5690_v19  ;;  %v5961_v0 = vshrl.u32 %v5720_v51, 16  ;;  %v5964_v2 = vshll.u32 %v5720_v51, 16 }
 0x26e   : > { %5699 = vst [vmem:[#allocation2 + $0xc0] sm:$0xf] %v5698_v31  ;;  %5692 = vst [vmem:[#allocation2 + $0xb4] sm:$0xf] %v5691_v16  ;;  %v5911_v53 = vsel %vm14007_vm2, %v5906_v3, %v5910_v6  ;;  %v5974_v56 = vshrl.u32 %v16641_v13, 16  ;;  %v11897_v63 = vcombine.low %v5720_v51, %v16641_v13  ;;  %v5008_v42 = vadd.f32 %v13187_v37, %v16205_v26 }
 0x26f   : > { %v11870_v39 = vcombine.low %v5901_v34, %v5911_v53  ;;  %v16660_v14 = vrot.slane %v5961_v0, 4  ;;  %v16662_v5 = vrot.slane %v5964_v2, 5  ;;  %v5919_v59 = vor.u32 %v16575_v7, %v16569_v28  ;;  %v5724_v19 = vld [vmem:[#allocation2 + $0x78] sm:$0xf]  ;;  %v16693_v3 = vld [vmem:[#allocation2 + $0x7c] sm:$0xf] }
 0x270   : > { %13268 = vmatprep.mubr.bf16.mxu0 %v11897_v63  ;;  %v5044_v40 = vmul.f32 %v16089_v21, %v5008_v42  ;;  %v5922_v60 = vshll.u32 %v16546_v50, 16  ;;  %v5928_v26 = vrot.slane %v5926_v36, 4  ;;  %v5932_v11 = vshll.u32 %v16649_v29, 16  ;;  %v5730_v55 = vld [vmem:[#allocation2 + $0x9c] sm:$0xf] }
 0x271   : > { %13213 = vmatmul.mubr.bf16.gmra.mxu1 %v11870_v39  ;;  %v5920_v52 = vrot.slane %v5919_v59, 4  ;;  %v5006_v20 = vadd.f32 %v4965_v45, %v16207_v58  ;;  %v5985_v34 = vshrl.u32 %v5722_v33, 16  ;;  %v5988_v43 = vshll.u32 %v5722_v33, 16 }
 0x272   : > { %v5080_v28 = vadd.f32 %v16091_v57, %v5044_v40  ;;  %v5924_v7 = vrot.slane %v5922_v60, 5  ;;  %v5934_v4 = vrot.slane %v5932_v11, 5  ;;  %v5998_v54 = vshrl.u32 %v16666_v15, 16 }
 0x273   : > { %v5042_v18 = vmul.f32 %v16089_v21, %v5006_v20  ;;  %v16679_v61 = vrot.slane %v5985_v34, 4  ;;  %v16681_v36 = vrot.slane %v5988_v43, 5  ;;  %v11898_v23 = vcombine.low %v5722_v33, %v16666_v15  ;;  %v5701_v20 = vld [vmem:[#allocation2 + $0xc8] sm:$0x1] }
 0x274   : > { %v5112_v58 = vmax.f32 %v5080_v28, 0.0  ;;  %v5925_v51 = vsel %vm14007_vm2, %v5920_v52, %v5924_v7  ;;  %v5929_v37 = vor.u32 %v5928_v26, %v5924_v7  ;;  %v5943_v62 = vor.u32 %v16603_v17, %v16601_v44  ;;  %v16705_v52 = vld [vmem:[#allocation2 + $0x68] sm:$0x1] }
 0x275   : > { %v5078_v49 = vadd.f32 %v16091_v57, %v5042_v18  ;;  %13269 = vmatmul.mubr.bf16.gmra.mxu0 %v11898_v23  ;;  %v5946_v21 = vshll.u32 %v16591_v9, 16  ;;  %v5952_v12 = vrot.slane %v5950_v8, 4  ;;  %v5956_v1 = vshll.u32 %v16676_v22, 16 }
 0x276   : > { %v12323_v6 = vpack.c.bf16 %v5112_v58, %v5112_v58  ;;  %v5930_v31 = vrot.slane %v5929_v37, 4  ;;  %v5944_v16 = vrot.slane %v5943_v62, 4  ;;  %v6009_v0 = vshrl.u32 %v5724_v19, 16 }
 0x277   : > { %v5110_v2 = vmax.f32 %v5078_v49, 0.0  ;;  %v5948_v53 = vrot.slane %v5946_v21, 5  ;;  %v5958_v63 = vrot.slane %v5956_v1, 5  ;;  %v6012_v44 = vshll.u32 %v5724_v19, 16  ;;  %v16715_v21 = vld [vmem:[#allocation2 + $0x88] sm:$0xf] }
 0x278   : > { %v5530_v17 = vshrl.u32 %v12323_v6, 16  ;;  %v5533_v57 = vshll.u32 %v12323_v6, 16  ;;  %v5935_v42 = vsel %vm14007_vm2, %v5930_v31, %v5934_v4  ;;  %v16697_v45 = vrot.slane %v6009_v0, 4  ;;  %v16723_v6 = vld [vmem:[#allocation2 + $0x74] sm:$0x1] }
 0x279   : > { %v11871_v8 = vcombine.low %v5925_v51, %v5935_v42  ;;  %v12321_v33 = vpack.c.bf16 %v5110_v2, %v5110_v2  ;;  %v5949_v39 = vsel %vm14007_vm2, %v5944_v16, %v5948_v53  ;;  %v5953_v59 = vor.u32 %v5952_v12, %v5948_v53  ;;  %v5726_v51 = vld [vmem:[#allocation2 + $0x84] sm:$0xf]  ;;  %v5694_v12 = vld [vmem:[#allocation2 + $0xbc] sm:$0x1]  ;;  %v5728_v53 = vld [vmem:[#allocation2 + $0x90] sm:$0xf] }
 0x27a   : > { %v5532_v40 = vrot.slane %v5530_v17, 7  ;;  %v16701_v60 = vrot.slane %v6012_v44, 5  ;;  %v6022_v26 = vshrl.u32 %v16693_v3, 16  ;;  %v11899_v11 = vcombine.low %v5724_v19, %v16693_v3  ;;  %v16728_v17 = vld [vmem:[#allocation2 + $0x94] sm:$0xf] }
 0x27b   : > { %13216 = vmatprep.mubr.bf16.mxu1 %v11871_v8  ;;  %v5513_v34 = vshrl.u32 %v12321_v33, 16  ;;  %v5516_v43 = vshll.u32 %v12321_v33, 16  ;;  %v5954_v28 = vrot.slane %v5953_v59, 4  ;;  %v5967_v7 = vor.u32 %v16662_v5, %v16660_v14 }
 0x27c   : > { %v5535_v4 = vor.u32 %v5533_v57, %v5532_v40  ;;  %v5537_v18 = vrot.slane %v5532_v40, 4  ;;  %13272 = vmatprep.mubr.bf16.mxu0 %v11899_v11  ;;  %v5970_v23 = vshll.u32 %v16641_v13, 16  ;;  %v5976_v58 = vrot.slane %v5974_v56, 4 }
 0x27d   : > { %v5515_v19 = vrot.slane %v5513_v34, 7  ;;  %v5959_v37 = vsel %vm14007_vm2, %v5954_v28, %v5958_v63  ;;  %v5968_v62 = vrot.slane %v5967_v7, 4  ;;  %v5980_v49 = vshll.u32 %v16705_v52, 16 }
 0x27e   : > { %v5536_v14 = vsel %vm16232_vm12, %v5528_v46, %v5535_v4  ;;  %v5702_v5 = vsel %vm16238_vm13, %v5537_v18, %v5701_v20  ;;  %v11872_v56 = vcombine.low %v5949_v39, %v5959_v37  ;;  %v5972_v1 = vrot.slane %v5970_v23, 5  ;;  %v16740_v20 = vld [vmem:[#allocation2 + $0x80] sm:$0x1] }
 0x27f   : > { %5700 = vst [vmem:[#allocation2 + $0xc4] sm:$0xf] %v5536_v14  ;;  %5703 = vst [vmem:[#allocation2 + $0xc8] sm:$0x1] %v5702_v5  ;;  %v5518_v31 = vor.u32 %v5516_v43, %v5515_v19  ;;  %v5520_v16 = vrot.slane %v5515_v19, 4  ;;  %v5982_v0 = vrot.slane %v5980_v49, 5  ;;  %v11900_v33 = vcombine.low %v5726_v51, %v16715_v21 }
 0x280   : > { %v6033_v2 = vshrl.u32 %v5726_v51, 16  ;;  %13217 = vmatmul.mubr.bf16.gmra.mxu1 %v11872_v56  ;;  %v5973_v47 = vsel %vm14007_vm2, %v5968_v62, %v5972_v1  ;;  %v5977_v46 = vor.u32 %v5976_v58, %v5972_v1  ;;  %v6036_v63 = vshll.u32 %v5726_v51, 16 }
 0x281   : > { %v6046_v44 = vshrl.u32 %v16715_v21, 16  ;;  %v5519_v57 = vsel %vm16232_vm12, %v5511_v48, %v5518_v31  ;;  %v5695_v42 = vsel %vm16238_vm13, %v5520_v16, %v5694_v12  ;;  %v5991_v40 = vor.u32 %v16681_v36, %v16679_v61  ;;  %13273 = vmatmul.mubr.bf16.gmra.mxu0 %v11900_v33  ;;  %v16748_v36 = vld [vmem:[#allocation2 + $0xa0] sm:$0xf]  ;;  %v16760_v16 = vld [vmem:[#allocation2 + $0x8c] sm:$0x1] }
 0x282   : > { %v6035_v8 = vrot.slane %v6033_v2, 4  ;;  %5693 = vst [vmem:[#allocation2 + $0xb8] sm:$0xf] %v5519_v57  ;;  %5696 = vst [vmem:[#allocation2 + $0xbc] sm:$0x1] %v5695_v42  ;;  %v5978_v39 = vrot.slane %v5977_v46, 4  ;;  %v11901_v19 = vcombine.low %v5728_v53, %v16728_v17  ;;  %v6015_v37 = vor.u32 %v16701_v60, %v16697_v45 }
 0x283   : > { %v6038_v59 = vrot.slane %v6036_v63, 5  ;;  %v5994_v11 = vshll.u32 %v16666_v15, 16  ;;  %v6000_v25 = vrot.slane %v5998_v54, 4  ;;  %v6004_v35 = vshll.u32 %v16723_v6, 16  ;;  %v16768_v57 = vld [vmem:[#allocation2 + $0xac] sm:$0xf] }
 0x284   : > { %v6057_v48 = vshrl.u32 %v5728_v53, 16  ;;  %v6060_v34 = vshll.u32 %v5728_v53, 16  ;;  %v5983_v43 = vsel %vm14007_vm2, %v5978_v39, %v5982_v0  ;;  %v5992_v28 = vrot.slane %v5991_v40, 4  ;;  %13276 = vmatprep.mubr.bf16.mxu0 %v11901_v19  ;;  %v5732_v53 = vld [vmem:[#allocation2 + $0xa8] sm:$0xf] }
 0x285   : > { %v5996_v7 = vrot.slane %v5994_v11, 5  ;;  %v6070_v61 = vshrl.u32 %v16728_v17, 16  ;;  %v11873_v4 = vcombine.low %v5973_v47, %v5983_v43  ;;  %v6006_v18 = vrot.slane %v6004_v35, 5  ;;  %v16775_v43 = vld [vmem:[#allocation2 + $0x98] sm:$0x1] }
 0x286   : > { %v6059_v23 = vrot.slane %v6057_v48, 4  ;;  %v6062_v58 = vrot.slane %v6060_v34, 5  ;;  %v6018_v62 = vshll.u32 %v16693_v3, 16  ;;  %v6024_v49 = vrot.slane %v6022_v26, 4 }
 0x287   : > { %v5997_v54 = vsel %vm14007_vm2, %v5992_v28, %v5996_v7  ;;  %v6001_v51 = vor.u32 %v6000_v25, %v5996_v7  ;;  %13220 = vmatprep.mubr.bf16.mxu1 %v11873_v4  ;;  %v6028_v14 = vshll.u32 %v16740_v20, 16  ;;  %v6081_v5 = vshrl.u32 %v5730_v55, 16 }
 0x288   : > { %v6016_v56 = vrot.slane %v6015_v37, 4  ;;  %v6084_v1 = vshll.u32 %v5730_v55, 16  ;;  %v6094_v31 = vshrl.u32 %v16748_v36, 16  ;;  %v6020_v0 = vrot.slane %v6018_v62, 5 }
 0x289   : > { %v6002_v12 = vrot.slane %v6001_v51, 4  ;;  %v6030_v2 = vrot.slane %v6028_v14, 5  ;;  %v16762_v45 = vrot.slane %v6081_v5, 4  ;;  %v11902_v60 = vcombine.low %v5730_v55, %v16748_v36  ;;  %v16782_v62 = vld [vmem:[#allocation2 + $0xb8] sm:$0xf] }
 0x28a   : > { %v6086_v47 = vrot.slane %v6084_v1, 5  ;;  %v6039_v46 = vor.u32 %v6038_v59, %v6035_v8  ;;  %v6042_v63 = vshll.u32 %v16715_v21, 16  ;;  %v6021_v33 = vsel %vm14007_vm2, %v6016_v56, %v6020_v0 }
 0x28b   : > { %v6007_v26 = vsel %vm14007_vm2, %v6002_v12, %v6006_v18  ;;  %v6025_v39 = vor.u32 %v6024_v49, %v6020_v0  ;;  %13277 = vmatmul.mubr.bf16.gmra.mxu0 %v11902_v60  ;;  %v6048_v40 = vrot.slane %v6046_v44, 4  ;;  %v6052_v55 = vshll.u32 %v16760_v16, 16  ;;  %v5734_v18 = vld [vmem:[#allocation2 + $0xb4] sm:$0xf] }
 0x28c   : > { %v11874_v42 = vcombine.low %v5997_v54, %v6007_v26  ;;  %v6040_v11 = vrot.slane %v6039_v46, 4  ;;  %v6044_v25 = vrot.slane %v6042_v63, 5  ;;  %v6105_v35 = vshrl.u32 %v5732_v53, 16  ;;  %v16789_v26 = vld [vmem:[#allocation2 + $0xa4] sm:$0x1] }
 0x28d   : > { %v6026_v48 = vrot.slane %v6025_v39, 4  ;;  %v6108_v34 = vshll.u32 %v5732_v53, 16  ;;  %v6118_v8 = vshrl.u32 %v16768_v57, 16  ;;  %v11903_v59 = vcombine.low %v5732_v53, %v16768_v57  ;;  %v16791_v46 = vld [vmem:[#allocation2 + $0xb0] sm:$0x1] }
 0x28e   : > { %13221 = vmatmul.mubr.bf16.gmra.mxu1 %v11874_v42  ;;  %v6045_v28 = vsel %vm14007_vm2, %v6040_v11, %v6044_v25  ;;  %v6049_v7 = vor.u32 %v6048_v40, %v6044_v25  ;;  %v6054_v4 = vrot.slane %v6052_v55, 5  ;;  %v6107_v44 = vrot.slane %v6105_v35, 4  ;;  %v13796_v39 = vld [vmem:[#allocation2 + $0xc] sm:$0xff]  }
 0x28f   : > { %v6031_v54 = vsel %vm14007_vm2, %v6026_v48, %v6030_v2  ;;  %v6110_v51 = vrot.slane %v6108_v34, 5  ;;  %13280 = vmatprep.mubr.bf16.mxu0 %v11903_v59  ;;  %v6063_v19 = vor.u32 %v6062_v58, %v6059_v23  ;;  %v6066_v37 = vshll.u32 %v16728_v17, 16 }
 0x290   : > { %v11875_v49 = vcombine.low %v6021_v33, %v6031_v54  ;;  %v6050_v14 = vrot.slane %v6049_v7, 4  ;;  %v6072_v5 = vrot.slane %v6070_v61, 4  ;;  %v6076_v12 = vshll.u32 %v16775_v43, 16  ;;  %v6747_v54 = vld [vmem:[#allocation2] sm:$0xe] }
 0x291   : > { %v6064_v56 = vrot.slane %v6063_v19, 4  ;;  %v6068_v1 = vrot.slane %v6066_v37, 5  ;;  %v6129_v0 = vshrl.u32 %v5734_v18, 16  ;;  %v6132_v60 = vshll.u32 %v5734_v18, 16  ;;  %v16802_v37 = vld [vmem:[#allocation2 + $0xbc] sm:$0x1] }
 0x292   : > { %13224 = vmatprep.mubr.bf16.mxu1 %v11875_v49  ;;  %v6055_v2 = vsel %vm14007_vm2, %v6050_v14, %v6054_v4  ;;  %v6078_v53 = vrot.slane %v6076_v12, 5  ;;  %v6142_v23 = vshrl.u32 %v16782_v62, 16  ;;  %v11904_v58 = vcombine.low %v5734_v18, %v16782_v62 }
 0x293   : > { %v11876_v61 = vcombine.low %v6045_v28, %v6055_v2  ;;  %v6069_v63 = vsel %vm14007_vm2, %v6064_v56, %v6068_v1  ;;  %v6073_v42 = vor.u32 %v6072_v5, %v6068_v1  ;;  %v6131_v33 = vrot.slane %v6129_v0, 4  ;;  %v6748_v1 = vld [vmem:[#allocation2 + $0xc] sm:$0xe] }
 0x294   : > { %v6134_v40 = vrot.slane %v6132_v60, 5  ;;  %13281 = vmatmul.mubr.bf16.gmra.mxu0 %v11904_v58  ;;  %v6087_v11 = vor.u32 %v6086_v47, %v16762_v45  ;;  %v6090_v25 = vshll.u32 %v16748_v36, 16  ;;  %v6096_v55 = vrot.slane %v6094_v31, 4  ;;  %v13798_v60 = vld [vmem:[#allocation2 + $0x18] sm:$0xff]  }
 0x295   : > { %v6074_v35 = vrot.slane %v6073_v42, 4  ;;  %v6100_v48 = vshll.u32 %v16789_v26, 16  ;;  %13348 = vmatprep.mubr.bf16.mxu0 %v13796_v39  ;;  %v6111_v34 = vor.u32 %v6110_v51, %v6107_v44  ;;  %v6114_v59 = vshll.u32 %v16768_v57, 16  ;;  %v13800_v39 = vld [vmem:[#allocation2 + $0x24] sm:$0xff]  }
 0x296   : > { %13225 = vmatmul.mubr.bf16.gmra.mxu1 %v11876_v61  ;;  %v6088_v28 = vrot.slane %v6087_v11, 4  ;;  %v6092_v7 = vrot.slane %v6090_v25, 5  ;;  %v6120_v4 = vrot.slane %v6118_v8, 4  ;;  %v6124_v18 = vshll.u32 %v16791_v46, 16  ;;  %v13878_v11 = vld [vmem:[#allocation2 + $0x4] sm:$0xf] }
 0x297   : > { %v6079_v45 = vsel %vm14007_vm2, %v6074_v35, %v6078_v53  ;;  %v6102_v47 = vrot.slane %v6100_v48, 5  ;;  %v6112_v19 = vrot.slane %v6111_v34, 4  ;;  %v6116_v31 = vrot.slane %v6114_v59, 5  ;;  %v13879_v35 = vld [vmem:[#allocation2 + $0x8] sm:$0x1] }
 0x298   : > { %v11877_v49 = vcombine.low %v6069_v63, %v6079_v45  ;;  %v6093_v44 = vsel %vm14007_vm2, %v6088_v28, %v6092_v7  ;;  %v6097_v51 = vor.u32 %v6096_v55, %v6092_v7  ;;  %v6126_v14 = vrot.slane %v6124_v18, 5  ;;  %v6749_v34 = vld [vmem:[#allocation2 + $0x18] sm:$0xe] }
 0x299   : > { %v6117_v8 = vsel %vm14007_vm2, %v6112_v19, %v6116_v31  ;;  %v6121_v5 = vor.u32 %v6120_v4, %v6116_v31  ;;  %v6135_v12 = vor.u32 %v6134_v40, %v6131_v33  ;;  %v6138_v56 = vshll.u32 %v16782_v62, 16  ;;  %v13814_v33 = vld [vmem:[%s19258_s2 + $0x170] sm:$0xff]  }
 0x29a   : > { %13228 = vmatprep.mubr.bf16.mxu1 %v11877_v49  ;;  %v6098_v0 = vrot.slane %v6097_v51, 4  ;;  %v6144_v2 = vrot.slane %v6142_v23, 4  ;;  %v6148_v53 = vshll.u32 %v16802_v37, 16  ;;  %v11913_v58 = vrot.slane %v6747_v54, 9  ;;  %v13880_v19 = vld [vmem:[#allocation2 + $0x10] sm:$0xf] }
 0x29b   : > { %v6122_v61 = vrot.slane %v6121_v5, 4  ;;  %v6136_v63 = vrot.slane %v6135_v12, 4  ;;  %v6140_v42 = vrot.slane %v6138_v56, 5  ;;  %v6797_v25 = vrot.slane %v13878_v11, 5  ;;  %v6750_v49 = vld [vmem:[#allocation2 + $0x24] sm:$0xe] }
 0x29c   : > { %v6103_v40 = vsel %vm14007_vm2, %v6098_v0, %v6102_v47  ;;  %13349 = vmatmul.mubr.bf16.vlgmr.msra.gmra.mxu0 %v13798_v60  ;;  %v6150_v55 = vrot.slane %v6148_v53, 5  ;;  %v6800_v23 = vrot.slane %v13879_v35, 5  ;;  %v11914_v48 = vrot.slane %v6748_v1, 9  ;;  %v13881_v51 = vld [vmem:[#allocation2 + $0x14] sm:$0x1] }
 0x29d   : > { %v11878_v59 = vcombine.low %v6093_v44, %v6103_v40  ;;  %v6127_v28 = vsel %vm14007_vm2, %v6122_v61, %v6126_v14  ;;  %v6141_v7 = vsel %vm14007_vm2, %v6136_v63, %v6140_v42  ;;  %v6145_v4 = vor.u32 %v6144_v2, %v6140_v42  ;;  %13352 = vmatprep.mubr.bf16.mxu0 %v13800_v39  ;;  %v13882_v12 = vld [vmem:[#allocation2 + $0x1c] sm:$0xf]  ;;  %v13883_v60 = vld [vmem:[#allocation2 + $0x20] sm:$0x1]  ;;  %v6751_v53 = vld [vmem:[#allocation2 + $0x30] sm:$0xe] }
 0x29e   : > { %v11879_v18 = vcombine.low %v6117_v8, %v6127_v28  ;;  %v16821_v45 = vsel %vm14359_vm5, %v11913_v58, %v6797_v25  ;;  %v6799_v47 = vrot.slane %v6797_v25, 4  ;;  %v6804_v31 = vrot.slane %v13880_v19, 5  ;;  %13429 = vmatpush3.bf16.msra.mxu0 %v16480_v24  ;;  %v13816_v8 = vld [vmem:[%s19258_s2 + $0x168] sm:$0xff]   ;;  %v13801_v11 = vld [vmem:[#allocation2 + $0x30] sm:$0xff]  }
 0x29f   : > { %13229 = vmatmul.mubr.bf16.gmra.mxu1 %v11878_v59  ;;  %v6146_v44 = vrot.slane %v6145_v4, 4  ;;  %v6807_v14 = vrot.slane %v13881_v51, 5  ;;  %v11915_v5 = vrot.slane %v6749_v34, 9  ;;  %v6811_v56 = vrot.slane %v13882_v12, 5  ;;  %13430 = vmatprep.subr.bf16.mxu0 %v13814_v33  ;;  %v13884_v35 = vld [vmem:[#allocation2 + $0x28] sm:$0xf] }
 0x2a0   : > { %13232 = vmatprep.mubr.bf16.mxu1 %v11879_v18  ;;  %v6801_v1 = vsel %vm14359_vm5, %v6799_v47, %v6800_v23  ;;  %v16831_v0 = vsel %vm14359_vm5, %v11914_v48, %v6804_v31  ;;  %v6806_v24 = vrot.slane %v6804_v31, 4  ;;  %v6814_v2 = vrot.slane %v13883_v60, 5  ;;  %v6752_v48 = vld [vmem:[#allocation2 + $0x3c] sm:$0xe]  ;;  %v6753_v4 = vld [vmem:[#allocation2 + $0x48] sm:$0xe] }
 0x2a1   : > { %v6151_v58 = vsel %vm14007_vm2, %v6146_v44, %v6150_v55  ;;  %v11945_v61 = vcombine.low %v16821_v45, %v6801_v1  ;;  %v16838_v63 = vsel %vm14359_vm5, %v11915_v5, %v6811_v56  ;;  %v6813_v42 = vrot.slane %v6811_v56, 4  ;;  %v13802_v34 = vld [vmem:[#allocation2 + $0x3c] sm:$0xff]   ;;  %v13885_v19 = vld [vmem:[#allocation2 + $0x34] sm:$0xf] }
 0x2a2   : > { %v11880_v39 = vcombine.low %v6141_v7, %v6151_v58  ;;  %v16842_v25 = vsel %vm14359_vm5, %v6806_v24, %v6807_v14  ;;  %v11916_v40 = vrot.slane %v6750_v49, 9  ;;  %v6818_v23 = vrot.slane %v13884_v35, 5  ;;  %13431 = vmatpush3.bf16.msra.mxu0 %v13814_v33  ;;  %v13819_v18 = vld [vmem:[%s19258_s2 + $0x160] sm:$0xff]   ;;  %v6754_v5 = vld [vmem:[#allocation2 + $0x54] sm:$0xe] }
 0x2a3   : > { %v11946_v55 = vcombine.low %v16831_v0, %v16842_v25  ;;  %v16848_v59 = vsel %vm14359_vm5, %v6813_v42, %v6814_v2  ;;  %v6821_v28 = vrot.slane %v16521_v41, 5  ;;  %v11917_v7 = vrot.slane %v6751_v53, 9  ;;  %13432 = vmatprep.subr.bf16.mxu0 %v13816_v8  ;;  %v13886_v44 = vld [vmem:[#allocation2 + $0x40] sm:$0xf]  ;;  %v13821_v53 = vld [vmem:[%s19258_s2 + $0x158] sm:$0xff]  }
 0x2a4   : > { %13353 = vmatmul.mubr.bf16.gmra.mxu0 %v13801_v11  ;;  %v11947_v33 = vcombine.low %v16838_v63, %v16848_v59  ;;  %v16858_v45 = vsel %vm14359_vm5, %v11916_v40, %v6818_v23  ;;  %v6820_v47 = vrot.slane %v6818_v23, 4  ;;  %v6825_v31 = vrot.slane %v13885_v19, 5  ;;  %v6755_v11 = vld [vmem:[#allocation2 + $0x60] sm:$0xe]  ;;  %v6756_v23 = vld [vmem:[#allocation2 + $0x6c] sm:$0xe] }
 0x2a5   : > { %13356 = vmatprep.mubr.bf16.mxu0 %v13802_v34  ;;  %v6828_v41 = vrot.slane %v16565_v27, 5  ;;  %v11918_v49 = vrot.slane %v6752_v48, 9  ;;  %v6832_v51 = vrot.slane %v13886_v44, 5  ;;  %v6835_v14 = vrot.slane %v16619_v30, 5  ;;  %v13804_v48 = vld [vmem:[#allocation2 + $0x48] sm:$0xff]   ;;  %v13805_v34 = vld [vmem:[#allocation2 + $0x54] sm:$0xff]  }
 0x2a6   : > { %v16864_v12 = vsel %vm14359_vm5, %v6820_v47, %v6821_v28  ;;  %v16868_v56 = vsel %vm14359_vm5, %v11917_v7, %v6825_v31  ;;  %v6827_v1 = vrot.slane %v6825_v31, 4  ;;  %v11919_v24 = vrot.slane %v6753_v4, 9  ;;  %13433 = vmatpush3.bf16.msra.mxu0 %v13816_v8  ;;  %v13809_v63 = vld [vmem:[%s19258_s2 + $0x128] sm:$0xff]  }
 0x2a7   : > { %13233 = vmatmul.mubr.bf16.gmra.mxu1 %v11880_v39  ;;  %v11948_v27 = vcombine.low %v16858_v45, %v16864_v12  ;;  %v16874_v60 = vsel %vm14359_vm5, %v11918_v49, %v6832_v51  ;;  %v6834_v30 = vrot.slane %v6832_v51, 4  ;;  %v6839_v2 = vrot.slane %v16546_v50, 5  ;;  %13434 = vmatprep.subr.bf16.mxu0 %v13819_v18  ;;  %v13824_v49 = vld [vmem:[%s19258_s2 + $0x150] sm:$0xff]  }
 0x2a8   : > { %13300 = vmatprep.mubr.bf16.mxu1 %v11945_v61  ;;  %v16882_v8 = vsel %vm14359_vm5, %v6827_v1, %v6828_v41  ;;  %v6842_v58 = vrot.slane %v16649_v29, 5  ;;  %v11920_v42 = vrot.slane %v6754_v5, 9  ;;  %v6846_v39 = vrot.slane %v16591_v9, 5  ;;  %v6757_v41 = vld [vmem:[#allocation2 + $0x78] sm:$0xe] }
 0x2a9   : > { %v11949_v40 = vcombine.low %v16868_v56, %v16882_v8  ;;  %v16890_v50 = vsel %vm14359_vm5, %v6834_v30, %v6835_v14  ;;  %v16894_v61 = vsel %vm14359_vm5, %v11919_v24, %v6839_v2  ;;  %v6841_v35 = vrot.slane %v6839_v2, 4 }
 0x2aa   : > { %v11950_v29 = vcombine.low %v16874_v60, %v16890_v50  ;;  %v16900_v9 = vsel %vm14359_vm5, %v11920_v42, %v6846_v39  ;;  %v6848_v28 = vrot.slane %v6846_v39, 4  ;;  %v6849_v7 = vrot.slane %v16676_v22, 5  ;;  %13435 = vmatpush3.bf16.msra.mxu0 %v13819_v18 }
 0x2ab   : > { %v16905_v4 = vsel %vm14359_vm5, %v6841_v35, %v6842_v58  ;;  %v11921_v47 = vrot.slane %v6755_v11, 9  ;;  %v6853_v19 = vrot.slane %v16641_v13, 5  ;;  %v6856_v31 = vrot.slane %v16705_v52, 5  ;;  %13436 = vmatprep.subr.bf16.mxu0 %v13821_v53  ;;  %v6758_v13 = vld [vmem:[#allocation2 + $0x84] sm:$0xe]  ;;  %v13806_v52 = vld [vmem:[%s19258_s2 + $0x130] sm:$0xff]  }
 0x2ac   : > { %13357 = vmatmul.mubr.bf16.gmra.mxu0 %v13804_v48  ;;  %v11951_v22 = vcombine.low %v16894_v61, %v16905_v4  ;;  %v16916_v18 = vsel %vm14359_vm5, %v6848_v28, %v6849_v7  ;;  %v11922_v44 = vrot.slane %v6756_v23, 9  ;;  %v6860_v51 = vrot.slane %v16666_v15, 5  ;;  %v6759_v35 = vld [vmem:[#allocation2 + $0x90] sm:$0xe] }
 0x2ad   : > { %13360 = vmatprep.mubr.bf16.mxu0 %v13805_v34  ;;  %v11952_v14 = vcombine.low %v16900_v9, %v16916_v18  ;;  %v16926_v5 = vsel %vm14359_vm5, %v11921_v47, %v6853_v19  ;;  %v6855_v1 = vrot.slane %v6853_v19, 4  ;;  %v6863_v24 = vrot.slane %v16723_v6, 5  ;;  %v16970_v48 = vld [vmem:[#allocation2 + $0x10] sm:$0xf]  ;;  %v13807_v34 = vld [vmem:[#allocation2 + $0x60] sm:$0xff]  }
 0x2ae   : > { %v16931_v30 = vsel %vm14359_vm5, %v11922_v44, %v6860_v51  ;;  %v6862_v15 = vrot.slane %v6860_v51, 4  ;;  %v11923_v2 = vrot.slane %v6757_v41, 9  ;;  %v6867_v58 = vrot.slane %v16693_v3, 5  ;;  %13437 = vmatpush3.bf16.msra.mxu0 %v13821_v53  ;;  %v13826_v3 = vld [vmem:[%s19258_s2 + $0x148] sm:$0xff]  }
 0x2af   : > { %13301 = vmatmul.mubr.bf16.vlgmr.msra.gmra.mxu1 %v11946_v55  ;;  %v16939_v42 = vsel %vm14359_vm5, %v6855_v1, %v6856_v31  ;;  %v6870_v39 = vrot.slane %v16740_v20, 5  ;;  %v11924_v6 = vrot.slane %v6758_v13, 9  ;;  %v6874_v11 = vrot.slane %v16715_v21, 5  ;;  %13438 = vmatprep.subr.bf16.mxu0 %v13824_v49  ;;  %v6760_v55 = vld [vmem:[#allocation2 + $0x9c] sm:$0xe]  ;;  %v13808_v41 = vld [vmem:[#allocation2 + $0x6c] sm:$0xff]  }
 0x2b0   : > { %13304 = vmatprep.mubr.bf16.mxu1 %v11947_v33  ;;  %13381 = vmatpush3.bf16.msra.mxu1 %v16617_v38  ;;  %v11953_v0 = vcombine.low %v16926_v5, %v16939_v42  ;;  %v16954_v20 = vsel %vm14359_vm5, %v6862_v15, %v6863_v24  ;;  %v16958_v21 = vsel %vm14359_vm5, %v11923_v2, %v6867_v58  ;;  %v6869_v25 = vrot.slane %v6867_v58, 4  ;;  %v8369_v53 = vld [vmem:[#allocation2 + $0xc] sm:$0xe]  ;;  %v16978_v31 = vld [vmem:[#allocation2 + $0x14] sm:$0x1]  ;;  %v17161_v5 = vld [vmem:[%s19258_s2 + $0x1b8] sm:$0xff]  }
 0x2b1   : > { %13382 = vmatprep.subr.bf16.mxu1 %v13806_v52  ;;  %v11954_v38 = vcombine.low %v16931_v30, %v16954_v20  ;;  %v16967_v59 = vsel %vm14359_vm5, %v11924_v6, %v6874_v11  ;;  %v6876_v33 = vrot.slane %v6874_v11, 4  ;;  %v6877_v23 = vrot.slane %v16760_v16, 5  ;;  %v6761_v1 = vld [vmem:[#allocation2 + $0xa8] sm:$0xe]  ;;  %v8370_v2 = vld [vmem:[#allocation2 + $0x18] sm:$0xe] }
 0x2b2   : > { %v16974_v28 = vsel %vm14359_vm5, %v6869_v25, %v6870_v39  ;;  %v11925_v7 = vrot.slane %v6759_v35, 9  ;;  %v6881_v47 = vrot.slane %v16728_v17, 5  ;;  %v6884_v19 = vrot.slane %v16775_v43, 5  ;;  %13439 = vmatpush3.bf16.msra.mxu0 %v13824_v49  ;;  %v13828_v17 = vld [vmem:[%s19258_s2 + $0x140] sm:$0xff]   ;;  %v17005_v11 = vld [vmem:[#allocation2 + $0x1c] sm:$0xf] }
 0x2b3   : > { %v11955_v44 = vcombine.low %v16958_v21, %v16974_v28  ;;  %v16984_v16 = vsel %vm14359_vm5, %v6876_v33, %v6877_v23  ;;  %13440 = vmatprep.subr.bf16.mxu0 %v13826_v3  ;;  %v11926_v51 = vrot.slane %v6760_v55, 9  ;;  %v6888_v13 = vrot.slane %v16748_v36, 5  ;;  %v13813_v36 = vld [vmem:[%s19258_s2 + $0x120] sm:$0xff]   ;;  %v17163_v42 = vld [vmem:[#allocation2 + $0x4c] sm:$0xf] }
 0x2b4   : > { %13383 = vmatpush3.bf16.msra.mxu1 %v13806_v52  ;;  %13361 = vmatmul.mubr.bf16.gmra.mxu0 %v13807_v34  ;;  %v16994_v49 = vsel %vm14359_vm5, %v11925_v7, %v6881_v47  ;;  %v6883_v24 = vrot.slane %v6881_v47, 4  ;;  %v6891_v15 = vrot.slane %v16789_v26, 5  ;;  %v12049_v39 = vrot.slane %v8369_v53, 9  ;;  %v17013_v33 = vld [vmem:[#allocation2 + $0x20] sm:$0x1]  ;;  %v17031_v7 = vld [vmem:[%s19258_s2 + $0x1f8] sm:$0xff]  }
 0x2b5   : > { %13364 = vmatprep.mubr.bf16.mxu0 %v13808_v41  ;;  %13384 = vmatprep.subr.bf16.mxu1 %v13809_v63  ;;  %v17002_v52 = vsel %vm14359_vm5, %v11926_v51, %v6888_v13  ;;  %v6890_v58 = vrot.slane %v6888_v13, 4  ;;  %v8435_v6 = vrot.slane %v16970_v48, 5  ;;  %v8438_v35 = vrot.slane %v16978_v31, 5  ;;  %v7615_v41 = vld [vmem:[#allocation2 + $0xc] sm:$0xf]  ;;  %v13818_v51 = vld [vmem:[%s19258_s2 + $0x118] sm:$0xff]  }
 0x2b6   : > { %v17009_v26 = vsel %vm14359_vm5, %v6883_v24, %v6884_v19  ;;  %13441 = vmatpush3.bf16.msra.mxu0 %v13826_v3  ;;  %v11927_v25 = vrot.slane %v6761_v1, 9  ;;  %v6895_v55 = vrot.slane %v16768_v57, 5  ;;  %v6762_v57 = vld [vmem:[#allocation2 + $0xb4] sm:$0xe]  ;;  %v6898_v47 = vrot.slane %v16791_v46, 5  ;;  %v13810_v1 = vld [vmem:[#allocation2 + $0x78] sm:$0xff]  }
 0x2b7   : > { %13305 = vmatmul.mubr.bf16.gmra.mxu1 %v11948_v27  ;;  %v17022_v23 = vsel %vm14359_vm5, %v6890_v58, %v6891_v15  ;;  %v17026_v3 = vsel %vm14359_vm5, %v12049_v39, %v8435_v6  ;;  %v8437_v34 = vrot.slane %v8435_v6, 4  ;;  %13442 = vmatprep.subr.bf16.mxu0 %v13828_v17  ;;  %v8371_v19 = vld [vmem:[#allocation2 + $0x24] sm:$0xe]  ;;  %v12050_v8 = vrot.slane %v8370_v2, 9  ;;  %v17052_v13 = vld [vmem:[#allocation2 + $0x28] sm:$0xf] }
 0x2b8   : > { %13308 = vmatprep.mubr.bf16.mxu1 %v11949_v40  ;;  %13385 = vmatpush3.bf16.msra.mxu1 %v13809_v63  ;;  %v17040_v12 = vsel %vm14359_vm5, %v11927_v25, %v6895_v55  ;;  %v6897_v27 = vrot.slane %v6895_v55, 4  ;;  %v8442_v40 = vrot.slane %v17005_v11, 5  ;;  %v8445_v63 = vrot.slane %v17013_v33, 5  ;;  %v17061_v39 = vld [vmem:[#allocation2 + $0x2c] sm:$0x1]  ;;  %v13812_v2 = vld [vmem:[#allocation2 + $0x84] sm:$0xff]  }
 0x2b9   : > { %13386 = vmatprep.subr.bf16.mxu1 %v13813_v36  ;;  %v17048_v56 = vsel %vm14359_vm5, %v8437_v34, %v8438_v35  ;;  %v11928_v15 = vrot.slane %v6762_v57, 9  ;;  %v6902_v58 = vrot.slane %v16782_v62, 5  ;;  %v6905_v55 = vrot.slane %v16802_v37, 5  ;;  %v17197_v30 = vld [vmem:[#allocation2 + $0x58] sm:$0xf] }
 0x2ba   : > { %v12081_v46 = vcombine.low %v17026_v3, %v17048_v56  ;;  %v17058_v24 = vsel %vm14359_vm5, %v6897_v27, %v6898_v47  ;;  %13443 = vmatpush3.bf16.msra.mxu0 %v13828_v17  ;;  %v17067_v35 = vsel %vm14359_vm5, %v12050_v8, %v8442_v40  ;;  %v8444_v25 = vrot.slane %v8442_v40, 4  ;;  %v13823_v27 = vld [vmem:[%s19258_s2 + $0x110] sm:$0xff]  }
 0x2bb   : > { %13524 = vmatprep.subr.bf16.mxu0 %v17031_v7  ;;  %v17073_v62 = vsel %vm14359_vm5, %v11928_v15, %v6902_v58  ;;  %v6904_v17 = vrot.slane %v6902_v58, 4  ;;  %v12051_v34 = vrot.slane %v8371_v19, 9  ;;  %v8449_v57 = vrot.slane %v17052_v13, 5  ;;  %v8372_v40 = vld [vmem:[#allocation2 + $0x30] sm:$0xe] }
 0x2bc   : > { %13365 = vmatmul.mubr.bf16.gmra.mxu0 %v13810_v1  ;;  %13387 = vmatpush3.bf16.msra.mxu1 %v13813_v36  ;;  %v17081_v37 = vsel %vm14359_vm5, %v8444_v25, %v8445_v63  ;;  %v8452_v36 = vrot.slane %v17061_v39, 5  ;;  %v7664_v47 = vshrl.u32 %v7615_v41, 16  ;;  %v7667_v8 = vshll.u32 %v7615_v41, 16  ;;  %v7618_v63 = vld [vmem:[#allocation2 + $0x18] sm:$0xf] }
 0x2bd   : > { %13368 = vmatprep.mubr.bf16.mxu0 %v13812_v2  ;;  %13388 = vmatprep.subr.bf16.mxu1 %v13818_v51  ;;  %v17088_v1 = vsel %vm14359_vm5, %v6904_v17, %v6905_v55  ;;  %v17092_v15 = vsel %vm14359_vm5, %v12051_v34, %v8449_v57  ;;  %v8451_v58 = vrot.slane %v8449_v57, 4  ;;  %v17094_v2 = vld [vmem:[#allocation2 + $0x34] sm:$0xf]  ;;  %v7673_v55 = vshll.u32 %v16970_v48, 16  ;;  %v17102_v17 = vld [vmem:[#allocation2 + $0x38] sm:$0x1] }
 0x2be   : > { %v7666_v25 = vrot.slane %v7664_v47, 4  ;;  %v7669_v6 = vrot.slane %v7667_v8, 5  ;;  %v7677_v60 = vshrl.u32 %v16970_v48, 16  ;;  %v7683_v50 = vshll.u32 %v16978_v31, 16  ;;  %v13827_v57 = vld [vmem:[%s19258_s2 + $0x108] sm:$0xff]  }
 0x2bf   : > { %13309 = vmatmul.mubr.bf16.gmra.mxu1 %v11950_v29  ;;  %v17109_v34 = vsel %vm14359_vm5, %v8451_v58, %v8452_v36  ;;  %v12052_v29 = vrot.slane %v8372_v40, 9  ;;  %v7675_v4 = vrot.slane %v7673_v55, 5  ;;  %v8459_v48 = vrot.slane %v17102_v17, 5  ;;  %v8373_v31 = vld [vmem:[#allocation2 + $0x3c] sm:$0xe] }
 0x2c0   : > { %13312 = vmatprep.mubr.bf16.mxu1 %v11951_v22  ;;  %13389 = vmatpush3.bf16.msra.mxu1 %v13818_v51  ;;  %v7670_v61 = vor.u32 %v7669_v6, %v7666_v25  ;;  %v8456_v22 = vrot.slane %v17094_v2, 5  ;;  %v13815_v51 = vld [vmem:[#allocation2 + $0x90] sm:$0xff]   ;;  %v7679_v36 = vrot.slane %v7677_v60, 4  ;;  %v7685_v8 = vrot.slane %v7683_v50, 5  ;;  %v13817_v40 = vld [vmem:[#allocation2 + $0x9c] sm:$0xff]  }
 0x2c1   : > { %13390 = vmatprep.subr.bf16.mxu1 %v13823_v27  ;;  %v7688_v58 = vshrl.u32 %v7618_v63, 16  ;;  %v7691_v53 = vshll.u32 %v7618_v63, 16  ;;  %v7621_v47 = vld [vmem:[#allocation2 + $0x24] sm:$0xf]  ;;  %v7697_v55 = vshll.u32 %v17005_v11, 16  ;;  %v7701_v60 = vshrl.u32 %v17005_v11, 16 }
 0x2c2   : > { %v7671_v41 = vrot.slane %v7670_v61, 4  ;;  %v17122_v45 = vsel %vm14359_vm5, %v12052_v29, %v8456_v22  ;;  %v8458_v19 = vrot.slane %v8456_v22, 4  ;;  %v7680_v6 = vor.u32 %v7679_v36, %v7675_v4  ;;  %v17126_v50 = vld [vmem:[#allocation2 + $0x40] sm:$0xf] }
 0x2c3   : > { %v7690_v25 = vrot.slane %v7688_v58, 4  ;;  %v13829_v29 = vld [vmem:[%s19258_s2 + $0x100] sm:$0xff]   ;;  %v7693_v61 = vrot.slane %v7691_v53, 5  ;;  %v7707_v22 = vshll.u32 %v17013_v33, 16  ;;  %v7699_v58 = vrot.slane %v7697_v55, 5 }
 0x2c4   : > { %13369 = vmatmul.mubr.bf16.gmra.mxu0 %v13815_v51  ;;  %13391 = vmatpush3.bf16.msra.mxu1 %v13823_v27  ;;  %v7676_v63 = vsel %vm14007_vm2, %v7671_v41, %v7675_v4  ;;  %v17135_v27 = vsel %vm14359_vm5, %v8458_v19, %v8459_v48  ;;  %v17138_v51 = vld [vmem:[#allocation2 + $0x44] sm:$0x1]  ;;  %v7681_v11 = vrot.slane %v7680_v6, 4  ;;  %v12053_v43 = vrot.slane %v8373_v31, 9 }
 0x2c5   : > { %13372 = vmatprep.mubr.bf16.mxu0 %v13817_v40  ;;  %13392 = vmatprep.subr.bf16.mxu1 %v13827_v57  ;;  %v12084_v36 = vcombine.low %v17122_v45, %v17135_v27  ;;  %v7703_v40 = vrot.slane %v7701_v60, 4  ;;  %v7694_v41 = vor.u32 %v7693_v61, %v7690_v25  ;;  %v7709_v4 = vrot.slane %v7707_v22, 5  ;;  %v13822_v61 = vld [vmem:[#allocation2 + $0xb4] sm:$0xff]  }
 0x2c6   : > { %v8463_v19 = vrot.slane %v17126_v50, 5  ;;  %v7686_v33 = vsel %vm14007_vm2, %v7681_v11, %v7685_v8  ;;  %v8466_v48 = vrot.slane %v17138_v51, 5  ;;  %v7712_v6 = vshrl.u32 %v7621_v47, 16  ;;  %v13820_v8 = vld [vmem:[#allocation2 + $0xa8] sm:$0xff]  }
 0x2c7   : > { %13313 = vmatmul.mubr.bf16.gmra.mxu1 %v11952_v14  ;;  %v7704_v53 = vor.u32 %v7703_v40, %v7699_v58  ;;  %v17152_v9 = vcombine.low %v7676_v63, %v7686_v33  ;;  %v7695_v18 = vrot.slane %v7694_v41, 4  ;;  %v7715_v60 = vshll.u32 %v7621_v47, 16  ;;  %v17174_v41 = vld [vmem:[#allocation2 + $0x50] sm:$0x1] }
 0x2c8   : > { %13316 = vmatprep.mubr.bf16.mxu1 %v11953_v0  ;;  %13393 = vmatpush3.bf16.msra.mxu1 %v13827_v57  ;;  %v17156_v14 = vsel %vm14359_vm5, %v12053_v43, %v8463_v19  ;;  %v8465_v31 = vrot.slane %v8463_v19, 4  ;;  %v8374_v0 = vld [vmem:[#allocation2 + $0x48] sm:$0xe]  ;;  %v7624_v57 = vld [vmem:[#allocation2 + $0x30] sm:$0xf]  ;;  %v7714_v55 = vrot.slane %v7712_v6, 4 }
 0x2c9   : > { %13394 = vmatprep.subr.bf16.mxu1 %v13829_v29  ;;  %v7705_v25 = vrot.slane %v7704_v53, 4  ;;  %v7721_v63 = vshll.u32 %v17052_v13, 16  ;;  %v7700_v43 = vsel %vm14007_vm2, %v7695_v18, %v7699_v58  ;;  %v7725_v11 = vshrl.u32 %v17052_v13, 16 }
 0x2ca   : > { %v17170_v22 = vsel %vm14359_vm5, %v8465_v31, %v8466_v48  ;;  %v7731_v40 = vshll.u32 %v17061_v39, 16  ;;  %v7717_v33 = vrot.slane %v7715_v60, 5  ;;  %v12054_v39 = vrot.slane %v8374_v0, 9 }
 0x2cb   : > { %v7710_v47 = vsel %vm14007_vm2, %v7705_v25, %v7709_v4  ;;  %v12085_v19 = vcombine.low %v17156_v14, %v17170_v22  ;;  %v7723_v58 = vrot.slane %v7721_v63, 5  ;;  %v7727_v13 = vrot.slane %v7725_v11, 4  ;;  %v8375_v63 = vld [vmem:[#allocation2 + $0x54] sm:$0xe]  ;;  %v13839_v14 = vld [vmem:[%s19258_s2 + $0x1d8] sm:$0xff]  }
 0x2cc   : > { %13373 = vmatmul.mubr.bf16.gmra.mxu0 %v13820_v8  ;;  %13395 = vmatpush3.bf16.msra.mxu1 %v13829_v29  ;;  %v17180_v53 = vcombine.low %v7700_v43, %v7710_v47  ;;  %v7733_v48 = vrot.slane %v7731_v40, 5  ;;  %v7718_v6 = vor.u32 %v7717_v33, %v7714_v55  ;;  %v8470_v18 = vrot.slane %v17163_v42, 5  ;;  %v17199_v40 = vld [vmem:[#allocation2 + $0x5c] sm:$0x1] }
 0x2cd   : > { %13376 = vmatprep.mubr.bf16.mxu0 %v13822_v61  ;;  %13476 = vmatprep.subr.bf16.mxu1 %v17161_v5  ;;  %v8473_v29 = vrot.slane %v17174_v41, 5  ;;  %v7736_v31 = vshrl.u32 %v7624_v57, 16  ;;  %v7728_v4 = vor.u32 %v7727_v13, %v7723_v58  ;;  %v7739_v8 = vshll.u32 %v7624_v57, 16  ;;  %v7627_v33 = vld [vmem:[#allocation2 + $0x3c] sm:$0xf] }
 0x2ce   : > { %v7745_v25 = vshll.u32 %v17094_v2, 16  ;;  %v7749_v60 = vshrl.u32 %v17094_v2, 16  ;;  %v7719_v0 = vrot.slane %v7718_v6, 4  ;;  %v17195_v55 = vsel %vm14359_vm5, %v12054_v39, %v8470_v18  ;;  %v13825_v2 = vld [vmem:[#allocation2 + $0xc0] sm:$0xff]  }
 0x2cf   : > { %13317 = vmatmul.mubr.bf16.gmra.mxu1 %v11954_v38  ;;  %v8472_v61 = vrot.slane %v8470_v18, 4  ;;  %v7738_v43 = vrot.slane %v7736_v31, 4  ;;  %v7729_v20 = vrot.slane %v7728_v4, 4  ;;  %v7741_v38 = vrot.slane %v7739_v8, 5 }
 0x2d0   : > { %13320 = vmatprep.mubr.bf16.mxu1 %v11955_v44  ;;  %v7747_v57 = vrot.slane %v7745_v25, 5  ;;  %v7751_v11 = vrot.slane %v7749_v60, 4  ;;  %v7724_v21 = vsel %vm14007_vm2, %v7719_v0, %v7723_v58  ;;  %v7755_v44 = vshll.u32 %v17102_v17, 16  ;;  %v7630_v60 = vld [vmem:[#allocation2 + $0x48] sm:$0xf] }
 0x2d1   : > { %v17205_v28 = vsel %vm14359_vm5, %v8472_v61, %v8473_v29  ;;  %v12055_v47 = vrot.slane %v8375_v63, 9  ;;  %v7734_v13 = vsel %vm14007_vm2, %v7729_v20, %v7733_v48  ;;  %v7742_v6 = vor.u32 %v7741_v38, %v7738_v43  ;;  %v8376_v20 = vld [vmem:[#allocation2 + $0x60] sm:$0xe] }
 0x2d2   : > { %v12086_v39 = vcombine.low %v17195_v55, %v17205_v28  ;;  %v7752_v18 = vor.u32 %v7751_v11, %v7747_v57  ;;  %v17212_v31 = vcombine.low %v7724_v21, %v7734_v13  ;;  %v7757_v58 = vrot.slane %v7755_v44, 5  ;;  %v17234_v21 = vld [vmem:[#allocation2 + $0x68] sm:$0x1] }
 0x2d3   : > { %v8477_v4 = vrot.slane %v17197_v30, 5  ;;  %v8480_v29 = vrot.slane %v17199_v40, 5  ;;  %v7743_v17 = vrot.slane %v7742_v6, 4  ;;  %v7760_v48 = vshrl.u32 %v7627_v33, 16 }
 0x2d4   : > { %13377 = vmatmul.mubr.bf16.gmra.mxu0 %v13825_v2  ;;  %v7753_v8 = vrot.slane %v7752_v18, 4  ;;  %v7763_v25 = vshll.u32 %v7627_v33, 16  ;;  %v7769_v61 = vshll.u32 %v17126_v50, 16  ;;  %v7773_v43 = vshrl.u32 %v17126_v50, 16  ;;  %v17232_v2 = vld [vmem:[#allocation2 + $0x64] sm:$0xf] }
 0x2d5   : > { %13444 = vmatprep.mubr.bf16.mxu0 %v12081_v46  ;;  %v17221_v63 = vsel %vm14359_vm5, %v12055_v47, %v8477_v4  ;;  %v8479_v0 = vrot.slane %v8477_v4, 4  ;;  %v19452_v38 = vcombine.low %v16967_v59, %v16984_v16  ;;  %v7748_v3 = vsel %vm14007_vm2, %v7743_v17, %v7747_v57  ;;  %v13835_v4 = vld [vmem:[%s19258_s2 + $0x1f0] sm:$0xff]  }
 0x2d6   : > { %v7758_v56 = vsel %vm14007_vm2, %v7753_v8, %v7757_v58  ;;  %v7762_v46 = vrot.slane %v7760_v48, 4  ;;  %v7765_v11 = vrot.slane %v7763_v25, 5  ;;  %v19453_v50 = vcombine.low %v16994_v49, %v17009_v26  ;;  %v8377_v25 = vld [vmem:[#allocation2 + $0x6c] sm:$0xe] }
 0x2d7   : > { %13321 = vmatmul.mubr.bf16.gmra.mxu1 %v19452_v38  ;;  %v17239_v44 = vcombine.low %v7748_v3, %v7758_v56  ;;  %v17243_v59 = vsel %vm14359_vm5, %v8479_v0, %v8480_v29  ;;  %v7771_v16 = vrot.slane %v7769_v61, 5  ;;  %v7775_v57 = vrot.slane %v7773_v43, 4  ;;  %v7633_v0 = vld [vmem:[#allocation2 + $0x54] sm:$0xf]  ;;  %v17261_v3 = vld [vmem:[#allocation2 + $0x70] sm:$0xf] }
 0x2d8   : > { %13324 = vmatprep.mubr.bf16.mxu1 %v19453_v50  ;;  %v12087_v47 = vcombine.low %v17221_v63, %v17243_v59  ;;  %v7766_v33 = vor.u32 %v7765_v11, %v7762_v46  ;;  %v7779_v13 = vshll.u32 %v17138_v51, 16  ;;  %v12056_v6 = vrot.slane %v8376_v20, 9 }
 0x2d9   : > { %v7776_v18 = vor.u32 %v7775_v57, %v7771_v16  ;;  %v8484_v58 = vrot.slane %v17232_v2, 5  ;;  %v8487_v49 = vrot.slane %v17234_v21, 5  ;;  %v7784_v26 = vshrl.u32 %v7630_v60, 16 }
 0x2da   : > { %v7767_v29 = vrot.slane %v7766_v33, 4  ;;  %v7781_v17 = vrot.slane %v7779_v13, 5  ;;  %v7787_v8 = vshll.u32 %v7630_v60, 16  ;;  %v7793_v48 = vshll.u32 %v17163_v42, 16 }
 0x2db   : > { %v19454_v51 = vcombine.low %v17067_v35, %v17081_v37  ;;  %v7777_v61 = vrot.slane %v7776_v18, 4  ;;  %v17259_v43 = vsel %vm14359_vm5, %v12056_v6, %v8484_v58  ;;  %v8486_v20 = vrot.slane %v8484_v58, 4  ;;  %v17269_v37 = vld [vmem:[#allocation2 + $0x74] sm:$0x1] }
 0x2dc   : > { %v7786_v38 = vrot.slane %v7784_v26, 4  ;;  %v19455_v60 = vcombine.low %v17092_v15, %v17109_v34  ;;  %v7772_v56 = vsel %vm14007_vm2, %v7767_v29, %v7771_v16  ;;  %v7789_v46 = vrot.slane %v7787_v8, 5  ;;  %v13836_v16 = vld [vmem:[%s19258_s2 + $0x1e8] sm:$0xff]   ;;  %v8378_v8 = vld [vmem:[#allocation2 + $0x78] sm:$0xe] }
 0x2dd   : > { %13445 = vmatmul.mubr.bf16.vlgmr.msra.gmra.mxu0 %v19454_v51  ;;  %v7795_v11 = vrot.slane %v7793_v48, 5  ;;  %v7797_v35 = vshrl.u32 %v17163_v42, 16  ;;  %v7782_v50 = vsel %vm14007_vm2, %v7777_v61, %v7781_v17  ;;  %v17276_v57 = vsel %vm14359_vm5, %v8486_v20, %v8487_v49  ;;  %v17300_v51 = vld [vmem:[#allocation2 + $0x7c] sm:$0xf]  ;;  %v13838_v61 = vld [vmem:[%s19258_s2 + $0x1e0] sm:$0xff]  }
 0x2de   : > { %13448 = vmatprep.mubr.bf16.mxu0 %v19455_v60  ;;  %13525 = vmatpush3.bf16.msra.mxu0 %v17031_v7  ;;  %v7803_v15 = vshll.u32 %v17174_v41, 16  ;;  %v12057_v34 = vrot.slane %v8377_v25, 9  ;;  %v19456_v42 = vcombine.low %v17002_v52, %v17022_v23  ;;  %v17285_v7 = vcombine.low %v7772_v56, %v7782_v50  ;;  %v17307_v60 = vld [vmem:[#allocation2 + $0x80] sm:$0x1] }
 0x2df   : > { %13526 = vmatprep.subr.bf16.mxu0 %v13835_v4  ;;  %v12088_v33 = vcombine.low %v17259_v43, %v17276_v57  ;;  %v7790_v13 = vor.u32 %v7789_v46, %v7786_v38  ;;  %v7799_v6 = vrot.slane %v7797_v35, 4  ;;  %v19457_v41 = vcombine.low %v17040_v12, %v17058_v24  ;;  %v7636_v50 = vld [vmem:[#allocation2 + $0x60] sm:$0xf] }
 0x2e0   : > { %13325 = vmatmul.mubr.bf16.gmra.mxu1 %v19456_v42  ;;  %v7805_v18 = vrot.slane %v7803_v15, 5  ;;  %v8491_v58 = vrot.slane %v17261_v3, 5  ;;  %v8494_v49 = vrot.slane %v17269_v37, 5  ;;  %v7808_v26 = vshrl.u32 %v7633_v0, 16 }
 0x2e1   : > { %13328 = vmatprep.mubr.bf16.mxu1 %v19457_v41  ;;  %v7791_v29 = vrot.slane %v7790_v13, 4  ;;  %v7800_v52 = vor.u32 %v7799_v6, %v7795_v11  ;;  %v7811_v23 = vshll.u32 %v7633_v0, 16  ;;  %v7817_v17 = vshll.u32 %v17197_v30, 16  ;;  %v8379_v41 = vld [vmem:[#allocation2 + $0x84] sm:$0xe] }
 0x2e2   : > { %13527 = vmatpush3.bf16.msra.mxu0 %v13835_v4  ;;  %v17297_v48 = vsel %vm14359_vm5, %v12057_v34, %v8491_v58  ;;  %v8493_v25 = vrot.slane %v8491_v58, 4  ;;  %v7810_v12 = vrot.slane %v7808_v26, 4  ;;  %v7821_v24 = vshrl.u32 %v17197_v30, 16 }
 0x2e3   : > { %13528 = vmatprep.subr.bf16.mxu0 %v13836_v16  ;;  %v7796_v0 = vsel %vm14007_vm2, %v7791_v29, %v7795_v11  ;;  %v7801_v20 = vrot.slane %v7800_v52, 4  ;;  %v7813_v4 = vrot.slane %v7811_v23, 5  ;;  %v7819_v38 = vrot.slane %v7817_v17, 5  ;;  %v7639_v29 = vld [vmem:[#allocation2 + $0x6c] sm:$0xf] }
 0x2e4   : > { %v17314_v30 = vsel %vm14359_vm5, %v8493_v25, %v8494_v49  ;;  %v7823_v56 = vrot.slane %v7821_v24, 4  ;;  %v7827_v46 = vshll.u32 %v17199_v40, 16  ;;  %v12058_v35 = vrot.slane %v8378_v8, 9  ;;  %v17348_v17 = vld [vmem:[#allocation2 + $0x88] sm:$0xf]  ;;  %v13841_v24 = vld [vmem:[%s19258_s2 + $0x1d0] sm:$0xff]  }
 0x2e5   : > { %13449 = vmatmul.mubr.bf16.gmra.mxu0 %v12084_v36  ;;  %v7806_v11 = vsel %vm14007_vm2, %v7801_v20, %v7805_v18  ;;  %v12089_v45 = vcombine.low %v17297_v48, %v17314_v30  ;;  %v7814_v27 = vor.u32 %v7813_v4, %v7810_v12  ;;  %v8498_v36 = vrot.slane %v17300_v51, 5 }
 0x2e6   : > { %13452 = vmatprep.mubr.bf16.mxu0 %v12085_v19  ;;  %13529 = vmatpush3.bf16.msra.mxu0 %v13836_v16  ;;  %v17325_v15 = vcombine.low %v7796_v0, %v7806_v11  ;;  %v7824_v34 = vor.u32 %v7823_v56, %v7819_v38  ;;  %v7829_v40 = vrot.slane %v7827_v46, 5  ;;  %v8501_v42 = vrot.slane %v17307_v60, 5 }
 0x2e7   : > { %13530 = vmatprep.subr.bf16.mxu0 %v13838_v61  ;;  %v19458_v22 = vcombine.low %v17073_v62, %v17088_v1  ;;  %v7815_v19 = vrot.slane %v7814_v27, 4  ;;  %v17336_v13 = vsel %vm14359_vm5, %v12058_v35, %v8498_v36  ;;  %v8500_v16 = vrot.slane %v8498_v36, 4  ;;  %v8380_v35 = vld [vmem:[#allocation2 + $0x90] sm:$0xe] }
 0x2e8   : > { %v7832_v6 = vshrl.u32 %v7636_v50, 16  ;;  %v7825_v18 = vrot.slane %v7824_v34, 4  ;;  %v7835_v58 = vshll.u32 %v7636_v50, 16  ;;  %v7841_v49 = vshll.u32 %v17232_v2, 16  ;;  %v13831_v50 = vld [vmem:[%s19258_s2 + $0x1b0] sm:$0xff]  }
 0x2e9   : > { %13329 = vmatmul.mubr.bf16.gmra.mxu1 %v19458_v22  ;;  %v7845_v26 = vshrl.u32 %v17232_v2, 16  ;;  %v7820_v62 = vsel %vm14007_vm2, %v7815_v19, %v7819_v38  ;;  %v17345_v1 = vsel %vm14359_vm5, %v8500_v16, %v8501_v42  ;;  %v7851_v23 = vshll.u32 %v17234_v21, 16 }
 0x2ea   : > { %13396 = vmatprep.mubr.bf16.mxu1 %v17152_v9  ;;  %v7834_v52 = vrot.slane %v7832_v6, 4  ;;  %v17350_v9 = vld [vmem:[#allocation2 + $0x8c] sm:$0x1]  ;;  %13531 = vmatpush3.bf16.msra.mxu0 %v13838_v61  ;;  %v7830_v8 = vsel %vm14007_vm2, %v7825_v18, %v7829_v40  ;;  %v12090_v2 = vcombine.low %v17336_v13, %v17345_v1  ;;  %v7837_v25 = vrot.slane %v7835_v58, 5 }
 0x2eb   : > { %v7843_v12 = vrot.slane %v7841_v49, 5  ;;  %13532 = vmatprep.subr.bf16.mxu0 %v13839_v14  ;;  %v17359_v0 = vcombine.low %v7820_v62, %v7830_v8  ;;  %v7847_v21 = vrot.slane %v7845_v26, 4  ;;  %v7853_v20 = vrot.slane %v7851_v23, 5  ;;  %v13832_v18 = vld [vmem:[%s19258_s2 + $0x1a8] sm:$0xff]  }
 0x2ec   : > { %v12059_v4 = vrot.slane %v8379_v41, 9  ;;  %v7838_v61 = vor.u32 %v7837_v25, %v7834_v52  ;;  %v8505_v38 = vrot.slane %v17348_v17, 5  ;;  %v8508_v56 = vrot.slane %v17350_v9, 5  ;;  %v7642_v41 = vld [vmem:[#allocation2 + $0x78] sm:$0xf] }
 0x2ed   : > { %13453 = vmatmul.mubr.bf16.gmra.mxu0 %v12086_v39  ;;  %v7856_v46 = vshrl.u32 %v7639_v29, 16  ;;  %v7848_v11 = vor.u32 %v7847_v21, %v7843_v12  ;;  %v7859_v27 = vshll.u32 %v7639_v29, 16  ;;  %v7865_v55 = vshll.u32 %v17261_v3, 16  ;;  %v17374_v39 = vld [vmem:[#allocation2 + $0x94] sm:$0xf]  ;;  %v13844_v21 = vld [vmem:[%s19258_s2 + $0x1c0] sm:$0xff]  }
 0x2ee   : > { %13456 = vmatprep.mubr.bf16.mxu0 %v12087_v47  ;;  %v7869_v28 = vshrl.u32 %v17261_v3, 16  ;;  %13533 = vmatpush3.bf16.msra.mxu0 %v13839_v14  ;;  %v7839_v36 = vrot.slane %v7838_v61, 4  ;;  %v17378_v34 = vsel %vm14359_vm5, %v12059_v4, %v8505_v38  ;;  %v8507_v63 = vrot.slane %v8505_v38, 4  ;;  %v17380_v47 = vld [vmem:[#allocation2 + $0x98] sm:$0x1]  ;;  %v13842_v3 = vld [vmem:[%s19258_s2 + $0x1c8] sm:$0xff]  }
 0x2ef   : > { %v7858_v59 = vrot.slane %v7856_v46, 4  ;;  %13534 = vmatprep.subr.bf16.mxu0 %v13841_v24  ;;  %v7849_v40 = vrot.slane %v7848_v11, 4  ;;  %v7861_v42 = vrot.slane %v7859_v27, 5  ;;  %v7867_v22 = vrot.slane %v7865_v55, 5  ;;  %v17432_v11 = vpop.f32.mrf.mxu0 }
 0x2f0   : > { %v7871_v19 = vrot.slane %v7869_v28, 4  ;;  %v7844_v14 = vsel %vm14007_vm2, %v7839_v36, %v7843_v12  ;;  %v17392_v16 = vsel %vm14359_vm5, %v8507_v63, %v8508_v56  ;;  %v12060_v6 = vrot.slane %v8380_v35, 9  ;;  %v7645_v12 = vld [vmem:[#allocation2 + $0x84] sm:$0xf]  ;;  %v8381_v56 = vld [vmem:[#allocation2 + $0x9c] sm:$0xe] }
 0x2f1   : > { %13397 = vmatmul.mubr.bf16.vlgmr.msra.gmra.mxu1 %v17180_v53  ;;  %v7875_v53 = vshll.u32 %v17269_v37, 16  ;;  %v7862_v58 = vor.u32 %v7861_v42, %v7858_v59  ;;  %v8512_v37 = vrot.slane %v17374_v39, 5  ;;  %v8515_v62 = vrot.slane %v17380_v47, 5  ;;  %v17428_v35 = vld [vmem:[#allocation2 + $0xa0] sm:$0xf] }
 0x2f2   : > { %13400 = vmatprep.mubr.bf16.mxu1 %v17212_v31  ;;  %13477 = vmatpush3.bf16.msra.mxu1 %v17161_v5  ;;  %v7854_v31 = vsel %vm14007_vm2, %v7849_v40, %v7853_v20  ;;  %v12091_v5 = vcombine.low %v17378_v34, %v17392_v16  ;;  %v7872_v49 = vor.u32 %v7871_v19, %v7867_v22  ;;  %v7880_v8 = vshrl.u32 %v7642_v41, 16  ;;  %v13834_v20 = vld [vmem:[%s19258_s2 + $0x1a0] sm:$0xff]  }
 0x2f3   : > { %13478 = vmatprep.subr.bf16.mxu1 %v13831_v50  ;;  %v17402_v26 = vcombine.low %v7844_v14, %v7854_v31  ;;  %v7877_v29 = vrot.slane %v7875_v53, 5  ;;  %13535 = vmatpush3.bf16.msra.mxu0 %v13841_v24  ;;  %v7863_v52 = vrot.slane %v7862_v58, 4  ;;  %v7883_v25 = vshll.u32 %v7642_v41, 16  ;;  %v7648_v53 = vld [vmem:[#allocation2 + $0x90] sm:$0xf] }
 0x2f4   : > { %v7873_v23 = vrot.slane %v7872_v49, 4  ;;  %13536 = vmatprep.subr.bf16.mxu0 %v13842_v3  ;;  %v17417_v24 = vsel %vm14359_vm5, %v12060_v6, %v8512_v37  ;;  %v8514_v4 = vrot.slane %v8512_v37, 4  ;;  %v7889_v61 = vshll.u32 %v17300_v51, 16  ;;  %v17457_v58 = vld [vmem:[#allocation2 + $0xac] sm:$0xf] }
 0x2f5   : > { %13457 = vmatmul.mubr.bf16.gmra.mxu0 %v12088_v33  ;;  %v7893_v38 = vshrl.u32 %v17300_v51, 16  ;;  %v7868_v43 = vsel %vm14007_vm2, %v7863_v52, %v7867_v22  ;;  %v7882_v33 = vrot.slane %v7880_v8, 4  ;;  %v7885_v46 = vrot.slane %v7883_v25, 5  ;;  %v8382_v22 = vld [vmem:[#allocation2 + $0xa8] sm:$0xe] }
 0x2f6   : > { %13479 = vmatpush3.bf16.msra.mxu1 %v13831_v50  ;;  %13460 = vmatprep.mubr.bf16.mxu0 %v12089_v45  ;;  %v7878_v57 = vsel %vm14007_vm2, %v7873_v23, %v7877_v29  ;;  %v17430_v50 = vld [vmem:[#allocation2 + $0xa4] sm:$0x1]  ;;  %v17438_v48 = vsel %vm14359_vm5, %v8514_v4, %v8515_v62  ;;  %v7891_v30 = vrot.slane %v7889_v61, 5  ;;  %v7899_v28 = vshll.u32 %v17307_v60, 16  ;;  %v17462_v52 = vld [vmem:[#allocation2 + $0xb0] sm:$0x1] }
 0x2f7   : > { %13480 = vmatprep.subr.bf16.mxu1 %v13832_v18  ;;  %v17434_v51 = vcombine.low %v7868_v43, %v7878_v57  ;;  %v7895_v45 = vrot.slane %v7893_v38, 4  ;;  %13537 = vmatpush3.bf16.msra.mxu0 %v13842_v3  ;;  %v12092_v27 = vcombine.low %v17417_v24, %v17438_v48  ;;  %v7886_v55 = vor.u32 %v7885_v46, %v7882_v33  ;;  %v13837_v3 = vld [vmem:[%s19258_s2 + $0x198] sm:$0xff]   ;;  %v8383_v43 = vld [vmem:[#allocation2 + $0xb4] sm:$0xe]  ;;  %v13845_v24 = vld [vmem:[%s19258_s2 + $0x180] sm:$0xff]  }
 0x2f8   : > { %v12061_v36 = vrot.slane %v8381_v56, 9  ;;  %13538 = vmatprep.subr.bf16.mxu0 %v13844_v21  ;;  %v8519_v59 = vrot.slane %v17428_v35, 5  ;;  %v8522_v40 = vrot.slane %v17430_v50, 5  ;;  %v7904_v42 = vshrl.u32 %v7645_v12, 16 }
 0x2f9   : > { %13401 = vmatmul.mubr.bf16.gmra.mxu1 %v17239_v44  ;;  %v7896_v63 = vor.u32 %v7895_v45, %v7891_v30  ;;  %v7887_v44 = vrot.slane %v7886_v55, 4  ;;  %v7901_v19 = vrot.slane %v7899_v28, 5  ;;  %v7907_v60 = vshll.u32 %v7645_v12, 16  ;;  %v17493_v45 = vld [vmem:[#allocation2 + $0xb8] sm:$0xf] }
 0x2fa   : > { %13404 = vmatprep.mubr.bf16.mxu1 %v17285_v7  ;;  %13481 = vmatpush3.bf16.msra.mxu1 %v13832_v18  ;;  %v7913_v14 = vshll.u32 %v17348_v17, 16  ;;  %v17451_v7 = vpop.f32.mrf.mxu0  ;;  %v17455_v41 = vsel %vm14359_vm5, %v12061_v36, %v8519_v59  ;;  %v8521_v18 = vrot.slane %v8519_v59, 4  ;;  %v7906_v31 = vrot.slane %v7904_v42, 4 }
 0x2fb   : > { %13482 = vmatprep.subr.bf16.mxu1 %v13834_v20  ;;  %v7897_v6 = vrot.slane %v7896_v63, 4  ;;  %13539 = vmatpush3.bf16.msra.mxu0 %v13844_v21  ;;  %v7892_v49 = vsel %vm14007_vm2, %v7887_v44, %v7891_v30  ;;  %v7909_v29 = vrot.slane %v7907_v60, 5  ;;  %v7917_v62 = vshrl.u32 %v17348_v17, 16  ;;  %v17497_v63 = vld [vmem:[#allocation2 + $0xbc] sm:$0x1] }
 0x2fc   : > { %v7915_v37 = vrot.slane %v7913_v14, 5  ;;  %v8523_v8 = vsel %vm14359_vm5, %v8521_v18, %v8522_v40  ;;  %v7923_v25 = vshll.u32 %v17350_v9, 16  ;;  %v12062_v12 = vrot.slane %v8382_v22, 9  ;;  %v7651_v44 = vld [vmem:[#allocation2 + $0x9c] sm:$0xf] }
 0x2fd   : > { %13461 = vmatmul.mubr.bf16.gmra.mxu0 %v12090_v2  ;;  %v7902_v23 = vsel %vm14007_vm2, %v7897_v6, %v7901_v19  ;;  %v12093_v21 = vcombine.low %v17455_v41, %v8523_v8  ;;  %v7910_v13 = vor.u32 %v7909_v29, %v7906_v31  ;;  %v7919_v1 = vrot.slane %v7917_v62, 4  ;;  %v13840_v2 = vld [vmem:[%s19258_s2 + $0x190] sm:$0xff]  }
 0x2fe   : > { %13483 = vmatpush3.bf16.msra.mxu1 %v13834_v20  ;;  %13464 = vmatprep.mubr.bf16.mxu0 %v12091_v5  ;;  %v17475_v17 = vcombine.low %v7892_v49, %v7902_v23  ;;  %v17481_v20 = vpop.f32.mrf.mxu0  ;;  %v7925_v4 = vrot.slane %v7923_v25, 5  ;;  %v8526_v9 = vrot.slane %v17457_v58, 5  ;;  %v8529_v61 = vrot.slane %v17462_v52, 5  ;;  %v7654_v25 = vld [vmem:[#allocation2 + $0xa8] sm:$0xf] }
 0x2ff   : > { %13484 = vmatprep.subr.bf16.mxu1 %v13837_v3  ;;  %v7928_v34 = vshrl.u32 %v7648_v53, 16  ;;  %v7911_v16 = vrot.slane %v7910_v13, 4  ;;  %v7920_v5 = vor.u32 %v7919_v1, %v7915_v37  ;;  %v7931_v38 = vshll.u32 %v7648_v53, 16 }
 0x300   : > { %v7937_v56 = vshll.u32 %v17374_v39, 16  ;;  %v17490_v57 = vsel %vm14359_vm5, %v12062_v12, %v8526_v9  ;;  %v8528_v33 = vrot.slane %v8526_v9, 4  ;;  %v7941_v30 = vshrl.u32 %v17374_v39, 16  ;;  %v17502_v59 = vpop.f32.mrf.mxu0 }
 0x301   : > { %13405 = vmatmul.mubr.bf16.gmra.mxu1 %v17325_v15  ;;  %v7930_v46 = vrot.slane %v7928_v34, 4  ;;  %v7916_v15 = vsel %vm14007_vm2, %v7911_v16, %v7915_v37  ;;  %v7921_v55 = vrot.slane %v7920_v5, 4  ;;  %v7933_v28 = vrot.slane %v7931_v38, 5  ;;  %v8384_v37 = vld [vmem:[#allocation2 + $0xc0] sm:$0xe] }
 0x302   : > { %13408 = vmatprep.mubr.bf16.mxu1 %v17359_v0  ;;  %13485 = vmatpush3.bf16.msra.mxu1 %v13837_v3  ;;  %v7939_v36 = vrot.slane %v7937_v56, 5  ;;  %v13843_v0 = vld [vmem:[%s19258_s2 + $0x188] sm:$0xff]   ;;  %v8530_v39 = vsel %vm14359_vm5, %v8528_v33, %v8529_v61  ;;  %v7943_v40 = vrot.slane %v7941_v30, 4  ;;  %v7947_v42 = vshll.u32 %v17380_v47, 16  ;;  %v17522_v48 = vpop.f32.mrf.mxu0 }
 0x303   : > { %13486 = vmatprep.subr.bf16.mxu1 %v13840_v2  ;;  %v12063_v22 = vrot.slane %v8383_v43, 9  ;;  %v7926_v19 = vsel %vm14007_vm2, %v7921_v55, %v7925_v4  ;;  %v12094_v3 = vcombine.low %v17490_v57, %v8530_v39  ;;  %v7934_v60 = vor.u32 %v7933_v28, %v7930_v46  ;;  %v17534_v4 = vld [vmem:[#allocation2 + $0xc8] sm:$0x1]  ;;  %v9254_v28 = vld [vmem:[#allocation2 + $0x18] sm:$0xf] }
 0x304   : > { %v8533_v14 = vrot.slane %v17493_v45, 5  ;;  %v17514_v53 = vcombine.low %v7916_v15, %v7926_v19  ;;  %v7944_v6 = vor.u32 %v7943_v40, %v7939_v36  ;;  %v7949_v41 = vrot.slane %v7947_v42, 5  ;;  %v17546_v56 = vpop.f32.mrf.mxu0 }
 0x305   : > { %13465 = vmatmul.mubr.bf16.gmra.mxu0 %v12092_v27  ;;  %v8536_v47 = vrot.slane %v17497_v63, 5  ;;  %v7935_v18 = vrot.slane %v7934_v60, 4  ;;  %v7952_v29 = vshrl.u32 %v7651_v44, 16  ;;  %v7955_v62 = vshll.u32 %v7651_v44, 16 }
 0x306   : > { %13487 = vmatpush3.bf16.msra.mxu1 %v13840_v2  ;;  %13468 = vmatprep.mubr.bf16.mxu0 %v12093_v21  ;;  %v8534_v31 = vsel %vm14359_vm5, %v12063_v22, %v8533_v14  ;;  %v8535_v49 = vrot.slane %v8533_v14, 4  ;;  %v7945_v27 = vrot.slane %v7944_v6, 4  ;;  %v7961_v23 = vshll.u32 %v17428_v35, 16  ;;  %v17532_v2 = vld [vmem:[#allocation2 + $0xc4] sm:$0xf]  ;;  %v17555_v60 = vpop.f32.mrf.mxu0 }
 0x307   : > { %13488 = vmatprep.subr.bf16.mxu1 %v13843_v0  ;;  %v7965_v8 = vshrl.u32 %v17428_v35, 16  ;;  %v7940_v12 = vsel %vm14007_vm2, %v7935_v18, %v7939_v36  ;;  %v7954_v13 = vrot.slane %v7952_v29, 4  ;;  %v7971_v1 = vshll.u32 %v17430_v50, 16  ;;  %v17544_v50 = vld [vmem:[%s19258_s2 + $0x238] sm:$0xff]   ;;  %v17567_v29 = vld [vmem:[#allocation2 + $0x20] sm:$0x1] }
 0x308   : > { %v8537_v21 = vsel %vm14359_vm5, %v8535_v49, %v8536_v47  ;;  %v7950_v35 = vsel %vm14007_vm2, %v7945_v27, %v7949_v41  ;;  %v7963_v61 = vrot.slane %v7961_v23, 5  ;;  %v12064_v38 = vrot.slane %v8384_v37, 9  ;;  %v17562_v6 = vld [vmem:[#allocation2 + $0x1c] sm:$0xf]  ;;  %v7657_v37 = vld [vmem:[#allocation2 + $0xb4] sm:$0xf] }
 0x309   : > { %13409 = vmatmul.mubr.bf16.gmra.mxu1 %v17402_v26  ;;  %v12095_v9 = vcombine.low %v8534_v31, %v8537_v21  ;;  %v7957_v26 = vrot.slane %v7955_v62, 5  ;;  %v17539_v34 = vcombine.low %v7940_v12, %v7950_v35  ;;  %v7967_v16 = vrot.slane %v7965_v8, 4  ;;  %v17572_v12 = vpop.f32.mrf.mxu1  ;;  %v17574_v21 = vpop.f32.mrf.mxu0 }
 0x30a   : > { %13412 = vmatprep.mubr.bf16.mxu1 %v17434_v51  ;;  %13489 = vmatpush3.bf16.msra.mxu1 %v13843_v0  ;;  %v7973_v5 = vrot.slane %v7971_v1, 5  ;;  %v8540_v43 = vrot.slane %v17532_v2, 5  ;;  %v8543_v57 = vrot.slane %v17534_v4, 5  ;;  %v7976_v33 = vshrl.u32 %v7654_v25, 16  ;;  %19459 = vst [vmem:[#allocation10_spill] sm:$0xff] %v17574_v21 }
 0x30b   : > { %13490 = vmatprep.subr.bf16.mxu1 %v13845_v24  ;;  %v7958_v51 = vor.u32 %v7957_v26, %v7954_v13  ;;  %v7968_v46 = vor.u32 %v7967_v16, %v7963_v61  ;;  %v7979_v30 = vshll.u32 %v7654_v25, 16  ;;  %v7985_v15 = vshll.u32 %v17457_v58, 16 }
 0x30c   : > { %v7989_v55 = vshrl.u32 %v17457_v58, 16  ;;  %v8541_v0 = vsel %vm14359_vm5, %v12064_v38, %v8540_v43  ;;  %v8542_v39 = vrot.slane %v8540_v43, 4  ;;  %v7978_v40 = vrot.slane %v7976_v33, 4 }
 0x30d   : > { %13469 = vmatmul.mubr.bf16.gmra.mxu0 %v12094_v3  ;;  %v7959_v36 = vrot.slane %v7958_v51, 4  ;;  %v7969_v42 = vrot.slane %v7968_v46, 4  ;;  %v7981_v22 = vrot.slane %v7979_v30, 5  ;;  %v7987_v44 = vrot.slane %v7985_v15, 5 }
 0x30e   : > { %13491 = vmatpush3.bf16.msra.mxu1 %v13845_v24  ;;  %13472 = vmatprep.mubr.bf16.mxu0 %v12095_v9  ;;  %v7991_v19 = vrot.slane %v7989_v55, 4  ;;  %v8544_v3 = vsel %vm14359_vm5, %v8542_v39, %v8543_v57  ;;  %v7995_v14 = vshll.u32 %v17462_v52, 16  ;;  %v9303_v41 = vshrl.u32 %v9254_v28, 16  ;;  %v17583_v55 = vpop.f32.mrf.mxu1  ;;  %v17588_v39 = vld [vmem:[#allocation2 + $0x28] sm:$0xf] }
 0x30f   : > { %13572 = vmatprep.subr.bf16.mxu1 %v17544_v50  ;;  %v7964_v58 = vsel %vm14007_vm2, %v7959_v36, %v7963_v61  ;;  %v7974_v47 = vsel %vm14007_vm2, %v7969_v42, %v7973_v5  ;;  %v12096_v18 = vcombine.low %v8541_v0, %v8544_v3  ;;  %v7982_v31 = vor.u32 %v7981_v22, %v7978_v40  ;;  %v9257_v5 = vld [vmem:[#allocation2 + $0x24] sm:$0xf]  ;;  %v17591_v3 = vld [vmem:[#allocation2 + $0x2c] sm:$0x1] }
 0x310   : > { %v7992_v49 = vor.u32 %v7991_v19, %v7987_v44  ;;  %v12037_v24 = vcombine.low %v7964_v58, %v7974_v47  ;;  %v7997_v27 = vrot.slane %v7995_v14, 5  ;;  %v9305_v62 = vrot.slane %v9303_v41, 4 }
 0x311   : > { %13413 = vmatmul.mubr.bf16.gmra.mxu1 %v17475_v17  ;;  %v9306_v52 = vshll.u32 %v9254_v28, 16  ;;  %v7983_v23 = vrot.slane %v7982_v31, 4  ;;  %v9312_v25 = vshll.u32 %v17562_v6, 16  ;;  %v9316_v17 = vshrl.u32 %v17562_v6, 16  ;;  %v17585_v28 = vpop.f32.mrf.mxu0 }
 0x312   : > { %13416 = vmatprep.mubr.bf16.mxu1 %v17514_v53  ;;  %v7993_v8 = vrot.slane %v7992_v49, 4  ;;  %v9322_v1 = vshll.u32 %v17567_v29, 16  ;;  %v8000_v35 = vshrl.u32 %v7657_v37, 16  ;;  %v8003_v9 = vshll.u32 %v7657_v37, 16  ;;  %v17598_v37 = vpop.f32.mrf.mxu1 }
 0x313   : > { %v9308_v13 = vrot.slane %v9306_v52, 5  ;;  %v7988_v53 = vsel %vm14007_vm2, %v7983_v23, %v7987_v44  ;;  %v9314_v61 = vrot.slane %v9312_v25, 5  ;;  %v9318_v16 = vrot.slane %v9316_v17, 4 }
 0x314   : > { %v7998_v26 = vsel %vm14007_vm2, %v7993_v8, %v7997_v27  ;;  %v9324_v43 = vrot.slane %v9322_v1, 5  ;;  %v8002_v57 = vrot.slane %v8000_v35, 4  ;;  %v8005_v46 = vrot.slane %v8003_v9, 5  ;;  %v17600_v27 = vpop.f32.mrf.mxu0 }
 0x315   : > { %13473 = vmatmul.mubr.bf16.gmra.mxu0 %v12096_v18  ;;  %v12038_v38 = vcombine.low %v7988_v53, %v7998_v26  ;;  %v9309_v51 = vor.u32 %v9308_v13, %v9305_v62  ;;  %v9319_v33 = vor.u32 %v9318_v16, %v9314_v61  ;;  %v8009_v30 = vshll.u32 %v17493_v45, 16  ;;  %v9260_v26 = vld [vmem:[#allocation2 + $0x30] sm:$0xf] }
 0x316   : > { %v8013_v15 = vshrl.u32 %v17493_v45, 16  ;;  %v8019_v0 = vshll.u32 %v17497_v63, 16  ;;  %v9327_v40 = vshrl.u32 %v9257_v5, 16  ;;  %v9330_v42 = vshll.u32 %v9257_v5, 16  ;;  %v7660_v63 = vld [vmem:[#allocation2 + $0xc0] sm:$0xf] }
 0x317   : > { %v9310_v36 = vrot.slane %v9309_v51, 4  ;;  %v9320_v22 = vrot.slane %v9319_v33, 4  ;;  %v8006_v44 = vor.u32 %v8005_v46, %v8002_v57  ;;  %v8011_v19 = vrot.slane %v8009_v30, 5  ;;  %v17612_v57 = vpop.f32.mrf.mxu1  ;;  %v17614_v33 = vpop.f32.mrf.mxu0 }
 0x318   : > { %v8015_v58 = vrot.slane %v8013_v15, 4  ;;  %v8021_v14 = vrot.slane %v8019_v0, 5  ;;  %v9329_v41 = vrot.slane %v9327_v40, 4  ;;  %v9332_v47 = vrot.slane %v9330_v42, 5 }
 0x319   : > { %13417 = vmatmul.mubr.bf16.gmra.mxu1 %v17539_v34  ;;  %v9315_v45 = vsel %vm14007_vm2, %v9310_v36, %v9314_v61  ;;  %v9325_v18 = vsel %vm14007_vm2, %v9320_v22, %v9324_v43  ;;  %v8007_v31 = vrot.slane %v8006_v44, 4  ;;  %v9336_v34 = vshll.u32 %v17588_v39, 16  ;;  %v17610_v43 = vld [vmem:[#allocation2 + $0x34] sm:$0xf] }
 0x31a   : > { %13420 = vmatprep.mubr.bf16.mxu1 %v12037_v24  ;;  %v8016_v49 = vor.u32 %v8015_v58, %v8011_v19  ;;  %v12161_v62 = vcombine.low %v9315_v45, %v9325_v18  ;;  %v9333_v24 = vor.u32 %v9332_v47, %v9329_v41  ;;  %v9340_v52 = vshrl.u32 %v17588_v39, 16  ;;  %v9263_v18 = vld [vmem:[#allocation2 + $0x3c] sm:$0xf] }
 0x31b   : > { %v9346_v23 = vshll.u32 %v17591_v3, 16  ;;  %v8012_v8 = vsel %vm14007_vm2, %v8007_v31, %v8011_v19  ;;  %v9338_v17 = vrot.slane %v9336_v34, 5  ;;  %v8024_v13 = vshrl.u32 %v7660_v63, 16  ;;  %v17619_v19 = vld [vmem:[#allocation2 + $0x38] sm:$0x1]  ;;  %v17625_v31 = vpop.f32.mrf.mxu0 }
 0x31c   : > { %v8017_v25 = vrot.slane %v8016_v49, 4  ;;  %13540 = vmatprep.mubr.bf16.mxu0 %v12161_v62  ;;  %v9334_v1 = vrot.slane %v9333_v24, 4  ;;  %v9342_v35 = vrot.slane %v9340_v52, 4  ;;  %v8027_v53 = vshll.u32 %v7660_v63, 16  ;;  %v17629_v24 = vld [vmem:[#allocation2 + $0x40] sm:$0xf] }
 0x31d   : > { %v9348_v9 = vrot.slane %v9346_v23, 5  ;;  %v8026_v16 = vrot.slane %v8024_v13, 4  ;;  %v8033_v5 = vshll.u32 %v17532_v2, 16  ;;  %v8037_v51 = vshrl.u32 %v17532_v2, 16 }
 0x31e   : > { %v8022_v61 = vsel %vm14007_vm2, %v8017_v25, %v8021_v14  ;;  %v9339_v30 = vsel %vm14007_vm2, %v9334_v1, %v9338_v17  ;;  %v9343_v15 = vor.u32 %v9342_v35, %v9338_v17  ;;  %v8029_v36 = vrot.slane %v8027_v53, 5 }
 0x31f   : > { %v12039_v46 = vcombine.low %v8012_v8, %v8022_v61  ;;  %v8035_v0 = vrot.slane %v8033_v5, 5  ;;  %v8039_v40 = vrot.slane %v8037_v51, 4  ;;  %v8043_v42 = vshll.u32 %v17534_v4, 16 }
 0x320   : > { %v9351_v22 = vshrl.u32 %v9260_v26, 16  ;;  %v9344_v2 = vrot.slane %v9343_v15, 4  ;;  %v8030_v44 = vor.u32 %v8029_v36, %v8026_v16  ;;  %v9354_v58 = vshll.u32 %v9260_v26, 16  ;;  %v17636_v26 = vld [vmem:[#allocation2 + $0x44] sm:$0x1]  ;;  %v13846_v15 = vld [vmem:[#allocation2 + $0x18] sm:$0xff]  }
 0x321   : > { %13421 = vmatmul.mubr.bf16.gmra.mxu1 %v12038_v38  ;;  %v9360_v45 = vshll.u32 %v17610_v43, 16  ;;  %v8040_v14 = vor.u32 %v8039_v40, %v8035_v0  ;;  %v8045_v41 = vrot.slane %v8043_v42, 5  ;;  %v9364_v63 = vshrl.u32 %v17610_v43, 16  ;;  %v17623_v38 = vpop.f32.mrf.mxu1  ;;  %v9266_v16 = vld [vmem:[#allocation2 + $0x48] sm:$0xf] }
 0x322   : > { %13424 = vmatprep.mubr.bf16.mxu1 %v12039_v46  ;;  %v9353_v47 = vrot.slane %v9351_v22, 4  ;;  %v9349_v4 = vsel %vm14007_vm2, %v9344_v2, %v9348_v9  ;;  %v8031_v49 = vrot.slane %v8030_v44, 4  ;;  %v9356_v34 = vrot.slane %v9354_v58, 5  ;;  %v17644_v44 = vld [vmem:[#allocation2 + $0x4c] sm:$0xf] }
 0x323   : > { %v9362_v62 = vrot.slane %v9360_v45, 5  ;;  %v12162_v52 = vcombine.low %v9339_v30, %v9349_v4  ;;  %v8041_v23 = vrot.slane %v8040_v14, 4  ;;  %v9366_v8 = vrot.slane %v9364_v63, 4  ;;  %v17639_v5 = vpop.f32.mrf.mxu1 }
 0x324   : > { %v9370_v25 = vshll.u32 %v17619_v19, 16  ;;  %v9357_v17 = vor.u32 %v9356_v34, %v9353_v47  ;;  %v9375_v13 = vshrl.u32 %v9263_v18, 16  ;;  %v9378_v1 = vshll.u32 %v9263_v18, 16  ;;  %v17641_v51 = vpop.f32.mrf.mxu0 }
 0x325   : > { %13541 = vmatmul.mubr.bf16.vlgmr.msra.gmra.mxu0 %v12162_v52  ;;  %v8036_v35 = vsel %vm14007_vm2, %v8031_v49, %v8035_v0  ;;  %v8046_v9 = vsel %vm14007_vm2, %v8041_v23, %v8045_v41  ;;  %v9367_v53 = vor.u32 %v9366_v8, %v9362_v62  ;;  %v9384_v61 = vshll.u32 %v17629_v24, 16  ;;  %v17651_v41 = vld [vmem:[#allocation2 + $0x50] sm:$0x1]  ;;  %v17657_v34 = vpop.f32.mrf.mxu1 }
 0x326   : > { %v12040_v46 = vcombine.low %v8036_v35, %v8046_v9  ;;  %v9358_v30 = vrot.slane %v9357_v17, 4  ;;  %v9377_v36 = vrot.slane %v9375_v13, 4  ;;  %v9380_v40 = vrot.slane %v9378_v1, 5  ;;  %v17659_v52 = vpop.f32.mrf.mxu0  ;;  %v17664_v35 = vld [vmem:[#allocation2 + $0x58] sm:$0xf] }
 0x327   : > { %v9368_v42 = vrot.slane %v9367_v53, 4  ;;  %v9372_v0 = vrot.slane %v9370_v25, 5  ;;  %v9386_v22 = vrot.slane %v9384_v61, 5  ;;  %v9388_v2 = vshrl.u32 %v17629_v24, 16  ;;  %v9269_v25 = vld [vmem:[#allocation2 + $0x54] sm:$0xf] }
 0x328   : > { %v9381_v58 = vor.u32 %v9380_v40, %v9377_v36  ;;  %v9394_v45 = vshll.u32 %v17636_v26, 16  ;;  %v17649_v14 = vadd.f32 %v17432_v11, %v17572_v12  ;;  %v9399_v47 = vshrl.u32 %v9266_v16, 16  ;;  %v17676_v40 = vld [vmem:[#allocation2 + $0x5c] sm:$0x1] }
 0x329   : > { %13425 = vmatmul.mubr.bf16.gmra.mxu1 %v12040_v46  ;;  %v9363_v63 = vsel %vm14007_vm2, %v9358_v30, %v9362_v62  ;;  %v9373_v18 = vsel %vm14007_vm2, %v9368_v42, %v9372_v0  ;;  %v9390_v4 = vrot.slane %v9388_v2, 4  ;;  %v9402_v49 = vshll.u32 %v9266_v16, 16  ;;  %v17678_v42 = vpop.f32.mrf.mxu1  ;;  %v17680_v0 = vpop.f32.mrf.mxu0  ;;  %v13847_v2 = vld [vmem:[#allocation2 + $0x24] sm:$0xff]  }
 0x32a   : > { %13492 = vmatprep.mubr.bf16.mxu1 %v13846_v15  ;;  %v12163_v23 = vcombine.low %v9363_v63, %v9373_v18  ;;  %v9382_v8 = vrot.slane %v9381_v58, 4  ;;  %v9401_v11 = vrot.slane %v9399_v47, 4  ;;  %v9408_v12 = vshll.u32 %v17644_v44, 16  ;;  %19461 = vst [vmem:[#allocation17_spill] sm:$0xff] %v17678_v42  ;;  %v13849_v63 = vld [vmem:[#allocation2 + $0x30] sm:$0xff]  }
 0x32b   : > { %v9391_v17 = vor.u32 %v9390_v4, %v9386_v22  ;;  %v9404_v13 = vrot.slane %v9402_v49, 5  ;;  %v9412_v62 = vshrl.u32 %v17644_v44, 16  ;;  %v9418_v1 = vshll.u32 %v17651_v41, 16  ;;  %v9272_v4 = vld [vmem:[#allocation2 + $0x60] sm:$0xf] }
 0x32c   : > { %13544 = vmatprep.mubr.bf16.mxu0 %v12163_v23  ;;  %v9396_v9 = vrot.slane %v9394_v45, 5  ;;  %v9410_v53 = vrot.slane %v9408_v12, 5  ;;  %v17668_v61 = vadd.f32 %v17451_v7, %v17583_v55  ;;  %v17672_v16 = vadd.f32 %v17481_v20, %v17598_v37  ;;  %v13851_v20 = vld [vmem:[%s19258_s2 + $0x230] sm:$0xff]   ;;  %v17689_v12 = vld [vmem:[#allocation2 + $0x64] sm:$0xf] }
 0x32d   : > { %v9387_v46 = vsel %vm14007_vm2, %v9382_v8, %v9386_v22  ;;  %v9392_v30 = vrot.slane %v9391_v17, 4  ;;  %v9405_v15 = vor.u32 %v9404_v13, %v9401_v11  ;;  %v9414_v36 = vrot.slane %v9412_v62, 4 }
 0x32e   : > { %19460 = vst [vmem:[#allocation19_spill] sm:$0xff] %v17672_v16  ;;  %v9420_v58 = vrot.slane %v9418_v1, 5  ;;  %v9423_v7 = vshrl.u32 %v9269_v25, 16  ;;  %v9426_v55 = vshll.u32 %v9269_v25, 16  ;;  %v9432_v45 = vshll.u32 %v17664_v35, 16  ;;  %v13855_v16 = vld [vmem:[#allocation2 + $0x60] sm:$0xff]  }
 0x32f   : > { %v9397_v37 = vsel %vm14007_vm2, %v9392_v30, %v9396_v9  ;;  %v9406_v22 = vrot.slane %v9405_v15, 4  ;;  %v9415_v47 = vor.u32 %v9414_v36, %v9410_v53  ;;  %v9436_v18 = vshrl.u32 %v17664_v35, 16  ;;  %v17695_v9 = vpop.f32.mrf.mxu0  ;;  %v17701_v15 = vld [vmem:[#allocation2 + $0x68] sm:$0x1] }
 0x330   : > { %v12164_v49 = vcombine.low %v9387_v46, %v9397_v37  ;;  %v9425_v23 = vrot.slane %v9423_v7, 4  ;;  %v9428_v8 = vrot.slane %v9426_v55, 5  ;;  %v9434_v11 = vrot.slane %v9432_v45, 5  ;;  %v13854_v45 = vld [vmem:[%s19258_s2 + $0x228] sm:$0xff]  }
 0x331   : > { %13493 = vmatmul.mubr.bf16.vlgmr.msra.gmra.mxu1 %v13847_v2  ;;  %v9411_v25 = vsel %vm14007_vm2, %v9406_v22, %v9410_v53  ;;  %v9416_v17 = vrot.slane %v9415_v47, 4  ;;  %v9438_v13 = vrot.slane %v9436_v18, 4  ;;  %v9442_v62 = vshll.u32 %v17676_v40, 16  ;;  %v13214_v1 = vpop.f32.mrf.mxu1 }
 0x332   : > { %13496 = vmatprep.mubr.bf16.mxu1 %v13849_v63  ;;  %13573 = vmatpush3.bf16.msra.mxu1 %v17544_v50  ;;  %v9429_v46 = vor.u32 %v9428_v8, %v9425_v23  ;;  %v17699_v30 = vadd.f32 %v17522_v48, %v17623_v38  ;;  %v9447_v36 = vshrl.u32 %v9272_v4, 16  ;;  %v9450_v53 = vshll.u32 %v9272_v4, 16  ;;  %v13850_v48 = vld [vmem:[#allocation2 + $0x3c] sm:$0xff]   ;;  %v9275_v23 = vld [vmem:[#allocation2 + $0x6c] sm:$0xf] }
 0x333   : > { %13545 = vmatmul.mubr.bf16.gmra.mxu0 %v12164_v49  ;;  %13574 = vmatprep.subr.bf16.mxu1 %v13851_v20  ;;  %v9421_v50 = vsel %vm14007_vm2, %v9416_v17, %v9420_v58  ;;  %v9439_v2 = vor.u32 %v9438_v13, %v9434_v11  ;;  %v9444_v7 = vrot.slane %v9442_v62, 5  ;;  %v9456_v55 = vshll.u32 %v17689_v12, 16  ;;  %v17709_v63 = vpop.f32.mrf.mxu1  ;;  %v17723_v62 = vld [vmem:[#allocation2 + $0x70] sm:$0xf] }
 0x334   : > { %19462 = vst [vmem:[#allocation28_spill] sm:$0xff] %v17699_v30  ;;  %v12165_v37 = vcombine.low %v9411_v25, %v9421_v50  ;;  %v9430_v22 = vrot.slane %v9429_v46, 4  ;;  %v9449_v38 = vrot.slane %v9447_v36, 4  ;;  %v9452_v47 = vrot.slane %v9450_v53, 5  ;;  %v17725_v46 = vld [vmem:[#allocation2 + $0x74] sm:$0x1] }
 0x335   : > { %v9440_v18 = vrot.slane %v9439_v2, 4  ;;  %v9458_v4 = vrot.slane %v9456_v55, 5  ;;  %v9460_v49 = vshrl.u32 %v17689_v12, 16  ;;  %v9466_v58 = vshll.u32 %v17701_v15, 16  ;;  %v17713_v8 = vpop.f32.mrf.mxu0  ;;  %19465 = vst [vmem:[#allocation29_spill] sm:$0xff] %v17725_v46  ;;  %v13852_v50 = vld [vmem:[#allocation2 + $0x48] sm:$0xff]  }
 0x336   : > { %13575 = vmatpush3.bf16.msra.mxu1 %v13851_v20  ;;  %13548 = vmatprep.mubr.bf16.mxu0 %v12165_v37  ;;  %v9453_v17 = vor.u32 %v9452_v47, %v9449_v38  ;;  %v17717_v25 = vadd.f32 %v17546_v56, %v17639_v5  ;;  %v17721_v13 = vadd.f32 %v17555_v60, %v17657_v34  ;;  %v13857_v20 = vld [vmem:[%s19258_s2 + $0x220] sm:$0xff]   ;;  %v9471_v55 = vshrl.u32 %v9275_v23, 16  ;;  %v9278_v38 = vld [vmem:[#allocation2 + $0x78] sm:$0xf]  ;;  %v13215_v47 = vpop.f32.mrf.mxu1 }
 0x337   : > { %v9435_v36 = vsel %vm14007_vm2, %v9430_v22, %v9434_v11  ;;  %v9445_v53 = vsel %vm14007_vm2, %v9440_v18, %v9444_v7  ;;  %v9462_v56 = vrot.slane %v9460_v49, 4  ;;  %v9468_v5 = vrot.slane %v9466_v58, 5  ;;  %13576 = vmatprep.subr.bf16.mxu1 %v13854_v45  ;;  %v17734_v60 = vpop.f32.mrf.mxu0  ;;  %v17739_v18 = vld [vmem:[#allocation2 + $0x7c] sm:$0xf] }
 0x338   : > { %19463 = vst [vmem:[#allocation23_spill] sm:$0xff] %v17717_v25  ;;  %19464 = vst [vmem:[#allocation30_spill] sm:$0xff] %v17721_v13  ;;  %v12166_v34 = vcombine.low %v9435_v36, %v9445_v53  ;;  %v9454_v2 = vrot.slane %v9453_v17, 4  ;;  %v9474_v37 = vshll.u32 %v9275_v23, 16  ;;  %v9480_v11 = vshll.u32 %v17723_v62, 16  ;;  %v13860_v36 = vld [vmem:[%s19258_s2 + $0x218] sm:$0xff]  }
 0x339   : > { %13497 = vmatmul.mubr.bf16.gmra.mxu1 %v13850_v48  ;;  %v9463_v10 = vor.u32 %v9462_v56, %v9458_v4  ;;  %v9484_v22 = vshrl.u32 %v17723_v62, 16  ;;  %v9490_v7 = vshll.u32 %v17725_v46, 16  ;;  %v9473_v49 = vrot.slane %v9471_v55, 4  ;;  %v17746_v17 = vld [vmem:[#allocation2 + $0x80] sm:$0x1] }
 0x33a   : > { %13500 = vmatprep.mubr.bf16.mxu1 %v13852_v50  ;;  %13577 = vmatpush3.bf16.msra.mxu1 %v13854_v45  ;;  %v9459_v48 = vsel %vm14007_vm2, %v9454_v2, %v9458_v4  ;;  %v9476_v58 = vrot.slane %v9474_v37, 5  ;;  %v17744_v23 = vadd.f32 %v17585_v28, %v13214_v1  ;;  %v9482_v56 = vrot.slane %v9480_v11, 5  ;;  %v6350_v28 = vpop.f32.mrf.mxu1 }
 0x33b   : > { %13549 = vmatmul.mubr.bf16.gmra.mxu0 %v12166_v34  ;;  %13578 = vmatprep.subr.bf16.mxu1 %v13857_v20  ;;  %v9464_v53 = vrot.slane %v9463_v10, 4  ;;  %v9486_v50 = vrot.slane %v9484_v22, 4  ;;  %v9492_v45 = vrot.slane %v9490_v7, 5  ;;  %v17751_v34 = vpop.f32.mrf.mxu0  ;;  %v9495_v4 = vshrl.u32 %v9278_v38, 16  ;;  %v9281_v10 = vld [vmem:[#allocation2 + $0x84] sm:$0xf] }
 0x33c   : > { %19466 = vst [vmem:[#allocation31_spill] sm:$0xff] %v17744_v23  ;;  %v9477_v13 = vor.u32 %v9476_v58, %v9473_v49  ;;  %v9498_v2 = vshll.u32 %v9278_v38, 16  ;;  %v9504_v55 = vshll.u32 %v17739_v18, 16  ;;  %v9508_v23 = vshrl.u32 %v17739_v18, 16  ;;  %v13853_v7 = vld [vmem:[#allocation2 + $0x54] sm:$0xff]  }
 0x33d   : > { %v9469_v1 = vsel %vm14007_vm2, %v9464_v53, %v9468_v5  ;;  %v9487_v37 = vor.u32 %v9486_v50, %v9482_v56  ;;  %v9514_v21 = vshll.u32 %v17746_v17, 16  ;;  %v9497_v42 = vrot.slane %v9495_v4, 4  ;;  %v17758_v46 = vpop.f32.mrf.mxu0  ;;  %v13863_v5 = vld [vmem:[%s19258_s2 + $0x210] sm:$0xff]   ;;  %v17769_v53 = vld [vmem:[#allocation2 + $0x88] sm:$0xf] }
 0x33e   : > { %13579 = vmatpush3.bf16.msra.mxu1 %v13857_v20  ;;  %v12167_v11 = vcombine.low %v9459_v48, %v9469_v1  ;;  %v9478_v22 = vrot.slane %v9477_v13, 4  ;;  %v9500_v49 = vrot.slane %v9498_v2, 5  ;;  %v9506_v58 = vrot.slane %v9504_v55, 5 }
 0x33f   : > { %13580 = vmatprep.subr.bf16.mxu1 %v13860_v36  ;;  %v9488_v38 = vrot.slane %v9487_v37, 4  ;;  %v9510_v25 = vrot.slane %v9508_v23, 4  ;;  %v9516_v30 = vrot.slane %v9514_v21, 5  ;;  %v17767_v48 = vadd.f32 %v17600_v27, %v17709_v63  ;;  %v17771_v21 = vld [vmem:[#allocation2 + $0x8c] sm:$0x1] }
 0x340   : > { %13552 = vmatprep.mubr.bf16.mxu0 %v12167_v11  ;;  %v9483_v20 = vsel %vm14007_vm2, %v9478_v22, %v9482_v56  ;;  %v9501_v13 = vor.u32 %v9500_v49, %v9497_v42  ;;  %v9519_v23 = vshrl.u32 %v9281_v10, 16  ;;  %v13218_v50 = vpop.f32.mrf.mxu1  ;;  %v17776_v55 = vadd.f32 %v17614_v33, %v13215_v47  ;;  %v9284_v56 = vld [vmem:[#allocation2 + $0x90] sm:$0xf]  ;;  %v13866_v33 = vld [vmem:[%s19258_s2 + $0x208] sm:$0xff]  }
 0x341   : > { %13501 = vmatmul.mubr.bf16.gmra.mxu1 %v13853_v7  ;;  %19467 = vst [vmem:[#allocation5_spill] sm:$0xff] %v17767_v48  ;;  %v9493_v4 = vsel %vm14007_vm2, %v9488_v38, %v9492_v45  ;;  %v9511_v2 = vor.u32 %v9510_v25, %v9506_v58  ;;  %v17779_v42 = vadd.f32 %v17625_v31, %v6350_v28  ;;  %v9522_v37 = vshll.u32 %v9281_v10, 16  ;;  %v17784_v25 = vpop.f32.mrf.mxu0  ;;  %v17794_v28 = vld [vmem:[#allocation2 + $0x94] sm:$0xf]  ;;  %v17796_v10 = vld [vmem:[#allocation2 + $0x98] sm:$0x1] }
 0x342   : > { %13504 = vmatprep.mubr.bf16.mxu1 %v13855_v16  ;;  %19468 = vst [vmem:[#allocation20_spill] sm:$0xff] %v17776_v55  ;;  %v12168_v27 = vcombine.low %v9483_v20, %v9493_v4  ;;  %v9502_v63 = vrot.slane %v9501_v13, 4  ;;  %v9521_v1 = vrot.slane %v9519_v23, 4  ;;  %v6363_v11 = vpop.f32.mrf.mxu1  ;;  %13581 = vmatpush3.bf16.msra.mxu1 %v13860_v36  ;;  %v9528_v7 = vshll.u32 %v17769_v53, 16  ;;  %19471 = vst [vmem:[#allocation8_spill] sm:$0xff] %v17796_v10 }
 0x343   : > { %19469 = vst [vmem:[#allocation15_spill] sm:$0xff] %v17779_v42  ;;  %v9512_v22 = vrot.slane %v9511_v2, 4  ;;  %v9532_v45 = vshrl.u32 %v17769_v53, 16  ;;  %v9538_v16 = vshll.u32 %v17771_v21, 16  ;;  %13582 = vmatprep.subr.bf16.mxu1 %v13863_v5  ;;  %v9524_v47 = vrot.slane %v9522_v37, 5  ;;  %v17800_v2 = vpop.f32.mrf.mxu0 }
 0x344   : > { %13553 = vmatmul.mubr.bf16.gmra.mxu0 %v12168_v27  ;;  %v9507_v31 = vsel %vm14007_vm2, %v9502_v63, %v9506_v58  ;;  %v17792_v36 = vadd.f32 %v17641_v51, %v13218_v50  ;;  %v9543_v49 = vshrl.u32 %v9284_v56, 16  ;;  %v13219_v38 = vpop.f32.mrf.mxu1  ;;  %v9530_v13 = vrot.slane %v9528_v7, 5  ;;  %v13856_v63 = vld [vmem:[#allocation2 + $0x6c] sm:$0xff]   ;;  %v13858_v50 = vld [vmem:[#allocation2 + $0x78] sm:$0xff]  }
 0x345   : > { %v9517_v20 = vsel %vm14007_vm2, %v9512_v22, %v9516_v30  ;;  %v9534_v23 = vrot.slane %v9532_v45, 4  ;;  %v9540_v4 = vrot.slane %v9538_v16, 5  ;;  %v9525_v58 = vor.u32 %v9524_v47, %v9521_v1  ;;  %v9287_v22 = vld [vmem:[#allocation2 + $0x9c] sm:$0xf]  ;;  %v17805_v7 = vpop.f32.mrf.mxu0  ;;  %v13869_v1 = vld [vmem:[%s19258_s2 + $0x200] sm:$0xff]  }
 0x346   : > { %19470 = vst [vmem:[#allocation13_spill] sm:$0xff] %v17792_v36  ;;  %v12169_v27 = vcombine.low %v9507_v31, %v9517_v20  ;;  %v9545_v37 = vrot.slane %v9543_v49, 4  ;;  %v9546_v51 = vshll.u32 %v9284_v56, 16  ;;  %13583 = vmatpush3.bf16.msra.mxu1 %v13863_v5  ;;  %v9552_v42 = vshll.u32 %v17794_v28, 16  ;;  %v6366_v30 = vpop.f32.mrf.mxu1  ;;  %v17816_v31 = vld [vmem:[#allocation2 + $0xa0] sm:$0xf] }
 0x347   : > { %v9535_v36 = vor.u32 %v9534_v23, %v9530_v13  ;;  %v9556_v55 = vshrl.u32 %v17794_v28, 16  ;;  %v9562_v48 = vshll.u32 %v17796_v10, 16  ;;  %13584 = vmatprep.subr.bf16.mxu1 %v13866_v33  ;;  %v9526_v56 = vrot.slane %v9525_v58, 4  ;;  %19474 = vst [vmem:[#allocation16_spill] sm:$0xff] %v17816_v31  ;;  %v17818_v10 = vpop.f32.mrf.mxu0 }
 0x348   : > { %13556 = vmatprep.mubr.bf16.mxu0 %v12169_v27  ;;  %v9548_v5 = vrot.slane %v9546_v51, 5  ;;  %v17811_v45 = vadd.f32 %v17659_v52, %v6363_v11  ;;  %v17814_v16 = vadd.f32 %v17680_v0, %v13219_v38  ;;  %v9554_v49 = vrot.slane %v9552_v42, 5  ;;  %v17825_v52 = vld [vmem:[#allocation2 + $0xa4] sm:$0x1] }
 0x349   : > { %13505 = vmatmul.mubr.bf16.gmra.mxu1 %v13856_v63  ;;  %v9536_v47 = vrot.slane %v9535_v36, 4  ;;  %v9558_v20 = vrot.slane %v9556_v55, 4  ;;  %v9564_v23 = vrot.slane %v9562_v48, 5  ;;  %v9531_v27 = vsel %vm14007_vm2, %v9526_v56, %v9530_v13  ;;  %19476 = vst [vmem:[#allocation22_spill] sm:$0xff] %v17825_v52  ;;  %v9290_v36 = vld [vmem:[#allocation2 + $0xa8] sm:$0xf] }
 0x34a   : > { %19472 = vst [vmem:[#allocation6_spill] sm:$0xff] %v17811_v45  ;;  %19473 = vst [vmem:[#allocation11_spill] sm:$0xff] %v17814_v16  ;;  %13508 = vmatprep.mubr.bf16.mxu1 %v13858_v50  ;;  %v9549_v58 = vor.u32 %v9548_v5, %v9545_v37  ;;  %v17823_v63 = vadd.f32 %v17695_v9, %v6366_v30  ;;  %v9567_v0 = vshrl.u32 %v9287_v22, 16  ;;  %13585 = vmatpush3.bf16.msra.mxu1 %v13866_v33  ;;  %v13861_v16 = vld [vmem:[#allocation2 + $0x90] sm:$0xff]  }
 0x34b   : > { %v9541_v11 = vsel %vm14007_vm2, %v9536_v47, %v9540_v4  ;;  %v9559_v42 = vor.u32 %v9558_v20, %v9554_v49  ;;  %v9570_v55 = vshll.u32 %v9287_v22, 16  ;;  %v9576_v48 = vshll.u32 %v17816_v31, 16  ;;  %v17830_v38 = vpop.f32.mrf.mxu0  ;;  %13586 = vmatprep.subr.bf16.mxu1 %v13869_v1  ;;  %v17834_v4 = vld [vmem:[#allocation2 + $0xac] sm:$0xf] }
 0x34c   : > { %19475 = vst [vmem:[#allocation18_spill] sm:$0xff] %v17823_v63  ;;  %v12170_v13 = vcombine.low %v9531_v27, %v9541_v11  ;;  %v9550_v37 = vrot.slane %v9549_v58, 4  ;;  %v9569_v51 = vrot.slane %v9567_v0, 4  ;;  %v9580_v9 = vshrl.u32 %v17816_v31, 16  ;;  %19477 = vst [vmem:[#allocation24_spill] sm:$0xff] %v17834_v4  ;;  %v13859_v58 = vld [vmem:[#allocation2 + $0x84] sm:$0xff]  }
 0x34d   : > { %v9560_v50 = vrot.slane %v9559_v42, 4  ;;  %v9572_v30 = vrot.slane %v9570_v55, 5  ;;  %v9578_v56 = vrot.slane %v9576_v48, 5  ;;  %v9586_v33 = vshll.u32 %v17825_v52, 16  ;;  %v17836_v22 = vpop.f32.mrf.mxu0  ;;  %v17843_v0 = vld [vmem:[#allocation2 + $0xb0] sm:$0x1] }
 0x34e   : > { %v13222_v5 = vpop.f32.mrf.mxu1  ;;  %13557 = vmatmul.mubr.bf16.gmra.mxu0 %v12170_v13  ;;  %v9555_v47 = vsel %vm14007_vm2, %v9550_v37, %v9554_v49  ;;  %v9582_v20 = vrot.slane %v9580_v9, 4  ;;  %19479 = vst [vmem:[#allocation7_spill] sm:$0xff] %v17843_v0  ;;  %v9591_v11 = vshrl.u32 %v9290_v36, 16  ;;  %13587 = vmatpush3.bf16.msra.mxu1 %v13869_v1  ;;  %v9594_v63 = vshll.u32 %v9290_v36, 16 }
 0x34f   : > { %v17841_v27 = vadd.f32 %v17713_v8, %v13222_v5  ;;  %v9565_v42 = vsel %vm14007_vm2, %v9560_v50, %v9564_v23  ;;  %v9573_v55 = vor.u32 %v9572_v30, %v9569_v51  ;;  %v9588_v48 = vrot.slane %v9586_v33, 5  ;;  %v17847_v45 = vpop.f32.mrf.mxu0  ;;  %v9293_v51 = vld [vmem:[#allocation2 + $0xb4] sm:$0xf] }
 0x350   : > { %v6379_v13 = vpop.f32.mrf.mxu1  ;;  %v12171_v49 = vcombine.low %v9555_v47, %v9565_v42  ;;  %v9583_v37 = vor.u32 %v9582_v20, %v9578_v56  ;;  %v9593_v8 = vrot.slane %v9591_v11, 4  ;;  %v9600_v9 = vshll.u32 %v17834_v4, 16  ;;  %v17860_v20 = vld [vmem:[#allocation2 + $0xb8] sm:$0xf] }
 0x351   : > { %19478 = vst [vmem:[#allocation32_spill] sm:$0xff] %v17841_v27  ;;  %13509 = vmatmul.mubr.bf16.gmra.mxu1 %v13859_v58  ;;  %v9574_v5 = vrot.slane %v9573_v55, 4  ;;  %v9596_v27 = vrot.slane %v9594_v63, 5  ;;  %v9604_v1 = vshrl.u32 %v17834_v4, 16  ;;  %v9610_v52 = vshll.u32 %v17843_v0, 16  ;;  %v17852_v36 = vpop.f32.mrf.mxu0  ;;  %19482 = vst [vmem:[#allocation14_spill] sm:$0xff] %v17860_v20 }
 0x352   : > { %13512 = vmatprep.mubr.bf16.mxu1 %v13861_v16  ;;  %v13223_v23 = vpop.f32.mrf.mxu1  ;;  %13560 = vmatprep.mubr.bf16.mxu0 %v12171_v49  ;;  %v9584_v50 = vrot.slane %v9583_v37, 4  ;;  %v9602_v30 = vrot.slane %v9600_v9, 5  ;;  %v17855_v33 = vadd.f32 %v17734_v60, %v6379_v13  ;;  %v17869_v49 = vld [vmem:[#allocation2 + $0xbc] sm:$0x1]  ;;  %v9615_v60 = vshrl.u32 %v9293_v51, 16 }
 0x353   : > { %v17858_v47 = vadd.f32 %v17751_v34, %v13223_v23  ;;  %v9579_v63 = vsel %vm14007_vm2, %v9574_v5, %v9578_v56  ;;  %v9597_v58 = vor.u32 %v9596_v27, %v9593_v8  ;;  %v9606_v16 = vrot.slane %v9604_v1, 4  ;;  %19484 = vst [vmem:[#allocation27_spill] sm:$0xff] %v17869_v49  ;;  %v13862_v8 = vld [vmem:[#allocation2 + $0x9c] sm:$0xff]   ;;  %v17885_v0 = vld [vmem:[#allocation2 + $0xc8] sm:$0x1] }
 0x354   : > { %19480 = vst [vmem:[#allocation21_spill] sm:$0xff] %v17855_v33  ;;  %v6382_v11 = vpop.f32.mrf.mxu1  ;;  %v9589_v42 = vsel %vm14007_vm2, %v9584_v50, %v9588_v48  ;;  %v9618_v13 = vshll.u32 %v9293_v51, 16  ;;  %v17871_v34 = vpop.f32.mrf.mxu0  ;;  %v9624_v56 = vshll.u32 %v17860_v20, 16  ;;  %v9296_v5 = vld [vmem:[#allocation2 + $0xc0] sm:$0xf]  ;;  %v9612_v1 = vrot.slane %v9610_v52, 5 }
 0x355   : > { %19481 = vst [vmem:[#allocation9_spill] sm:$0xff] %v17858_v47  ;;  %v17867_v55 = vadd.f32 %v17758_v46, %v6382_v11  ;;  %v12172_v37 = vcombine.low %v9579_v63, %v9589_v42  ;;  %v9598_v9 = vrot.slane %v9597_v58, 4  ;;  %v9607_v23 = vor.u32 %v9606_v16, %v9602_v30  ;;  %v17875_v50 = vld [vmem:[#allocation2 + $0xc4] sm:$0xf]  ;;  %v13864_v16 = vld [vmem:[#allocation2 + $0xa8] sm:$0xff]  }
 0x356   : > { %v13226_v27 = vpop.f32.mrf.mxu1  ;;  %v9617_v47 = vrot.slane %v9615_v60, 4  ;;  %v9620_v48 = vrot.slane %v9618_v13, 5  ;;  %v9628_v46 = vshrl.u32 %v17860_v20, 16  ;;  %19485 = vst [vmem:[#allocation26_spill] sm:$0xff] %v17875_v50  ;;  %v17877_v11 = vpop.f32.mrf.mxu0  ;;  %v9634_v63 = vshll.u32 %v17869_v49, 16 }
 0x357   : > { %19483 = vst [vmem:[#allocation25_spill] sm:$0xff] %v17867_v55  ;;  %13561 = vmatmul.mubr.bf16.gmra.mxu0 %v12172_v37  ;;  %v9608_v51 = vrot.slane %v9607_v23, 4  ;;  %v9626_v55 = vrot.slane %v9624_v56, 5  ;;  %v17881_v58 = vadd.f32 %v17784_v25, %v13226_v27  ;;  %v9603_v52 = vsel %vm14007_vm2, %v9598_v9, %v9602_v30 }
 0x358   : > { %v6395_v42 = vpop.f32.mrf.mxu1  ;;  %v9621_v60 = vor.u32 %v9620_v48, %v9617_v47  ;;  %v9630_v13 = vrot.slane %v9628_v46, 4  ;;  %v9639_v33 = vshrl.u32 %v9296_v5, 16  ;;  %v17887_v4 = vpop.f32.mrf.mxu0  ;;  %v9642_v23 = vshll.u32 %v9296_v5, 16  ;;  %v19501_v32 = vld [vmem:[#allocation14_spill] sm:$0xff] }
 0x359   : > { %19486 = vst [vmem:[#allocation33_spill] sm:$0xff] %v17881_v58  ;;  %13513 = vmatmul.mubr.bf16.gmra.mxu1 %v13862_v8  ;;  %v9613_v37 = vsel %vm14007_vm2, %v9608_v51, %v9612_v1  ;;  %v9648_v25 = vshll.u32 %v17875_v50, 16  ;;  %v9652_v56 = vshrl.u32 %v17875_v50, 16  ;;  %v9658_v20 = vshll.u32 %v17885_v0, 16  ;;  %v10008_v1 = vld [vmem:[#allocation2 + $0x18] sm:$0xe] }
 0x35a   : > { %13516 = vmatprep.mubr.bf16.mxu1 %v13864_v16  ;;  %v13227_v27 = vpop.f32.mrf.mxu1  ;;  %v12173_v58 = vcombine.low %v9603_v52, %v9613_v37  ;;  %v9622_v30 = vrot.slane %v9621_v60, 4  ;;  %v9631_v47 = vor.u32 %v9630_v13, %v9626_v55  ;;  %v9641_v9 = vrot.slane %v9639_v33, 4  ;;  %v17893_v8 = vpop.f32.mrf.mxu0  ;;  %v9299_v33 = vld [vmem:[#allocation2 + $0xcc] sm:$0xf] }
 0x35b   : > { %v9644_v48 = vrot.slane %v9642_v23, 5  ;;  %v9650_v46 = vrot.slane %v9648_v25, 5  ;;  %v9654_v49 = vrot.slane %v9652_v56, 4  ;;  %v9636_v51 = vrot.slane %v9634_v63, 5  ;;  %v17914_v56 = vld [vmem:[#allocation2 + $0xd0] sm:$0xf] }
 0x35c   : > { %v6398_v31 = vpop.f32.mrf.mxu1  ;;  %13564 = vmatprep.mubr.bf16.mxu0 %v12173_v58  ;;  %v9632_v5 = vrot.slane %v9631_v47, 4  ;;  %v17897_v50 = vadd.f32 %v17800_v2, %v6395_v42  ;;  %v17900_v16 = vadd.f32 %v17805_v7, %v13227_v27  ;;  %v17902_v52 = vpop.f32.mrf.mxu0  ;;  %v9627_v60 = vsel %vm14007_vm2, %v9622_v30, %v9626_v55  ;;  %v13865_v2 = vld [vmem:[#allocation2 + $0xb4] sm:$0xff]  }
 0x35d   : > { %v9645_v13 = vor.u32 %v9644_v48, %v9641_v9  ;;  %v9655_v37 = vor.u32 %v9654_v49, %v9650_v46  ;;  %v17907_v23 = vadd.f32 %v17818_v10, %v6398_v31  ;;  %v9660_v58 = vrot.slane %v9658_v20, 5  ;;  %v13867_v49 = vld [vmem:[#allocation2 + $0xc0] sm:$0xff]   ;;  %v17920_v48 = vld [vmem:[#allocation2 + $0xd4] sm:$0x1] }
 0x35e   : > { %v9637_v63 = vsel %vm14007_vm2, %v9632_v5, %v9636_v51  ;;  %v17911_v42 = vpop.f32.mrf.mxu0  ;;  %v12185_v7 = vrot.slane %v10008_v1, 9  ;;  %v10074_v25 = vrot.slane %v17562_v6, 5  ;;  %v9663_v9 = vshrl.u32 %v9299_v33, 16 }
 0x35f   : > { %v12174_v27 = vcombine.low %v9627_v60, %v9637_v63  ;;  %v9646_v47 = vrot.slane %v9645_v13, 4  ;;  %v9656_v55 = vrot.slane %v9655_v37, 4  ;;  %v13230_v30 = vpop.f32.mrf.mxu1  ;;  %v10077_v20 = vrot.slane %v17567_v29, 5 }
 0x360   : > { %v17917_v10 = vadd.f32 %v17830_v38, %v13230_v30  ;;  %v10076_v31 = vrot.slane %v10074_v25, 4  ;;  %v9666_v1 = vshll.u32 %v9299_v33, 16  ;;  %v17922_v5 = vpop.f32.mrf.mxu0  ;;  %v9665_v38 = vrot.slane %v9663_v9, 4 }
 0x361   : > { %13517 = vmatmul.mubr.bf16.gmra.mxu1 %v13865_v2  ;;  %13565 = vmatmul.mubr.bf16.gmra.mxu0 %v12174_v27  ;;  %v9651_v6 = vsel %vm14007_vm2, %v9646_v47, %v9650_v46  ;;  %v9661_v51 = vsel %vm14007_vm2, %v9656_v55, %v9660_v58  ;;  %v6411_v60 = vpop.f32.mrf.mxu1  ;;  %v9672_v13 = vshll.u32 %v17914_v56, 16  ;;  %v10009_v27 = vld [vmem:[#allocation2 + $0x24] sm:$0xe]  ;;  %v17938_v46 = vadd.f32 %v17502_v59, %v17612_v57  ;;  %v10010_v57 = vld [vmem:[#allocation2 + $0x30] sm:$0xe] }
 0x362   : > { %13520 = vmatprep.mubr.bf16.mxu1 %v13867_v49  ;;  %v12175_v37 = vcombine.low %v9651_v6, %v9661_v51  ;;  %v17930_v29 = vadd.f32 %v17836_v22, %v6411_v60  ;;  %v10078_v33 = vsel %vm14359_vm5, %v10076_v31, %v10077_v20  ;;  %v9668_v63 = vrot.slane %v9666_v1, 5  ;;  %v17934_v2 = vpop.f32.mrf.mxu0  ;;  %v13868_v49 = vld [vmem:[#allocation2 + $0xcc] sm:$0xff]  }
 0x363   : > { %v13231_v58 = vpop.f32.mrf.mxu1  ;;  %v9674_v47 = vrot.slane %v9672_v13, 5  ;;  %v9676_v55 = vshrl.u32 %v17914_v56, 16  ;;  %v9682_v30 = vshll.u32 %v17920_v48, 16  ;;  %v10075_v9 = vsel %vm14359_vm5, %v12185_v7, %v10074_v25  ;;  %v10011_v7 = vld [vmem:[#allocation2 + $0x3c] sm:$0xe] }
 0x364   : > { %19487 = vst [vmem:[#allocation34_spill] sm:$0xff] %v17930_v29  ;;  %13568 = vmatprep.mubr.bf16.mxu0 %v12175_v37  ;;  %v17943_v22 = vadd.f32 %v17847_v45, %v13231_v58  ;;  %v9669_v31 = vor.u32 %v9668_v63, %v9665_v38  ;;  %v17947_v20 = vpop.f32.mrf.mxu0  ;;  %v10081_v59 = vrot.slane %v17588_v39, 5  ;;  %v12217_v6 = vcombine.low %v10075_v9, %v10078_v33 }
 0x365   : > { %v6414_v1 = vpop.f32.mrf.mxu1  ;;  %v9678_v51 = vrot.slane %v9676_v55, 4  ;;  %v9684_v60 = vrot.slane %v9682_v30, 5  ;;  %v12186_v13 = vrot.slane %v10009_v27, 9  ;;  %v12187_v63 = vrot.slane %v10010_v57, 9 }
 0x366   : > { %19488 = vst [vmem:[#allocation36_spill] sm:$0xff] %v17943_v22  ;;  %v17951_v37 = vadd.f32 %v17852_v36, %v6414_v1  ;;  %v9670_v45 = vrot.slane %v9669_v31, 4  ;;  %v10083_v58 = vrot.slane %v10081_v59, 4  ;;  %v10084_v22 = vrot.slane %v17591_v3, 5  ;;  %v17954_v29 = vpop.f32.mrf.mxu0 }
 0x367   : > { %v13234_v25 = vpop.f32.mrf.mxu1  ;;  %v9679_v38 = vor.u32 %v9678_v51, %v9674_v47  ;;  %v10082_v39 = vsel %vm14359_vm5, %v12186_v13, %v10081_v59  ;;  %v10088_v33 = vrot.slane %v17610_v43, 5  ;;  %v10091_v3 = vrot.slane %v17619_v19, 5 }
 0x368   : > { %v17960_v27 = vadd.f32 %v17871_v34, %v13234_v25  ;;  %v10085_v36 = vsel %vm14359_vm5, %v10083_v58, %v10084_v22  ;;  %v17965_v55 = vpop.f32.mrf.mxu0  ;;  %v10095_v30 = vrot.slane %v17629_v24, 5  ;;  %v9675_v31 = vsel %vm14007_vm2, %v9670_v45, %v9674_v47  ;;  %v10012_v34 = vld [vmem:[#allocation2 + $0x48] sm:$0xe]  ;;  %v10013_v25 = vld [vmem:[#allocation2 + $0x54] sm:$0xe] }
 0x369   : > { %13521 = vmatmul.mubr.bf16.gmra.mxu1 %v13868_v49  ;;  %v6427_v9 = vpop.f32.mrf.mxu1  ;;  %v9680_v59 = vrot.slane %v9679_v38, 4  ;;  %v10090_v43 = vrot.slane %v10088_v33, 4  ;;  %v12188_v57 = vrot.slane %v10011_v7, 9  ;;  %v12218_v1 = vcombine.low %v10082_v39, %v10085_v36  ;;  %v10014_v36 = vld [vmem:[#allocation2 + $0x60] sm:$0xe] }
 0x36a   : > { %13588 = vmatprep.mubr.bf16.mxu1 %v12217_v6  ;;  %v17971_v49 = vadd.f32 %v17877_v11, %v6427_v9  ;;  %v17973_v22 = vpop.f32.mrf.mxu0  ;;  %v10097_v19 = vrot.slane %v10095_v30, 4  ;;  %v10098_v51 = vrot.slane %v17636_v26, 5  ;;  %v10089_v47 = vsel %vm14359_vm5, %v12187_v63, %v10088_v33 }
 0x36b   : > { %v9685_v24 = vsel %vm14007_vm2, %v9680_v59, %v9684_v60  ;;  %v13235_v6 = vpop.f32.mrf.mxu1  ;;  %v10092_v13 = vsel %vm14359_vm5, %v10090_v43, %v10091_v3  ;;  %v10102_v45 = vrot.slane %v17644_v44, 5  ;;  %v12189_v60 = vrot.slane %v10012_v34, 9 }
 0x36c   : > { %v12176_v11 = vcombine.low %v9675_v31, %v9685_v24  ;;  %v17984_v58 = vadd.f32 %v17887_v4, %v13235_v6  ;;  %v17986_v7 = vpop.f32.mrf.mxu0  ;;  %v17990_v26 = vsel %vm14359_vm5, %v10097_v19, %v10098_v51  ;;  %v12219_v39 = vcombine.low %v10089_v47, %v10092_v13 }
 0x36d   : > { %v6430_v38 = vpop.f32.mrf.mxu1  ;;  %v10096_v63 = vsel %vm14359_vm5, %v12188_v57, %v10095_v30  ;;  %v10104_v33 = vrot.slane %v10102_v45, 4  ;;  %v10105_v44 = vrot.slane %v17651_v41, 5  ;;  %v10103_v31 = vsel %vm14359_vm5, %v12189_v60, %v10102_v45 }
 0x36e   : > { %19489 = vst [vmem:[#allocation35_spill] sm:$0xff] %v17984_v58  ;;  %13569 = vmatmul.mubr.bf16.gmra.mxu0 %v12176_v11  ;;  %v17996_v4 = vadd.f32 %v17893_v8, %v6430_v38  ;;  %v12220_v3 = vcombine.low %v10096_v63, %v17990_v26  ;;  %v17999_v9 = vpop.f32.mrf.mxu0  ;;  %v10109_v59 = vrot.slane %v17664_v35, 5  ;;  %v12190_v57 = vrot.slane %v10013_v25, 9  ;;  %v10015_v8 = vld [vmem:[#allocation2 + $0x6c] sm:$0xe] }
 0x36f   : > { %v13302_v43 = vpop.f32.mrf.mxu1  ;;  %v10106_v30 = vsel %vm14359_vm5, %v10104_v33, %v10105_v44  ;;  %v10112_v41 = vrot.slane %v17676_v40, 5  ;;  %v10116_v34 = vrot.slane %v17689_v12, 5  ;;  %v12191_v6 = vrot.slane %v10014_v36, 9  ;;  %v10016_v11 = vld [vmem:[#allocation2 + $0x78] sm:$0xe] }
 0x370   : > { %19490 = vst [vmem:[#allocation38_spill] sm:$0xff] %v17996_v4  ;;  %v18009_v19 = vadd.f32 %v13302_v43, %v17649_v14  ;;  %v18011_v51 = vpop.f32.mrf.mxu0  ;;  %v10111_v24 = vrot.slane %v10109_v59, 4  ;;  %v10119_v35 = vrot.slane %v17701_v15, 5  ;;  %v12221_v13 = vcombine.low %v10103_v31, %v10106_v30  ;;  %v10017_v33 = vld [vmem:[#allocation2 + $0x84] sm:$0xe]  ;;  %v19492_v44 = vld [vmem:[#allocation19_spill] sm:$0xff] }
 0x371   : > { %13589 = vmatmul.mubr.bf16.vlgmr.msra.gmra.mxu1 %v12218_v1  ;;  %v7070_v47 = vpop.f32.mrf.mxu1  ;;  %v18016_v45 = vsel %vm14359_vm5, %v12190_v57, %v10109_v59  ;;  %v10118_v40 = vrot.slane %v10116_v34, 4  ;;  %v10123_v12 = vrot.slane %v17723_v62, 5  ;;  %v18030_v15 = vsel %vm14359_vm5, %v12191_v6, %v10116_v34  ;;  %v10018_v6 = vld [vmem:[#allocation2 + $0x90] sm:$0xe] }
 0x372   : > { %13592 = vmatprep.mubr.bf16.mxu1 %v12219_v39  ;;  %v18020_v14 = vadd.f32 %v7070_v47, %v17668_v61  ;;  %v18022_v1 = vpop.f32.mrf.mxu0  ;;  %v18026_v26 = vsel %vm14359_vm5, %v10111_v24, %v10112_v41  ;;  %v12192_v60 = vrot.slane %v10015_v8, 9  ;;  %v19491_v39 = vld [vmem:[#allocation29_spill] sm:$0xff]  ;;  %v12193_v43 = vrot.slane %v10016_v11, 9 }
 0x373   : > { %v13303_v25 = vpop.f32.mrf.mxu1  ;;  %v18036_v62 = vsel %vm14359_vm5, %v10118_v40, %v10119_v35  ;;  %v10125_v61 = vrot.slane %v10123_v12, 4  ;;  %v10126_v63 = vrot.slane %v19491_v39, 5  ;;  %v10130_v30 = vrot.slane %v17739_v18, 5  ;;  %v19500_v18 = vld [vmem:[#allocation22_spill] sm:$0xff] }
 0x374   : > { %v18040_v36 = vadd.f32 %v13303_v25, %v19492_v44  ;;  %v18042_v31 = vpop.f32.mrf.mxu0  ;;  %v12223_v59 = vcombine.low %v18030_v15, %v18036_v62  ;;  %v18049_v41 = vsel %vm14359_vm5, %v12192_v60, %v10123_v12  ;;  %v10133_v8 = vrot.slane %v17746_v17, 5  ;;  %v19493_v25 = vld [vmem:[#allocation28_spill] sm:$0xff] }
 0x375   : > { %v7073_v57 = vpop.f32.mrf.mxu1  ;;  %v18053_v34 = vsel %vm14359_vm5, %v10125_v61, %v10126_v63  ;;  %v10137_v24 = vrot.slane %v17769_v53, 5  ;;  %v10132_v40 = vrot.slane %v10130_v30, 4  ;;  %v12194_v12 = vrot.slane %v10017_v33, 9  ;;  %v10019_v33 = vld [vmem:[#allocation2 + $0x9c] sm:$0xe] }
 0x376   : > { %v18058_v35 = vadd.f32 %v7073_v57, %v17938_v46  ;;  %v18060_v47 = vpop.f32.mrf.mxu0  ;;  %v18066_v15 = vsel %vm14359_vm5, %v12193_v43, %v10130_v30  ;;  %v10140_v17 = vrot.slane %v17771_v21, 5  ;;  %v10144_v53 = vrot.slane %v17794_v28, 5  ;;  %v19494_v43 = vld [vmem:[#allocation8_spill] sm:$0xff]  ;;  %v19495_v57 = vld [vmem:[#allocation23_spill] sm:$0xff] }
 0x377   : > { %v13306_v11 = vpop.f32.mrf.mxu1  ;;  %v10139_v60 = vrot.slane %v10137_v24, 4  ;;  %v18075_v61 = vsel %vm14359_vm5, %v10132_v40, %v10133_v8  ;;  %v18079_v39 = vsel %vm14359_vm5, %v12194_v12, %v10137_v24  ;;  %v12195_v63 = vrot.slane %v10018_v6, 9  ;;  %v19496_v6 = vld [vmem:[#allocation16_spill] sm:$0xff]  ;;  %v19497_v12 = vld [vmem:[#allocation17_spill] sm:$0xff] }
 0x378   : > { %v7203_v46 = vadd.f32 %v13306_v11, %v19493_v25  ;;  %v18071_v62 = vpop.f32.mrf.mxu0  ;;  %v12225_v21 = vcombine.low %v18066_v15, %v18075_v61  ;;  %v10147_v30 = vrot.slane %v19494_v43, 5  ;;  %v19498_v11 = vld [vmem:[#allocation10_spill] sm:$0xff]  ;;  %v12196_v61 = vrot.slane %v10019_v33, 9 }
 0x379   : > { %13593 = vmatmul.mubr.bf16.gmra.mxu1 %v12220_v3  ;;  %v7086_v44 = vpop.f32.mrf.mxu1  ;;  %v18085_v28 = vsel %vm14359_vm5, %v10139_v60, %v10140_v17  ;;  %v10146_v3 = vrot.slane %v10144_v53, 4  ;;  %v6640_v25 = vadd.f32 %v19498_v11, %v19497_v12  ;;  %v18098_v60 = vsel %vm14359_vm5, %v12195_v63, %v10144_v53  ;;  %v10021_v11 = vld [vmem:[#allocation2 + $0xb4] sm:$0xe] }
 0x37a   : > { %13596 = vmatprep.mubr.bf16.mxu1 %v12221_v13  ;;  %v7201_v8 = vadd.f32 %v7086_v44, %v19495_v57  ;;  %v18089_v40 = vpop.f32.mrf.mxu0  ;;  %v10151_v13 = vrot.slane %v19496_v6, 5  ;;  %v19499_v44 = vld [vmem:[#allocation30_spill] sm:$0xff]  ;;  %v10154_v12 = vrot.slane %v19500_v18, 5  ;;  %v10165_v53 = vrot.slane %v19501_v32, 5  ;;  %v19502_v6 = vld [vmem:[#allocation27_spill] sm:$0xff] }
 0x37b   : > { %v13307_v15 = vpop.f32.mrf.mxu1  ;;  %v18102_v17 = vsel %vm14359_vm5, %v10146_v3, %v10147_v30  ;;  %v12198_v18 = vrot.slane %v10021_v11, 9  ;;  %v10168_v58 = vrot.slane %v19502_v6, 5  ;;  %v19503_v32 = vld [vmem:[#allocation31_spill] sm:$0xff]  ;;  %v19505_v11 = vld [vmem:[#allocation5_spill] sm:$0xff] }
 0x37c   : > { %v7204_v43 = vadd.f32 %v13307_v15, %v19499_v44  ;;  %v18105_v57 = vpop.f32.mrf.mxu0  ;;  %v10153_v24 = vrot.slane %v10151_v13, 4  ;;  %v18115_v33 = vsel %vm14359_vm5, %v12196_v61, %v10151_v13  ;;  %v10167_v44 = vrot.slane %v10165_v53, 4 }
 0x37d   : > { %v7089_v38 = vpop.f32.mrf.mxu1 }
 0x37e   : > { %v7202_v63 = vadd.f32 %v7089_v38, %v6640_v25  ;;  %v18111_v4 = vpop.f32.mrf.mxu0  ;;  %v18119_v3 = vsel %vm14359_vm5, %v10153_v24, %v10154_v12  ;;  %v19504_v25 = vcombine.low %v18016_v45, %v18026_v26  ;;  %v18132_v24 = vsel %vm14359_vm5, %v12198_v18, %v10165_v53 }
 0x37f   : > { %v13310_v30 = vpop.f32.mrf.mxu1  ;;  %v18136_v12 = vsel %vm14359_vm5, %v10167_v44, %v10168_v58  ;;  %v18149_v53 = vadd.f32 %v17911_v42, %v18020_v14  ;;  %v18156_v44 = vadd.f32 %v17922_v5, %v18040_v36  ;;  %v19507_v42 = vld [vmem:[#allocation15_spill] sm:$0xff] }
 0x380   : > { %v7207_v38 = vadd.f32 %v13310_v30, %v19503_v32  ;;  %v18128_v13 = vpop.f32.mrf.mxu0  ;;  %v12230_v45 = vcombine.low %v18132_v24, %v18136_v12  ;;  %v19506_v30 = vld [vmem:[#allocation20_spill] sm:$0xff]  ;;  %v18160_v32 = vadd.f32 %v17934_v2, %v18058_v35  ;;  %v18175_v5 = vadd.f32 %v17973_v22, %v7202_v63  ;;  %v19508_v35 = vld [vmem:[#allocation13_spill] sm:$0xff] }
 0x381   : > { %13597 = vmatmul.mubr.bf16.gmra.mxu1 %v19504_v25  ;;  %v7102_v61 = vpop.f32.mrf.mxu1 }
 0x382   : > { %13600 = vmatprep.mubr.bf16.mxu1 %v12223_v59  ;;  %v7205_v6 = vadd.f32 %v7102_v61, %v19505_v11  ;;  %v18139_v15 = vpop.f32.mrf.mxu0  ;;  %v18145_v59 = vadd.f32 %v17902_v52, %v18009_v19  ;;  %v18163_v52 = vadd.f32 %v17947_v20, %v7203_v46  ;;  %v18166_v19 = vadd.f32 %v17954_v29, %v7201_v8 }
 0x383   : > { %v13311_v26 = vpop.f32.mrf.mxu1  ;;  %v18172_v11 = vadd.f32 %v17965_v55, %v7204_v43  ;;  %v18178_v2 = vadd.f32 %v17986_v7, %v7207_v38  ;;  %v19509_v8 = vcombine.low %v18049_v41, %v18053_v34  ;;  %v19510_v43 = vld [vmem:[#allocation6_spill] sm:$0xff]  ;;  %v19512_v41 = vld [vmem:[#allocation24_spill] sm:$0xff] }
 0x384   : > { %v7208_v18 = vadd.f32 %v13311_v26, %v19506_v30  ;;  %v18152_v58 = vpop.f32.mrf.mxu0  ;;  %v18181_v20 = vadd.f32 %v17999_v9, %v7205_v6  ;;  %v19511_v6 = vld [vmem:[#allocation11_spill] sm:$0xff]  ;;  %v10158_v34 = vrot.slane %v19512_v41, 5 }
 0x385   : > { %v7105_v25 = vpop.f32.mrf.mxu1 }
 0x386   : > { %v7206_v14 = vadd.f32 %v7105_v25, %v19507_v42  ;;  %v18169_v61 = vpop.f32.mrf.mxu0  ;;  %v18184_v29 = vadd.f32 %v18011_v51, %v7208_v18 }
 0x387   : > { %v13314_v36 = vpop.f32.mrf.mxu1 }
 0x388   : > { %v7211_v46 = vadd.f32 %v13314_v36, %v19508_v35  ;;  %v18190_v55 = vpop.f32.mrf.mxu0  ;;  %v18193_v22 = vadd.f32 %v18022_v1, %v7206_v14  ;;  %v19514_v36 = vld [vmem:[#allocation32_spill] sm:$0xff] }
 0x389   : > { %13601 = vmatmul.mubr.bf16.gmra.mxu1 %v19509_v8  ;;  %v7118_v7 = vpop.f32.mrf.mxu1  ;;  %v10020_v8 = vld [vmem:[#allocation2 + $0xa8] sm:$0xe] }
 0x38a   : > { %13604 = vmatprep.mubr.bf16.mxu1 %v12225_v21  ;;  %v7209_v63 = vadd.f32 %v7118_v7, %v19510_v43  ;;  %v18196_v9 = vpop.f32.mrf.mxu0  ;;  %v18199_v51 = vadd.f32 %v18042_v31, %v7211_v46  ;;  %v19513_v21 = vld [vmem:[#allocation18_spill] sm:$0xff]  ;;  %v19515_v46 = vcombine.low %v18079_v39, %v18085_v28  ;;  %v10160_v7 = vrot.slane %v10158_v34, 4 }
 0x38b   : > { %v13315_v38 = vpop.f32.mrf.mxu1 }
 0x38c   : > { %v7212_v26 = vadd.f32 %v13315_v38, %v19511_v6  ;;  %v18202_v30 = vpop.f32.mrf.mxu0  ;;  %v18206_v18 = vadd.f32 %v18060_v47, %v7209_v63  ;;  %v19516_v63 = vcombine.low %v18098_v60, %v18102_v17  ;;  %v19517_v38 = vld [vmem:[#allocation21_spill] sm:$0xff]  ;;  %v19520_v60 = vld [vmem:[#allocation26_spill] sm:$0xff] }
 0x38d   : > { %v7121_v1 = vpop.f32.mrf.mxu1  ;;  %v10172_v17 = vrot.slane %v19520_v60, 5 }
 0x38e   : > { %v7210_v25 = vadd.f32 %v7121_v1, %v19513_v21  ;;  %v18209_v42 = vpop.f32.mrf.mxu0  ;;  %v18212_v14 = vadd.f32 %v18071_v62, %v7212_v26  ;;  %v19518_v26 = vld [vmem:[#allocation7_spill] sm:$0xff]  ;;  %v12197_v21 = vrot.slane %v10020_v8, 9 }
 0x38f   : > { %v13318_v31 = vpop.f32.mrf.mxu1  ;;  %v10161_v41 = vrot.slane %v19518_v26, 5 }
 0x390   : > { %v7215_v35 = vadd.f32 %v13318_v31, %v19514_v36  ;;  %v18218_v43 = vpop.f32.mrf.mxu0  ;;  %v18221_v47 = vadd.f32 %v18089_v40, %v7210_v25  ;;  %v19519_v31 = vld [vmem:[#allocation9_spill] sm:$0xff] }
 0x391   : > { %13605 = vmatmul.mubr.bf16.gmra.mxu1 %v19515_v46  ;;  %v7134_v62 = vpop.f32.mrf.mxu1  ;;  %v10162_v40 = vsel %vm14359_vm5, %v10160_v7, %v10161_v41  ;;  %v19522_v41 = vld [vmem:[#allocation33_spill] sm:$0xff] }
 0x392   : > { %13608 = vmatprep.mubr.bf16.mxu1 %v19516_v63  ;;  %v7213_v6 = vadd.f32 %v7134_v62, %v19517_v38  ;;  %v18228_v1 = vpop.f32.mrf.mxu0  ;;  %v18231_v39 = vadd.f32 %v18105_v57, %v7215_v35  ;;  %v19521_v62 = vld [vmem:[#allocation25_spill] sm:$0xff]  ;;  %v10159_v57 = vsel %vm14359_vm5, %v12197_v21, %v10158_v34  ;;  %v10022_v21 = vld [vmem:[#allocation2 + $0xc0] sm:$0xe] }
 0x393   : > { %v13319_v28 = vpop.f32.mrf.mxu1  ;;  %v12229_v7 = vcombine.low %v10159_v57, %v10162_v40  ;;  %v10175_v40 = vrot.slane %v17885_v0, 5 }
 0x394   : > { %v7216_v36 = vadd.f32 %v13319_v28, %v19519_v31  ;;  %v18236_v25 = vpop.f32.mrf.mxu0  ;;  %v18240_v46 = vadd.f32 %v18111_v4, %v7213_v6  ;;  %v19523_v31 = vcombine.low %v18115_v33, %v18119_v3  ;;  %v10174_v4 = vrot.slane %v10172_v17, 4 }
 0x395   : > { %v7137_v63 = vpop.f32.mrf.mxu1 }
 0x396   : > { %v7214_v38 = vadd.f32 %v7137_v63, %v19521_v62  ;;  %v18245_v35 = vpop.f32.mrf.mxu0  ;;  %v18248_v8 = vadd.f32 %v18128_v13, %v7216_v36  ;;  %v10179_v13 = vrot.slane %v17914_v56, 5  ;;  %v10023_v62 = vld [vmem:[#allocation2 + $0xcc] sm:$0xe] }
 0x397   : > { %v13322_v26 = vpop.f32.mrf.mxu1 }
 0x398   : > { %v7219_v28 = vadd.f32 %v13322_v26, %v19522_v41  ;;  %v18254_v6 = vpop.f32.mrf.mxu0  ;;  %v18257_v60 = vadd.f32 %v18139_v15, %v7214_v38  ;;  %v12199_v26 = vrot.slane %v10022_v21, 9  ;;  %v10176_v15 = vsel %vm14359_vm5, %v10174_v4, %v10175_v40 }
 0x399   : > { %13609 = vmatmul.mubr.bf16.gmra.mxu1 %v19523_v31  ;;  %v7150_v34 = vpop.f32.mrf.mxu1  ;;  %v10181_v0 = vrot.slane %v10179_v13, 4  ;;  %v10182_v41 = vrot.slane %v17920_v48, 5 }
 0x39a   : > { %13612 = vmatprep.mubr.bf16.mxu1 %v12229_v7  ;;  %v7217_v36 = vadd.f32 %v7150_v34, %v17897_v50  ;;  %v7571_v63 = vpop.f32.mrf.mxu0  ;;  %v18263_v33 = vadd.f32 %v18152_v58, %v7219_v28  ;;  %v12200_v7 = vrot.slane %v10023_v62, 9  ;;  %v10173_v28 = vsel %vm14359_vm5, %v12199_v26, %v10172_v17 }
 0x39b   : > { %v13323_v3 = vpop.f32.mrf.mxu1  ;;  %v12231_v34 = vcombine.low %v10173_v28, %v10176_v15 }
 0x39c   : > { %v7220_v57 = vadd.f32 %v13323_v3, %v17900_v16  ;;  %v18271_v56 = vadd.f32 %v18169_v61, %v7217_v36  ;;  %v10180_v17 = vsel %vm14359_vm5, %v12200_v7, %v10179_v13  ;;  %v19524_v36 = vld [vmem:[#allocation34_spill] sm:$0xff] }
 0x39d   : > { %v18268_v38 = vpop.f32.mrf.mxu0  ;;  %v7153_v50 = vpop.f32.mrf.mxu1 }
 0x39e   : > { %v7218_v58 = vadd.f32 %v7153_v50, %v17907_v23  ;;  %v18280_v31 = vadd.f32 %v18190_v55, %v7220_v57  ;;  %v10183_v55 = vsel %vm14359_vm5, %v10181_v0, %v10182_v41 }
 0x39f   : > { %v18277_v16 = vpop.f32.mrf.mxu0 }
 0x3a0   : > { %v13326_v4 = vpop.f32.mrf.mxu1  ;;  %v18289_v23 = vadd.f32 %v18196_v9, %v7218_v58  ;;  %v12232_v9 = vcombine.low %v10180_v17, %v10183_v55 }
 0x3a1   : > { %v7223_v61 = vadd.f32 %v13326_v4, %v17917_v10  ;;  %13613 = vmatmul.mubr.bf16.gmra.mxu1 %v12230_v45  ;;  %v18286_v21 = vpop.f32.mrf.mxu0  ;;  %v19525_v45 = vld [vmem:[#allocation36_spill] sm:$0xff] }
 0x3a2   : > { %13616 = vmatprep.mubr.bf16.mxu1 %v12231_v34  ;;  %v7166_v48 = vpop.f32.mrf.mxu1 }
 0x3a3   : > { %v7221_v40 = vadd.f32 %v7166_v48, %v19524_v36  ;;  %v18296_v10 = vpop.f32.mrf.mxu0  ;;  %v18299_v24 = vadd.f32 %v18202_v30, %v7223_v61  ;;  %v19527_v48 = vld [vmem:[#allocation38_spill] sm:$0xff] }
 0x3a4   : > { %v13327_v12 = vpop.f32.mrf.mxu1 }
 0x3a5   : > { %v7224_v62 = vadd.f32 %v13327_v12, %v19525_v45  ;;  %v18302_v3 = vpop.f32.mrf.mxu0  ;;  %v18305_v57 = vadd.f32 %v18209_v42, %v7221_v40 }
 0x3a6   : > { %v7169_v13 = vpop.f32.mrf.mxu1 }
 0x3a7   : > { %v7222_v54 = vadd.f32 %v7169_v13, %v17951_v37  ;;  %v18308_v26 = vpop.f32.mrf.mxu0  ;;  %v18311_v15 = vadd.f32 %v18218_v43, %v7224_v62  ;;  %v19526_v43 = vld [vmem:[#allocation35_spill] sm:$0xff] }
 0x3a9   : > { %v13330_v50 = vpop.f32.mrf.mxu1  ;;  %13617 = vmatmul.mubr.bf16.gmra.mxu1 %v12232_v9  ;;  %v18314_v7 = vpop.f32.mrf.mxu0  ;;  %v18317_v0 = vadd.f32 %v18228_v1, %v7222_v54 }
 0x3aa   : > { %v7227_v30 = vadd.f32 %v13330_v50, %v17960_v27 }
 0x3ab   : > { %v7182_v41 = vpop.f32.mrf.mxu1  ;;  %v18320_v58 = vpop.f32.mrf.mxu0 }
 0x3ac   : > { %v7225_v42 = vadd.f32 %v7182_v41, %v17971_v49  ;;  %v18323_v37 = vadd.f32 %v18236_v25, %v7227_v30 }
 0x3ad   : > { %v13331_v28 = vpop.f32.mrf.mxu1  ;;  %v18326_v34 = vpop.f32.mrf.mxu0 }
 0x3ae   : > { %v7228_v4 = vadd.f32 %v13331_v28, %v19526_v43  ;;  %v18329_v27 = vadd.f32 %v18245_v35, %v7225_v42 }
 0x3af   : > { %v7185_v61 = vpop.f32.mrf.mxu1  ;;  %v18332_v17 = vpop.f32.mrf.mxu0 }
 0x3b0   : > { %v7226_v1 = vadd.f32 %v7185_v61, %v19527_v48  ;;  %v18335_v49 = vadd.f32 %v18254_v6, %v7228_v4 }
 0x3b1   : > { %v13398_v55 = vpop.f32.mrf.mxu1  ;;  %v18340_v36 = vpop.f32.mrf.mxu0 }
 0x3b2   : > { %v18338_v25 = vadd.f32 %v13398_v55, %v18145_v59  ;;  %v18342_v40 = vadd.f32 %v7571_v63, %v7226_v1 }
 0x3b3   : > { %v8210_v12 = vpop.f32.mrf.mxu1  ;;  %v18347_v45 = vpop.f32.mrf.mxu0 }
 0x3b4   : > { %v18345_v35 = vadd.f32 %v8210_v12, %v18149_v53 }
 0x3b5   : > { %v13399_v62 = vpop.f32.mrf.mxu1  ;;  %v18352_v6 = vpop.f32.mrf.mxu0 }
 0x3b6   : > { %v18350_v9 = vadd.f32 %v13399_v62, %v18156_v44 }
 0x3b7   : > { %v8213_v13 = vpop.f32.mrf.mxu1  ;;  %v18357_v54 = vpop.f32.mrf.mxu0 }
 0x3b8   : > { %v18355_v59 = vadd.f32 %v8213_v13, %v18160_v32 }
 0x3b9   : > { %v13402_v63 = vpop.f32.mrf.mxu1  ;;  %v18362_v53 = vpop.f32.mrf.mxu0 }
 0x3ba   : > { %v18360_v50 = vadd.f32 %v13402_v63, %v18163_v52 }
 0x3bb   : > { %v8226_v30 = vpop.f32.mrf.mxu1  ;;  %v18367_v44 = vpop.f32.mrf.mxu0 }
 0x3bc   : > { %v18365_v41 = vadd.f32 %v8226_v30, %v18166_v19 }
 0x3bd   : > { %v13403_v42 = vpop.f32.mrf.mxu1  ;;  %v18372_v32 = vpop.f32.mrf.mxu0 }
 0x3be   : > { %v18370_v28 = vadd.f32 %v13403_v42, %v18172_v11 }
 0x3bf   : > { %v8229_v43 = vpop.f32.mrf.mxu1  ;;  %v18377_v52 = vpop.f32.mrf.mxu0 }
 0x3c0   : > { %v18375_v4 = vadd.f32 %v8229_v43, %v18175_v5 }
 0x3c1   : > { %v13406_v61 = vpop.f32.mrf.mxu1  ;;  %v18382_v19 = vpop.f32.mrf.mxu0 }
 0x3c2   : > { %v18380_v48 = vadd.f32 %v13406_v61, %v18178_v2  ;;  %19528 = vst [vmem:[#allocation37_spill] sm:$0xff] %v18382_v19 }
 0x3c3   : > { %v8242_v1 = vpop.f32.mrf.mxu1  ;;  %v18387_v11 = vpop.f32.mrf.mxu0 }
 0x3c4   : > { %v18385_v55 = vadd.f32 %v8242_v1, %v18181_v20  ;;  %19529 = vst [vmem:[#allocation39_spill] sm:$0xff] %v18387_v11 }
 0x3c5   : > { %v13407_v12 = vpop.f32.mrf.mxu1  ;;  %v18392_v5 = vpop.f32.mrf.mxu0 }
 0x3c6   : > { %v18390_v62 = vadd.f32 %v13407_v12, %v18184_v29  ;;  %19530 = vst [vmem:[#allocation40_spill] sm:$0xff] %v18392_v5 }
 0x3c7   : > { %v8245_v13 = vpop.f32.mrf.mxu1  ;;  %v18397_v2 = vpop.f32.mrf.mxu0 }
 0x3c8   : > { %v18395_v63 = vadd.f32 %v8245_v13, %v18193_v22  ;;  %19531 = vst [vmem:[#allocation43_spill] sm:$0xff] %v18397_v2 }
 0x3c9   : > { %v13410_v30 = vpop.f32.mrf.mxu1  ;;  %v18402_v20 = vpop.f32.mrf.mxu0 }
 0x3ca   : > { %v18400_v42 = vadd.f32 %v13410_v30, %v18199_v51  ;;  %19532 = vst [vmem:[#allocation41_spill] sm:$0xff] %v18402_v20 }
 0x3cb   : > { %v8258_v43 = vpop.f32.mrf.mxu1  ;;  %v18407_v1 = vpop.f32.mrf.mxu0 }
 0x3cc   : > { %v18405_v61 = vadd.f32 %v8258_v43, %v18206_v18  ;;  %19533 = vst [vmem:[#allocation44_spill] sm:$0xff] %v18407_v1 }
 0x3cd   : > { %v13411_v29 = vpop.f32.mrf.mxu1  ;;  %v18415_v5 = vpop.f32.mrf.mxu0 }
 0x3ce   : > { %v18410_v12 = vadd.f32 %v13411_v29, %v18212_v14  ;;  %19534 = vst [vmem:[#allocation42_spill] sm:$0xff] %v18415_v5 }
 0x3cf   : > { %v8261_v22 = vpop.f32.mrf.mxu1  ;;  %v18423_v20 = vpop.f32.mrf.mxu0 }
 0x3d0   : > { %v18413_v13 = vadd.f32 %v8261_v22, %v18221_v47  ;;  %19535 = vst [vmem:[#allocation46_spill] sm:$0xff] %v18423_v20 }
 0x3d1   : > { %v13414_v2 = vpop.f32.mrf.mxu1  ;;  %v18431_v5 = vpop.f32.mrf.mxu0 }
 0x3d2   : > { %v18418_v51 = vadd.f32 %v13414_v2, %v18231_v39  ;;  %19538 = vst [vmem:[#allocation45_spill] sm:$0xff] %v18431_v5 }
 0x3d3   : > { %v8274_v30 = vpop.f32.mrf.mxu1  ;;  %v18439_v20 = vpop.f32.mrf.mxu0 }
 0x3d4   : > { %v18421_v18 = vadd.f32 %v8274_v30, %v18240_v46  ;;  %19541 = vst [vmem:[#allocation52_spill] sm:$0xff] %v18439_v20  ;;  %v12245_v20 = vld [vmem:[%s13966_s14 + $0x1c] sm:$0xf] }
 0x3d5   : > { %v13415_v43 = vpop.f32.mrf.mxu1 }
 0x3d6   : > { %v18426_v14 = vadd.f32 %v13415_v43, %v18248_v8 }
 0x3d7   : > { %v8277_v29 = vpop.f32.mrf.mxu1 }
 0x3d8   : > { %19536 = vst [vmem:[#allocation57_spill] sm:$0xff] %v18426_v14  ;;  %v18429_v47 = vadd.f32 %v8277_v29, %v18257_v60  ;;  %v18447_v29 = vpop.f32.mrf.mxu0 }
 0x3d9   : > { %v13418_v22 = vpop.f32.mrf.mxu1  ;;  %19544 = vst [vmem:[#allocation56_spill] sm:$0xff] %v18447_v29 }
 0x3da   : > { %19537 = vst [vmem:[#allocation48_spill] sm:$0xff] %v18429_v47  ;;  %v18434_v39 = vadd.f32 %v13418_v22, %v18263_v33  ;;  %v12244_v22 = vld [vmem:[%s13966_s14 + $0x18] sm:$0xf] }
 0x3db   : > { %v8290_v46 = vpop.f32.mrf.mxu1  ;;  %v10651_v1 = vshrl.u32 %v12244_v22, 16 }
 0x3dc   : > { %19539 = vst [vmem:[#allocation50_spill] sm:$0xff] %v18434_v39  ;;  %v18437_v2 = vadd.f32 %v8290_v46, %v18271_v56 }
 0x3dd   : > { %v13419_v30 = vpop.f32.mrf.mxu1 }
 0x3de   : > { %19540 = vst [vmem:[#allocation47_spill] sm:$0xff] %v18437_v2  ;;  %v18442_v8 = vadd.f32 %v13419_v30, %v18280_v31  ;;  %v10654_v31 = vshll.u32 %v12244_v22, 16  ;;  %v18457_v30 = vpop.f32.mrf.mxu0  ;;  %v12241_v2 = vld [vmem:[%s13966_s14 + $0xc] sm:$0xf] }
 0x3df   : > { %v8293_v60 = vpop.f32.mrf.mxu1  ;;  %19547 = vst [vmem:[#allocation53_spill] sm:$0xff] %v18457_v30  ;;  %v10630_v30 = vshll.u32 %v12241_v2, 16 }
 0x3e0   : > { %19542 = vst [vmem:[#allocation49_spill] sm:$0xff] %v18442_v8  ;;  %v18445_v43 = vadd.f32 %v8293_v60, %v18289_v23  ;;  %v12242_v60 = vld [vmem:[%s13966_s14 + $0x10] sm:$0xf]  ;;  %v18467_v22 = vpop.f32.mrf.mxu0 }
 0x3e1   : > { %v13422_v33 = vpop.f32.mrf.mxu1  ;;  %19550 = vst [vmem:[#allocation4_spill] sm:$0xff] %v18467_v22  ;;  %v10640_v39 = vshrl.u32 %v12242_v60, 16 }
 0x3e2   : > { %19543 = vst [vmem:[#allocation54_spill] sm:$0xff] %v18445_v43  ;;  %v18451_v5 = vadd.f32 %v13422_v33, %v18299_v24  ;;  %v10660_v43 = vshll.u32 %v12245_v20, 16  ;;  %v10664_v24 = vshrl.u32 %v12245_v20, 16 }
 0x3e3   : > { %v8306_v56 = vpop.f32.mrf.mxu1  ;;  %v10642_v19 = vrot.slane %v10640_v39, 4 }
 0x3e4   : > { %19545 = vst [vmem:[#allocation51_spill] sm:$0xff] %v18451_v5  ;;  %v18454_v46 = vadd.f32 %v8306_v56, %v18305_v57  ;;  %v10653_v57 = vrot.slane %v10651_v1, 4  ;;  %v10656_v56 = vrot.slane %v10654_v31, 5  ;;  %v10636_v5 = vshll.u32 %v12242_v60, 16  ;;  %v12247_v1 = vld [vmem:[%s13966_s14 + $0x24] sm:$0xf]  ;;  %v18474_v31 = vpop.f32.mrf.mxu0 }
 0x3e5   : > { %v13423_v8 = vpop.f32.mrf.mxu1  ;;  %19552 = vst [vmem:[#allocation19_spill] sm:$0xff] %v18474_v31  ;;  %v12246_v60 = vld [vmem:[%s13966_s14 + $0x20] sm:$0x1] }
 0x3e6   : > { %19546 = vst [vmem:[#allocation59_spill] sm:$0xff] %v18454_v46  ;;  %v18461_v23 = vadd.f32 %v13423_v8, %v18311_v15  ;;  %v10627_v46 = vshrl.u32 %v12241_v2, 16  ;;  %v12250_v8 = vld [vmem:[%s13966_s14 + $0x30] sm:$0xf]  ;;  %v10632_v2 = vrot.slane %v10630_v30, 5  ;;  %v18479_v47 = vrot.slane %v10636_v5, 5 }
 0x3e7   : > { %v8309_v29 = vpop.f32.mrf.mxu1 }
 0x3e8   : > { %19548 = vst [vmem:[#allocation55_spill] sm:$0xff] %v18461_v23  ;;  %v18465_v33 = vadd.f32 %v8309_v29, %v18317_v0  ;;  %v10657_v23 = vor.u32 %v10656_v56, %v10653_v57  ;;  %v10662_v0 = vrot.slane %v10660_v43, 5  ;;  %v10629_v29 = vrot.slane %v10627_v46, 4 }
 0x3e9   : > { %v13426_v11 = vpop.f32.mrf.mxu1  ;;  %v10675_v43 = vshrl.u32 %v12247_v1, 16  ;;  %v10678_v46 = vshll.u32 %v12247_v1, 16  ;;  %v10643_v30 = vor.u32 %v10642_v19, %v18479_v47  ;;  %v18503_v19 = vadd.f32 %v18277_v16, %v18345_v35  ;;  %v13887_v35 = vld [vmem:[%s19259_s3] sm:$0xff] }
 0x3ea   : > { %19549 = vst [vmem:[#allocation58_spill] sm:$0xff] %v18465_v33  ;;  %v18470_v15 = vadd.f32 %v13426_v11, %v18323_v37  ;;  %v10666_v33 = vrot.slane %v10664_v24, 4  ;;  %v12243_v37 = vld [vmem:[%s13966_s14 + $0x14] sm:$0x1]  ;;  %v10699_v11 = vshrl.u32 %v12250_v8, 16  ;;  %v10658_v56 = vrot.slane %v10657_v23, 4 }
 0x3eb   : > { %v8322_v20 = vpop.f32.mrf.mxu1  ;;  %v10633_v39 = vor.u32 %v10632_v2, %v10629_v29  ;;  %v18497_v23 = vadd.f32 %v18268_v38, %v18338_v25  ;;  %v18509_v2 = vadd.f32 %v18286_v21, %v18350_v9  ;;  %v12248_v25 = vld [vmem:[%s13966_s14 + $0x28] sm:$0xf] }
 0x3ec   : > { %19551 = vst [vmem:[#allocation29_spill] sm:$0xff] %v18470_v15  ;;  %v18477_v22 = vadd.f32 %v8322_v20, %v18329_v27  ;;  %v10702_v15 = vshll.u32 %v12250_v8, 16  ;;  %v10667_v31 = vor.u32 %v10666_v33, %v10662_v0  ;;  %v10670_v27 = vshll.u32 %v12246_v60, 16  ;;  %v18486_v20 = vpop.f32.mrf.mxu0  ;;  %v12251_v60 = vld [vmem:[%s13966_s14 + $0x34] sm:$0xf] }
 0x3ed   : > { %v13427_v14 = vpop.f32.mrf.mxu1  ;;  %19555 = vst [vmem:[#allocation23_spill] sm:$0xff] %v18486_v20  ;;  %v10646_v8 = vshll.u32 %v12243_v37, 16  ;;  %v10701_v1 = vrot.slane %v10699_v11, 4  ;;  %19557 = vst [vmem:[#allocation16_spill] sm:$0xff] %v18509_v2  ;;  %v10663_v37 = vsel %vm14007_vm2, %v10658_v56, %v10662_v0  ;;  %v10708_v2 = vshll.u32 %v12251_v60, 16 }
 0x3ee   : > { %19553 = vst [vmem:[#allocation28_spill] sm:$0xff] %v18477_v22  ;;  %v18484_v57 = vadd.f32 %v13427_v14, %v18335_v49  ;;  %v19556_v49 = vld [vmem:[#allocation12_spill] sm:$0xff]  ;;  %v10668_v38 = vrot.slane %v10667_v31, 4  ;;  %v18514_v11 = vpop.f32.mrf.mxu0  ;;  %v10712_v0 = vshrl.u32 %v12251_v60, 16  ;;  %v18525_v31 = vadd.f32 %v18296_v10, %v18355_v59  ;;  %v12256_v59 = vld [vmem:[%s13966_s14 + $0x48] sm:$0xf] }
 0x3ef   : > { %v8325_v24 = vpop.f32.mrf.mxu1  ;;  %v10508_v14 = vsub.s32 2, %v19556_v49  ;;  %v10544_v33 = vsub.s32 3, %v19556_v49  ;;  %v10634_v49 = vrot.slane %v10633_v39, 4  ;;  %v10648_v20 = vrot.slane %v10646_v8, 5 }
 0x3f0   : > { %19554 = vst [vmem:[#allocation8_spill] sm:$0xff] %v18484_v57  ;;  %v18489_v5 = vadd.f32 %v8325_v24, %v18342_v40  ;;  %v10704_v57 = vrot.slane %v10702_v15, 5  ;;  %v10677_v40 = vrot.slane %v10675_v43, 4  ;;  %v10680_v24 = vrot.slane %v10678_v46, 5 }
 0x3f1   : > { %v18492_v22 = vpop.f32.mrf.mxu1  ;;  %v10672_v43 = vrot.slane %v10670_v27, 5  ;;  %v10644_v46 = vrot.slane %v10643_v30, 4  ;;  %v18521_v21 = vrot.slane %v13887_v35, %v10508_v14  ;;  %v18527_v56 = vrot.slane %v13887_v35, %v10544_v33 }
 0x3f2   : > { %v10705_v9 = vor.u32 %v10704_v57, %v10701_v1  ;;  %v10681_v27 = vor.u32 %v10680_v24, %v10677_v40  ;;  %v10684_v39 = vshll.u32 %v12248_v25, 16  ;;  %v18533_v8 = vadd.f32 %v18302_v3, %v18360_v50  ;;  %v18546_v1 = vpop.f32.mrf.mxu0 }
 0x3f3   : > { %v18505_v29 = vpop.f32.mrf.mxu1  ;;  %19559 = vst [vmem:[#allocation17_spill] sm:$0xff] %v18521_v21  ;;  %19560 = vst [vmem:[#allocation10_spill] sm:$0xff] %v18527_v56  ;;  %v18537_v14 = vadd.f32 %v18308_v26, %v18365_v41  ;;  %v18541_v57 = vadd.f32 %v18314_v7, %v18370_v28  ;;  %v18543_v10 = vunpack.c.l.bf16 %v10663_v37  ;;  %v18550_v33 = vadd.f32 %v18320_v58, %v18375_v4  ;;  %v12252_v4 = vld [vmem:[%s13966_s14 + $0x38] sm:$0x1] }
 0x3f4   : > { %v10639_v3 = vsel %vm14007_vm2, %v10634_v49, %v18479_v47  ;;  %v10673_v26 = vsel %vm14007_vm2, %v10668_v38, %v10672_v43  ;;  %v10649_v7 = vsel %vm14007_vm2, %v10644_v46, %v10648_v20  ;;  %v10706_v41 = vrot.slane %v10705_v9, 4  ;;  %v12249_v43 = vld [vmem:[%s13966_s14 + $0x2c] sm:$0x1]  ;;  %v18581_v46 = vpop.f32.mrf.mxu0 }
 0x3f5   : > { %v18516_v16 = vpop.f32.mrf.mxu1  ;;  %19561 = vst [vmem:[#allocation30_spill] sm:$0xff] %v18543_v10  ;;  %v10710_v28 = vrot.slane %v10708_v2, 5  ;;  %v10688_v60 = vshrl.u32 %v12248_v25, 16  ;;  %v10714_v40 = vrot.slane %v10712_v0, 4  ;;  %v10682_v24 = vrot.slane %v10681_v27, 4 }
 0x3f6   : > { %v18561_v58 = vrot.slane %v10684_v39, 5  ;;  %v10747_v47 = vshrl.u32 %v12256_v59, 16  ;;  %v10750_v37 = vshll.u32 %v12256_v59, 16  ;;  %v18568_v20 = vadd.f32 %v18326_v34, %v18380_v48 }
 0x3f7   : > { %v18529_v30 = vpop.f32.mrf.mxu1  ;;  %v18572_v38 = vadd.f32 %v18332_v17, %v18385_v55  ;;  %v18576_v2 = vadd.f32 %v18340_v36, %v18390_v62  ;;  %v18578_v25 = vunpack.c.l.bf16 %v10673_v26  ;;  %v18585_v35 = vadd.f32 %v18347_v45, %v18395_v63  ;;  %v12257_v55 = vld [vmem:[%s13966_s14 + $0x4c] sm:$0xf]  ;;  %v12253_v36 = vld [vmem:[%s13966_s14 + $0x3c] sm:$0xf]  ;;  %v12254_v45 = vld [vmem:[%s13966_s14 + $0x40] sm:$0xf] }
 0x3f8   : > { %v18589_v34 = vadd.f32 %v18352_v6, %v18400_v42  ;;  %v18591_v17 = vunpack.c.l.bf16 %v10639_v3  ;;  %v18593_v48 = vunpack.c.l.bf16 %v10649_v7  ;;  %v10711_v9 = vsel %vm14007_vm2, %v10706_v41, %v10710_v28  ;;  %v18607_v41 = vpop.f32.mrf.mxu0 }
 0x3f9   : > { %v18559_v50 = vpop.f32.mrf.mxu1  ;;  %19562 = vst [vmem:[#allocation22_spill] sm:$0xff] %v18576_v2  ;;  %19563 = vst [vmem:[#allocation14_spill] sm:$0xff] %v18578_v25  ;;  %v10715_v0 = vor.u32 %v10714_v40, %v10710_v28  ;;  %v10718_v27 = vshll.u32 %v12252_v4, 16  ;;  %v10690_v39 = vrot.slane %v10688_v60, 4  ;;  %v10687_v6 = vsel %vm14007_vm2, %v10682_v24, %v18561_v58 }
 0x3fa   : > { %19564 = vst [vmem:[#allocation27_spill] sm:$0xff] %v18585_v35  ;;  %19565 = vst [vmem:[#allocation31_spill] sm:$0xff] %v18589_v34  ;;  %v10694_v63 = vshll.u32 %v12249_v43, 16  ;;  %v10749_v42 = vrot.slane %v10747_v47, 4  ;;  %v10752_v59 = vrot.slane %v10750_v37, 5  ;;  %v10756_v26 = vshll.u32 %v12257_v55, 16 }
 0x3fb   : > { %v18564_v49 = vpop.f32.mrf.mxu1  ;;  %19566 = vst [vmem:[#allocation5_spill] sm:$0xff] %v18591_v17  ;;  %19567 = vst [vmem:[#allocation20_spill] sm:$0xff] %v18593_v48  ;;  %v10760_v7 = vshrl.u32 %v12257_v55, 16  ;;  %v10723_v48 = vshrl.u32 %v12253_v36, 16  ;;  %v10726_v25 = vshll.u32 %v12253_v36, 16  ;;  %v18611_v28 = vadd.f32 %v18357_v54, %v18405_v61  ;;  %v18638_v17 = vpop.f32.mrf.mxu0 }
 0x3fc   : > { %v18613_v60 = vunpack.c.l.bf16 %v10711_v9  ;;  %v10732_v40 = vshll.u32 %v12254_v45, 16  ;;  %v10736_v24 = vshrl.u32 %v12254_v45, 16  ;;  %v18619_v47 = vadd.f32 %v18362_v53, %v18410_v12  ;;  %v12262_v36 = vld [vmem:[%s13966_s14 + $0x60] sm:$0xf]  ;;  %v12259_v53 = vld [vmem:[%s13966_s14 + $0x54] sm:$0xf] }
 0x3fd   : > { %v18597_v62 = vpop.f32.mrf.mxu1  ;;  %19568 = vst [vmem:[#allocation15_spill] sm:$0xff] %v18611_v28  ;;  %v10716_v37 = vrot.slane %v10715_v0, 4  ;;  %v10720_v43 = vrot.slane %v10718_v27, 5  ;;  %v10691_v55 = vor.u32 %v10690_v39, %v18561_v58  ;;  %v18625_v54 = vadd.f32 %v18367_v44, %v18413_v13  ;;  %v12258_v13 = vld [vmem:[%s13966_s14 + $0x50] sm:$0x1]  ;;  %v18651_v35 = vpop.f32.mrf.mxu0 }
 0x3fe   : > { %19569 = vst [vmem:[#allocation13_spill] sm:$0xff] %v18613_v60  ;;  %19570 = vst [vmem:[#allocation6_spill] sm:$0xff] %v18619_v47  ;;  %v18627_v61 = vunpack.c.l.bf16 %v10687_v6  ;;  %v18629_v9 = vrot.slane %v10694_v63, 5  ;;  %v10753_v45 = vor.u32 %v10752_v59, %v10749_v42  ;;  %v12263_v60 = vld [vmem:[%s13966_s14 + $0x64] sm:$0xf]  ;;  %v18635_v0 = vrot.slane %v10756_v26, 5 }
 0x3ff   : > { %v18605_v3 = vpop.f32.mrf.mxu1  ;;  %19571 = vst [vmem:[#allocation11_spill] sm:$0xff] %v18625_v54  ;;  %v10725_v27 = vrot.slane %v10723_v48, 4  ;;  %v10728_v58 = vrot.slane %v10726_v25, 5  ;;  %v10762_v39 = vrot.slane %v10760_v7, 4  ;;  %v12260_v47 = vld [vmem:[%s13966_s14 + $0x58] sm:$0xf]  ;;  %v10721_v25 = vsel %vm14007_vm2, %v10716_v37, %v10720_v43 }
 0x400   : > { %19572 = vst [vmem:[#allocation24_spill] sm:$0xff] %v18627_v61  ;;  %v18640_v44 = vrot.slane %v10732_v40, 5  ;;  %v10738_v6 = vrot.slane %v10736_v24, 4  ;;  %v10795_v63 = vshrl.u32 %v12262_v36, 16  ;;  %v10798_v54 = vshll.u32 %v12262_v36, 16 }
 0x401   : > { %v18615_v4 = vpop.f32.mrf.mxu1  ;;  %v12255_v59 = vld [vmem:[%s13966_s14 + $0x44] sm:$0x1]  ;;  %v10804_v61 = vshll.u32 %v12263_v60, 16  ;;  %v10808_v28 = vshrl.u32 %v12263_v60, 16  ;;  %v10771_v10 = vshrl.u32 %v12259_v53, 16  ;;  %v10774_v26 = vshll.u32 %v12259_v53, 16 }
 0x402   : > { %v10692_v48 = vrot.slane %v10691_v55, 4  ;;  %v10780_v7 = vshll.u32 %v12260_v47, 16  ;;  %v10784_v56 = vshrl.u32 %v12260_v47, 16  ;;  %v10754_v40 = vrot.slane %v10753_v45, 4 }
 0x403   : > { %v18633_v12 = vpop.f32.mrf.mxu1  ;;  %v10729_v21 = vor.u32 %v10728_v58, %v10725_v27  ;;  %v10763_v24 = vor.u32 %v10762_v39, %v18635_v0  ;;  %v10766_v36 = vshll.u32 %v12258_v13, 16  ;;  %v10739_v60 = vor.u32 %v10738_v6, %v18640_v44  ;;  %v12264_v13 = vld [vmem:[%s13966_s14 + $0x68] sm:$0x1] }
 0x404   : > { %v10797_v53 = vrot.slane %v10795_v63, 4  ;;  %v10800_v2 = vrot.slane %v10798_v54, 5  ;;  %v18656_v47 = vrot.slane %v10804_v61, 5  ;;  %v10773_v43 = vrot.slane %v10771_v10, 4  ;;  %v12268_v61 = vld [vmem:[%s13966_s14 + $0x78] sm:$0xf] }
 0x405   : > { %v18643_v42 = vpop.f32.mrf.mxu1  ;;  %v10776_v55 = vrot.slane %v10774_v26, 5  ;;  %v10810_v45 = vrot.slane %v10808_v28, 4  ;;  %v18660_v27 = vadd.f32 %v18372_v32, %v18418_v51  ;;  %v18662_v58 = vunpack.c.l.bf16 %v10721_v25  ;;  %v12261_v28 = vld [vmem:[%s13966_s14 + $0x5c] sm:$0x1] }
 0x406   : > { %19573 = vst [vmem:[#allocation18_spill] sm:$0xff] %v18643_v42  ;;  %v10742_v42 = vshll.u32 %v12255_v59, 16  ;;  %v18664_v39 = vrot.slane %v10780_v7, 5  ;;  %v10786_v6 = vrot.slane %v10784_v56, 4  ;;  %v18671_v63 = vadd.f32 %v18377_v52, %v18421_v18  ;;  %v18681_v59 = vpop.f32.mrf.mxu0 }
 0x407   : > { %v18648_v34 = vpop.f32.mrf.mxu1  ;;  %19574 = vst [vmem:[#allocation32_spill] sm:$0xff] %v18660_v27  ;;  %19575 = vst [vmem:[#allocation21_spill] sm:$0xff] %v18662_v58  ;;  %v10697_v10 = vsel %vm14007_vm2, %v10692_v48, %v18629_v9  ;;  %v10759_v32 = vsel %vm14007_vm2, %v10754_v40, %v18635_v0  ;;  %v10768_v51 = vrot.slane %v10766_v36, 5  ;;  %v10730_v56 = vrot.slane %v10729_v21, 4  ;;  %v19580_v21 = vld [vmem:[#allocation37_spill] sm:$0xff] }
 0x408   : > { %19577 = vst [vmem:[#allocation9_spill] sm:$0xff] %v18671_v63  ;;  %v10764_v26 = vrot.slane %v10763_v24, 4  ;;  %v10740_v25 = vrot.slane %v10739_v60, 4  ;;  %v10744_v7 = vrot.slane %v10742_v42, 5  ;;  %v10801_v52 = vor.u32 %v10800_v2, %v10797_v53  ;;  %v19582_v42 = vld [vmem:[#allocation48_spill] sm:$0xff]  ;;  %v19583_v60 = vld [vmem:[#allocation39_spill] sm:$0xff] }
 0x409   : > { %v18654_v37 = vpop.f32.mrf.mxu1  ;;  %v10777_v18 = vor.u32 %v10776_v55, %v10773_v43  ;;  %v10811_v63 = vor.u32 %v10810_v45, %v18656_v47  ;;  %v10814_v9 = vshll.u32 %v12264_v13, 16  ;;  %v10787_v48 = vor.u32 %v10786_v6, %v18664_v39  ;;  %v18701_v55 = vpop.f32.mrf.mxu0  ;;  %v19587_v45 = vld [vmem:[#allocation50_spill] sm:$0xff]  ;;  %v19588_v13 = vld [vmem:[#allocation40_spill] sm:$0xff] }
 0x40a   : > { %v10790_v0 = vshll.u32 %v12261_v28, 16  ;;  %v10843_v40 = vshrl.u32 %v12268_v61, 16  ;;  %v10846_v36 = vshll.u32 %v12268_v61, 16  ;;  %v18695_v2 = vadd.f32 %v19583_v60, %v19582_v42 }
 0x40b   : > { %v18667_v54 = vpop.f32.mrf.mxu1  ;;  %v18697_v53 = vunpack.c.l.bf16 %v10697_v10  ;;  %v18699_v43 = vunpack.c.l.bf16 %v10759_v32  ;;  %v18705_v6 = vadd.f32 %v19588_v13, %v19587_v45  ;;  %v10735_v28 = vsel %vm14007_vm2, %v10730_v56, %v18640_v44  ;;  %v12265_v10 = vld [vmem:[%s13966_s14 + $0x6c] sm:$0xf]  ;;  %v12269_v45 = vld [vmem:[%s13966_s14 + $0x7c] sm:$0xf] }
 0x40c   : > { %19576 = vst [vmem:[#allocation7_spill] sm:$0xff] %v18667_v54  ;;  %v19579_v54 = vld [vmem:[#allocation57_spill] sm:$0xff]  ;;  %19584 = vst [vmem:[#allocation33_spill] sm:$0xff] %v18695_v2  ;;  %v10745_v61 = vsel %vm14007_vm2, %v10740_v25, %v10744_v7  ;;  %v10802_v32 = vrot.slane %v10801_v52, 4  ;;  %v10778_v42 = vrot.slane %v10777_v18, 4  ;;  %v10812_v60 = vrot.slane %v10811_v63, 4  ;;  %v18726_v18 = vpop.f32.mrf.mxu0 }
 0x40d   : > { %v18683_v27 = vpop.f32.mrf.mxu1  ;;  %v18691_v24 = vadd.f32 %v19580_v21, %v19579_v54  ;;  %19585 = vst [vmem:[#allocation34_spill] sm:$0xff] %v18697_v53  ;;  %19586 = vst [vmem:[#allocation36_spill] sm:$0xff] %v18699_v43  ;;  %v10769_v54 = vsel %vm14007_vm2, %v10764_v26, %v10768_v51  ;;  %v10816_v2 = vrot.slane %v10814_v9, 5  ;;  %v10788_v13 = vrot.slane %v10787_v48, 4  ;;  %v19592_v56 = vld [vmem:[#allocation47_spill] sm:$0xff]  ;;  %v19596_v63 = vld [vmem:[#allocation49_spill] sm:$0xff] }
 0x40e   : > { %19589 = vst [vmem:[#allocation35_spill] sm:$0xff] %v18705_v6  ;;  %v10792_v6 = vrot.slane %v10790_v0, 5  ;;  %v10848_v43 = vrot.slane %v10846_v36, 5  ;;  %v19593_v51 = vld [vmem:[#allocation43_spill] sm:$0xff]  ;;  %v18724_v25 = vunpack.c.l.bf16 %v10769_v54  ;;  %v10819_v7 = vshrl.u32 %v12265_v10, 16  ;;  %v19597_v9 = vld [vmem:[#allocation41_spill] sm:$0xff] }
 0x40f   : > { %v18687_v58 = vpop.f32.mrf.mxu1  ;;  %19581 = vst [vmem:[#allocation25_spill] sm:$0xff] %v18691_v24  ;;  %v10845_v24 = vrot.slane %v10843_v40, 4  ;;  %v18722_v26 = vadd.f32 %v19593_v51, %v19592_v56  ;;  %v10822_v52 = vshll.u32 %v12265_v10, 16  ;;  %v18732_v48 = vunpack.c.l.bf16 %v10735_v28  ;;  %v12266_v36 = vld [vmem:[%s13966_s14 + $0x70] sm:$0xf]  ;;  %v19602_v56 = vld [vmem:[#allocation44_spill] sm:$0xff] }
 0x410   : > { %19578 = vst [vmem:[#allocation26_spill] sm:$0xff] %v18687_v58  ;;  %19595 = vst [vmem:[#allocation57_spill] sm:$0xff] %v18724_v25  ;;  %v10852_v0 = vshll.u32 %v12269_v45, 16  ;;  %v10856_v40 = vshrl.u32 %v12269_v45, 16  ;;  %v19601_v53 = vld [vmem:[#allocation54_spill] sm:$0xff]  ;;  %v19604_v54 = vld [vmem:[#allocation51_spill] sm:$0xff]  ;;  %v18745_v25 = vunpack.c.l.bf16 %v10745_v61  ;;  %v10807_v28 = vsel %vm14007_vm2, %v10802_v32, %v18656_v47  ;;  %v18760_v32 = vpop.f32.mrf.mxu0 }
 0x411   : > { %v18715_v21 = vpop.f32.mrf.mxu1  ;;  %19594 = vst [vmem:[#allocation3_spill] sm:$0xff] %v18722_v26  ;;  %19599 = vst [vmem:[#allocation48_spill] sm:$0xff] %v18732_v48  ;;  %v18739_v51 = vadd.f32 %v19602_v56, %v19601_v53  ;;  %v19605_v26 = vld [vmem:[#allocation42_spill] sm:$0xff]  ;;  %v10783_v45 = vsel %vm14007_vm2, %v10778_v42, %v18664_v39  ;;  %v10793_v53 = vsel %vm14007_vm2, %v10788_v13, %v10792_v6  ;;  %v10821_v56 = vrot.slane %v10819_v7, 4 }
 0x412   : > { %19590 = vst [vmem:[#allocation38_spill] sm:$0xff] %v18715_v21  ;;  %v18730_v21 = vadd.f32 %v19597_v9, %v19596_v63  ;;  %v18743_v10 = vadd.f32 %v19605_v26, %v19604_v54  ;;  %19607 = vst [vmem:[#allocation47_spill] sm:$0xff] %v18745_v25  ;;  %v12274_v63 = vld [vmem:[%s13966_s14 + $0x90] sm:$0xf]  ;;  %v10817_v9 = vsel %vm14007_vm2, %v10812_v60, %v10816_v2  ;;  %v10824_v54 = vrot.slane %v10822_v52, 5  ;;  %v19617_v52 = vld [vmem:[#allocation52_spill] sm:$0xff]  ;;  %v18794_v48 = vpop.f32.mrf.mxu0 }
 0x413   : > { %v18718_v44 = vpop.f32.mrf.mxu1  ;;  %19603 = vst [vmem:[#allocation50_spill] sm:$0xff] %v18739_v51  ;;  %v10849_v26 = vor.u32 %v10848_v43, %v10845_v24  ;;  %v10832_v47 = vshrl.u32 %v12266_v36, 16  ;;  %v19609_v51 = vld [vmem:[#allocation59_spill] sm:$0xff]  ;;  %v10854_v2 = vrot.slane %v10852_v0, 5  ;;  %v10858_v42 = vrot.slane %v10856_v40, 4  ;;  %v19614_v43 = vld [vmem:[#allocation45_spill] sm:$0xff] }
 0x414   : > { %19591 = vst [vmem:[#allocation12_spill] sm:$0xff] %v18718_v44  ;;  %19598 = vst [vmem:[#allocation37_spill] sm:$0xff] %v18730_v21  ;;  %v19610_v21 = vld [vmem:[#allocation46_spill] sm:$0xff]  ;;  %v10891_v60 = vshrl.u32 %v12274_v63, 16  ;;  %v19613_v24 = vld [vmem:[#allocation55_spill] sm:$0xff] }
 0x415   : > { %v18735_v44 = vpop.f32.mrf.mxu1  ;;  %19606 = vst [vmem:[#allocation40_spill] sm:$0xff] %v18743_v10  ;;  %v10828_v10 = vshll.u32 %v12266_v36, 16  ;;  %v18764_v39 = vadd.f32 %v19610_v21, %v19609_v51  ;;  %v18770_v13 = vadd.f32 %v19614_v43, %v19613_v24  ;;  %v19616_v7 = vld [vmem:[#allocation58_spill] sm:$0xff]  ;;  %v10894_v21 = vshll.u32 %v12274_v63, 16  ;;  %v19620_v0 = vld [vmem:[#allocation29_spill] sm:$0xff]  ;;  %v19621_v40 = vld [vmem:[#allocation56_spill] sm:$0xff] }
 0x416   : > { %19600 = vst [vmem:[#allocation39_spill] sm:$0xff] %v18735_v44  ;;  %v18774_v36 = vadd.f32 %v19617_v52, %v19616_v7  ;;  %v12270_v44 = vld [vmem:[%s13966_s14 + $0x80] sm:$0x1]  ;;  %v12275_v25 = vld [vmem:[%s13966_s14 + $0x94] sm:$0xf]  ;;  %v18782_v51 = vadd.f32 %v19621_v40, %v19620_v0  ;;  %v18788_v24 = vunpack.c.l.bf16 %v10793_v53  ;;  %v10850_v7 = vrot.slane %v10849_v26, 4 }
 0x417   : > { %v18758_v61 = vpop.f32.mrf.mxu1  ;;  %19611 = vst [vmem:[#allocation49_spill] sm:$0xff] %v18764_v39  ;;  %19615 = vst [vmem:[#allocation54_spill] sm:$0xff] %v18770_v13  ;;  %v18784_v39 = vunpack.c.l.bf16 %v10783_v45  ;;  %v12271_v43 = vld [vmem:[%s13966_s14 + $0x84] sm:$0xf]  ;;  %v10830_v52 = vrot.slane %v10828_v10, 5  ;;  %v10859_v63 = vor.u32 %v10858_v42, %v10854_v2  ;;  %v10862_v58 = vshll.u32 %v12270_v44, 16 }
 0x418   : > { %19608 = vst [vmem:[#allocation43_spill] sm:$0xff] %v18758_v61  ;;  %19618 = vst [vmem:[#allocation44_spill] sm:$0xff] %v18774_v36  ;;  %v18776_v61 = vunpack.c.l.bf16 %v10807_v28  ;;  %v10825_v28 = vor.u32 %v10824_v54, %v10821_v56  ;;  %v10834_v36 = vrot.slane %v10832_v47, 4  ;;  %v12267_v0 = vld [vmem:[%s13966_s14 + $0x74] sm:$0x1]  ;;  %v10893_v40 = vrot.slane %v10891_v60, 4 }
 0x419   : > { %v18766_v6 = vpop.f32.mrf.mxu1  ;;  %19622 = vst [vmem:[#allocation42_spill] sm:$0xff] %v18782_v51  ;;  %19623 = vst [vmem:[#allocation59_spill] sm:$0xff] %v18784_v39  ;;  %v10900_v45 = vshll.u32 %v12275_v25, 16  ;;  %v10904_v53 = vshrl.u32 %v12275_v25, 16  ;;  %v19628_v39 = vld [vmem:[#allocation28_spill] sm:$0xff]  ;;  %v10855_v60 = vsel %vm14007_vm2, %v10850_v7, %v10854_v2 }
 0x41a   : > { %19612 = vst [vmem:[#allocation41_spill] sm:$0xff] %v18766_v6  ;;  %19619 = vst [vmem:[#allocation51_spill] sm:$0xff] %v18776_v61  ;;  %v18786_v6 = vunpack.c.l.bf16 %v10817_v9  ;;  %v12272_v61 = vld [vmem:[%s13966_s14 + $0x88] sm:$0xf]  ;;  %v10896_v9 = vrot.slane %v10894_v21, 5  ;;  %v19631_v10 = vld [vmem:[#allocation8_spill] sm:$0xff]  ;;  %v10835_v25 = vor.u32 %v10834_v36, %v10830_v52  ;;  %v9222_v36 = vadd.f32 %v18505_v29, %v18503_v19 }
 0x41b   : > { %19625 = vst [vmem:[#allocation55_spill] sm:$0xff] %v18788_v24  ;;  %v18791_v13 = vpop.f32.mrf.mxu1  ;;  %v10867_v24 = vshrl.u32 %v12271_v43, 16  ;;  %v19632_v56 = vld [vmem:[#allocation4_spill] sm:$0xff]  ;;  %v10876_v47 = vshll.u32 %v12272_v61, 16  ;;  %v10880_v42 = vshrl.u32 %v12272_v61, 16  ;;  %v10826_v21 = vrot.slane %v10825_v28, 4 }
 0x41c   : > { %19624 = vst [vmem:[#allocation46_spill] sm:$0xff] %v18786_v6  ;;  %19626 = vst [vmem:[#allocation45_spill] sm:$0xff] %v18791_v13  ;;  %v10870_v6 = vshll.u32 %v12271_v43, 16  ;;  %v19629_v13 = vld [vmem:[#allocation53_spill] sm:$0xff]  ;;  %v18805_v54 = vadd.f32 %v19632_v56, %v19631_v10  ;;  %v9224_v43 = vadd.f32 %v18492_v22, %v18497_v23  ;;  %v18815_v10 = vrot.slane %v10900_v45, 5  ;;  %v19635_v22 = vld [vmem:[#allocation19_spill] sm:$0xff] }
 0x41d   : > { %v18797_v51 = vpop.f32.mrf.mxu1  ;;  %v18801_v26 = vadd.f32 %v19629_v13, %v19628_v39  ;;  %v18813_v39 = vpop.f32.mrf.mxu0  ;;  %v10860_v13 = vrot.slane %v10859_v63, 4  ;;  %v10897_v56 = vor.u32 %v10896_v9, %v10893_v40  ;;  %v10906_v2 = vrot.slane %v10904_v53, 4  ;;  %v12280_v7 = vld [vmem:[%s13966_s14 + $0xa8] sm:$0xf]  ;;  %v12276_v45 = vld [vmem:[%s13966_s14 + $0x98] sm:$0x1] }
 0x41e   : > { %19627 = vst [vmem:[#allocation58_spill] sm:$0xff] %v18797_v51  ;;  %19633 = vst [vmem:[#allocation29_spill] sm:$0xff] %v18805_v54  ;;  %v10838_v51 = vshll.u32 %v12267_v0, 16  ;;  %v10869_v54 = vrot.slane %v10867_v24, 4  ;;  %v18824_v23 = vadd.f32 %v19635_v22, %v18489_v5  ;;  %v18826_v28 = vrot.slane %v10876_v47, 5  ;;  %v19637_v53 = vld [vmem:[#allocation16_spill] sm:$0xff] }
 0x41f   : > { %19630 = vst [vmem:[#allocation52_spill] sm:$0xff] %v18801_v26  ;;  %v18807_v44 = vpop.f32.mrf.mxu1  ;;  %v10864_v26 = vrot.slane %v10862_v58, 5  ;;  %v10882_v58 = vrot.slane %v10880_v42, 4  ;;  %v18830_v0 = vunpack.c.l.bf16 %v10855_v60  ;;  %v10831_v24 = vsel %vm14007_vm2, %v10826_v21, %v10830_v52  ;;  %v12273_v9 = vld [vmem:[%s13966_s14 + $0x8c] sm:$0x1]  ;;  %v18838_v29 = vpop.f32.mrf.mxu0  ;;  %v19639_v22 = vld [vmem:[#allocation23_spill] sm:$0xff] }
 0x420   : > { %19634 = vst [vmem:[#allocation56_spill] sm:$0xff] %v18807_v44  ;;  %v10872_v44 = vrot.slane %v10870_v6, 5  ;;  %19636 = vst [vmem:[#allocation28_spill] sm:$0xff] %v18824_v23  ;;  %v10836_v6 = vrot.slane %v10835_v25, 4  ;;  %v10840_v40 = vrot.slane %v10838_v51, 5  ;;  %v9225_v19 = vadd.f32 %v18516_v16, %v19637_v53 }
 0x421   : > { %v18817_v61 = vpop.f32.mrf.mxu1  ;;  %v10865_v5 = vsel %vm14007_vm2, %v10860_v13, %v10864_v26  ;;  %v10939_v47 = vshrl.u32 %v12280_v7, 16  ;;  %v10942_v42 = vshll.u32 %v12280_v7, 16  ;;  %v18845_v23 = vadd.f32 %v19639_v22, %v9224_v43 }
 0x422   : > { %v10898_v52 = vrot.slane %v10897_v56, 4  ;;  %v10873_v51 = vor.u32 %v10872_v44, %v10869_v54  ;;  %v10907_v21 = vor.u32 %v10906_v2, %v18815_v10  ;;  %v18849_v16 = vadd.f32 %v18514_v11, %v9222_v36  ;;  %v12281_v44 = vld [vmem:[%s13966_s14 + $0xac] sm:$0xf]  ;;  %v18865_v56 = vpop.f32.mrf.mxu0 }
 0x423   : > { %v18828_v63 = vpop.f32.mrf.mxu1  ;;  %v10910_v25 = vshll.u32 %v12276_v45, 16  ;;  %v10883_v53 = vor.u32 %v10882_v58, %v18826_v28  ;;  %v10886_v26 = vshll.u32 %v12273_v9, 16  ;;  %v9223_v13 = vadd.f32 %v18529_v30, %v18525_v31  ;;  %v12277_v30 = vld [vmem:[%s13966_s14 + $0x9c] sm:$0xf] }
 0x424   : > { %v18858_v43 = vunpack.c.l.bf16 %v10865_v5  ;;  %v10841_v54 = vsel %vm14007_vm2, %v10836_v6, %v10840_v40  ;;  %v9228_v11 = vadd.f32 %v18559_v50, %v18533_v8  ;;  %v18868_v2 = vadd.f32 %v18546_v1, %v9225_v19  ;;  %v18886_v22 = vpop.f32.mrf.mxu0 }
 0x425   : > { %v18842_v60 = vpop.f32.mrf.mxu1  ;;  %v10941_v36 = vrot.slane %v10939_v47, 4  ;;  %v10944_v31 = vrot.slane %v10942_v42, 5  ;;  %v9226_v58 = vadd.f32 %v18564_v49, %v18537_v14  ;;  %v10903_v6 = vsel %vm14007_vm2, %v10898_v52, %v18815_v10 }
 0x426   : > { %19638 = vst [vmem:[#allocation53_spill] sm:$0xff] %v18842_v60  ;;  %v18856_v60 = vunpack.c.l.bf16 %v10831_v24  ;;  %v10874_v40 = vrot.slane %v10873_v51, 4  ;;  %v10908_v45 = vrot.slane %v10907_v21, 4  ;;  %v10912_v8 = vrot.slane %v10910_v25, 5 }
 0x427   : > { %v18854_v7 = vpop.f32.mrf.mxu1  ;;  %v10884_v50 = vrot.slane %v10883_v53, 4  ;;  %v10888_v9 = vrot.slane %v10886_v26, 5  ;;  %v10948_v5 = vshll.u32 %v12281_v44, 16  ;;  %v18880_v19 = vunpack.c.l.bf16 %v10841_v54 }
 0x428   : > { %v10952_v47 = vshrl.u32 %v12281_v44, 16  ;;  %v10915_v42 = vshrl.u32 %v12277_v30, 16  ;;  %v10918_v14 = vshll.u32 %v12277_v30, 16  ;;  %v9229_v49 = vadd.f32 %v18597_v62, %v18541_v57  ;;  %v12282_v30 = vld [vmem:[%s13966_s14 + $0xb0] sm:$0x1] }
 0x429   : > { %v18873_v24 = vpop.f32.mrf.mxu1  ;;  %v9227_v10 = vadd.f32 %v18605_v3, %v18550_v33  ;;  %v9977_v52 = vadd.f32 %v18581_v46, %v9223_v13  ;;  %v10945_v51 = vor.u32 %v10944_v31, %v10941_v36  ;;  %v18892_v25 = vadd.f32 %v18607_v41, %v9228_v11  ;;  %v12278_v33 = vld [vmem:[%s13966_s14 + $0xa0] sm:$0xf]  ;;  %v18913_v11 = vpop.f32.mrf.mxu0 }
 0x42a   : > { %v18895_v53 = vadd.f32 %v18638_v17, %v9226_v58  ;;  %v18897_v26 = vunpack.c.l.bf16 %v10903_v6  ;;  %v10879_v57 = vsel %vm14007_vm2, %v10874_v40, %v18826_v28  ;;  %v9232_v46 = vadd.f32 %v18615_v4, %v18568_v20  ;;  %v19640_v58 = vld [vmem:[#allocation22_spill] sm:$0xff] }
 0x42b   : > { %v18878_v1 = vpop.f32.mrf.mxu1  ;;  %v10913_v62 = vsel %vm14007_vm2, %v10908_v45, %v10912_v8  ;;  %v10889_v3 = vsel %vm14007_vm2, %v10884_v50, %v10888_v9  ;;  %v10950_v41 = vrot.slane %v10948_v5, 5  ;;  %v9230_v17 = vadd.f32 %v18633_v12, %v18572_v38  ;;  %v19641_v6 = vld [vmem:[#allocation18_spill] sm:$0xff]  ;;  %v19642_v50 = vld [vmem:[#allocation27_spill] sm:$0xff] }
 0x42c   : > { %v10917_v54 = vrot.slane %v10915_v42, 4  ;;  %v10920_v44 = vrot.slane %v10918_v14, 5  ;;  %v10954_v28 = vrot.slane %v10952_v47, 4  ;;  %v18916_v20 = vadd.f32 %v18651_v35, %v9229_v49  ;;  %v12279_v47 = vld [vmem:[%s13966_s14 + $0xa4] sm:$0x1] }
 0x42d   : > { %v18889_v21 = vpop.f32.mrf.mxu1  ;;  %v18919_v4 = vadd.f32 %v18681_v59, %v9227_v10  ;;  %v10946_v36 = vrot.slane %v10945_v51, 4  ;;  %v10924_v31 = vshll.u32 %v12278_v33, 16  ;;  %v9233_v38 = vadd.f32 %v19641_v6, %v19640_v58 }
 0x42e   : > { %v18924_v40 = vunpack.c.l.bf16 %v10879_v57  ;;  %v18926_v45 = vunpack.c.l.bf16 %v10913_v62  ;;  %v10928_v8 = vshrl.u32 %v12278_v33, 16  ;;  %v9231_v9 = vadd.f32 %v18648_v34, %v19642_v50  ;;  %v18940_v57 = vpop.f32.mrf.mxu0  ;;  %v19643_v33 = vld [vmem:[#allocation17_spill] sm:$0xff]  ;;  %v19644_v62 = vld [vmem:[#allocation31_spill] sm:$0xff] }
 0x42f   : > { %v18911_v13 = vpop.f32.mrf.mxu1  ;;  %v18932_v59 = vadd.f32 %v18701_v55, %v9232_v46  ;;  %v18934_v5 = vunpack.c.l.bf16 %v10889_v3  ;;  %v18938_v14 = vadd.f32 %v18726_v18, %v9230_v17  ;;  %v10921_v49 = vor.u32 %v10920_v44, %v10917_v54  ;;  %v19645_v44 = vld [vmem:[#allocation10_spill] sm:$0xff] }
 0x430   : > { %v10955_v10 = vor.u32 %v10954_v28, %v10950_v41  ;;  %v10958_v51 = vshll.u32 %v12282_v30, 16  ;;  %v10951_v55 = vsel %vm14007_vm2, %v10946_v36, %v10950_v41  ;;  %v10926_v46 = vrot.slane %v10924_v31, 5 }
 0x431   : > { %v13590_v12 = vpop.f32.mrf.mxu1  ;;  %v9236_v3 = vadd.f32 %v18654_v37, %v19644_v62  ;;  %v18949_v18 = vadd.f32 %v18760_v32, %v9233_v38  ;;  %v10930_v17 = vrot.slane %v10928_v8, 4  ;;  %v10934_v54 = vshll.u32 %v12279_v47, 16  ;;  %v18960_v38 = vpop.f32.mrf.mxu0 }
 0x432   : > { %v10476_v35 = vadd.f32 %v13590_v12, %v18845_v23  ;;  %v18956_v41 = vadd.f32 %v18794_v48, %v9231_v9  ;;  %v18958_v31 = vunpack.c.l.bf16 %v10951_v55  ;;  %v10922_v37 = vrot.slane %v10921_v49, 4  ;;  %v19646_v12 = vld [vmem:[#allocation30_spill] sm:$0xff]  ;;  %v19648_v48 = vld [vmem:[#allocation7_spill] sm:$0xff]  ;;  %v19649_v55 = vld [vmem:[#allocation5_spill] sm:$0xff] }
 0x433   : > { %v10347_v42 = vpop.f32.mrf.mxu1  ;;  %v10956_v6 = vrot.slane %v10955_v10, 4  ;;  %v10960_v32 = vrot.slane %v10958_v51, 5  ;;  %v18974_v10 = vadd.f32 %v18813_v39, %v9236_v3  ;;  %v10931_v51 = vor.u32 %v10930_v17, %v10926_v46 }
 0x434   : > { %v10512_v34 = vmul.f32 %v19643_v33, %v10476_v35  ;;  %v10474_v23 = vadd.f32 %v10347_v42, %v18849_v16  ;;  %v19647_v42 = vld [vmem:[#allocation15_spill] sm:$0xff]  ;;  %v10927_v39 = vsel %vm14007_vm2, %v10922_v37, %v10926_v46 }
 0x435   : > { %v13591_v58 = vpop.f32.mrf.mxu1  ;;  %v9234_v9 = vadd.f32 %v19648_v48, %v19647_v42  ;;  %v10961_v42 = vsel %vm14007_vm2, %v10956_v6, %v10960_v32  ;;  %v10932_v46 = vrot.slane %v10931_v51, 4  ;;  %v19651_v48 = vld [vmem:[#allocation20_spill] sm:$0xff]  ;;  %v19007_v32 = vunpack.c.l.bf16 %v10927_v39 }
 0x436   : > { %v10548_v28 = vadd.f32 %v19645_v44, %v10512_v34  ;;  %v10510_v30 = vmul.f32 %v19643_v33, %v10474_v23  ;;  %v10477_v16 = vadd.f32 %v13591_v58, %v18868_v2  ;;  %v12286_v2 = vld [vmem:[%s13966_s14 + $0xc0] sm:$0xf]  ;;  %v18976_v34 = vrot.slane %v10934_v54, 5  ;;  %v18987_v54 = vpop.f32.mrf.mxu0 }
 0x437   : > { %v10350_v36 = vpop.f32.mrf.mxu1  ;;  %v10987_v3 = vshrl.u32 %v12286_v2, 16  ;;  %v10990_v17 = vshll.u32 %v12286_v2, 16  ;;  %v19005_v6 = vadd.f32 %v18838_v29, %v9234_v9  ;;  %v19654_v39 = vld [vmem:[#allocation24_spill] sm:$0xff] }
 0x438   : > { %v11076_v8 = vadd.f32 %v19646_v12, %v10548_v28  ;;  %v10546_v50 = vadd.f32 %v19645_v44, %v10510_v30  ;;  %v10513_v35 = vmul.f32 %v19643_v33, %v10477_v16  ;;  %v10475_v47 = vadd.f32 %v10350_v36, %v9977_v52  ;;  %v18982_v28 = vld [vmem:[%s13966_s14 + $0xc4] sm:$0xf]  ;;  %v19650_v12 = vld [vmem:[#allocation14_spill] sm:$0xff]  ;;  %v19009_v51 = vpop.f32.mrf.mxu0 }
 0x439   : > { %v13594_v49 = vpop.f32.mrf.mxu1  ;;  %v10996_v37 = vshll.u32 %v18982_v28, 16  ;;  %v10937_v29 = vsel %vm14007_vm2, %v10932_v46, %v18976_v34  ;;  %v10989_v9 = vrot.slane %v10987_v3, 4 }
 0x43a   : > { %v11108_v23 = vmax.f32 %v11076_v8, 0.0  ;;  %v11074_v52 = vadd.f32 %v19649_v55, %v10546_v50  ;;  %v10549_v62 = vadd.f32 %v19645_v44, %v10513_v35  ;;  %v10511_v58 = vmul.f32 %v19643_v33, %v10475_v47  ;;  %v19030_v3 = vpop.f32.mrf.mxu0 }
 0x43b   : > { %v10480_v30 = vadd.f32 %v13594_v49, %v18892_v25  ;;  %v10363_v16 = vpop.f32.mrf.mxu1  ;;  %v19028_v34 = vrot.slane %v10996_v37, 5  ;;  %v19039_v37 = vunpack.c.l.bf16 %v10937_v29 }
 0x43c   : > { %11140 = vst [vmem:[%s18971_s17 + $0x10] sm:$0xff] %v11108_v23  ;;  %v11106_v36 = vmax.f32 %v11074_v52, 0.0  ;;  %v11077_v8 = vadd.f32 %v19650_v12, %v10549_v62  ;;  %v10547_v50 = vadd.f32 %v19645_v44, %v10511_v58  ;;  %v10478_v35 = vadd.f32 %v10363_v16, %v18895_v53  ;;  %v19652_v52 = vld [vmem:[#allocation6_spill] sm:$0xff]  ;;  %v19050_v29 = vpop.f32.mrf.mxu0 }
 0x43d   : > { %v10516_v47 = vmul.f32 %v19643_v33, %v10480_v30  ;;  %v13595_v25 = vpop.f32.mrf.mxu1  ;;  %v9237_v53 = vadd.f32 %v18683_v27, %v19652_v52  ;;  %v19653_v27 = vld [vmem:[#allocation13_spill] sm:$0xff] }
 0x43e   : > { %11138 = vst [vmem:[%s18971_s17] sm:$0xff] %v11106_v36  ;;  %v11109_v2 = vmax.f32 %v11077_v8, 0.0  ;;  %v11075_v49 = vadd.f32 %v19651_v48, %v10547_v50  ;;  %v10514_v23 = vmul.f32 %v19643_v33, %v10478_v35  ;;  %v10481_v55 = vadd.f32 %v13595_v25, %v18916_v20  ;;  %v19656_v48 = vld [vmem:[#allocation26_spill] sm:$0xff]  ;;  %v19657_v52 = vld [vmem:[#allocation21_spill] sm:$0xff] }
 0x43f   : > { %v10552_v62 = vadd.f32 %v19645_v44, %v10516_v47  ;;  %v10366_v58 = vpop.f32.mrf.mxu1  ;;  %v19016_v50 = vunpack.c.l.bf16 %v10961_v42 }
 0x440   : > { %11141 = vst [vmem:[%s18971_s17 + $0x18] sm:$0xff] %v11109_v2  ;;  %v11107_v30 = vmax.f32 %v11075_v49, 0.0  ;;  %v10550_v16 = vadd.f32 %v19645_v44, %v10514_v23  ;;  %v10517_v20 = vmul.f32 %v19643_v33, %v10481_v55  ;;  %v10479_v36 = vadd.f32 %v10366_v58, %v18919_v4  ;;  %v19655_v2 = vld [vmem:[#allocation11_spill] sm:$0xff] }
 0x441   : > { %v11080_v12 = vadd.f32 %v19653_v27, %v10552_v62  ;;  %v13598_v8 = vpop.f32.mrf.mxu1  ;;  %v9235_v42 = vadd.f32 %v19656_v48, %v19655_v2  ;;  %v10992_v55 = vrot.slane %v10990_v17, 5  ;;  %v9991_v17 = vadd.f32 %v18865_v56, %v9237_v53  ;;  %v19659_v2 = vld [vmem:[#allocation36_spill] sm:$0xff] }
 0x442   : > { %11139 = vst [vmem:[%s18971_s17 + $0x8] sm:$0xff] %v11107_v30  ;;  %v11078_v35 = vadd.f32 %v19654_v39, %v10550_v16  ;;  %v10553_v47 = vadd.f32 %v19645_v44, %v10517_v20  ;;  %v10515_v25 = vmul.f32 %v19643_v33, %v10479_v36  ;;  %v10484_v4 = vadd.f32 %v13598_v8, %v18932_v59  ;;  %v12283_v59 = vld [vmem:[%s13966_s14 + $0xb4] sm:$0xf] }
 0x443   : > { %v11112_v49 = vmax.f32 %v11080_v12, 0.0  ;;  %v10379_v23 = vpop.f32.mrf.mxu1  ;;  %v11000_v36 = vshrl.u32 %v18982_v28, 16  ;;  %v19658_v12 = vld [vmem:[#allocation34_spill] sm:$0xff]  ;;  %v10963_v56 = vshrl.u32 %v12283_v59, 16  ;;  %v10966_v53 = vshll.u32 %v12283_v59, 16 }
 0x444   : > { %v11110_v46 = vmax.f32 %v11078_v35, 0.0  ;;  %v11081_v62 = vadd.f32 %v19657_v52, %v10553_v47  ;;  %v10551_v58 = vadd.f32 %v19645_v44, %v10515_v25  ;;  %v10520_v30 = vmul.f32 %v19643_v33, %v10484_v4  ;;  %v19047_v47 = vld [vmem:[%s13966_s14 + $0xb8] sm:$0xf] }
 0x445   : > { %11144 = vst [vmem:[%s18971_s17 + $0x30] sm:$0xff] %v11112_v49  ;;  %v10482_v16 = vadd.f32 %v10379_v23, %v18938_v14  ;;  %v13599_v20 = vpop.f32.mrf.mxu1  ;;  %v10993_v4 = vor.u32 %v10992_v55, %v10989_v9  ;;  %v9989_v9 = vadd.f32 %v18886_v22, %v9235_v42  ;;  %v10972_v55 = vshll.u32 %v19047_v47, 16  ;;  %v19071_v22 = vpop.f32.mrf.mxu0  ;;  %v19663_v42 = vld [vmem:[#allocation57_spill] sm:$0xff] }
 0x446   : > { %11142 = vst [vmem:[%s18971_s17 + $0x20] sm:$0xff] %v11110_v46  ;;  %v11113_v27 = vmax.f32 %v11081_v62, 0.0  ;;  %v11079_v8 = vadd.f32 %v19658_v12, %v10551_v58  ;;  %v10556_v39 = vadd.f32 %v19645_v44, %v10520_v30  ;;  %v10485_v35 = vadd.f32 %v13599_v20, %v18949_v18  ;;  %v19660_v18 = vld [vmem:[#allocation32_spill] sm:$0xff]  ;;  %v19661_v46 = vld [vmem:[#allocation38_spill] sm:$0xff] }
 0x447   : > { %v10518_v14 = vmul.f32 %v19643_v33, %v10482_v16  ;;  %v10382_v25 = vpop.f32.mrf.mxu1  ;;  %v9240_v52 = vadd.f32 %v19661_v46, %v19660_v18  ;;  %v19082_v18 = vrot.slane %v10966_v53, 5  ;;  %v19094_v53 = vrot.slane %v10972_v55, 5 }
 0x448   : > { %11145 = vst [vmem:[%s18971_s17 + $0x38] sm:$0xff] %v11113_v27  ;;  %v11111_v28 = vmax.f32 %v11079_v8, 0.0  ;;  %v11084_v48 = vadd.f32 %v19659_v2, %v10556_v39  ;;  %v10521_v49 = vmul.f32 %v19643_v33, %v10485_v35  ;;  %v10483_v23 = vadd.f32 %v10382_v25, %v18956_v41  ;;  %v19662_v41 = vld [vmem:[#allocation48_spill] sm:$0xff]  ;;  %v19664_v2 = vld [vmem:[#allocation9_spill] sm:$0xff] }
 0x449   : > { %v10554_v62 = vadd.f32 %v19645_v44, %v10518_v14  ;;  %v13602_v58 = vpop.f32.mrf.mxu1  ;;  %v19066_v8 = vrot.slane %v10993_v4, 4  ;;  %v10976_v39 = vshrl.u32 %v19047_v47, 16  ;;  %v19069_v35 = vrot.slane %v11000_v36, 4  ;;  %v19665_v4 = vld [vmem:[#allocation12_spill] sm:$0xff] }
 0x44a   : > { %11143 = vst [vmem:[%s18971_s17 + $0x28] sm:$0xff] %v11111_v28  ;;  %v11116_v30 = vmax.f32 %v11084_v48, 0.0  ;;  %v10557_v59 = vadd.f32 %v19645_v44, %v10521_v49  ;;  %v10519_v16 = vmul.f32 %v19643_v33, %v10483_v23  ;;  %v10488_v20 = vadd.f32 %v13602_v58, %v18974_v10 }
 0x44b   : > { %v11082_v27 = vadd.f32 %v19662_v41, %v10554_v62  ;;  %v10395_v12 = vpop.f32.mrf.mxu1  ;;  %v9238_v48 = vadd.f32 %v19665_v4, %v19664_v2  ;;  %v19080_v23 = vrot.slane %v10963_v56, 4  ;;  %v19666_v62 = vld [vmem:[#allocation47_spill] sm:$0xff]  ;;  %v9994_v56 = vadd.f32 %v18913_v11, %v9240_v52 }
 0x44c   : > { %11148 = vst [vmem:[%s18971_s17 + $0x50] sm:$0xff] %v11116_v30  ;;  %v11085_v14 = vadd.f32 %v19663_v42, %v10557_v59  ;;  %v10555_v25 = vadd.f32 %v19645_v44, %v10519_v16  ;;  %v10524_v10 = vmul.f32 %v19643_v33, %v10488_v20  ;;  %v10486_v28 = vadd.f32 %v10395_v12, %v19005_v6  ;;  %v19088_v16 = vld [vmem:[%s13966_s14 + $0xc8] sm:$0x1]  ;;  %v19668_v20 = vld [vmem:[#allocation39_spill] sm:$0xff]  ;;  %v19096_v42 = vpop.f32.mrf.mxu0 }
 0x44d   : > { %v11114_v49 = vmax.f32 %v11082_v27, 0.0  ;;  %v13603_v36 = vpop.f32.mrf.mxu1  ;;  %v19667_v6 = vld [vmem:[#allocation25_spill] sm:$0xff]  ;;  %v11003_v11 = vor.u32 %v19069_v35, %v19028_v34  ;;  %v11006_v52 = vshll.u32 %v19088_v16, 16 }
 0x44e   : > { %v11117_v46 = vmax.f32 %v11085_v14, 0.0  ;;  %v11083_v58 = vadd.f32 %v19666_v62, %v10555_v25  ;;  %v10560_v30 = vadd.f32 %v19645_v44, %v10524_v10  ;;  %v10522_v59 = vmul.f32 %v19643_v33, %v10486_v28  ;;  %v19669_v25 = vld [vmem:[#allocation51_spill] sm:$0xff] }
 0x44f   : > { %v9241_v41 = vadd.f32 %v19668_v20, %v19667_v6  ;;  %11146 = vst [vmem:[%s18971_s17 + $0x40] sm:$0xff] %v11114_v49  ;;  %v10489_v27 = vadd.f32 %v13603_v36, %v9991_v17  ;;  %v10398_v12 = vpop.f32.mrf.mxu1  ;;  %v9992_v17 = vadd.f32 %v18940_v57, %v9238_v48  ;;  %v19670_v36 = vld [vmem:[#allocation59_spill] sm:$0xff]  ;;  %v19674_v20 = vld [vmem:[#allocation41_spill] sm:$0xff] }
 0x450   : > { %11149 = vst [vmem:[%s18971_s17 + $0x58] sm:$0xff] %v11117_v46  ;;  %v11115_v14 = vmax.f32 %v11083_v58, 0.0  ;;  %v11088_v10 = vadd.f32 %v19669_v25, %v10560_v30  ;;  %v10558_v28 = vadd.f32 %v19645_v44, %v10522_v59  ;;  %v10487_v2 = vadd.f32 %v10398_v12, %v9989_v9  ;;  %v19671_v30 = vld [vmem:[#allocation33_spill] sm:$0xff]  ;;  %v19672_v9 = vld [vmem:[#allocation43_spill] sm:$0xff]  ;;  %v19115_v25 = vpop.f32.mrf.mxu0 }
 0x451   : > { %v10525_v4 = vmul.f32 %v19643_v33, %v10489_v27  ;;  %v13606_v49 = vpop.f32.mrf.mxu1  ;;  %v9239_v59 = vadd.f32 %v19672_v9, %v19671_v30  ;;  %v19673_v6 = vld [vmem:[#allocation35_spill] sm:$0xff]  ;;  %v9995_v12 = vadd.f32 %v18960_v38, %v9241_v41  ;;  %v19677_v30 = vld [vmem:[#allocation46_spill] sm:$0xff]  ;;  %v10999_v38 = vsel %vm14007_vm2, %v19066_v8, %v19028_v34 }
 0x452   : > { %11147 = vst [vmem:[%s18971_s17 + $0x48] sm:$0xff] %v11115_v14  ;;  %v11120_v55 = vmax.f32 %v11088_v10, 0.0  ;;  %v11086_v46 = vadd.f32 %v19670_v36, %v10558_v28  ;;  %v10523_v62 = vmul.f32 %v19643_v33, %v10487_v2  ;;  %v10492_v58 = vadd.f32 %v13606_v49, %v9994_v56  ;;  %v19675_v2 = vld [vmem:[#allocation3_spill] sm:$0xff]  ;;  %v19676_v49 = vld [vmem:[#allocation45_spill] sm:$0xff] }
 0x453   : > { %v9244_v27 = vadd.f32 %v19674_v20, %v19673_v6  ;;  %v10561_v57 = vadd.f32 %v19645_v44, %v10525_v4  ;;  %v10411_v48 = vpop.f32.mrf.mxu1  ;;  %v9242_v36 = vadd.f32 %v19676_v49, %v19675_v2  ;;  %v10969_v41 = vor.u32 %v19082_v18, %v19080_v23  ;;  %v19678_v4 = vld [vmem:[#allocation55_spill] sm:$0xff]  ;;  %v19680_v20 = vld [vmem:[#allocation58_spill] sm:$0xff]  ;;  %v19137_v18 = vpop.f32.mrf.mxu0 }
 0x454   : > { %11152 = vst [vmem:[%s18971_s17 + $0x70] sm:$0xff] %v11120_v55  ;;  %v11118_v14 = vmax.f32 %v11086_v46, 0.0  ;;  %v10559_v10 = vadd.f32 %v19645_v44, %v10523_v62  ;;  %v10528_v56 = vmul.f32 %v19643_v33, %v10492_v58  ;;  %v10490_v28 = vadd.f32 %v10411_v48, %v9992_v17  ;;  %v19679_v58 = vld [vmem:[#allocation37_spill] sm:$0xff]  ;;  %v19681_v49 = vld [vmem:[#allocation50_spill] sm:$0xff] }
 0x455   : > { %v11089_v9 = vadd.f32 %v19677_v30, %v10561_v57  ;;  %v13607_v6 = vpop.f32.mrf.mxu1  ;;  %v9245_v57 = vadd.f32 %v19680_v20, %v19679_v58  ;;  %v9993_v8 = vadd.f32 %v18987_v54, %v9239_v59  ;;  %v9998_v23 = vadd.f32 %v19009_v51, %v9244_v27  ;;  %v19682_v30 = vld [vmem:[#allocation56_spill] sm:$0xff]  ;;  %v9948_v47 = vpop.f32.mrf.mxu0 }
 0x456   : > { %11150 = vst [vmem:[%s18971_s17 + $0x60] sm:$0xff] %v11118_v14  ;;  %v11087_v55 = vadd.f32 %v19678_v4, %v10559_v10  ;;  %v10564_v17 = vadd.f32 %v19645_v44, %v10528_v56  ;;  %v10526_v46 = vmul.f32 %v19643_v33, %v10490_v28  ;;  %v10493_v62 = vadd.f32 %v13607_v6, %v9995_v12  ;;  %v19143_v12 = vld [vmem:[%s13966_s14 + $0xbc] sm:$0x1] }
 0x457   : > { %v11121_v48 = vmax.f32 %v11089_v9, 0.0  ;;  %v10414_v2 = vpop.f32.mrf.mxu1  ;;  %v9243_v9 = vadd.f32 %v19682_v30, %v19681_v49  ;;  %v9996_v51 = vadd.f32 %v19030_v3, %v9242_v36  ;;  %v19151_v27 = vrot.slane %v10976_v39, 4  ;;  %v19686_v49 = vld [vmem:[#allocation53_spill] sm:$0xff] }
 0x458   : > { %v11119_v14 = vmax.f32 %v11087_v55, 0.0  ;;  %v11092_v10 = vadd.f32 %v18830_v0, %v10564_v17  ;;  %v10562_v56 = vadd.f32 %v19645_v44, %v10526_v46  ;;  %v10529_v28 = vmul.f32 %v19643_v33, %v10493_v62 }
 0x459   : > { %11153 = vst [vmem:[%s18971_s17 + $0x78] sm:$0xff] %v11121_v48  ;;  %v10491_v54 = vadd.f32 %v10414_v2, %v9993_v8  ;;  %v13610_v59 = vpop.f32.mrf.mxu1  ;;  %v9999_v62 = vadd.f32 %v19050_v29, %v9245_v57  ;;  %v19158_v58 = vunpack.c.l.bf16 %v10999_v38  ;;  %v10982_v3 = vshll.u32 %v19143_v12, 16  ;;  %v19683_v48 = vld [vmem:[#allocation40_spill] sm:$0xff]  ;;  %v19684_v2 = vld [vmem:[#allocation49_spill] sm:$0xff]  ;;  %v19685_v12 = vld [vmem:[#allocation54_spill] sm:$0xff] }
 0x45a   : > { %11151 = vst [vmem:[%s18971_s17 + $0x68] sm:$0xff] %v11119_v14  ;;  %v11124_v0 = vmax.f32 %v11092_v10, 0.0  ;;  %v11090_v6 = vadd.f32 %v18856_v60, %v10562_v56  ;;  %v10565_v4 = vadd.f32 %v19645_v44, %v10529_v28  ;;  %v10496_v55 = vadd.f32 %v13610_v59, %v9998_v23  ;;  %v13570_v14 = vpop.f32.mrf.mxu0 }
 0x45b   : > { %v10527_v17 = vmul.f32 %v19643_v33, %v10491_v54  ;;  %v10427_v46 = vpop.f32.mrf.mxu1  ;;  %v9248_v8 = vadd.f32 %v18817_v61, %v19683_v48  ;;  %v9246_v23 = vadd.f32 %v18828_v63, %v19684_v2  ;;  %v9997_v57 = vadd.f32 %v19071_v22, %v9243_v9 }
 0x45c   : > { %11156 = vst [vmem:[%s18971_s17 + $0x90] sm:$0xff] %v11124_v0  ;;  %v11122_v39 = vmax.f32 %v11090_v6, 0.0  ;;  %v11093_v36 = vadd.f32 %v18858_v43, %v10565_v4  ;;  %v10532_v60 = vmul.f32 %v19643_v33, %v10496_v55  ;;  %v10494_v20 = vadd.f32 %v10427_v46, %v9996_v51  ;;  %v19687_v6 = vld [vmem:[#allocation44_spill] sm:$0xff]  ;;  %v9961_v35 = vpop.f32.mrf.mxu0 }
 0x45d   : > { %v10563_v29 = vadd.f32 %v19645_v44, %v10527_v17  ;;  %v13611_v38 = vpop.f32.mrf.mxu1  ;;  %v9249_v61 = vadd.f32 %v19686_v49, %v19685_v12  ;;  %v19176_v63 = vrot.slane %v10969_v41, 4  ;;  %v19181_v22 = vrot.slane %v11003_v11, 4 }
 0x45e   : > { %11154 = vst [vmem:[%s18971_s17 + $0x80] sm:$0xff] %v11122_v39  ;;  %v11125_v10 = vmax.f32 %v11093_v36, 0.0  ;;  %v10568_v43 = vadd.f32 %v19645_v44, %v10532_v60  ;;  %v10530_v56 = vmul.f32 %v19643_v33, %v10494_v20  ;;  %v10497_v28 = vadd.f32 %v13611_v38, %v9999_v62  ;;  %v19688_v62 = vld [vmem:[#allocation42_spill] sm:$0xff] }
 0x45f   : > { %v11091_v30 = vadd.f32 %v18880_v19, %v10563_v29  ;;  %v10430_v54 = vpop.f32.mrf.mxu1  ;;  %v9247_v19 = vadd.f32 %v18854_v7, %v19687_v6  ;;  %v10002_v4 = vadd.f32 %v19096_v42, %v9248_v8  ;;  %v10000_v34 = vadd.f32 %v19115_v25, %v9246_v23 }
 0x460   : > { %11157 = vst [vmem:[%s18971_s17 + $0x98] sm:$0xff] %v11125_v10  ;;  %v11096_v9 = vadd.f32 %v18897_v26, %v10568_v43  ;;  %v10566_v59 = vadd.f32 %v19645_v44, %v10530_v56  ;;  %v10533_v51 = vmul.f32 %v19643_v33, %v10497_v28  ;;  %v10495_v0 = vadd.f32 %v10430_v54, %v9997_v57  ;;  %v19689_v57 = vld [vmem:[#allocation52_spill] sm:$0xff]  ;;  %v19690_v56 = vld [vmem:[#allocation29_spill] sm:$0xff] }
 0x461   : > { %v11123_v41 = vmax.f32 %v11091_v30, 0.0  ;;  %v13614_v55 = vpop.f32.mrf.mxu1  ;;  %v9252_v39 = vadd.f32 %v18873_v24, %v19688_v62  ;;  %v10003_v42 = vadd.f32 %v19137_v18, %v9249_v61  ;;  %v11008_v25 = vrot.slane %v11006_v52, 5  ;;  %v13571_v18 = vpop.f32.mrf.mxu0  ;;  %v19691_v61 = vld [vmem:[#allocation28_spill] sm:$0xff] }
 0x462   : > { %v11128_v11 = vmax.f32 %v11096_v9, 0.0  ;;  %v11094_v17 = vadd.f32 %v18924_v40, %v10566_v59  ;;  %v10569_v26 = vadd.f32 %v19645_v44, %v10533_v51  ;;  %v10531_v46 = vmul.f32 %v19643_v33, %v10495_v0 }
 0x463   : > { %11155 = vst [vmem:[%s18971_s17 + $0x88] sm:$0xff] %v11123_v41  ;;  %v10500_v7 = vadd.f32 %v13614_v55, %v10002_v4  ;;  %v10443_v36 = vpop.f32.mrf.mxu1  ;;  %v10001_v2 = vadd.f32 %v9948_v47, %v9247_v19  ;;  %v10979_v23 = vor.u32 %v19151_v27, %v19094_v53  ;;  %v10984_v29 = vrot.slane %v10982_v3, 5  ;;  %v9964_v9 = vpop.f32.mrf.mxu0 }
 0x464   : > { %11160 = vst [vmem:[%s18971_s17 + $0xb0] sm:$0xff] %v11128_v11  ;;  %v11126_v60 = vmax.f32 %v11094_v17, 0.0  ;;  %v11097_v40 = vadd.f32 %v18926_v45, %v10569_v26  ;;  %v10567_v20 = vadd.f32 %v19645_v44, %v10531_v46  ;;  %v10498_v48 = vadd.f32 %v10443_v36, %v10000_v34 }
 0x465   : > { %v10536_v8 = vmul.f32 %v19643_v33, %v10500_v7  ;;  %v13615_v24 = vpop.f32.mrf.mxu1  ;;  %v9250_v10 = vadd.f32 %v18878_v1, %v19689_v57  ;;  %v10006_v43 = vadd.f32 %v13570_v14, %v9252_v39  ;;  %v9253_v47 = vadd.f32 %v18889_v21, %v19690_v56 }
 0x466   : > { %11158 = vst [vmem:[%s18971_s17 + $0xa0] sm:$0xff] %v11126_v60  ;;  %v11129_v16 = vmax.f32 %v11097_v40, 0.0  ;;  %v11095_v52 = vadd.f32 %v18934_v5, %v10567_v20  ;;  %v10534_v38 = vmul.f32 %v19643_v33, %v10498_v48  ;;  %v10501_v45 = vadd.f32 %v13615_v24, %v10003_v42 }
 0x467   : > { %v10572_v28 = vadd.f32 %v19645_v44, %v10536_v8  ;;  %v10446_v27 = vpop.f32.mrf.mxu1  ;;  %v9251_v30 = vadd.f32 %v18911_v13, %v19691_v61  ;;  %v10975_v21 = vsel %vm14007_vm2, %v19176_v63, %v19094_v53  ;;  %v11009_v14 = vsel %vm14007_vm2, %v19181_v22, %v11008_v25 }
 0x468   : > { %11161 = vst [vmem:[%s18971_s17 + $0xb8] sm:$0xff] %v11129_v16  ;;  %v11127_v3 = vmax.f32 %v11095_v52, 0.0  ;;  %v10570_v12 = vadd.f32 %v19645_v44, %v10534_v38  ;;  %v10537_v5 = vmul.f32 %v19643_v33, %v10501_v45  ;;  %v10499_v49 = vadd.f32 %v10446_v27, %v10001_v2 }
 0x469   : > { %v11100_v1 = vadd.f32 %v18958_v31, %v10572_v28  ;;  %v13618_v54 = vpop.f32.mrf.mxu1  ;;  %v10004_v0 = vadd.f32 %v9961_v35, %v9250_v10  ;;  %v10007_v6 = vadd.f32 %v13571_v18, %v9253_v47  ;;  %v10980_v53 = vrot.slane %v10979_v23, 4 }
 0x46a   : > { %11159 = vst [vmem:[%s18971_s17 + $0xa8] sm:$0xff] %v11127_v3  ;;  %v11098_v59 = vadd.f32 %v19007_v32, %v10570_v12  ;;  %v10573_v51 = vadd.f32 %v19645_v44, %v10537_v5  ;;  %v10535_v13 = vmul.f32 %v19643_v33, %v10499_v49  ;;  %v10504_v31 = vadd.f32 %v13618_v54, %v10006_v43 }
 0x46b   : > { %v11132_v19 = vmax.f32 %v11100_v1, 0.0  ;;  %v10459_v41 = vpop.f32.mrf.mxu1  ;;  %v10005_v32 = vadd.f32 %v9964_v9, %v9251_v30  ;;  %v11073_v39 = vunpack.c.l.bf16 %v11009_v14  ;;  %v10985_v36 = vsel %vm14007_vm2, %v10980_v53, %v10984_v29 }
 0x46c   : > { %v11130_v63 = vmax.f32 %v11098_v59, 0.0  ;;  %v11101_v4 = vadd.f32 %v19016_v50, %v10573_v51  ;;  %v10571_v22 = vadd.f32 %v19645_v44, %v10535_v13  ;;  %v10540_v55 = vmul.f32 %v19643_v33, %v10504_v31 }
 0x46d   : > { %11164 = vst [vmem:[%s18971_s17 + $0xd0] sm:$0xff] %v11132_v19  ;;  %v10502_v34 = vadd.f32 %v10459_v41, %v10004_v0  ;;  %v13619_v11 = vpop.f32.mrf.mxu1  ;;  %v11070_v50 = vunpack.c.l.bf16 %v10975_v21  ;;  %v11071_v15 = vunpack.c.l.bf16 %v10985_v36 }
 0x46e   : > { %11162 = vst [vmem:[%s18971_s17 + $0xc0] sm:$0xff] %v11130_v63  ;;  %v11133_v17 = vmax.f32 %v11101_v4, 0.0  ;;  %v11099_v35 = vadd.f32 %v19039_v37, %v10571_v22  ;;  %v10576_v26 = vadd.f32 %v19645_v44, %v10540_v55  ;;  %v10505_v46 = vadd.f32 %v13619_v11, %v10007_v6 }
 0x46f   : > { %v10538_v62 = vmul.f32 %v19643_v33, %v10502_v34  ;;  %v10462_v7 = vpop.f32.mrf.mxu1 }
 0x470   : > { %11165 = vst [vmem:[%s18971_s17 + $0xd8] sm:$0xff] %v11133_v17  ;;  %v11131_v42 = vmax.f32 %v11099_v35, 0.0  ;;  %v11104_v25 = vadd.f32 %v19158_v58, %v10576_v26  ;;  %v10541_v60 = vmul.f32 %v19643_v33, %v10505_v46  ;;  %v10503_v37 = vadd.f32 %v10462_v7, %v10005_v32 }
 0x471   : > { %v10574_v40 = vadd.f32 %v19645_v44, %v10538_v62 }
 0x472   : > { %11163 = vst [vmem:[%s18971_s17 + $0xc8] sm:$0xff] %v11131_v42  ;;  %v11136_v20 = vmax.f32 %v11104_v25, 0.0  ;;  %v10577_v48 = vadd.f32 %v19645_v44, %v10541_v60  ;;  %v10539_v8 = vmul.f32 %v19643_v33, %v10503_v37 }
 0x473   : > { %v11102_v24 = vadd.f32 %v11070_v50, %v10574_v40 }
 0x474   : > { %11168 = vst [vmem:[%s18971_s17 + $0xf0] sm:$0xff] %v11136_v20  ;;  %v11105_v2 = vadd.f32 %v11073_v39, %v10577_v48  ;;  %v10575_v58 = vadd.f32 %v19645_v44, %v10539_v8 }
 0x475   : > { %v11134_v23 = vmax.f32 %v11102_v24, 0.0 }
 0x476   : > { %v11137_v29 = vmax.f32 %v11105_v2, 0.0  ;;  %v11103_v18 = vadd.f32 %v11071_v15, %v10575_v58 }
 0x477   : > { %11166 = vst [vmem:[%s18971_s17 + $0xe0] sm:$0xff] %v11134_v23 }
 0x478   : > { %11169 = vst [vmem:[%s18971_s17 + $0xf8] sm:$0xff] %v11137_v29  ;;  %v11135_v16 = vmax.f32 %v11103_v18, 0.0 }
 0x47a   : > { %11167 = vst [vmem:[%s18971_s17 + $0xe8] sm:$0xff] %v11135_v16 }
 0x47b PF: > { %s14_s15 = sadd.s32 1, %s13894_s15  }
 0x47c   : > { %p11_p4 = scmp.ge.s32.totalorder %s14_s15, 4  }
 0x47e   :  { %13 = sbr.rel (!%p11_p4) target bundleno = 1 (0x1), region = 86 }

</bundles_post_ra>
